<compile_context>
chip_gen: v5e
topology: v5e:2x2
jax: 0.10.0
libtpu: 0.0.40
codegen_flags: <defaults>
</compile_context>

<pallas_src>
import functools

import numpy as np
import jax
import jax.numpy as jnp
from jax import lax
from jax.experimental import pallas as pl
from jax.experimental.pallas import tpu as pltpu

LN_EPS = 1e-5            # PyTorch nn.LayerNorm default
LANE = 128               # TPU lane width


def _round_up(n, m):
    return ((n + m - 1) // m) * m


# ----------------------------- in-kernel helpers -----------------------------

def _layernorm_rows(x, gamma, beta):
    """LayerNorm over axis 0 (per column) == LN over the permuted token-mix
    hidden axis in channel-last layout."""
    mu = jnp.mean(x, axis=0, keepdims=True)
    var = jnp.mean(jnp.square(x - mu), axis=0, keepdims=True)
    return (x - mu) * lax.rsqrt(var + LN_EPS) * gamma + beta


def _masked_layernorm(x, gamma, beta, n_true):
    """LayerNorm over the (zero-padded) last dim using only the first n_true
    lanes for the statistics.  gamma/beta are zero on padded lanes, so padded
    outputs are exactly 0."""
    d_pad = x.shape[-1]
    if n_true >= d_pad:
        mu = jnp.mean(x, axis=-1, keepdims=True)
        var = jnp.mean(jnp.square(x - mu), axis=-1, keepdims=True)
        return (x - mu) * lax.rsqrt(var + LN_EPS) * gamma + beta
    mask = (lax.broadcasted_iota(jnp.int32, (1, d_pad), 1) < n_true).astype(x.dtype)
    xm = x * mask
    inv_n = 1.0 / float(n_true)
    mu = jnp.sum(xm, axis=-1, keepdims=True) * inv_n
    var = jnp.sum(jnp.square(xm - mu) * mask, axis=-1, keepdims=True) * inv_n
    return (x - mu) * lax.rsqrt(var + LN_EPS) * gamma + beta


def _silu(x):
    # exp -> EUP; divide replaced by approximate EUP reciprocal (free slot).
    return x * pl.reciprocal(1.0 + jnp.exp(-x), approx=True)


def _rational(x, a, b):
    """Group-rational activation y = P5(x) / (1 + |Q4(x)|).
    a: 6 coefficient arrays, b: 4, each broadcast-compatible with x."""
    num = a[5]
    for k in (4, 3, 2, 1, 0):
        num = num * x + a[k]
    den = b[3]
    for k in (2, 1, 0):
        den = den * x + b[k]
    den = 1.0 + jnp.abs(den * x)
    return num * pl.reciprocal(den, approx=True)


def _widen(c, width):
    """Tile a lane-replicated (rows, 128) parameter to (rows, width); width is
    a multiple of 128, so this is a free lane-block concat (no shuffles)."""
    reps = width // c.shape[-1]
    if reps == 1:
        return c
    return jnp.concatenate([c] * reps, axis=-1)


def _bf16(x):
    return x.astype(jnp.bfloat16)


def _kanlinear(x, ln_g, ln_b, spline_w, base_w, base_b, *, d_true, grid_pts,
               inv_denom):
    """FastKAN-style KANLinear on 2-D rows: masked LN -> stacked RBF basis
    (lane-aligned concat, ONE exp) -> one fused spline matmul, plus the
    silu(x) base branch.  Padded input lanes contribute 0 (zero weight rows)."""
    h = _masked_layernorm(x, ln_g, ln_b, d_true)
    z = jnp.concatenate([(h - gp) * inv_denom for gp in grid_pts], axis=-1)
    basis = jnp.exp(-jnp.square(z))                       # single long EUP burst
    out = jnp.dot(_bf16(_silu(x)), base_w,
                  preferred_element_type=jnp.float32) + base_b
    out = out + jnp.dot(_bf16(basis), spline_w,
                        preferred_element_type=jnp.float32)
    return out


# ----------------------------- fused forward kernel ---------------------------

def katmixer_kernel(
        x_ref,
        # patch-embedding KANLinear
        pe_g_ref, pe_b_ref, pe_sw_ref, pe_bw_ref, pe_bb_ref,
        # stacked mixer-layer weights (leading dim = num_layers)
        a1s_ref, b1s_ref, w1s_ref, c1s_ref, a2s_ref, b2s_ref,
        gs_ref, bs_ref, w2s_ref, c2s_ref,
        a1c_ref, b1c_ref, w1c_ref, c1c_ref, a2c_ref, b2c_ref,
        gc_ref, bc_ref, w2c_ref, c2c_ref,
        # final LayerNorm
        ln_g_ref, ln_b_ref,
        # classifier KANLinear
        cl_g_ref, cl_b_ref, cl_sw_ref, cl_bw_ref, cl_bb_ref,
        o_ref,
        *, bt, seq, d_true, hc_true, patch_dim, grid_pts, inv_denom, skips):
    dp = w2c_ref.shape[-1]              # lane-padded hidden size
    width = bt * dp                     # lane-packed width for token mixing
    num_layers = w1s_ref.shape[0]

    # ---- patch embedding: KANLinear over (bt*seq) rows, channel-last --------
    x = x_ref[...].reshape(bt * seq, x_ref.shape[-1])          # (bt*S, Pdp)
    X = _kanlinear(x, pe_g_ref[...], pe_b_ref[...], pe_sw_ref[...],
                   pe_bw_ref[...], pe_bb_ref[...],
                   d_true=patch_dim, grid_pts=grid_pts, inv_denom=inv_denom)

    # lane mask keeping padded hidden lanes exactly zero through the residuals
    if d_true < dp:
        dmask = (lax.broadcasted_iota(jnp.int32, (1, dp), 1) < d_true
                 ).astype(jnp.float32)
    else:
        dmask = None

    for l in range(num_layers):
        skip = skips[l]

        # -------- KAN1: token mixing on the lane-packed (S, bt*Dp) view ------
        # pack: batch row-blocks -> 128-lane blocks (free block concat)
        P = jnp.concatenate([X[b * seq:(b + 1) * seq, :] for b in range(bt)],
                            axis=-1)                             # (S, bt*Dp)
        A1, B1 = a1s_ref[l], b1s_ref[l]
        t = _rational(P, [_widen(A1[k], width) for k in range(6)],
                      [_widen(B1[k], width) for k in range(4)])
        u = jnp.dot(w1s_ref[l], _bf16(t),                        # (Hs, bt*Dp)
                    preferred_element_type=jnp.float32)
        u = u + _widen(c1s_ref[l], width)
        A2, B2 = a2s_ref[l], b2s_ref[l]
        u = _rational(u, [_widen(A2[k], width) for k in range(6)],
                      [_widen(B2[k], width) for k in range(4)])
        u = _layernorm_rows(u, _widen(gs_ref[l], width), _widen(bs_ref[l], width))
        v = jnp.dot(w2s_ref[l], _bf16(u),                        # (S, bt*Dp)
                    preferred_element_type=jnp.float32)
        v = v + _widen(c2s_ref[l], width)
        P1 = v + P if skip == 1.0 else v + skip * P              # residual
        # unpack: 128-lane blocks -> batch row-blocks
        X1 = jnp.concatenate([P1[:, b * dp:(b + 1) * dp] for b in range(bt)],
                             axis=0)                             # (bt*S, Dp)

        # -------- KAN2: channel mixing on the (bt*S, Dp) view ----------------
        A1c, B1c = a1c_ref[l], b1c_ref[l]
        t = _rational(X1, [A1c[k] for k in range(6)], [B1c[k] for k in range(4)])
        u = jnp.dot(_bf16(t), w1c_ref[l],
                    preferred_element_type=jnp.float32) + c1c_ref[l]  # (bt*S, Hcp)
        A2c, B2c = a2c_ref[l], b2c_ref[l]
        u = _rational(u, [A2c[k] for k in range(6)], [B2c[k] for k in range(4)])
        u = _masked_layernorm(u, gc_ref[l], bc_ref[l], hc_true)
        v = jnp.dot(_bf16(u), w2c_ref[l],
                    preferred_element_type=jnp.float32) + c2c_ref[l]  # (bt*S, Dp)
        X = v + X1 if skip == 1.0 else v + skip * X1             # residual
        if dmask is not None:
            X = X * dmask        # defensive: padded lanes stay exactly zero

    # ---- final LayerNorm + token mean-pool (fused, no extra launches) -------
    H = _masked_layernorm(X, ln_g_ref[...], ln_b_ref[...], d_true)   # (bt*S, Dp)
    pooled = jnp.mean(H.reshape(bt, seq, dp), axis=1)                # (bt, Dp)

    # ---- classifier KANLinear ------------------------------------------------
    logits = _kanlinear(pooled, cl_g_ref[...], cl_b_ref[...], cl_sw_ref[...],
                        cl_bw_ref[...], cl_bb_ref[...],
                        d_true=d_true, grid_pts=grid_pts, inv_denom=inv_denom)
    o_ref[...] = logits


# ----------------------------- wrapper -----------------------------------------

def _const_spec(arr):
    nd = arr.ndim
    return pl.BlockSpec(arr.shape, lambda i, _nd=nd: (0,) * _nd)


def _pick_batch_tile(batch, max_bt=8):
    """Batch elements per grid step: small batches run as ONE fat step (widest
    MXU N, no per-step overhead on 1-TC v5e/v6e); larger batches tile by 8 so
    the grid has >=2 balanced steps (v7x megacore) and output blocks stay
    8-row aligned."""
    return batch if batch <= max_bt else max_bt


def katmixer_forward(x_img, params, cfg):
    B, C, H, W = x_img.shape
    psz = cfg["patch_size"]
    hg, wg = H // psz, W // psz
    S = hg * wg
    patch_dim = psz * psz * C
    pe, mx, cl = params["patch_emb"], params["mixer"], params["clf"]
    Pdp = pe["base_w"].shape[0]
    Ncp = cl["base_w"].shape[1]

    # patchify glue: b c (h p1) (w p2) -> b (h w) (p1 p2 c); pad to 128 lanes.
    patches = (x_img.reshape(B, C, hg, psz, wg, psz)
                    .transpose(0, 2, 4, 3, 5, 1)
                    .reshape(B, S, patch_dim))
    patches = jnp.pad(patches, ((0, 0), (0, 0), (0, Pdp - patch_dim)))

    bt = _pick_batch_tile(B)
    b_pad = _round_up(B, bt)
    if b_pad != B:
        patches = jnp.pad(patches, ((0, b_pad - B), (0, 0), (0, 0)))

    L = cfg["num_layers"]
    delta_skip = (1.0 - cfg["skip_min"]) / L
    skips = tuple(float(1.0 - delta_skip * i) for i in range(L))
    grid_pts = tuple(float(v) for v in np.linspace(-2.0, 2.0, cfg["num_grids"]))
    inv_denom = float((cfg["num_grids"] - 1) / 4.0)

    weights = [pe["ln_g"], pe["ln_b"], pe["spline_w"], pe["base_w"], pe["base_b"],
               mx["a1s"], mx["b1s"], mx["w1s"], mx["c1s"], mx["a2s"], mx["b2s"],
               mx["gs"], mx["bs"], mx["w2s"], mx["c2s"],
               mx["a1c"], mx["b1c"], mx["w1c"], mx["c1c"], mx["a2c"], mx["b2c"],
               mx["gc"], mx["bc"], mx["w2c"], mx["c2c"],
               params["ln_g"], params["ln_b"],
               cl["ln_g"], cl["ln_b"], cl["spline_w"], cl["base_w"], cl["base_b"]]

    kern = functools.partial(
        katmixer_kernel, bt=bt, seq=S, d_true=cfg["hidden_size"],
        hc_true=cfg["hidden_c"], patch_dim=patch_dim,
        grid_pts=grid_pts, inv_denom=inv_denom, skips=skips)

    logits = pl.pallas_call(
        kern,
        out_shape=jax.ShapeDtypeStruct((b_pad, Ncp), jnp.float32),
        grid=(b_pad // bt,),
        in_specs=[pl.BlockSpec((bt, S, Pdp), lambda i: (i, 0, 0))]
                + [_const_spec(w) for w in weights],
        out_specs=pl.BlockSpec((bt, Ncp), lambda i: (i, 0)),
        compiler_params=pltpu.CompilerParams(
            dimension_semantics=("parallel",)),
    )(patches, *weights)
    return logits[:B, :cfg["num_classes"]]


# ----------------------------- deterministic params ---------------------------

def init_params(key, cfg):
    C, psz = cfg["in_channels"], cfg["patch_size"]
    D, Hs, Hc = cfg["hidden_size"], cfg["hidden_s"], cfg["hidden_c"]
    S = (cfg["img_size"] // psz) ** 2
    G, groups, L = cfg["num_grids"], cfg["rat_groups"], cfg["num_layers"]
    ncls = cfg["num_classes"]
    patch_dim = psz * psz * C
    Pdp = _round_up(patch_dim, LANE)
    Dp = _round_up(D, LANE)
    Hcp = _round_up(Hc, LANE)
    Ncp = _round_up(ncls, LANE)
    keys = iter(jax.random.split(key, 1024))

    def nrm(shape, scale):
        return (scale * jax.random.normal(next(keys), shape)).astype(jnp.float32)

    def pad_to(a, shape):
        return jnp.pad(a, [(0, t - s) for s, t in zip(a.shape, shape)])

    def kanlinear_params(din_true, din_pad, dout_true, dout_pad):
        # spline weight stacked over grid points -> (G*din_pad, dout_pad);
        # padded input rows are zero so padded-lane basis values contribute 0.
        sw = nrm((G, din_true, dout_true), 0.1 / np.sqrt(din_true * G))
        sw = pad_to(sw, (G, din_pad, dout_pad)).reshape(G * din_pad, dout_pad)
        bw = pad_to(nrm((din_true, dout_true), 1.0 / np.sqrt(din_true)),
                    (din_pad, dout_pad))
        return dict(
            ln_g=pad_to(jnp.ones((1, din_true), jnp.float32), (1, din_pad)),
            ln_b=jnp.zeros((1, din_pad), jnp.float32),
            spline_w=sw.astype(jnp.bfloat16),
            base_w=bw.astype(jnp.bfloat16),
            base_b=jnp.zeros((1, dout_pad), jnp.float32),
        )

    ident_a = np.array([0.0, 1.0, 0.0, 0.0, 0.0, 0.0], np.float32)
    ident_b = np.zeros(4, np.float32)
    gelu_a = np.array([-0.0040, 0.5000, 0.3700, 0.0700, 0.0050, 0.0001], np.float32)
    gelu_b = np.array([0.0, 0.16, 0.0, 0.003], np.float32)

    def rational_params(dim_true, dim_pad, base_a, base_b):
        ga = jnp.asarray(base_a)[None, :] + 0.01 * jax.random.normal(next(keys), (groups, 6))
        gb = jnp.asarray(base_b)[None, :] + 0.01 * jax.random.normal(next(keys), (groups, 4))
        rep = dim_true // groups
        a_full = jnp.repeat(ga, rep, axis=0).T.astype(jnp.float32)   # (6, dim_true)
        b_full = jnp.repeat(gb, rep, axis=0).T.astype(jnp.float32)   # (4, dim_true)
        # padded coefficient columns are zero -> rational output 0 on padding
        return pad_to(a_full, (6, dim_pad)), pad_to(b_full, (4, dim_pad))

    lane_rep = lambda m: jnp.tile(m[:, :, None], (1, 1, LANE))   # (k,R)->(k,R,128)
    row_rep = lambda v: jnp.tile(v[:, None], (1, LANE))          # (R,)->(R,128)

    def kat1_params():
        # Token-mixing KAT (S -> Hs -> S): per-row parameters pre-replicated
        # along 128 lanes; fc weights stored pre-transposed so the kernel
        # contracts over S without transposing the activation.
        a1, b1 = rational_params(S, S, ident_a, ident_b)
        a2, b2 = rational_params(Hs, Hs, gelu_a, gelu_b)
        return dict(
            a1s=lane_rep(a1), b1s=lane_rep(b1),                      # (6,S,128)
            w1s=nrm((Hs, S), 1.0 / np.sqrt(S)).astype(jnp.bfloat16),  # W1^T
            c1s=row_rep(nrm((Hs,), 0.02)),
            a2s=lane_rep(a2), b2s=lane_rep(b2),                      # (6,Hs,128)
            gs=row_rep(jnp.ones((Hs,), jnp.float32)),
            bs=row_rep(jnp.zeros((Hs,), jnp.float32)),
            w2s=nrm((S, Hs), 1.0 / np.sqrt(Hs)).astype(jnp.bfloat16),  # W2^T
            c2s=row_rep(nrm((S,), 0.02)),
        )

    def kat2_params():
        # Channel-mixing KAT (D -> Hc -> D), zero-padded to 128 lanes.
        a1, b1 = rational_params(D, Dp, ident_a, ident_b)
        a2, b2 = rational_params(Hc, Hcp, gelu_a, gelu_b)
        return dict(
            a1c=a1[:, None, :], b1c=b1[:, None, :],                  # (6,1,Dp)
            w1c=pad_to(nrm((D, Hc), 1.0 / np.sqrt(D)), (Dp, Hcp)).astype(jnp.bfloat16),
            c1c=pad_to(nrm((1, Hc), 0.02), (1, Hcp)),
            a2c=a2[:, None, :], b2c=b2[:, None, :],                  # (6,1,Hcp)
            gc=pad_to(jnp.ones((1, Hc), jnp.float32), (1, Hcp)),
            bc=jnp.zeros((1, Hcp), jnp.float32),
            w2c=pad_to(nrm((Hc, D), 1.0 / np.sqrt(Hc)), (Hcp, Dp)).astype(jnp.bfloat16),
            c2c=pad_to(nrm((1, D), 0.02), (1, Dp)),
        )

    layer_dicts = [{**kat1_params(), **kat2_params()} for _ in range(L)]
    mixer = {k: jnp.stack([d[k] for d in layer_dicts]) for k in layer_dicts[0]}

    return dict(
        patch_emb=kanlinear_params(patch_dim, Pdp, D, Dp),
        mixer=mixer,
        ln_g=pad_to(jnp.ones((1, D), jnp.float32), (1, Dp)),
        ln_b=jnp.zeros((1, Dp), jnp.float32),
        clf=kanlinear_params(D, Dp, ncls, Ncp),
    )


# ----------------------------- main --------------------------------------------

if __name__ == "__main__":
    cfg = dict(
        in_channels=3, img_size=16, patch_size=4,
        hidden_size=32, hidden_s=16, hidden_c=64,
        num_layers=2, num_classes=10,
        num_grids=8, rat_groups=8, skip_min=1.0,
    )
    key = jax.random.PRNGKey(0)
    xk, pk = jax.random.split(key)
    x = jax.random.normal(
        xk, (2, cfg["in_channels"], cfg["img_size"], cfg["img_size"]),
        dtype=jnp.float32)                       # NCHW, like the PyTorch input
    params = init_params(pk, cfg)

    fwd = jax.jit(functools.partial(katmixer_forward, cfg=cfg))
    logits = fwd(x, params)
    jax.block_until_ready(logits)

    assert logits.shape == (2, cfg["num_classes"]), logits.shape
    assert bool(jnp.all(jnp.isfinite(logits)))
    print("KERNEL_OK")
</pallas_src>

<mosaic_0001>
module attributes {stable_mosaic.version = 11 : i64} {
  func.func @katmixer_kernel(%arg0: i32, %arg1: memref<2x16x128xf32, #tpu.memory_space<vmem>>, %arg2: memref<1x128xf32, #tpu.memory_space<vmem>>, %arg3: memref<1x128xf32, #tpu.memory_space<vmem>>, %arg4: memref<1024x128xbf16, #tpu.memory_space<vmem>>, %arg5: memref<128x128xbf16, #tpu.memory_space<vmem>>, %arg6: memref<1x128xf32, #tpu.memory_space<vmem>>, %arg7: memref<2x6x16x128xf32, #tpu.memory_space<vmem>>, %arg8: memref<2x4x16x128xf32, #tpu.memory_space<vmem>>, %arg9: memref<2x16x16xbf16, #tpu.memory_space<vmem>>, %arg10: memref<2x16x128xf32, #tpu.memory_space<vmem>>, %arg11: memref<2x6x16x128xf32, #tpu.memory_space<vmem>>, %arg12: memref<2x4x16x128xf32, #tpu.memory_space<vmem>>, %arg13: memref<2x16x128xf32, #tpu.memory_space<vmem>>, %arg14: memref<2x16x128xf32, #tpu.memory_space<vmem>>, %arg15: memref<2x16x16xbf16, #tpu.memory_space<vmem>>, %arg16: memref<2x16x128xf32, #tpu.memory_space<vmem>>, %arg17: memref<2x6x1x128xf32, #tpu.memory_space<vmem>>, %arg18: memref<2x4x1x128xf32, #tpu.memory_space<vmem>>, %arg19: memref<2x128x128xbf16, #tpu.memory_space<vmem>>, %arg20: memref<2x1x128xf32, #tpu.memory_space<vmem>>, %arg21: memref<2x6x1x128xf32, #tpu.memory_space<vmem>>, %arg22: memref<2x4x1x128xf32, #tpu.memory_space<vmem>>, %arg23: memref<2x1x128xf32, #tpu.memory_space<vmem>>, %arg24: memref<2x1x128xf32, #tpu.memory_space<vmem>>, %arg25: memref<2x128x128xbf16, #tpu.memory_space<vmem>>, %arg26: memref<2x1x128xf32, #tpu.memory_space<vmem>>, %arg27: memref<1x128xf32, #tpu.memory_space<vmem>>, %arg28: memref<1x128xf32, #tpu.memory_space<vmem>>, %arg29: memref<1x128xf32, #tpu.memory_space<vmem>>, %arg30: memref<1x128xf32, #tpu.memory_space<vmem>>, %arg31: memref<1024x128xbf16, #tpu.memory_space<vmem>>, %arg32: memref<128x128xbf16, #tpu.memory_space<vmem>>, %arg33: memref<1x128xf32, #tpu.memory_space<vmem>>, %arg34: memref<2x128xf32, #tpu.memory_space<vmem>>) attributes {dimension_semantics = [#tpu.dimension_semantics<parallel>], iteration_bounds = array<i64: 1>, scalar_prefetch = 0 : i64, scratch_operands = 0 : i64, tpu.core_type = #tpu.core_type<tc>, window_params = [{transform_indices = @transform_0, window_bounds = array<i64: 2, 16, 128>}, {pipeline_mode = #tpu.pipeline_mode<synchronous>, transform_indices = @transform_1, window_bounds = array<i64: 1, 128>}, {pipeline_mode = #tpu.pipeline_mode<synchronous>, transform_indices = @transform_2, window_bounds = array<i64: 1, 128>}, {pipeline_mode = #tpu.pipeline_mode<synchronous>, transform_indices = @transform_3, window_bounds = array<i64: 1024, 128>}, {pipeline_mode = #tpu.pipeline_mode<synchronous>, transform_indices = @transform_4, window_bounds = array<i64: 128, 128>}, {pipeline_mode = #tpu.pipeline_mode<synchronous>, transform_indices = @transform_5, window_bounds = array<i64: 1, 128>}, {pipeline_mode = #tpu.pipeline_mode<synchronous>, transform_indices = @transform_6, window_bounds = array<i64: 2, 6, 16, 128>}, {pipeline_mode = #tpu.pipeline_mode<synchronous>, transform_indices = @transform_7, window_bounds = array<i64: 2, 4, 16, 128>}, {pipeline_mode = #tpu.pipeline_mode<synchronous>, transform_indices = @transform_8, window_bounds = array<i64: 2, 16, 16>}, {pipeline_mode = #tpu.pipeline_mode<synchronous>, transform_indices = @transform_9, window_bounds = array<i64: 2, 16, 128>}, {pipeline_mode = #tpu.pipeline_mode<synchronous>, transform_indices = @transform_10, window_bounds = array<i64: 2, 6, 16, 128>}, {pipeline_mode = #tpu.pipeline_mode<synchronous>, transform_indices = @transform_11, window_bounds = array<i64: 2, 4, 16, 128>}, {pipeline_mode = #tpu.pipeline_mode<synchronous>, transform_indices = @transform_12, window_bounds = array<i64: 2, 16, 128>}, {pipeline_mode = #tpu.pipeline_mode<synchronous>, transform_indices = @transform_13, window_bounds = array<i64: 2, 16, 128>}, {pipeline_mode = #tpu.pipeline_mode<synchronous>, transform_indices = @transform_14, window_bounds = array<i64: 2, 16, 16>}, {pipeline_mode = #tpu.pipeline_mode<synchronous>, transform_indices = @transform_15, window_bounds = array<i64: 2, 16, 128>}, {pipeline_mode = #tpu.pipeline_mode<synchronous>, transform_indices = @transform_16, window_bounds = array<i64: 2, 6, 1, 128>}, {pipeline_mode = #tpu.pipeline_mode<synchronous>, transform_indices = @transform_17, window_bounds = array<i64: 2, 4, 1, 128>}, {pipeline_mode = #tpu.pipeline_mode<synchronous>, transform_indices = @transform_18, window_bounds = array<i64: 2, 128, 128>}, {pipeline_mode = #tpu.pipeline_mode<synchronous>, transform_indices = @transform_19, window_bounds = array<i64: 2, 1, 128>}, {pipeline_mode = #tpu.pipeline_mode<synchronous>, transform_indices = @transform_20, window_bounds = array<i64: 2, 6, 1, 128>}, {pipeline_mode = #tpu.pipeline_mode<synchronous>, transform_indices = @transform_21, window_bounds = array<i64: 2, 4, 1, 128>}, {pipeline_mode = #tpu.pipeline_mode<synchronous>, transform_indices = @transform_22, window_bounds = array<i64: 2, 1, 128>}, {pipeline_mode = #tpu.pipeline_mode<synchronous>, transform_indices = @transform_23, window_bounds = array<i64: 2, 1, 128>}, {pipeline_mode = #tpu.pipeline_mode<synchronous>, transform_indices = @transform_24, window_bounds = array<i64: 2, 128, 128>}, {pipeline_mode = #tpu.pipeline_mode<synchronous>, transform_indices = @transform_25, window_bounds = array<i64: 2, 1, 128>}, {pipeline_mode = #tpu.pipeline_mode<synchronous>, transform_indices = @transform_26, window_bounds = array<i64: 1, 128>}, {pipeline_mode = #tpu.pipeline_mode<synchronous>, transform_indices = @transform_27, window_bounds = array<i64: 1, 128>}, {pipeline_mode = #tpu.pipeline_mode<synchronous>, transform_indices = @transform_28, window_bounds = array<i64: 1, 128>}, {pipeline_mode = #tpu.pipeline_mode<synchronous>, transform_indices = @transform_29, window_bounds = array<i64: 1, 128>}, {pipeline_mode = #tpu.pipeline_mode<synchronous>, transform_indices = @transform_30, window_bounds = array<i64: 1024, 128>}, {pipeline_mode = #tpu.pipeline_mode<synchronous>, transform_indices = @transform_31, window_bounds = array<i64: 128, 128>}, {pipeline_mode = #tpu.pipeline_mode<synchronous>, transform_indices = @transform_32, window_bounds = array<i64: 1, 128>}, {transform_indices = @transform_33, window_bounds = array<i64: 2, 128>}]} {
    %c0 = arith.constant 0 : index
    %c0_0 = arith.constant 0 : index
    %c0_1 = arith.constant 0 : index
    %0 = vector.load %arg1[%c0, %c0_0, %c0_1] : memref<2x16x128xf32, #tpu.memory_space<vmem>>, vector<2x16x128xf32>
    %1 = vector.shape_cast %0 : vector<2x16x128xf32> to vector<32x128xf32>
    %c0_2 = arith.constant 0 : index
    %c0_3 = arith.constant 0 : index
    %2 = vector.load %arg2[%c0_2, %c0_3] : memref<1x128xf32, #tpu.memory_space<vmem>>, vector<1x128xf32>
    %c0_4 = arith.constant 0 : index
    %c0_5 = arith.constant 0 : index
    %3 = vector.load %arg3[%c0_4, %c0_5] : memref<1x128xf32, #tpu.memory_space<vmem>>, vector<1x128xf32>
    %c0_6 = arith.constant 0 : index
    %c0_7 = arith.constant 0 : index
    %4 = vector.load %arg4[%c0_6, %c0_7] : memref<1024x128xbf16, #tpu.memory_space<vmem>>, vector<1024x128xbf16>
    %c0_8 = arith.constant 0 : index
    %c0_9 = arith.constant 0 : index
    %5 = vector.load %arg5[%c0_8, %c0_9] : memref<128x128xbf16, #tpu.memory_space<vmem>>, vector<128x128xbf16>
    %c0_10 = arith.constant 0 : index
    %c0_11 = arith.constant 0 : index
    %6 = vector.load %arg6[%c0_10, %c0_11] : memref<1x128xf32, #tpu.memory_space<vmem>>, vector<1x128xf32>
    %7 = tpu.iota {dimensions = array<i32: 1>} : vector<1x128xi32>
    %c48_i32 = arith.constant 48 : i32
    %8 = vector.broadcast %c48_i32 : i32 to vector<1x128xi32>
    %9 = arith.cmpi slt, %7, %8 : vector<1x128xi32>
    %10 = arith.extui %9 : vector<1x128xi1> to vector<1x128xi32>
    %11 = arith.sitofp %10 : vector<1x128xi32> to vector<1x128xf32>
    %12 = vector.broadcast %11 : vector<1x128xf32> to vector<32x128xf32>
    %13 = arith.mulf %1, %12 : vector<32x128xf32>
    %cst = arith.constant dense<0.000000e+00> : vector<32xf32>
    %14 = vector.multi_reduction <add>, %13, %cst [1] : vector<32x128xf32> to vector<32xf32>
    %15 = vector.shape_cast %14 : vector<32xf32> to vector<32x1xf32>
    %cst_12 = arith.constant 0.020833334 : f32
    %16 = vector.broadcast %cst_12 : f32 to vector<32x1xf32>
    %17 = arith.mulf %15, %16 : vector<32x1xf32>
    %18 = vector.broadcast %17 : vector<32x1xf32> to vector<32x128xf32>
    %19 = arith.subf %13, %18 : vector<32x128xf32>
    %20 = arith.mulf %19, %19 : vector<32x128xf32>
    %21 = vector.broadcast %11 : vector<1x128xf32> to vector<32x128xf32>
    %22 = arith.mulf %20, %21 : vector<32x128xf32>
    %cst_13 = arith.constant dense<0.000000e+00> : vector<32xf32>
    %23 = vector.multi_reduction <add>, %22, %cst_13 [1] : vector<32x128xf32> to vector<32xf32>
    %24 = vector.shape_cast %23 : vector<32xf32> to vector<32x1xf32>
    %cst_14 = arith.constant 0.020833334 : f32
    %25 = vector.broadcast %cst_14 : f32 to vector<32x1xf32>
    %26 = arith.mulf %24, %25 : vector<32x1xf32>
    %27 = vector.broadcast %17 : vector<32x1xf32> to vector<32x128xf32>
    %28 = arith.subf %1, %27 : vector<32x128xf32>
    %cst_15 = arith.constant 9.99999974E-6 : f32
    %29 = vector.broadcast %cst_15 : f32 to vector<32x1xf32>
    %30 = arith.addf %26, %29 : vector<32x1xf32>
    %31 = math.rsqrt %30 : vector<32x1xf32>
    %32 = vector.broadcast %31 : vector<32x1xf32> to vector<32x128xf32>
    %33 = arith.mulf %28, %32 : vector<32x128xf32>
    %34 = vector.broadcast %2 : vector<1x128xf32> to vector<32x128xf32>
    %35 = arith.mulf %33, %34 : vector<32x128xf32>
    %36 = vector.broadcast %3 : vector<1x128xf32> to vector<32x128xf32>
    %37 = arith.addf %35, %36 : vector<32x128xf32>
    %cst_16 = arith.constant -2.000000e+00 : f32
    %38 = vector.broadcast %cst_16 : f32 to vector<32x128xf32>
    %39 = arith.subf %37, %38 : vector<32x128xf32>
    %cst_17 = arith.constant 1.750000e+00 : f32
    %40 = vector.broadcast %cst_17 : f32 to vector<32x128xf32>
    %41 = arith.mulf %39, %40 : vector<32x128xf32>
    %cst_18 = arith.constant -1.42857146 : f32
    %42 = vector.broadcast %cst_18 : f32 to vector<32x128xf32>
    %43 = arith.subf %37, %42 : vector<32x128xf32>
    %cst_19 = arith.constant 1.750000e+00 : f32
    %44 = vector.broadcast %cst_19 : f32 to vector<32x128xf32>
    %45 = arith.mulf %43, %44 : vector<32x128xf32>
    %cst_20 = arith.constant -0.857142865 : f32
    %46 = vector.broadcast %cst_20 : f32 to vector<32x128xf32>
    %47 = arith.subf %37, %46 : vector<32x128xf32>
    %cst_21 = arith.constant 1.750000e+00 : f32
    %48 = vector.broadcast %cst_21 : f32 to vector<32x128xf32>
    %49 = arith.mulf %47, %48 : vector<32x128xf32>
    %cst_22 = arith.constant -0.285714298 : f32
    %50 = vector.broadcast %cst_22 : f32 to vector<32x128xf32>
    %51 = arith.subf %37, %50 : vector<32x128xf32>
    %cst_23 = arith.constant 1.750000e+00 : f32
    %52 = vector.broadcast %cst_23 : f32 to vector<32x128xf32>
    %53 = arith.mulf %51, %52 : vector<32x128xf32>
    %cst_24 = arith.constant 0.285714298 : f32
    %54 = vector.broadcast %cst_24 : f32 to vector<32x128xf32>
    %55 = arith.subf %37, %54 : vector<32x128xf32>
    %cst_25 = arith.constant 1.750000e+00 : f32
    %56 = vector.broadcast %cst_25 : f32 to vector<32x128xf32>
    %57 = arith.mulf %55, %56 : vector<32x128xf32>
    %cst_26 = arith.constant 0.857142865 : f32
    %58 = vector.broadcast %cst_26 : f32 to vector<32x128xf32>
    %59 = arith.subf %37, %58 : vector<32x128xf32>
    %cst_27 = arith.constant 1.750000e+00 : f32
    %60 = vector.broadcast %cst_27 : f32 to vector<32x128xf32>
    %61 = arith.mulf %59, %60 : vector<32x128xf32>
    %cst_28 = arith.constant 1.42857146 : f32
    %62 = vector.broadcast %cst_28 : f32 to vector<32x128xf32>
    %63 = arith.subf %37, %62 : vector<32x128xf32>
    %cst_29 = arith.constant 1.750000e+00 : f32
    %64 = vector.broadcast %cst_29 : f32 to vector<32x128xf32>
    %65 = arith.mulf %63, %64 : vector<32x128xf32>
    %cst_30 = arith.constant 2.000000e+00 : f32
    %66 = vector.broadcast %cst_30 : f32 to vector<32x128xf32>
    %67 = arith.subf %37, %66 : vector<32x128xf32>
    %cst_31 = arith.constant 1.750000e+00 : f32
    %68 = vector.broadcast %cst_31 : f32 to vector<32x128xf32>
    %69 = arith.mulf %67, %68 : vector<32x128xf32>
    %70 = tpu.concatenate %41, %45, %49, %53, %57, %61, %65, %69 in 1 : vector<32x128xf32>, vector<32x128xf32>, vector<32x128xf32>, vector<32x128xf32>, vector<32x128xf32>, vector<32x128xf32>, vector<32x128xf32>, vector<32x128xf32> -> vector<32x1024xf32>
    %71 = arith.mulf %70, %70 : vector<32x1024xf32>
    %cst_32 = arith.constant 0.000000e+00 : f32
    %72 = vector.broadcast %cst_32 : f32 to vector<32x1024xf32>
    %73 = arith.subf %72, %71 : vector<32x1024xf32>
    %74 = math.exp %73 : vector<32x1024xf32>
    %cst_33 = arith.constant 0.000000e+00 : f32
    %75 = vector.broadcast %cst_33 : f32 to vector<32x128xf32>
    %76 = arith.subf %75, %1 : vector<32x128xf32>
    %77 = math.exp %76 : vector<32x128xf32>
    %cst_34 = arith.constant 1.000000e+00 : f32
    %78 = vector.broadcast %cst_34 : f32 to vector<32x128xf32>
    %79 = arith.addf %78, %77 : vector<32x128xf32>
    %80 = tpu.reciprocal %79 {approx = true} : vector<32x128xf32> -> vector<32x128xf32>
    %81 = arith.mulf %1, %80 : vector<32x128xf32>
    %82 = arith.truncf %81 : vector<32x128xf32> to vector<32x128xbf16>
    %cst_35 = arith.constant dense<0.000000e+00> : vector<32x128xf32>
    %83 = tpu.matmul %82, %5, %cst_35 {dimension_numbers = #tpu.dot_dimension_numbers<[1], [0], [0], [1], [0, 0, 1, 1], [], []>} : vector<32x128xbf16>, vector<128x128xbf16>, vector<32x128xf32> -> vector<32x128xf32>
    %84 = vector.broadcast %6 : vector<1x128xf32> to vector<32x128xf32>
    %85 = arith.addf %83, %84 : vector<32x128xf32>
    %86 = arith.truncf %74 : vector<32x1024xf32> to vector<32x1024xbf16>
    %cst_36 = arith.constant dense<0.000000e+00> : vector<32x128xf32>
    %87 = tpu.matmul %86, %4, %cst_36 {dimension_numbers = #tpu.dot_dimension_numbers<[1], [0], [0], [1], [0, 0, 1, 1], [], []>} : vector<32x1024xbf16>, vector<1024x128xbf16>, vector<32x128xf32> -> vector<32x128xf32>
    %88 = arith.addf %85, %87 : vector<32x128xf32>
    %89 = tpu.iota {dimensions = array<i32: 1>} : vector<1x128xi32>
    %c32_i32 = arith.constant 32 : i32
    %90 = vector.broadcast %c32_i32 : i32 to vector<1x128xi32>
    %91 = arith.cmpi slt, %89, %90 : vector<1x128xi32>
    %92 = arith.extui %91 : vector<1x128xi1> to vector<1x128xi32>
    %93 = arith.sitofp %92 : vector<1x128xi32> to vector<1x128xf32>
    %94 = vector.extract_strided_slice %88 {offsets = [0, 0], sizes = [16, 128], strides = [1, 1]} : vector<32x128xf32> to vector<16x128xf32>
    %95 = vector.extract_strided_slice %88 {offsets = [16, 0], sizes = [16, 128], strides = [1, 1]} : vector<32x128xf32> to vector<16x128xf32>
    %96 = tpu.concatenate %94, %95 in 1 : vector<16x128xf32>, vector<16x128xf32> -> vector<16x256xf32>
    %c0_37 = arith.constant 0 : index
    %c0_38 = arith.constant 0 : index
    %c0_39 = arith.constant 0 : index
    %c0_40 = arith.constant 0 : index
    %97 = vector.load %arg7[%c0_37, %c0_38, %c0_39, %c0_40] : memref<2x6x16x128xf32, #tpu.memory_space<vmem>>, vector<1x6x16x128xf32>
    %98 = vector.shape_cast %97 : vector<1x6x16x128xf32> to vector<6x16x128xf32>
    %c0_41 = arith.constant 0 : index
    %c0_42 = arith.constant 0 : index
    %c0_43 = arith.constant 0 : index
    %c0_44 = arith.constant 0 : index
    %99 = vector.load %arg8[%c0_41, %c0_42, %c0_43, %c0_44] : memref<2x4x16x128xf32, #tpu.memory_space<vmem>>, vector<1x4x16x128xf32>
    %100 = vector.shape_cast %99 : vector<1x4x16x128xf32> to vector<4x16x128xf32>
    %101 = vector.extract_strided_slice %98 {offsets = [0, 0, 0], sizes = [1, 16, 128], strides = [1, 1, 1]} : vector<6x16x128xf32> to vector<1x16x128xf32>
    %102 = vector.shape_cast %101 : vector<1x16x128xf32> to vector<16x128xf32>
    %103 = tpu.concatenate %102, %102 in 1 : vector<16x128xf32>, vector<16x128xf32> -> vector<16x256xf32>
    %104 = vector.extract_strided_slice %98 {offsets = [1, 0, 0], sizes = [1, 16, 128], strides = [1, 1, 1]} : vector<6x16x128xf32> to vector<1x16x128xf32>
    %105 = vector.shape_cast %104 : vector<1x16x128xf32> to vector<16x128xf32>
    %106 = tpu.concatenate %105, %105 in 1 : vector<16x128xf32>, vector<16x128xf32> -> vector<16x256xf32>
    %107 = vector.extract_strided_slice %98 {offsets = [2, 0, 0], sizes = [1, 16, 128], strides = [1, 1, 1]} : vector<6x16x128xf32> to vector<1x16x128xf32>
    %108 = vector.shape_cast %107 : vector<1x16x128xf32> to vector<16x128xf32>
    %109 = tpu.concatenate %108, %108 in 1 : vector<16x128xf32>, vector<16x128xf32> -> vector<16x256xf32>
    %110 = vector.extract_strided_slice %98 {offsets = [3, 0, 0], sizes = [1, 16, 128], strides = [1, 1, 1]} : vector<6x16x128xf32> to vector<1x16x128xf32>
    %111 = vector.shape_cast %110 : vector<1x16x128xf32> to vector<16x128xf32>
    %112 = tpu.concatenate %111, %111 in 1 : vector<16x128xf32>, vector<16x128xf32> -> vector<16x256xf32>
    %113 = vector.extract_strided_slice %98 {offsets = [4, 0, 0], sizes = [1, 16, 128], strides = [1, 1, 1]} : vector<6x16x128xf32> to vector<1x16x128xf32>
    %114 = vector.shape_cast %113 : vector<1x16x128xf32> to vector<16x128xf32>
    %115 = tpu.concatenate %114, %114 in 1 : vector<16x128xf32>, vector<16x128xf32> -> vector<16x256xf32>
    %116 = vector.extract_strided_slice %98 {offsets = [5, 0, 0], sizes = [1, 16, 128], strides = [1, 1, 1]} : vector<6x16x128xf32> to vector<1x16x128xf32>
    %117 = vector.shape_cast %116 : vector<1x16x128xf32> to vector<16x128xf32>
    %118 = tpu.concatenate %117, %117 in 1 : vector<16x128xf32>, vector<16x128xf32> -> vector<16x256xf32>
    %119 = vector.extract_strided_slice %100 {offsets = [0, 0, 0], sizes = [1, 16, 128], strides = [1, 1, 1]} : vector<4x16x128xf32> to vector<1x16x128xf32>
    %120 = vector.shape_cast %119 : vector<1x16x128xf32> to vector<16x128xf32>
    %121 = tpu.concatenate %120, %120 in 1 : vector<16x128xf32>, vector<16x128xf32> -> vector<16x256xf32>
    %122 = vector.extract_strided_slice %100 {offsets = [1, 0, 0], sizes = [1, 16, 128], strides = [1, 1, 1]} : vector<4x16x128xf32> to vector<1x16x128xf32>
    %123 = vector.shape_cast %122 : vector<1x16x128xf32> to vector<16x128xf32>
    %124 = tpu.concatenate %123, %123 in 1 : vector<16x128xf32>, vector<16x128xf32> -> vector<16x256xf32>
    %125 = vector.extract_strided_slice %100 {offsets = [2, 0, 0], sizes = [1, 16, 128], strides = [1, 1, 1]} : vector<4x16x128xf32> to vector<1x16x128xf32>
    %126 = vector.shape_cast %125 : vector<1x16x128xf32> to vector<16x128xf32>
    %127 = tpu.concatenate %126, %126 in 1 : vector<16x128xf32>, vector<16x128xf32> -> vector<16x256xf32>
    %128 = vector.extract_strided_slice %100 {offsets = [3, 0, 0], sizes = [1, 16, 128], strides = [1, 1, 1]} : vector<4x16x128xf32> to vector<1x16x128xf32>
    %129 = vector.shape_cast %128 : vector<1x16x128xf32> to vector<16x128xf32>
    %130 = tpu.concatenate %129, %129 in 1 : vector<16x128xf32>, vector<16x128xf32> -> vector<16x256xf32>
    %131 = arith.mulf %118, %96 : vector<16x256xf32>
    %132 = arith.addf %131, %115 : vector<16x256xf32>
    %133 = arith.mulf %132, %96 : vector<16x256xf32>
    %134 = arith.addf %133, %112 : vector<16x256xf32>
    %135 = arith.mulf %134, %96 : vector<16x256xf32>
    %136 = arith.addf %135, %109 : vector<16x256xf32>
    %137 = arith.mulf %136, %96 : vector<16x256xf32>
    %138 = arith.addf %137, %106 : vector<16x256xf32>
    %139 = arith.mulf %138, %96 : vector<16x256xf32>
    %140 = arith.addf %139, %103 : vector<16x256xf32>
    %141 = arith.mulf %130, %96 : vector<16x256xf32>
    %142 = arith.addf %141, %127 : vector<16x256xf32>
    %143 = arith.mulf %142, %96 : vector<16x256xf32>
    %144 = arith.addf %143, %124 : vector<16x256xf32>
    %145 = arith.mulf %144, %96 : vector<16x256xf32>
    %146 = arith.addf %145, %121 : vector<16x256xf32>
    %147 = arith.mulf %146, %96 : vector<16x256xf32>
    %148 = math.absf %147 : vector<16x256xf32>
    %cst_45 = arith.constant 1.000000e+00 : f32
    %149 = vector.broadcast %cst_45 : f32 to vector<16x256xf32>
    %150 = arith.addf %149, %148 : vector<16x256xf32>
    %151 = tpu.reciprocal %150 {approx = true} : vector<16x256xf32> -> vector<16x256xf32>
    %152 = arith.mulf %140, %151 : vector<16x256xf32>
    %c0_46 = arith.constant 0 : index
    %c0_47 = arith.constant 0 : index
    %c0_48 = arith.constant 0 : index
    %153 = vector.load %arg9[%c0_46, %c0_47, %c0_48] : memref<2x16x16xbf16, #tpu.memory_space<vmem>>, vector<1x16x16xbf16>
    %154 = vector.shape_cast %153 : vector<1x16x16xbf16> to vector<16x16xbf16>
    %155 = arith.truncf %152 : vector<16x256xf32> to vector<16x256xbf16>
    %cst_49 = arith.constant dense<0.000000e+00> : vector<16x256xf32>
    %156 = tpu.matmul %154, %155, %cst_49 {dimension_numbers = #tpu.dot_dimension_numbers<[1], [0], [0], [1], [0, 0, 1, 1], [], []>} : vector<16x16xbf16>, vector<16x256xbf16>, vector<16x256xf32> -> vector<16x256xf32>
    %c0_50 = arith.constant 0 : index
    %c0_51 = arith.constant 0 : index
    %c0_52 = arith.constant 0 : index
    %157 = vector.load %arg10[%c0_50, %c0_51, %c0_52] : memref<2x16x128xf32, #tpu.memory_space<vmem>>, vector<1x16x128xf32>
    %158 = vector.shape_cast %157 : vector<1x16x128xf32> to vector<16x128xf32>
    %159 = tpu.concatenate %158, %158 in 1 : vector<16x128xf32>, vector<16x128xf32> -> vector<16x256xf32>
    %160 = arith.addf %156, %159 : vector<16x256xf32>
    %c0_53 = arith.constant 0 : index
    %c0_54 = arith.constant 0 : index
    %c0_55 = arith.constant 0 : index
    %c0_56 = arith.constant 0 : index
    %161 = vector.load %arg11[%c0_53, %c0_54, %c0_55, %c0_56] : memref<2x6x16x128xf32, #tpu.memory_space<vmem>>, vector<1x6x16x128xf32>
    %162 = vector.shape_cast %161 : vector<1x6x16x128xf32> to vector<6x16x128xf32>
    %c0_57 = arith.constant 0 : index
    %c0_58 = arith.constant 0 : index
    %c0_59 = arith.constant 0 : index
    %c0_60 = arith.constant 0 : index
    %163 = vector.load %arg12[%c0_57, %c0_58, %c0_59, %c0_60] : memref<2x4x16x128xf32, #tpu.memory_space<vmem>>, vector<1x4x16x128xf32>
    %164 = vector.shape_cast %163 : vector<1x4x16x128xf32> to vector<4x16x128xf32>
    %165 = vector.extract_strided_slice %162 {offsets = [0, 0, 0], sizes = [1, 16, 128], strides = [1, 1, 1]} : vector<6x16x128xf32> to vector<1x16x128xf32>
    %166 = vector.shape_cast %165 : vector<1x16x128xf32> to vector<16x128xf32>
    %167 = tpu.concatenate %166, %166 in 1 : vector<16x128xf32>, vector<16x128xf32> -> vector<16x256xf32>
    %168 = vector.extract_strided_slice %162 {offsets = [1, 0, 0], sizes = [1, 16, 128], strides = [1, 1, 1]} : vector<6x16x128xf32> to vector<1x16x128xf32>
    %169 = vector.shape_cast %168 : vector<1x16x128xf32> to vector<16x128xf32>
    %170 = tpu.concatenate %169, %169 in 1 : vector<16x128xf32>, vector<16x128xf32> -> vector<16x256xf32>
    %171 = vector.extract_strided_slice %162 {offsets = [2, 0, 0], sizes = [1, 16, 128], strides = [1, 1, 1]} : vector<6x16x128xf32> to vector<1x16x128xf32>
    %172 = vector.shape_cast %171 : vector<1x16x128xf32> to vector<16x128xf32>
    %173 = tpu.concatenate %172, %172 in 1 : vector<16x128xf32>, vector<16x128xf32> -> vector<16x256xf32>
    %174 = vector.extract_strided_slice %162 {offsets = [3, 0, 0], sizes = [1, 16, 128], strides = [1, 1, 1]} : vector<6x16x128xf32> to vector<1x16x128xf32>
    %175 = vector.shape_cast %174 : vector<1x16x128xf32> to vector<16x128xf32>
    %176 = tpu.concatenate %175, %175 in 1 : vector<16x128xf32>, vector<16x128xf32> -> vector<16x256xf32>
    %177 = vector.extract_strided_slice %162 {offsets = [4, 0, 0], sizes = [1, 16, 128], strides = [1, 1, 1]} : vector<6x16x128xf32> to vector<1x16x128xf32>
    %178 = vector.shape_cast %177 : vector<1x16x128xf32> to vector<16x128xf32>
    %179 = tpu.concatenate %178, %178 in 1 : vector<16x128xf32>, vector<16x128xf32> -> vector<16x256xf32>
    %180 = vector.extract_strided_slice %162 {offsets = [5, 0, 0], sizes = [1, 16, 128], strides = [1, 1, 1]} : vector<6x16x128xf32> to vector<1x16x128xf32>
    %181 = vector.shape_cast %180 : vector<1x16x128xf32> to vector<16x128xf32>
    %182 = tpu.concatenate %181, %181 in 1 : vector<16x128xf32>, vector<16x128xf32> -> vector<16x256xf32>
    %183 = vector.extract_strided_slice %164 {offsets = [0, 0, 0], sizes = [1, 16, 128], strides = [1, 1, 1]} : vector<4x16x128xf32> to vector<1x16x128xf32>
    %184 = vector.shape_cast %183 : vector<1x16x128xf32> to vector<16x128xf32>
    %185 = tpu.concatenate %184, %184 in 1 : vector<16x128xf32>, vector<16x128xf32> -> vector<16x256xf32>
    %186 = vector.extract_strided_slice %164 {offsets = [1, 0, 0], sizes = [1, 16, 128], strides = [1, 1, 1]} : vector<4x16x128xf32> to vector<1x16x128xf32>
    %187 = vector.shape_cast %186 : vector<1x16x128xf32> to vector<16x128xf32>
    %188 = tpu.concatenate %187, %187 in 1 : vector<16x128xf32>, vector<16x128xf32> -> vector<16x256xf32>
    %189 = vector.extract_strided_slice %164 {offsets = [2, 0, 0], sizes = [1, 16, 128], strides = [1, 1, 1]} : vector<4x16x128xf32> to vector<1x16x128xf32>
    %190 = vector.shape_cast %189 : vector<1x16x128xf32> to vector<16x128xf32>
    %191 = tpu.concatenate %190, %190 in 1 : vector<16x128xf32>, vector<16x128xf32> -> vector<16x256xf32>
    %192 = vector.extract_strided_slice %164 {offsets = [3, 0, 0], sizes = [1, 16, 128], strides = [1, 1, 1]} : vector<4x16x128xf32> to vector<1x16x128xf32>
    %193 = vector.shape_cast %192 : vector<1x16x128xf32> to vector<16x128xf32>
    %194 = tpu.concatenate %193, %193 in 1 : vector<16x128xf32>, vector<16x128xf32> -> vector<16x256xf32>
    %195 = arith.mulf %182, %160 : vector<16x256xf32>
    %196 = arith.addf %195, %179 : vector<16x256xf32>
    %197 = arith.mulf %196, %160 : vector<16x256xf32>
    %198 = arith.addf %197, %176 : vector<16x256xf32>
    %199 = arith.mulf %198, %160 : vector<16x256xf32>
    %200 = arith.addf %199, %173 : vector<16x256xf32>
    %201 = arith.mulf %200, %160 : vector<16x256xf32>
    %202 = arith.addf %201, %170 : vector<16x256xf32>
    %203 = arith.mulf %202, %160 : vector<16x256xf32>
    %204 = arith.addf %203, %167 : vector<16x256xf32>
    %205 = arith.mulf %194, %160 : vector<16x256xf32>
    %206 = arith.addf %205, %191 : vector<16x256xf32>
    %207 = arith.mulf %206, %160 : vector<16x256xf32>
    %208 = arith.addf %207, %188 : vector<16x256xf32>
    %209 = arith.mulf %208, %160 : vector<16x256xf32>
    %210 = arith.addf %209, %185 : vector<16x256xf32>
    %211 = arith.mulf %210, %160 : vector<16x256xf32>
    %212 = math.absf %211 : vector<16x256xf32>
    %cst_61 = arith.constant 1.000000e+00 : f32
    %213 = vector.broadcast %cst_61 : f32 to vector<16x256xf32>
    %214 = arith.addf %213, %212 : vector<16x256xf32>
    %215 = tpu.reciprocal %214 {approx = true} : vector<16x256xf32> -> vector<16x256xf32>
    %216 = arith.mulf %204, %215 : vector<16x256xf32>
    %c0_62 = arith.constant 0 : index
    %c0_63 = arith.constant 0 : index
    %c0_64 = arith.constant 0 : index
    %217 = vector.load %arg13[%c0_62, %c0_63, %c0_64] : memref<2x16x128xf32, #tpu.memory_space<vmem>>, vector<1x16x128xf32>
    %218 = vector.shape_cast %217 : vector<1x16x128xf32> to vector<16x128xf32>
    %219 = tpu.concatenate %218, %218 in 1 : vector<16x128xf32>, vector<16x128xf32> -> vector<16x256xf32>
    %c0_65 = arith.constant 0 : index
    %c0_66 = arith.constant 0 : index
    %c0_67 = arith.constant 0 : index
    %220 = vector.load %arg14[%c0_65, %c0_66, %c0_67] : memref<2x16x128xf32, #tpu.memory_space<vmem>>, vector<1x16x128xf32>
    %221 = vector.shape_cast %220 : vector<1x16x128xf32> to vector<16x128xf32>
    %222 = tpu.concatenate %221, %221 in 1 : vector<16x128xf32>, vector<16x128xf32> -> vector<16x256xf32>
    %cst_68 = arith.constant dense<0.000000e+00> : vector<256xf32>
    %223 = vector.multi_reduction <add>, %216, %cst_68 [0] : vector<16x256xf32> to vector<256xf32>
    %224 = vector.shape_cast %223 : vector<256xf32> to vector<1x256xf32>
    %cst_69 = arith.constant 1.600000e+01 : f32
    %225 = vector.broadcast %cst_69 : f32 to vector<1x256xf32>
    %226 = arith.divf %224, %225 : vector<1x256xf32>
    %227 = vector.broadcast %226 : vector<1x256xf32> to vector<16x256xf32>
    %228 = arith.subf %216, %227 : vector<16x256xf32>
    %229 = arith.mulf %228, %228 : vector<16x256xf32>
    %cst_70 = arith.constant dense<0.000000e+00> : vector<256xf32>
    %230 = vector.multi_reduction <add>, %229, %cst_70 [0] : vector<16x256xf32> to vector<256xf32>
    %231 = vector.shape_cast %230 : vector<256xf32> to vector<1x256xf32>
    %cst_71 = arith.constant 1.600000e+01 : f32
    %232 = vector.broadcast %cst_71 : f32 to vector<1x256xf32>
    %233 = arith.divf %231, %232 : vector<1x256xf32>
    %234 = vector.broadcast %226 : vector<1x256xf32> to vector<16x256xf32>
    %235 = arith.subf %216, %234 : vector<16x256xf32>
    %cst_72 = arith.constant 9.99999974E-6 : f32
    %236 = vector.broadcast %cst_72 : f32 to vector<1x256xf32>
    %237 = arith.addf %233, %236 : vector<1x256xf32>
    %238 = math.rsqrt %237 : vector<1x256xf32>
    %239 = vector.broadcast %238 : vector<1x256xf32> to vector<16x256xf32>
    %240 = arith.mulf %235, %239 : vector<16x256xf32>
    %241 = arith.mulf %240, %219 : vector<16x256xf32>
    %242 = arith.addf %241, %222 : vector<16x256xf32>
    %c0_73 = arith.constant 0 : index
    %c0_74 = arith.constant 0 : index
    %c0_75 = arith.constant 0 : index
    %243 = vector.load %arg15[%c0_73, %c0_74, %c0_75] : memref<2x16x16xbf16, #tpu.memory_space<vmem>>, vector<1x16x16xbf16>
    %244 = vector.shape_cast %243 : vector<1x16x16xbf16> to vector<16x16xbf16>
    %245 = arith.truncf %242 : vector<16x256xf32> to vector<16x256xbf16>
    %cst_76 = arith.constant dense<0.000000e+00> : vector<16x256xf32>
    %246 = tpu.matmul %244, %245, %cst_76 {dimension_numbers = #tpu.dot_dimension_numbers<[1], [0], [0], [1], [0, 0, 1, 1], [], []>} : vector<16x16xbf16>, vector<16x256xbf16>, vector<16x256xf32> -> vector<16x256xf32>
    %c0_77 = arith.constant 0 : index
    %c0_78 = arith.constant 0 : index
    %c0_79 = arith.constant 0 : index
    %247 = vector.load %arg16[%c0_77, %c0_78, %c0_79] : memref<2x16x128xf32, #tpu.memory_space<vmem>>, vector<1x16x128xf32>
    %248 = vector.shape_cast %247 : vector<1x16x128xf32> to vector<16x128xf32>
    %249 = tpu.concatenate %248, %248 in 1 : vector<16x128xf32>, vector<16x128xf32> -> vector<16x256xf32>
    %250 = arith.addf %246, %249 : vector<16x256xf32>
    %251 = arith.addf %250, %96 : vector<16x256xf32>
    %252 = vector.extract_strided_slice %251 {offsets = [0, 0], sizes = [16, 128], strides = [1, 1]} : vector<16x256xf32> to vector<16x128xf32>
    %253 = vector.extract_strided_slice %251 {offsets = [0, 128], sizes = [16, 128], strides = [1, 1]} : vector<16x256xf32> to vector<16x128xf32>
    %254 = tpu.concatenate %252, %253 in 0 : vector<16x128xf32>, vector<16x128xf32> -> vector<32x128xf32>
    %c0_80 = arith.constant 0 : index
    %c0_81 = arith.constant 0 : index
    %c0_82 = arith.constant 0 : index
    %c0_83 = arith.constant 0 : index
    %255 = vector.load %arg17[%c0_80, %c0_81, %c0_82, %c0_83] : memref<2x6x1x128xf32, #tpu.memory_space<vmem>>, vector<1x6x1x128xf32>
    %256 = vector.shape_cast %255 : vector<1x6x1x128xf32> to vector<6x1x128xf32>
    %c0_84 = arith.constant 0 : index
    %c0_85 = arith.constant 0 : index
    %c0_86 = arith.constant 0 : index
    %c0_87 = arith.constant 0 : index
    %257 = vector.load %arg18[%c0_84, %c0_85, %c0_86, %c0_87] : memref<2x4x1x128xf32, #tpu.memory_space<vmem>>, vector<1x4x1x128xf32>
    %258 = vector.shape_cast %257 : vector<1x4x1x128xf32> to vector<4x1x128xf32>
    %259 = vector.extract_strided_slice %256 {offsets = [0, 0, 0], sizes = [1, 1, 128], strides = [1, 1, 1]} : vector<6x1x128xf32> to vector<1x1x128xf32>
    %260 = vector.shape_cast %259 : vector<1x1x128xf32> to vector<1x128xf32>
    %261 = vector.extract_strided_slice %256 {offsets = [1, 0, 0], sizes = [1, 1, 128], strides = [1, 1, 1]} : vector<6x1x128xf32> to vector<1x1x128xf32>
    %262 = vector.shape_cast %261 : vector<1x1x128xf32> to vector<1x128xf32>
    %263 = vector.extract_strided_slice %256 {offsets = [2, 0, 0], sizes = [1, 1, 128], strides = [1, 1, 1]} : vector<6x1x128xf32> to vector<1x1x128xf32>
    %264 = vector.shape_cast %263 : vector<1x1x128xf32> to vector<1x128xf32>
    %265 = vector.extract_strided_slice %256 {offsets = [3, 0, 0], sizes = [1, 1, 128], strides = [1, 1, 1]} : vector<6x1x128xf32> to vector<1x1x128xf32>
    %266 = vector.shape_cast %265 : vector<1x1x128xf32> to vector<1x128xf32>
    %267 = vector.extract_strided_slice %256 {offsets = [4, 0, 0], sizes = [1, 1, 128], strides = [1, 1, 1]} : vector<6x1x128xf32> to vector<1x1x128xf32>
    %268 = vector.shape_cast %267 : vector<1x1x128xf32> to vector<1x128xf32>
    %269 = vector.extract_strided_slice %256 {offsets = [5, 0, 0], sizes = [1, 1, 128], strides = [1, 1, 1]} : vector<6x1x128xf32> to vector<1x1x128xf32>
    %270 = vector.shape_cast %269 : vector<1x1x128xf32> to vector<1x128xf32>
    %271 = vector.extract_strided_slice %258 {offsets = [0, 0, 0], sizes = [1, 1, 128], strides = [1, 1, 1]} : vector<4x1x128xf32> to vector<1x1x128xf32>
    %272 = vector.shape_cast %271 : vector<1x1x128xf32> to vector<1x128xf32>
    %273 = vector.extract_strided_slice %258 {offsets = [1, 0, 0], sizes = [1, 1, 128], strides = [1, 1, 1]} : vector<4x1x128xf32> to vector<1x1x128xf32>
    %274 = vector.shape_cast %273 : vector<1x1x128xf32> to vector<1x128xf32>
    %275 = vector.extract_strided_slice %258 {offsets = [2, 0, 0], sizes = [1, 1, 128], strides = [1, 1, 1]} : vector<4x1x128xf32> to vector<1x1x128xf32>
    %276 = vector.shape_cast %275 : vector<1x1x128xf32> to vector<1x128xf32>
    %277 = vector.extract_strided_slice %258 {offsets = [3, 0, 0], sizes = [1, 1, 128], strides = [1, 1, 1]} : vector<4x1x128xf32> to vector<1x1x128xf32>
    %278 = vector.shape_cast %277 : vector<1x1x128xf32> to vector<1x128xf32>
    %279 = vector.broadcast %270 : vector<1x128xf32> to vector<32x128xf32>
    %280 = arith.mulf %279, %254 : vector<32x128xf32>
    %281 = vector.broadcast %268 : vector<1x128xf32> to vector<32x128xf32>
    %282 = arith.addf %280, %281 : vector<32x128xf32>
    %283 = arith.mulf %282, %254 : vector<32x128xf32>
    %284 = vector.broadcast %266 : vector<1x128xf32> to vector<32x128xf32>
    %285 = arith.addf %283, %284 : vector<32x128xf32>
    %286 = arith.mulf %285, %254 : vector<32x128xf32>
    %287 = vector.broadcast %264 : vector<1x128xf32> to vector<32x128xf32>
    %288 = arith.addf %286, %287 : vector<32x128xf32>
    %289 = arith.mulf %288, %254 : vector<32x128xf32>
    %290 = vector.broadcast %262 : vector<1x128xf32> to vector<32x128xf32>
    %291 = arith.addf %289, %290 : vector<32x128xf32>
    %292 = arith.mulf %291, %254 : vector<32x128xf32>
    %293 = vector.broadcast %260 : vector<1x128xf32> to vector<32x128xf32>
    %294 = arith.addf %292, %293 : vector<32x128xf32>
    %295 = vector.broadcast %278 : vector<1x128xf32> to vector<32x128xf32>
    %296 = arith.mulf %295, %254 : vector<32x128xf32>
    %297 = vector.broadcast %276 : vector<1x128xf32> to vector<32x128xf32>
    %298 = arith.addf %296, %297 : vector<32x128xf32>
    %299 = arith.mulf %298, %254 : vector<32x128xf32>
    %300 = vector.broadcast %274 : vector<1x128xf32> to vector<32x128xf32>
    %301 = arith.addf %299, %300 : vector<32x128xf32>
    %302 = arith.mulf %301, %254 : vector<32x128xf32>
    %303 = vector.broadcast %272 : vector<1x128xf32> to vector<32x128xf32>
    %304 = arith.addf %302, %303 : vector<32x128xf32>
    %305 = arith.mulf %304, %254 : vector<32x128xf32>
    %306 = math.absf %305 : vector<32x128xf32>
    %cst_88 = arith.constant 1.000000e+00 : f32
    %307 = vector.broadcast %cst_88 : f32 to vector<32x128xf32>
    %308 = arith.addf %307, %306 : vector<32x128xf32>
    %309 = tpu.reciprocal %308 {approx = true} : vector<32x128xf32> -> vector<32x128xf32>
    %310 = arith.mulf %294, %309 : vector<32x128xf32>
    %311 = arith.truncf %310 : vector<32x128xf32> to vector<32x128xbf16>
    %c0_89 = arith.constant 0 : index
    %c0_90 = arith.constant 0 : index
    %c0_91 = arith.constant 0 : index
    %312 = vector.load %arg19[%c0_89, %c0_90, %c0_91] : memref<2x128x128xbf16, #tpu.memory_space<vmem>>, vector<1x128x128xbf16>
    %313 = vector.shape_cast %312 : vector<1x128x128xbf16> to vector<128x128xbf16>
    %cst_92 = arith.constant dense<0.000000e+00> : vector<32x128xf32>
    %314 = tpu.matmul %311, %313, %cst_92 {dimension_numbers = #tpu.dot_dimension_numbers<[1], [0], [0], [1], [0, 0, 1, 1], [], []>} : vector<32x128xbf16>, vector<128x128xbf16>, vector<32x128xf32> -> vector<32x128xf32>
    %c0_93 = arith.constant 0 : index
    %c0_94 = arith.constant 0 : index
    %c0_95 = arith.constant 0 : index
    %315 = vector.load %arg20[%c0_93, %c0_94, %c0_95] : memref<2x1x128xf32, #tpu.memory_space<vmem>>, vector<1x1x128xf32>
    %316 = vector.shape_cast %315 : vector<1x1x128xf32> to vector<1x128xf32>
    %317 = vector.broadcast %316 : vector<1x128xf32> to vector<32x128xf32>
    %318 = arith.addf %314, %317 : vector<32x128xf32>
    %c0_96 = arith.constant 0 : index
    %c0_97 = arith.constant 0 : index
    %c0_98 = arith.constant 0 : index
    %c0_99 = arith.constant 0 : index
    %319 = vector.load %arg21[%c0_96, %c0_97, %c0_98, %c0_99] : memref<2x6x1x128xf32, #tpu.memory_space<vmem>>, vector<1x6x1x128xf32>
    %320 = vector.shape_cast %319 : vector<1x6x1x128xf32> to vector<6x1x128xf32>
    %c0_100 = arith.constant 0 : index
    %c0_101 = arith.constant 0 : index
    %c0_102 = arith.constant 0 : index
    %c0_103 = arith.constant 0 : index
    %321 = vector.load %arg22[%c0_100, %c0_101, %c0_102, %c0_103] : memref<2x4x1x128xf32, #tpu.memory_space<vmem>>, vector<1x4x1x128xf32>
    %322 = vector.shape_cast %321 : vector<1x4x1x128xf32> to vector<4x1x128xf32>
    %323 = vector.extract_strided_slice %320 {offsets = [0, 0, 0], sizes = [1, 1, 128], strides = [1, 1, 1]} : vector<6x1x128xf32> to vector<1x1x128xf32>
    %324 = vector.shape_cast %323 : vector<1x1x128xf32> to vector<1x128xf32>
    %325 = vector.extract_strided_slice %320 {offsets = [1, 0, 0], sizes = [1, 1, 128], strides = [1, 1, 1]} : vector<6x1x128xf32> to vector<1x1x128xf32>
    %326 = vector.shape_cast %325 : vector<1x1x128xf32> to vector<1x128xf32>
    %327 = vector.extract_strided_slice %320 {offsets = [2, 0, 0], sizes = [1, 1, 128], strides = [1, 1, 1]} : vector<6x1x128xf32> to vector<1x1x128xf32>
    %328 = vector.shape_cast %327 : vector<1x1x128xf32> to vector<1x128xf32>
    %329 = vector.extract_strided_slice %320 {offsets = [3, 0, 0], sizes = [1, 1, 128], strides = [1, 1, 1]} : vector<6x1x128xf32> to vector<1x1x128xf32>
    %330 = vector.shape_cast %329 : vector<1x1x128xf32> to vector<1x128xf32>
    %331 = vector.extract_strided_slice %320 {offsets = [4, 0, 0], sizes = [1, 1, 128], strides = [1, 1, 1]} : vector<6x1x128xf32> to vector<1x1x128xf32>
    %332 = vector.shape_cast %331 : vector<1x1x128xf32> to vector<1x128xf32>
    %333 = vector.extract_strided_slice %320 {offsets = [5, 0, 0], sizes = [1, 1, 128], strides = [1, 1, 1]} : vector<6x1x128xf32> to vector<1x1x128xf32>
    %334 = vector.shape_cast %333 : vector<1x1x128xf32> to vector<1x128xf32>
    %335 = vector.extract_strided_slice %322 {offsets = [0, 0, 0], sizes = [1, 1, 128], strides = [1, 1, 1]} : vector<4x1x128xf32> to vector<1x1x128xf32>
    %336 = vector.shape_cast %335 : vector<1x1x128xf32> to vector<1x128xf32>
    %337 = vector.extract_strided_slice %322 {offsets = [1, 0, 0], sizes = [1, 1, 128], strides = [1, 1, 1]} : vector<4x1x128xf32> to vector<1x1x128xf32>
    %338 = vector.shape_cast %337 : vector<1x1x128xf32> to vector<1x128xf32>
    %339 = vector.extract_strided_slice %322 {offsets = [2, 0, 0], sizes = [1, 1, 128], strides = [1, 1, 1]} : vector<4x1x128xf32> to vector<1x1x128xf32>
    %340 = vector.shape_cast %339 : vector<1x1x128xf32> to vector<1x128xf32>
    %341 = vector.extract_strided_slice %322 {offsets = [3, 0, 0], sizes = [1, 1, 128], strides = [1, 1, 1]} : vector<4x1x128xf32> to vector<1x1x128xf32>
    %342 = vector.shape_cast %341 : vector<1x1x128xf32> to vector<1x128xf32>
    %343 = vector.broadcast %334 : vector<1x128xf32> to vector<32x128xf32>
    %344 = arith.mulf %343, %318 : vector<32x128xf32>
    %345 = vector.broadcast %332 : vector<1x128xf32> to vector<32x128xf32>
    %346 = arith.addf %344, %345 : vector<32x128xf32>
    %347 = arith.mulf %346, %318 : vector<32x128xf32>
    %348 = vector.broadcast %330 : vector<1x128xf32> to vector<32x128xf32>
    %349 = arith.addf %347, %348 : vector<32x128xf32>
    %350 = arith.mulf %349, %318 : vector<32x128xf32>
    %351 = vector.broadcast %328 : vector<1x128xf32> to vector<32x128xf32>
    %352 = arith.addf %350, %351 : vector<32x128xf32>
    %353 = arith.mulf %352, %318 : vector<32x128xf32>
    %354 = vector.broadcast %326 : vector<1x128xf32> to vector<32x128xf32>
    %355 = arith.addf %353, %354 : vector<32x128xf32>
    %356 = arith.mulf %355, %318 : vector<32x128xf32>
    %357 = vector.broadcast %324 : vector<1x128xf32> to vector<32x128xf32>
    %358 = arith.addf %356, %357 : vector<32x128xf32>
    %359 = vector.broadcast %342 : vector<1x128xf32> to vector<32x128xf32>
    %360 = arith.mulf %359, %318 : vector<32x128xf32>
    %361 = vector.broadcast %340 : vector<1x128xf32> to vector<32x128xf32>
    %362 = arith.addf %360, %361 : vector<32x128xf32>
    %363 = arith.mulf %362, %318 : vector<32x128xf32>
    %364 = vector.broadcast %338 : vector<1x128xf32> to vector<32x128xf32>
    %365 = arith.addf %363, %364 : vector<32x128xf32>
    %366 = arith.mulf %365, %318 : vector<32x128xf32>
    %367 = vector.broadcast %336 : vector<1x128xf32> to vector<32x128xf32>
    %368 = arith.addf %366, %367 : vector<32x128xf32>
    %369 = arith.mulf %368, %318 : vector<32x128xf32>
    %370 = math.absf %369 : vector<32x128xf32>
    %cst_104 = arith.constant 1.000000e+00 : f32
    %371 = vector.broadcast %cst_104 : f32 to vector<32x128xf32>
    %372 = arith.addf %371, %370 : vector<32x128xf32>
    %373 = tpu.reciprocal %372 {approx = true} : vector<32x128xf32> -> vector<32x128xf32>
    %374 = arith.mulf %358, %373 : vector<32x128xf32>
    %c0_105 = arith.constant 0 : index
    %c0_106 = arith.constant 0 : index
    %c0_107 = arith.constant 0 : index
    %375 = vector.load %arg23[%c0_105, %c0_106, %c0_107] : memref<2x1x128xf32, #tpu.memory_space<vmem>>, vector<1x1x128xf32>
    %376 = vector.shape_cast %375 : vector<1x1x128xf32> to vector<1x128xf32>
    %c0_108 = arith.constant 0 : index
    %c0_109 = arith.constant 0 : index
    %c0_110 = arith.constant 0 : index
    %377 = vector.load %arg24[%c0_108, %c0_109, %c0_110] : memref<2x1x128xf32, #tpu.memory_space<vmem>>, vector<1x1x128xf32>
    %378 = vector.shape_cast %377 : vector<1x1x128xf32> to vector<1x128xf32>
    %379 = tpu.iota {dimensions = array<i32: 1>} : vector<1x128xi32>
    %c64_i32 = arith.constant 64 : i32
    %380 = vector.broadcast %c64_i32 : i32 to vector<1x128xi32>
    %381 = arith.cmpi slt, %379, %380 : vector<1x128xi32>
    %382 = arith.extui %381 : vector<1x128xi1> to vector<1x128xi32>
    %383 = arith.sitofp %382 : vector<1x128xi32> to vector<1x128xf32>
    %384 = vector.broadcast %383 : vector<1x128xf32> to vector<32x128xf32>
    %385 = arith.mulf %374, %384 : vector<32x128xf32>
    %cst_111 = arith.constant dense<0.000000e+00> : vector<32xf32>
    %386 = vector.multi_reduction <add>, %385, %cst_111 [1] : vector<32x128xf32> to vector<32xf32>
    %387 = vector.shape_cast %386 : vector<32xf32> to vector<32x1xf32>
    %cst_112 = arith.constant 1.562500e-02 : f32
    %388 = vector.broadcast %cst_112 : f32 to vector<32x1xf32>
    %389 = arith.mulf %387, %388 : vector<32x1xf32>
    %390 = vector.broadcast %389 : vector<32x1xf32> to vector<32x128xf32>
    %391 = arith.subf %385, %390 : vector<32x128xf32>
    %392 = arith.mulf %391, %391 : vector<32x128xf32>
    %393 = vector.broadcast %383 : vector<1x128xf32> to vector<32x128xf32>
    %394 = arith.mulf %392, %393 : vector<32x128xf32>
    %cst_113 = arith.constant dense<0.000000e+00> : vector<32xf32>
    %395 = vector.multi_reduction <add>, %394, %cst_113 [1] : vector<32x128xf32> to vector<32xf32>
    %396 = vector.shape_cast %395 : vector<32xf32> to vector<32x1xf32>
    %cst_114 = arith.constant 1.562500e-02 : f32
    %397 = vector.broadcast %cst_114 : f32 to vector<32x1xf32>
    %398 = arith.mulf %396, %397 : vector<32x1xf32>
    %399 = vector.broadcast %389 : vector<32x1xf32> to vector<32x128xf32>
    %400 = arith.subf %374, %399 : vector<32x128xf32>
    %cst_115 = arith.constant 9.99999974E-6 : f32
    %401 = vector.broadcast %cst_115 : f32 to vector<32x1xf32>
    %402 = arith.addf %398, %401 : vector<32x1xf32>
    %403 = math.rsqrt %402 : vector<32x1xf32>
    %404 = vector.broadcast %403 : vector<32x1xf32> to vector<32x128xf32>
    %405 = arith.mulf %400, %404 : vector<32x128xf32>
    %406 = vector.broadcast %376 : vector<1x128xf32> to vector<32x128xf32>
    %407 = arith.mulf %405, %406 : vector<32x128xf32>
    %408 = vector.broadcast %378 : vector<1x128xf32> to vector<32x128xf32>
    %409 = arith.addf %407, %408 : vector<32x128xf32>
    %410 = arith.truncf %409 : vector<32x128xf32> to vector<32x128xbf16>
    %c0_116 = arith.constant 0 : index
    %c0_117 = arith.constant 0 : index
    %c0_118 = arith.constant 0 : index
    %411 = vector.load %arg25[%c0_116, %c0_117, %c0_118] : memref<2x128x128xbf16, #tpu.memory_space<vmem>>, vector<1x128x128xbf16>
    %412 = vector.shape_cast %411 : vector<1x128x128xbf16> to vector<128x128xbf16>
    %cst_119 = arith.constant dense<0.000000e+00> : vector<32x128xf32>
    %413 = tpu.matmul %410, %412, %cst_119 {dimension_numbers = #tpu.dot_dimension_numbers<[1], [0], [0], [1], [0, 0, 1, 1], [], []>} : vector<32x128xbf16>, vector<128x128xbf16>, vector<32x128xf32> -> vector<32x128xf32>
    %c0_120 = arith.constant 0 : index
    %c0_121 = arith.constant 0 : index
    %c0_122 = arith.constant 0 : index
    %414 = vector.load %arg26[%c0_120, %c0_121, %c0_122] : memref<2x1x128xf32, #tpu.memory_space<vmem>>, vector<1x1x128xf32>
    %415 = vector.shape_cast %414 : vector<1x1x128xf32> to vector<1x128xf32>
    %416 = vector.broadcast %415 : vector<1x128xf32> to vector<32x128xf32>
    %417 = arith.addf %413, %416 : vector<32x128xf32>
    %418 = arith.addf %417, %254 : vector<32x128xf32>
    %419 = vector.broadcast %93 : vector<1x128xf32> to vector<32x128xf32>
    %420 = arith.mulf %418, %419 : vector<32x128xf32>
    %421 = vector.extract_strided_slice %420 {offsets = [0, 0], sizes = [16, 128], strides = [1, 1]} : vector<32x128xf32> to vector<16x128xf32>
    %422 = vector.extract_strided_slice %420 {offsets = [16, 0], sizes = [16, 128], strides = [1, 1]} : vector<32x128xf32> to vector<16x128xf32>
    %423 = tpu.concatenate %421, %422 in 1 : vector<16x128xf32>, vector<16x128xf32> -> vector<16x256xf32>
    %c1 = arith.constant 1 : index
    %c0_123 = arith.constant 0 : index
    %c0_124 = arith.constant 0 : index
    %c0_125 = arith.constant 0 : index
    %424 = vector.load %arg7[%c1, %c0_123, %c0_124, %c0_125] : memref<2x6x16x128xf32, #tpu.memory_space<vmem>>, vector<1x6x16x128xf32>
    %425 = vector.shape_cast %424 : vector<1x6x16x128xf32> to vector<6x16x128xf32>
    %c1_126 = arith.constant 1 : index
    %c0_127 = arith.constant 0 : index
    %c0_128 = arith.constant 0 : index
    %c0_129 = arith.constant 0 : index
    %426 = vector.load %arg8[%c1_126, %c0_127, %c0_128, %c0_129] : memref<2x4x16x128xf32, #tpu.memory_space<vmem>>, vector<1x4x16x128xf32>
    %427 = vector.shape_cast %426 : vector<1x4x16x128xf32> to vector<4x16x128xf32>
    %428 = vector.extract_strided_slice %425 {offsets = [0, 0, 0], sizes = [1, 16, 128], strides = [1, 1, 1]} : vector<6x16x128xf32> to vector<1x16x128xf32>
    %429 = vector.shape_cast %428 : vector<1x16x128xf32> to vector<16x128xf32>
    %430 = tpu.concatenate %429, %429 in 1 : vector<16x128xf32>, vector<16x128xf32> -> vector<16x256xf32>
    %431 = vector.extract_strided_slice %425 {offsets = [1, 0, 0], sizes = [1, 16, 128], strides = [1, 1, 1]} : vector<6x16x128xf32> to vector<1x16x128xf32>
    %432 = vector.shape_cast %431 : vector<1x16x128xf32> to vector<16x128xf32>
    %433 = tpu.concatenate %432, %432 in 1 : vector<16x128xf32>, vector<16x128xf32> -> vector<16x256xf32>
    %434 = vector.extract_strided_slice %425 {offsets = [2, 0, 0], sizes = [1, 16, 128], strides = [1, 1, 1]} : vector<6x16x128xf32> to vector<1x16x128xf32>
    %435 = vector.shape_cast %434 : vector<1x16x128xf32> to vector<16x128xf32>
    %436 = tpu.concatenate %435, %435 in 1 : vector<16x128xf32>, vector<16x128xf32> -> vector<16x256xf32>
    %437 = vector.extract_strided_slice %425 {offsets = [3, 0, 0], sizes = [1, 16, 128], strides = [1, 1, 1]} : vector<6x16x128xf32> to vector<1x16x128xf32>
    %438 = vector.shape_cast %437 : vector<1x16x128xf32> to vector<16x128xf32>
    %439 = tpu.concatenate %438, %438 in 1 : vector<16x128xf32>, vector<16x128xf32> -> vector<16x256xf32>
    %440 = vector.extract_strided_slice %425 {offsets = [4, 0, 0], sizes = [1, 16, 128], strides = [1, 1, 1]} : vector<6x16x128xf32> to vector<1x16x128xf32>
    %441 = vector.shape_cast %440 : vector<1x16x128xf32> to vector<16x128xf32>
    %442 = tpu.concatenate %441, %441 in 1 : vector<16x128xf32>, vector<16x128xf32> -> vector<16x256xf32>
    %443 = vector.extract_strided_slice %425 {offsets = [5, 0, 0], sizes = [1, 16, 128], strides = [1, 1, 1]} : vector<6x16x128xf32> to vector<1x16x128xf32>
    %444 = vector.shape_cast %443 : vector<1x16x128xf32> to vector<16x128xf32>
    %445 = tpu.concatenate %444, %444 in 1 : vector<16x128xf32>, vector<16x128xf32> -> vector<16x256xf32>
    %446 = vector.extract_strided_slice %427 {offsets = [0, 0, 0], sizes = [1, 16, 128], strides = [1, 1, 1]} : vector<4x16x128xf32> to vector<1x16x128xf32>
    %447 = vector.shape_cast %446 : vector<1x16x128xf32> to vector<16x128xf32>
    %448 = tpu.concatenate %447, %447 in 1 : vector<16x128xf32>, vector<16x128xf32> -> vector<16x256xf32>
    %449 = vector.extract_strided_slice %427 {offsets = [1, 0, 0], sizes = [1, 16, 128], strides = [1, 1, 1]} : vector<4x16x128xf32> to vector<1x16x128xf32>
    %450 = vector.shape_cast %449 : vector<1x16x128xf32> to vector<16x128xf32>
    %451 = tpu.concatenate %450, %450 in 1 : vector<16x128xf32>, vector<16x128xf32> -> vector<16x256xf32>
    %452 = vector.extract_strided_slice %427 {offsets = [2, 0, 0], sizes = [1, 16, 128], strides = [1, 1, 1]} : vector<4x16x128xf32> to vector<1x16x128xf32>
    %453 = vector.shape_cast %452 : vector<1x16x128xf32> to vector<16x128xf32>
    %454 = tpu.concatenate %453, %453 in 1 : vector<16x128xf32>, vector<16x128xf32> -> vector<16x256xf32>
    %455 = vector.extract_strided_slice %427 {offsets = [3, 0, 0], sizes = [1, 16, 128], strides = [1, 1, 1]} : vector<4x16x128xf32> to vector<1x16x128xf32>
    %456 = vector.shape_cast %455 : vector<1x16x128xf32> to vector<16x128xf32>
    %457 = tpu.concatenate %456, %456 in 1 : vector<16x128xf32>, vector<16x128xf32> -> vector<16x256xf32>
    %458 = arith.mulf %445, %423 : vector<16x256xf32>
    %459 = arith.addf %458, %442 : vector<16x256xf32>
    %460 = arith.mulf %459, %423 : vector<16x256xf32>
    %461 = arith.addf %460, %439 : vector<16x256xf32>
    %462 = arith.mulf %461, %423 : vector<16x256xf32>
    %463 = arith.addf %462, %436 : vector<16x256xf32>
    %464 = arith.mulf %463, %423 : vector<16x256xf32>
    %465 = arith.addf %464, %433 : vector<16x256xf32>
    %466 = arith.mulf %465, %423 : vector<16x256xf32>
    %467 = arith.addf %466, %430 : vector<16x256xf32>
    %468 = arith.mulf %457, %423 : vector<16x256xf32>
    %469 = arith.addf %468, %454 : vector<16x256xf32>
    %470 = arith.mulf %469, %423 : vector<16x256xf32>
    %471 = arith.addf %470, %451 : vector<16x256xf32>
    %472 = arith.mulf %471, %423 : vector<16x256xf32>
    %473 = arith.addf %472, %448 : vector<16x256xf32>
    %474 = arith.mulf %473, %423 : vector<16x256xf32>
    %475 = math.absf %474 : vector<16x256xf32>
    %cst_130 = arith.constant 1.000000e+00 : f32
    %476 = vector.broadcast %cst_130 : f32 to vector<16x256xf32>
    %477 = arith.addf %476, %475 : vector<16x256xf32>
    %478 = tpu.reciprocal %477 {approx = true} : vector<16x256xf32> -> vector<16x256xf32>
    %479 = arith.mulf %467, %478 : vector<16x256xf32>
    %c1_131 = arith.constant 1 : index
    %c0_132 = arith.constant 0 : index
    %c0_133 = arith.constant 0 : index
    %480 = vector.load %arg9[%c1_131, %c0_132, %c0_133] : memref<2x16x16xbf16, #tpu.memory_space<vmem>>, vector<1x16x16xbf16>
    %481 = vector.shape_cast %480 : vector<1x16x16xbf16> to vector<16x16xbf16>
    %482 = arith.truncf %479 : vector<16x256xf32> to vector<16x256xbf16>
    %cst_134 = arith.constant dense<0.000000e+00> : vector<16x256xf32>
    %483 = tpu.matmul %481, %482, %cst_134 {dimension_numbers = #tpu.dot_dimension_numbers<[1], [0], [0], [1], [0, 0, 1, 1], [], []>} : vector<16x16xbf16>, vector<16x256xbf16>, vector<16x256xf32> -> vector<16x256xf32>
    %c1_135 = arith.constant 1 : index
    %c0_136 = arith.constant 0 : index
    %c0_137 = arith.constant 0 : index
    %484 = vector.load %arg10[%c1_135, %c0_136, %c0_137] : memref<2x16x128xf32, #tpu.memory_space<vmem>>, vector<1x16x128xf32>
    %485 = vector.shape_cast %484 : vector<1x16x128xf32> to vector<16x128xf32>
    %486 = tpu.concatenate %485, %485 in 1 : vector<16x128xf32>, vector<16x128xf32> -> vector<16x256xf32>
    %487 = arith.addf %483, %486 : vector<16x256xf32>
    %c1_138 = arith.constant 1 : index
    %c0_139 = arith.constant 0 : index
    %c0_140 = arith.constant 0 : index
    %c0_141 = arith.constant 0 : index
    %488 = vector.load %arg11[%c1_138, %c0_139, %c0_140, %c0_141] : memref<2x6x16x128xf32, #tpu.memory_space<vmem>>, vector<1x6x16x128xf32>
    %489 = vector.shape_cast %488 : vector<1x6x16x128xf32> to vector<6x16x128xf32>
    %c1_142 = arith.constant 1 : index
    %c0_143 = arith.constant 0 : index
    %c0_144 = arith.constant 0 : index
    %c0_145 = arith.constant 0 : index
    %490 = vector.load %arg12[%c1_142, %c0_143, %c0_144, %c0_145] : memref<2x4x16x128xf32, #tpu.memory_space<vmem>>, vector<1x4x16x128xf32>
    %491 = vector.shape_cast %490 : vector<1x4x16x128xf32> to vector<4x16x128xf32>
    %492 = vector.extract_strided_slice %489 {offsets = [0, 0, 0], sizes = [1, 16, 128], strides = [1, 1, 1]} : vector<6x16x128xf32> to vector<1x16x128xf32>
    %493 = vector.shape_cast %492 : vector<1x16x128xf32> to vector<16x128xf32>
    %494 = tpu.concatenate %493, %493 in 1 : vector<16x128xf32>, vector<16x128xf32> -> vector<16x256xf32>
    %495 = vector.extract_strided_slice %489 {offsets = [1, 0, 0], sizes = [1, 16, 128], strides = [1, 1, 1]} : vector<6x16x128xf32> to vector<1x16x128xf32>
    %496 = vector.shape_cast %495 : vector<1x16x128xf32> to vector<16x128xf32>
    %497 = tpu.concatenate %496, %496 in 1 : vector<16x128xf32>, vector<16x128xf32> -> vector<16x256xf32>
    %498 = vector.extract_strided_slice %489 {offsets = [2, 0, 0], sizes = [1, 16, 128], strides = [1, 1, 1]} : vector<6x16x128xf32> to vector<1x16x128xf32>
    %499 = vector.shape_cast %498 : vector<1x16x128xf32> to vector<16x128xf32>
    %500 = tpu.concatenate %499, %499 in 1 : vector<16x128xf32>, vector<16x128xf32> -> vector<16x256xf32>
    %501 = vector.extract_strided_slice %489 {offsets = [3, 0, 0], sizes = [1, 16, 128], strides = [1, 1, 1]} : vector<6x16x128xf32> to vector<1x16x128xf32>
    %502 = vector.shape_cast %501 : vector<1x16x128xf32> to vector<16x128xf32>
    %503 = tpu.concatenate %502, %502 in 1 : vector<16x128xf32>, vector<16x128xf32> -> vector<16x256xf32>
    %504 = vector.extract_strided_slice %489 {offsets = [4, 0, 0], sizes = [1, 16, 128], strides = [1, 1, 1]} : vector<6x16x128xf32> to vector<1x16x128xf32>
    %505 = vector.shape_cast %504 : vector<1x16x128xf32> to vector<16x128xf32>
    %506 = tpu.concatenate %505, %505 in 1 : vector<16x128xf32>, vector<16x128xf32> -> vector<16x256xf32>
    %507 = vector.extract_strided_slice %489 {offsets = [5, 0, 0], sizes = [1, 16, 128], strides = [1, 1, 1]} : vector<6x16x128xf32> to vector<1x16x128xf32>
    %508 = vector.shape_cast %507 : vector<1x16x128xf32> to vector<16x128xf32>
    %509 = tpu.concatenate %508, %508 in 1 : vector<16x128xf32>, vector<16x128xf32> -> vector<16x256xf32>
    %510 = vector.extract_strided_slice %491 {offsets = [0, 0, 0], sizes = [1, 16, 128], strides = [1, 1, 1]} : vector<4x16x128xf32> to vector<1x16x128xf32>
    %511 = vector.shape_cast %510 : vector<1x16x128xf32> to vector<16x128xf32>
    %512 = tpu.concatenate %511, %511 in 1 : vector<16x128xf32>, vector<16x128xf32> -> vector<16x256xf32>
    %513 = vector.extract_strided_slice %491 {offsets = [1, 0, 0], sizes = [1, 16, 128], strides = [1, 1, 1]} : vector<4x16x128xf32> to vector<1x16x128xf32>
    %514 = vector.shape_cast %513 : vector<1x16x128xf32> to vector<16x128xf32>
    %515 = tpu.concatenate %514, %514 in 1 : vector<16x128xf32>, vector<16x128xf32> -> vector<16x256xf32>
    %516 = vector.extract_strided_slice %491 {offsets = [2, 0, 0], sizes = [1, 16, 128], strides = [1, 1, 1]} : vector<4x16x128xf32> to vector<1x16x128xf32>
    %517 = vector.shape_cast %516 : vector<1x16x128xf32> to vector<16x128xf32>
    %518 = tpu.concatenate %517, %517 in 1 : vector<16x128xf32>, vector<16x128xf32> -> vector<16x256xf32>
    %519 = vector.extract_strided_slice %491 {offsets = [3, 0, 0], sizes = [1, 16, 128], strides = [1, 1, 1]} : vector<4x16x128xf32> to vector<1x16x128xf32>
    %520 = vector.shape_cast %519 : vector<1x16x128xf32> to vector<16x128xf32>
    %521 = tpu.concatenate %520, %520 in 1 : vector<16x128xf32>, vector<16x128xf32> -> vector<16x256xf32>
    %522 = arith.mulf %509, %487 : vector<16x256xf32>
    %523 = arith.addf %522, %506 : vector<16x256xf32>
    %524 = arith.mulf %523, %487 : vector<16x256xf32>
    %525 = arith.addf %524, %503 : vector<16x256xf32>
    %526 = arith.mulf %525, %487 : vector<16x256xf32>
    %527 = arith.addf %526, %500 : vector<16x256xf32>
    %528 = arith.mulf %527, %487 : vector<16x256xf32>
    %529 = arith.addf %528, %497 : vector<16x256xf32>
    %530 = arith.mulf %529, %487 : vector<16x256xf32>
    %531 = arith.addf %530, %494 : vector<16x256xf32>
    %532 = arith.mulf %521, %487 : vector<16x256xf32>
    %533 = arith.addf %532, %518 : vector<16x256xf32>
    %534 = arith.mulf %533, %487 : vector<16x256xf32>
    %535 = arith.addf %534, %515 : vector<16x256xf32>
    %536 = arith.mulf %535, %487 : vector<16x256xf32>
    %537 = arith.addf %536, %512 : vector<16x256xf32>
    %538 = arith.mulf %537, %487 : vector<16x256xf32>
    %539 = math.absf %538 : vector<16x256xf32>
    %cst_146 = arith.constant 1.000000e+00 : f32
    %540 = vector.broadcast %cst_146 : f32 to vector<16x256xf32>
    %541 = arith.addf %540, %539 : vector<16x256xf32>
    %542 = tpu.reciprocal %541 {approx = true} : vector<16x256xf32> -> vector<16x256xf32>
    %543 = arith.mulf %531, %542 : vector<16x256xf32>
    %c1_147 = arith.constant 1 : index
    %c0_148 = arith.constant 0 : index
    %c0_149 = arith.constant 0 : index
    %544 = vector.load %arg13[%c1_147, %c0_148, %c0_149] : memref<2x16x128xf32, #tpu.memory_space<vmem>>, vector<1x16x128xf32>
    %545 = vector.shape_cast %544 : vector<1x16x128xf32> to vector<16x128xf32>
    %546 = tpu.concatenate %545, %545 in 1 : vector<16x128xf32>, vector<16x128xf32> -> vector<16x256xf32>
    %c1_150 = arith.constant 1 : index
    %c0_151 = arith.constant 0 : index
    %c0_152 = arith.constant 0 : index
    %547 = vector.load %arg14[%c1_150, %c0_151, %c0_152] : memref<2x16x128xf32, #tpu.memory_space<vmem>>, vector<1x16x128xf32>
    %548 = vector.shape_cast %547 : vector<1x16x128xf32> to vector<16x128xf32>
    %549 = tpu.concatenate %548, %548 in 1 : vector<16x128xf32>, vector<16x128xf32> -> vector<16x256xf32>
    %cst_153 = arith.constant dense<0.000000e+00> : vector<256xf32>
    %550 = vector.multi_reduction <add>, %543, %cst_153 [0] : vector<16x256xf32> to vector<256xf32>
    %551 = vector.shape_cast %550 : vector<256xf32> to vector<1x256xf32>
    %cst_154 = arith.constant 1.600000e+01 : f32
    %552 = vector.broadcast %cst_154 : f32 to vector<1x256xf32>
    %553 = arith.divf %551, %552 : vector<1x256xf32>
    %554 = vector.broadcast %553 : vector<1x256xf32> to vector<16x256xf32>
    %555 = arith.subf %543, %554 : vector<16x256xf32>
    %556 = arith.mulf %555, %555 : vector<16x256xf32>
    %cst_155 = arith.constant dense<0.000000e+00> : vector<256xf32>
    %557 = vector.multi_reduction <add>, %556, %cst_155 [0] : vector<16x256xf32> to vector<256xf32>
    %558 = vector.shape_cast %557 : vector<256xf32> to vector<1x256xf32>
    %cst_156 = arith.constant 1.600000e+01 : f32
    %559 = vector.broadcast %cst_156 : f32 to vector<1x256xf32>
    %560 = arith.divf %558, %559 : vector<1x256xf32>
    %561 = vector.broadcast %553 : vector<1x256xf32> to vector<16x256xf32>
    %562 = arith.subf %543, %561 : vector<16x256xf32>
    %cst_157 = arith.constant 9.99999974E-6 : f32
    %563 = vector.broadcast %cst_157 : f32 to vector<1x256xf32>
    %564 = arith.addf %560, %563 : vector<1x256xf32>
    %565 = math.rsqrt %564 : vector<1x256xf32>
    %566 = vector.broadcast %565 : vector<1x256xf32> to vector<16x256xf32>
    %567 = arith.mulf %562, %566 : vector<16x256xf32>
    %568 = arith.mulf %567, %546 : vector<16x256xf32>
    %569 = arith.addf %568, %549 : vector<16x256xf32>
    %c1_158 = arith.constant 1 : index
    %c0_159 = arith.constant 0 : index
    %c0_160 = arith.constant 0 : index
    %570 = vector.load %arg15[%c1_158, %c0_159, %c0_160] : memref<2x16x16xbf16, #tpu.memory_space<vmem>>, vector<1x16x16xbf16>
    %571 = vector.shape_cast %570 : vector<1x16x16xbf16> to vector<16x16xbf16>
    %572 = arith.truncf %569 : vector<16x256xf32> to vector<16x256xbf16>
    %cst_161 = arith.constant dense<0.000000e+00> : vector<16x256xf32>
    %573 = tpu.matmul %571, %572, %cst_161 {dimension_numbers = #tpu.dot_dimension_numbers<[1], [0], [0], [1], [0, 0, 1, 1], [], []>} : vector<16x16xbf16>, vector<16x256xbf16>, vector<16x256xf32> -> vector<16x256xf32>
    %c1_162 = arith.constant 1 : index
    %c0_163 = arith.constant 0 : index
    %c0_164 = arith.constant 0 : index
    %574 = vector.load %arg16[%c1_162, %c0_163, %c0_164] : memref<2x16x128xf32, #tpu.memory_space<vmem>>, vector<1x16x128xf32>
    %575 = vector.shape_cast %574 : vector<1x16x128xf32> to vector<16x128xf32>
    %576 = tpu.concatenate %575, %575 in 1 : vector<16x128xf32>, vector<16x128xf32> -> vector<16x256xf32>
    %577 = arith.addf %573, %576 : vector<16x256xf32>
    %578 = arith.addf %577, %423 : vector<16x256xf32>
    %579 = vector.extract_strided_slice %578 {offsets = [0, 0], sizes = [16, 128], strides = [1, 1]} : vector<16x256xf32> to vector<16x128xf32>
    %580 = vector.extract_strided_slice %578 {offsets = [0, 128], sizes = [16, 128], strides = [1, 1]} : vector<16x256xf32> to vector<16x128xf32>
    %581 = tpu.concatenate %579, %580 in 0 : vector<16x128xf32>, vector<16x128xf32> -> vector<32x128xf32>
    %c1_165 = arith.constant 1 : index
    %c0_166 = arith.constant 0 : index
    %c0_167 = arith.constant 0 : index
    %c0_168 = arith.constant 0 : index
    %582 = vector.load %arg17[%c1_165, %c0_166, %c0_167, %c0_168] : memref<2x6x1x128xf32, #tpu.memory_space<vmem>>, vector<1x6x1x128xf32>
    %583 = vector.shape_cast %582 : vector<1x6x1x128xf32> to vector<6x1x128xf32>
    %c1_169 = arith.constant 1 : index
    %c0_170 = arith.constant 0 : index
    %c0_171 = arith.constant 0 : index
    %c0_172 = arith.constant 0 : index
    %584 = vector.load %arg18[%c1_169, %c0_170, %c0_171, %c0_172] : memref<2x4x1x128xf32, #tpu.memory_space<vmem>>, vector<1x4x1x128xf32>
    %585 = vector.shape_cast %584 : vector<1x4x1x128xf32> to vector<4x1x128xf32>
    %586 = vector.extract_strided_slice %583 {offsets = [0, 0, 0], sizes = [1, 1, 128], strides = [1, 1, 1]} : vector<6x1x128xf32> to vector<1x1x128xf32>
    %587 = vector.shape_cast %586 : vector<1x1x128xf32> to vector<1x128xf32>
    %588 = vector.extract_strided_slice %583 {offsets = [1, 0, 0], sizes = [1, 1, 128], strides = [1, 1, 1]} : vector<6x1x128xf32> to vector<1x1x128xf32>
    %589 = vector.shape_cast %588 : vector<1x1x128xf32> to vector<1x128xf32>
    %590 = vector.extract_strided_slice %583 {offsets = [2, 0, 0], sizes = [1, 1, 128], strides = [1, 1, 1]} : vector<6x1x128xf32> to vector<1x1x128xf32>
    %591 = vector.shape_cast %590 : vector<1x1x128xf32> to vector<1x128xf32>
    %592 = vector.extract_strided_slice %583 {offsets = [3, 0, 0], sizes = [1, 1, 128], strides = [1, 1, 1]} : vector<6x1x128xf32> to vector<1x1x128xf32>
    %593 = vector.shape_cast %592 : vector<1x1x128xf32> to vector<1x128xf32>
    %594 = vector.extract_strided_slice %583 {offsets = [4, 0, 0], sizes = [1, 1, 128], strides = [1, 1, 1]} : vector<6x1x128xf32> to vector<1x1x128xf32>
    %595 = vector.shape_cast %594 : vector<1x1x128xf32> to vector<1x128xf32>
    %596 = vector.extract_strided_slice %583 {offsets = [5, 0, 0], sizes = [1, 1, 128], strides = [1, 1, 1]} : vector<6x1x128xf32> to vector<1x1x128xf32>
    %597 = vector.shape_cast %596 : vector<1x1x128xf32> to vector<1x128xf32>
    %598 = vector.extract_strided_slice %585 {offsets = [0, 0, 0], sizes = [1, 1, 128], strides = [1, 1, 1]} : vector<4x1x128xf32> to vector<1x1x128xf32>
    %599 = vector.shape_cast %598 : vector<1x1x128xf32> to vector<1x128xf32>
    %600 = vector.extract_strided_slice %585 {offsets = [1, 0, 0], sizes = [1, 1, 128], strides = [1, 1, 1]} : vector<4x1x128xf32> to vector<1x1x128xf32>
    %601 = vector.shape_cast %600 : vector<1x1x128xf32> to vector<1x128xf32>
    %602 = vector.extract_strided_slice %585 {offsets = [2, 0, 0], sizes = [1, 1, 128], strides = [1, 1, 1]} : vector<4x1x128xf32> to vector<1x1x128xf32>
    %603 = vector.shape_cast %602 : vector<1x1x128xf32> to vector<1x128xf32>
    %604 = vector.extract_strided_slice %585 {offsets = [3, 0, 0], sizes = [1, 1, 128], strides = [1, 1, 1]} : vector<4x1x128xf32> to vector<1x1x128xf32>
    %605 = vector.shape_cast %604 : vector<1x1x128xf32> to vector<1x128xf32>
    %606 = vector.broadcast %597 : vector<1x128xf32> to vector<32x128xf32>
    %607 = arith.mulf %606, %581 : vector<32x128xf32>
    %608 = vector.broadcast %595 : vector<1x128xf32> to vector<32x128xf32>
    %609 = arith.addf %607, %608 : vector<32x128xf32>
    %610 = arith.mulf %609, %581 : vector<32x128xf32>
    %611 = vector.broadcast %593 : vector<1x128xf32> to vector<32x128xf32>
    %612 = arith.addf %610, %611 : vector<32x128xf32>
    %613 = arith.mulf %612, %581 : vector<32x128xf32>
    %614 = vector.broadcast %591 : vector<1x128xf32> to vector<32x128xf32>
    %615 = arith.addf %613, %614 : vector<32x128xf32>
    %616 = arith.mulf %615, %581 : vector<32x128xf32>
    %617 = vector.broadcast %589 : vector<1x128xf32> to vector<32x128xf32>
    %618 = arith.addf %616, %617 : vector<32x128xf32>
    %619 = arith.mulf %618, %581 : vector<32x128xf32>
    %620 = vector.broadcast %587 : vector<1x128xf32> to vector<32x128xf32>
    %621 = arith.addf %619, %620 : vector<32x128xf32>
    %622 = vector.broadcast %605 : vector<1x128xf32> to vector<32x128xf32>
    %623 = arith.mulf %622, %581 : vector<32x128xf32>
    %624 = vector.broadcast %603 : vector<1x128xf32> to vector<32x128xf32>
    %625 = arith.addf %623, %624 : vector<32x128xf32>
    %626 = arith.mulf %625, %581 : vector<32x128xf32>
    %627 = vector.broadcast %601 : vector<1x128xf32> to vector<32x128xf32>
    %628 = arith.addf %626, %627 : vector<32x128xf32>
    %629 = arith.mulf %628, %581 : vector<32x128xf32>
    %630 = vector.broadcast %599 : vector<1x128xf32> to vector<32x128xf32>
    %631 = arith.addf %629, %630 : vector<32x128xf32>
    %632 = arith.mulf %631, %581 : vector<32x128xf32>
    %633 = math.absf %632 : vector<32x128xf32>
    %cst_173 = arith.constant 1.000000e+00 : f32
    %634 = vector.broadcast %cst_173 : f32 to vector<32x128xf32>
    %635 = arith.addf %634, %633 : vector<32x128xf32>
    %636 = tpu.reciprocal %635 {approx = true} : vector<32x128xf32> -> vector<32x128xf32>
    %637 = arith.mulf %621, %636 : vector<32x128xf32>
    %638 = arith.truncf %637 : vector<32x128xf32> to vector<32x128xbf16>
    %c1_174 = arith.constant 1 : index
    %c0_175 = arith.constant 0 : index
    %c0_176 = arith.constant 0 : index
    %639 = vector.load %arg19[%c1_174, %c0_175, %c0_176] : memref<2x128x128xbf16, #tpu.memory_space<vmem>>, vector<1x128x128xbf16>
    %640 = vector.shape_cast %639 : vector<1x128x128xbf16> to vector<128x128xbf16>
    %cst_177 = arith.constant dense<0.000000e+00> : vector<32x128xf32>
    %641 = tpu.matmul %638, %640, %cst_177 {dimension_numbers = #tpu.dot_dimension_numbers<[1], [0], [0], [1], [0, 0, 1, 1], [], []>} : vector<32x128xbf16>, vector<128x128xbf16>, vector<32x128xf32> -> vector<32x128xf32>
    %c1_178 = arith.constant 1 : index
    %c0_179 = arith.constant 0 : index
    %c0_180 = arith.constant 0 : index
    %642 = vector.load %arg20[%c1_178, %c0_179, %c0_180] : memref<2x1x128xf32, #tpu.memory_space<vmem>>, vector<1x1x128xf32>
    %643 = vector.shape_cast %642 : vector<1x1x128xf32> to vector<1x128xf32>
    %644 = vector.broadcast %643 : vector<1x128xf32> to vector<32x128xf32>
    %645 = arith.addf %641, %644 : vector<32x128xf32>
    %c1_181 = arith.constant 1 : index
    %c0_182 = arith.constant 0 : index
    %c0_183 = arith.constant 0 : index
    %c0_184 = arith.constant 0 : index
    %646 = vector.load %arg21[%c1_181, %c0_182, %c0_183, %c0_184] : memref<2x6x1x128xf32, #tpu.memory_space<vmem>>, vector<1x6x1x128xf32>
    %647 = vector.shape_cast %646 : vector<1x6x1x128xf32> to vector<6x1x128xf32>
    %c1_185 = arith.constant 1 : index
    %c0_186 = arith.constant 0 : index
    %c0_187 = arith.constant 0 : index
    %c0_188 = arith.constant 0 : index
    %648 = vector.load %arg22[%c1_185, %c0_186, %c0_187, %c0_188] : memref<2x4x1x128xf32, #tpu.memory_space<vmem>>, vector<1x4x1x128xf32>
    %649 = vector.shape_cast %648 : vector<1x4x1x128xf32> to vector<4x1x128xf32>
    %650 = vector.extract_strided_slice %647 {offsets = [0, 0, 0], sizes = [1, 1, 128], strides = [1, 1, 1]} : vector<6x1x128xf32> to vector<1x1x128xf32>
    %651 = vector.shape_cast %650 : vector<1x1x128xf32> to vector<1x128xf32>
    %652 = vector.extract_strided_slice %647 {offsets = [1, 0, 0], sizes = [1, 1, 128], strides = [1, 1, 1]} : vector<6x1x128xf32> to vector<1x1x128xf32>
    %653 = vector.shape_cast %652 : vector<1x1x128xf32> to vector<1x128xf32>
    %654 = vector.extract_strided_slice %647 {offsets = [2, 0, 0], sizes = [1, 1, 128], strides = [1, 1, 1]} : vector<6x1x128xf32> to vector<1x1x128xf32>
    %655 = vector.shape_cast %654 : vector<1x1x128xf32> to vector<1x128xf32>
    %656 = vector.extract_strided_slice %647 {offsets = [3, 0, 0], sizes = [1, 1, 128], strides = [1, 1, 1]} : vector<6x1x128xf32> to vector<1x1x128xf32>
    %657 = vector.shape_cast %656 : vector<1x1x128xf32> to vector<1x128xf32>
    %658 = vector.extract_strided_slice %647 {offsets = [4, 0, 0], sizes = [1, 1, 128], strides = [1, 1, 1]} : vector<6x1x128xf32> to vector<1x1x128xf32>
    %659 = vector.shape_cast %658 : vector<1x1x128xf32> to vector<1x128xf32>
    %660 = vector.extract_strided_slice %647 {offsets = [5, 0, 0], sizes = [1, 1, 128], strides = [1, 1, 1]} : vector<6x1x128xf32> to vector<1x1x128xf32>
    %661 = vector.shape_cast %660 : vector<1x1x128xf32> to vector<1x128xf32>
    %662 = vector.extract_strided_slice %649 {offsets = [0, 0, 0], sizes = [1, 1, 128], strides = [1, 1, 1]} : vector<4x1x128xf32> to vector<1x1x128xf32>
    %663 = vector.shape_cast %662 : vector<1x1x128xf32> to vector<1x128xf32>
    %664 = vector.extract_strided_slice %649 {offsets = [1, 0, 0], sizes = [1, 1, 128], strides = [1, 1, 1]} : vector<4x1x128xf32> to vector<1x1x128xf32>
    %665 = vector.shape_cast %664 : vector<1x1x128xf32> to vector<1x128xf32>
    %666 = vector.extract_strided_slice %649 {offsets = [2, 0, 0], sizes = [1, 1, 128], strides = [1, 1, 1]} : vector<4x1x128xf32> to vector<1x1x128xf32>
    %667 = vector.shape_cast %666 : vector<1x1x128xf32> to vector<1x128xf32>
    %668 = vector.extract_strided_slice %649 {offsets = [3, 0, 0], sizes = [1, 1, 128], strides = [1, 1, 1]} : vector<4x1x128xf32> to vector<1x1x128xf32>
    %669 = vector.shape_cast %668 : vector<1x1x128xf32> to vector<1x128xf32>
    %670 = vector.broadcast %661 : vector<1x128xf32> to vector<32x128xf32>
    %671 = arith.mulf %670, %645 : vector<32x128xf32>
    %672 = vector.broadcast %659 : vector<1x128xf32> to vector<32x128xf32>
    %673 = arith.addf %671, %672 : vector<32x128xf32>
    %674 = arith.mulf %673, %645 : vector<32x128xf32>
    %675 = vector.broadcast %657 : vector<1x128xf32> to vector<32x128xf32>
    %676 = arith.addf %674, %675 : vector<32x128xf32>
    %677 = arith.mulf %676, %645 : vector<32x128xf32>
    %678 = vector.broadcast %655 : vector<1x128xf32> to vector<32x128xf32>
    %679 = arith.addf %677, %678 : vector<32x128xf32>
    %680 = arith.mulf %679, %645 : vector<32x128xf32>
    %681 = vector.broadcast %653 : vector<1x128xf32> to vector<32x128xf32>
    %682 = arith.addf %680, %681 : vector<32x128xf32>
    %683 = arith.mulf %682, %645 : vector<32x128xf32>
    %684 = vector.broadcast %651 : vector<1x128xf32> to vector<32x128xf32>
    %685 = arith.addf %683, %684 : vector<32x128xf32>
    %686 = vector.broadcast %669 : vector<1x128xf32> to vector<32x128xf32>
    %687 = arith.mulf %686, %645 : vector<32x128xf32>
    %688 = vector.broadcast %667 : vector<1x128xf32> to vector<32x128xf32>
    %689 = arith.addf %687, %688 : vector<32x128xf32>
    %690 = arith.mulf %689, %645 : vector<32x128xf32>
    %691 = vector.broadcast %665 : vector<1x128xf32> to vector<32x128xf32>
    %692 = arith.addf %690, %691 : vector<32x128xf32>
    %693 = arith.mulf %692, %645 : vector<32x128xf32>
    %694 = vector.broadcast %663 : vector<1x128xf32> to vector<32x128xf32>
    %695 = arith.addf %693, %694 : vector<32x128xf32>
    %696 = arith.mulf %695, %645 : vector<32x128xf32>
    %697 = math.absf %696 : vector<32x128xf32>
    %cst_189 = arith.constant 1.000000e+00 : f32
    %698 = vector.broadcast %cst_189 : f32 to vector<32x128xf32>
    %699 = arith.addf %698, %697 : vector<32x128xf32>
    %700 = tpu.reciprocal %699 {approx = true} : vector<32x128xf32> -> vector<32x128xf32>
    %701 = arith.mulf %685, %700 : vector<32x128xf32>
    %c1_190 = arith.constant 1 : index
    %c0_191 = arith.constant 0 : index
    %c0_192 = arith.constant 0 : index
    %702 = vector.load %arg23[%c1_190, %c0_191, %c0_192] : memref<2x1x128xf32, #tpu.memory_space<vmem>>, vector<1x1x128xf32>
    %703 = vector.shape_cast %702 : vector<1x1x128xf32> to vector<1x128xf32>
    %c1_193 = arith.constant 1 : index
    %c0_194 = arith.constant 0 : index
    %c0_195 = arith.constant 0 : index
    %704 = vector.load %arg24[%c1_193, %c0_194, %c0_195] : memref<2x1x128xf32, #tpu.memory_space<vmem>>, vector<1x1x128xf32>
    %705 = vector.shape_cast %704 : vector<1x1x128xf32> to vector<1x128xf32>
    %706 = tpu.iota {dimensions = array<i32: 1>} : vector<1x128xi32>
    %c64_i32_196 = arith.constant 64 : i32
    %707 = vector.broadcast %c64_i32_196 : i32 to vector<1x128xi32>
    %708 = arith.cmpi slt, %706, %707 : vector<1x128xi32>
    %709 = arith.extui %708 : vector<1x128xi1> to vector<1x128xi32>
    %710 = arith.sitofp %709 : vector<1x128xi32> to vector<1x128xf32>
    %711 = vector.broadcast %710 : vector<1x128xf32> to vector<32x128xf32>
    %712 = arith.mulf %701, %711 : vector<32x128xf32>
    %cst_197 = arith.constant dense<0.000000e+00> : vector<32xf32>
    %713 = vector.multi_reduction <add>, %712, %cst_197 [1] : vector<32x128xf32> to vector<32xf32>
    %714 = vector.shape_cast %713 : vector<32xf32> to vector<32x1xf32>
    %cst_198 = arith.constant 1.562500e-02 : f32
    %715 = vector.broadcast %cst_198 : f32 to vector<32x1xf32>
    %716 = arith.mulf %714, %715 : vector<32x1xf32>
    %717 = vector.broadcast %716 : vector<32x1xf32> to vector<32x128xf32>
    %718 = arith.subf %712, %717 : vector<32x128xf32>
    %719 = arith.mulf %718, %718 : vector<32x128xf32>
    %720 = vector.broadcast %710 : vector<1x128xf32> to vector<32x128xf32>
    %721 = arith.mulf %719, %720 : vector<32x128xf32>
    %cst_199 = arith.constant dense<0.000000e+00> : vector<32xf32>
    %722 = vector.multi_reduction <add>, %721, %cst_199 [1] : vector<32x128xf32> to vector<32xf32>
    %723 = vector.shape_cast %722 : vector<32xf32> to vector<32x1xf32>
    %cst_200 = arith.constant 1.562500e-02 : f32
    %724 = vector.broadcast %cst_200 : f32 to vector<32x1xf32>
    %725 = arith.mulf %723, %724 : vector<32x1xf32>
    %726 = vector.broadcast %716 : vector<32x1xf32> to vector<32x128xf32>
    %727 = arith.subf %701, %726 : vector<32x128xf32>
    %cst_201 = arith.constant 9.99999974E-6 : f32
    %728 = vector.broadcast %cst_201 : f32 to vector<32x1xf32>
    %729 = arith.addf %725, %728 : vector<32x1xf32>
    %730 = math.rsqrt %729 : vector<32x1xf32>
    %731 = vector.broadcast %730 : vector<32x1xf32> to vector<32x128xf32>
    %732 = arith.mulf %727, %731 : vector<32x128xf32>
    %733 = vector.broadcast %703 : vector<1x128xf32> to vector<32x128xf32>
    %734 = arith.mulf %732, %733 : vector<32x128xf32>
    %735 = vector.broadcast %705 : vector<1x128xf32> to vector<32x128xf32>
    %736 = arith.addf %734, %735 : vector<32x128xf32>
    %737 = arith.truncf %736 : vector<32x128xf32> to vector<32x128xbf16>
    %c1_202 = arith.constant 1 : index
    %c0_203 = arith.constant 0 : index
    %c0_204 = arith.constant 0 : index
    %738 = vector.load %arg25[%c1_202, %c0_203, %c0_204] : memref<2x128x128xbf16, #tpu.memory_space<vmem>>, vector<1x128x128xbf16>
    %739 = vector.shape_cast %738 : vector<1x128x128xbf16> to vector<128x128xbf16>
    %cst_205 = arith.constant dense<0.000000e+00> : vector<32x128xf32>
    %740 = tpu.matmul %737, %739, %cst_205 {dimension_numbers = #tpu.dot_dimension_numbers<[1], [0], [0], [1], [0, 0, 1, 1], [], []>} : vector<32x128xbf16>, vector<128x128xbf16>, vector<32x128xf32> -> vector<32x128xf32>
    %c1_206 = arith.constant 1 : index
    %c0_207 = arith.constant 0 : index
    %c0_208 = arith.constant 0 : index
    %741 = vector.load %arg26[%c1_206, %c0_207, %c0_208] : memref<2x1x128xf32, #tpu.memory_space<vmem>>, vector<1x1x128xf32>
    %742 = vector.shape_cast %741 : vector<1x1x128xf32> to vector<1x128xf32>
    %743 = vector.broadcast %742 : vector<1x128xf32> to vector<32x128xf32>
    %744 = arith.addf %740, %743 : vector<32x128xf32>
    %745 = arith.addf %744, %581 : vector<32x128xf32>
    %746 = vector.broadcast %93 : vector<1x128xf32> to vector<32x128xf32>
    %747 = arith.mulf %745, %746 : vector<32x128xf32>
    %c0_209 = arith.constant 0 : index
    %c0_210 = arith.constant 0 : index
    %748 = vector.load %arg27[%c0_209, %c0_210] : memref<1x128xf32, #tpu.memory_space<vmem>>, vector<1x128xf32>
    %c0_211 = arith.constant 0 : index
    %c0_212 = arith.constant 0 : index
    %749 = vector.load %arg28[%c0_211, %c0_212] : memref<1x128xf32, #tpu.memory_space<vmem>>, vector<1x128xf32>
    %750 = tpu.iota {dimensions = array<i32: 1>} : vector<1x128xi32>
    %c32_i32_213 = arith.constant 32 : i32
    %751 = vector.broadcast %c32_i32_213 : i32 to vector<1x128xi32>
    %752 = arith.cmpi slt, %750, %751 : vector<1x128xi32>
    %753 = arith.extui %752 : vector<1x128xi1> to vector<1x128xi32>
    %754 = arith.sitofp %753 : vector<1x128xi32> to vector<1x128xf32>
    %755 = vector.broadcast %754 : vector<1x128xf32> to vector<32x128xf32>
    %756 = arith.mulf %747, %755 : vector<32x128xf32>
    %cst_214 = arith.constant dense<0.000000e+00> : vector<32xf32>
    %757 = vector.multi_reduction <add>, %756, %cst_214 [1] : vector<32x128xf32> to vector<32xf32>
    %758 = vector.shape_cast %757 : vector<32xf32> to vector<32x1xf32>
    %cst_215 = arith.constant 3.125000e-02 : f32
    %759 = vector.broadcast %cst_215 : f32 to vector<32x1xf32>
    %760 = arith.mulf %758, %759 : vector<32x1xf32>
    %761 = vector.broadcast %760 : vector<32x1xf32> to vector<32x128xf32>
    %762 = arith.subf %756, %761 : vector<32x128xf32>
    %763 = arith.mulf %762, %762 : vector<32x128xf32>
    %764 = vector.broadcast %754 : vector<1x128xf32> to vector<32x128xf32>
    %765 = arith.mulf %763, %764 : vector<32x128xf32>
    %cst_216 = arith.constant dense<0.000000e+00> : vector<32xf32>
    %766 = vector.multi_reduction <add>, %765, %cst_216 [1] : vector<32x128xf32> to vector<32xf32>
    %767 = vector.shape_cast %766 : vector<32xf32> to vector<32x1xf32>
    %cst_217 = arith.constant 3.125000e-02 : f32
    %768 = vector.broadcast %cst_217 : f32 to vector<32x1xf32>
    %769 = arith.mulf %767, %768 : vector<32x1xf32>
    %770 = vector.broadcast %760 : vector<32x1xf32> to vector<32x128xf32>
    %771 = arith.subf %747, %770 : vector<32x128xf32>
    %cst_218 = arith.constant 9.99999974E-6 : f32
    %772 = vector.broadcast %cst_218 : f32 to vector<32x1xf32>
    %773 = arith.addf %769, %772 : vector<32x1xf32>
    %774 = math.rsqrt %773 : vector<32x1xf32>
    %775 = vector.broadcast %774 : vector<32x1xf32> to vector<32x128xf32>
    %776 = arith.mulf %771, %775 : vector<32x128xf32>
    %777 = vector.broadcast %748 : vector<1x128xf32> to vector<32x128xf32>
    %778 = arith.mulf %776, %777 : vector<32x128xf32>
    %779 = vector.broadcast %749 : vector<1x128xf32> to vector<32x128xf32>
    %780 = arith.addf %778, %779 : vector<32x128xf32>
    %781 = vector.shape_cast %780 : vector<32x128xf32> to vector<2x16x128xf32>
    %cst_219 = arith.constant dense<0.000000e+00> : vector<2x128xf32>
    %782 = vector.multi_reduction <add>, %781, %cst_219 [1] : vector<2x16x128xf32> to vector<2x128xf32>
    %cst_220 = arith.constant 1.600000e+01 : f32
    %783 = vector.broadcast %cst_220 : f32 to vector<2x128xf32>
    %784 = arith.divf %782, %783 : vector<2x128xf32>
    %c0_221 = arith.constant 0 : index
    %c0_222 = arith.constant 0 : index
    %785 = vector.load %arg29[%c0_221, %c0_222] : memref<1x128xf32, #tpu.memory_space<vmem>>, vector<1x128xf32>
    %c0_223 = arith.constant 0 : index
    %c0_224 = arith.constant 0 : index
    %786 = vector.load %arg30[%c0_223, %c0_224] : memref<1x128xf32, #tpu.memory_space<vmem>>, vector<1x128xf32>
    %c0_225 = arith.constant 0 : index
    %c0_226 = arith.constant 0 : index
    %787 = vector.load %arg31[%c0_225, %c0_226] : memref<1024x128xbf16, #tpu.memory_space<vmem>>, vector<1024x128xbf16>
    %c0_227 = arith.constant 0 : index
    %c0_228 = arith.constant 0 : index
    %788 = vector.load %arg32[%c0_227, %c0_228] : memref<128x128xbf16, #tpu.memory_space<vmem>>, vector<128x128xbf16>
    %c0_229 = arith.constant 0 : index
    %c0_230 = arith.constant 0 : index
    %789 = vector.load %arg33[%c0_229, %c0_230] : memref<1x128xf32, #tpu.memory_space<vmem>>, vector<1x128xf32>
    %790 = tpu.iota {dimensions = array<i32: 1>} : vector<1x128xi32>
    %c32_i32_231 = arith.constant 32 : i32
    %791 = vector.broadcast %c32_i32_231 : i32 to vector<1x128xi32>
    %792 = arith.cmpi slt, %790, %791 : vector<1x128xi32>
    %793 = arith.extui %792 : vector<1x128xi1> to vector<1x128xi32>
    %794 = arith.sitofp %793 : vector<1x128xi32> to vector<1x128xf32>
    %795 = vector.broadcast %794 : vector<1x128xf32> to vector<2x128xf32>
    %796 = arith.mulf %784, %795 : vector<2x128xf32>
    %cst_232 = arith.constant dense<0.000000e+00> : vector<2xf32>
    %797 = vector.multi_reduction <add>, %796, %cst_232 [1] : vector<2x128xf32> to vector<2xf32>
    %798 = vector.shape_cast %797 : vector<2xf32> to vector<2x1xf32>
    %cst_233 = arith.constant 3.125000e-02 : f32
    %799 = vector.broadcast %cst_233 : f32 to vector<2x1xf32>
    %800 = arith.mulf %798, %799 : vector<2x1xf32>
    %801 = vector.broadcast %800 : vector<2x1xf32> to vector<2x128xf32>
    %802 = arith.subf %796, %801 : vector<2x128xf32>
    %803 = arith.mulf %802, %802 : vector<2x128xf32>
    %804 = vector.broadcast %794 : vector<1x128xf32> to vector<2x128xf32>
    %805 = arith.mulf %803, %804 : vector<2x128xf32>
    %cst_234 = arith.constant dense<0.000000e+00> : vector<2xf32>
    %806 = vector.multi_reduction <add>, %805, %cst_234 [1] : vector<2x128xf32> to vector<2xf32>
    %807 = vector.shape_cast %806 : vector<2xf32> to vector<2x1xf32>
    %cst_235 = arith.constant 3.125000e-02 : f32
    %808 = vector.broadcast %cst_235 : f32 to vector<2x1xf32>
    %809 = arith.mulf %807, %808 : vector<2x1xf32>
    %810 = vector.broadcast %800 : vector<2x1xf32> to vector<2x128xf32>
    %811 = arith.subf %784, %810 : vector<2x128xf32>
    %cst_236 = arith.constant 9.99999974E-6 : f32
    %812 = vector.broadcast %cst_236 : f32 to vector<2x1xf32>
    %813 = arith.addf %809, %812 : vector<2x1xf32>
    %814 = math.rsqrt %813 : vector<2x1xf32>
    %815 = vector.broadcast %814 : vector<2x1xf32> to vector<2x128xf32>
    %816 = arith.mulf %811, %815 : vector<2x128xf32>
    %817 = vector.broadcast %785 : vector<1x128xf32> to vector<2x128xf32>
    %818 = arith.mulf %816, %817 : vector<2x128xf32>
    %819 = vector.broadcast %786 : vector<1x128xf32> to vector<2x128xf32>
    %820 = arith.addf %818, %819 : vector<2x128xf32>
    %cst_237 = arith.constant -2.000000e+00 : f32
    %821 = vector.broadcast %cst_237 : f32 to vector<2x128xf32>
    %822 = arith.subf %820, %821 : vector<2x128xf32>
    %cst_238 = arith.constant 1.750000e+00 : f32
    %823 = vector.broadcast %cst_238 : f32 to vector<2x128xf32>
    %824 = arith.mulf %822, %823 : vector<2x128xf32>
    %cst_239 = arith.constant -1.42857146 : f32
    %825 = vector.broadcast %cst_239 : f32 to vector<2x128xf32>
    %826 = arith.subf %820, %825 : vector<2x128xf32>
    %cst_240 = arith.constant 1.750000e+00 : f32
    %827 = vector.broadcast %cst_240 : f32 to vector<2x128xf32>
    %828 = arith.mulf %826, %827 : vector<2x128xf32>
    %cst_241 = arith.constant -0.857142865 : f32
    %829 = vector.broadcast %cst_241 : f32 to vector<2x128xf32>
    %830 = arith.subf %820, %829 : vector<2x128xf32>
    %cst_242 = arith.constant 1.750000e+00 : f32
    %831 = vector.broadcast %cst_242 : f32 to vector<2x128xf32>
    %832 = arith.mulf %830, %831 : vector<2x128xf32>
    %cst_243 = arith.constant -0.285714298 : f32
    %833 = vector.broadcast %cst_243 : f32 to vector<2x128xf32>
    %834 = arith.subf %820, %833 : vector<2x128xf32>
    %cst_244 = arith.constant 1.750000e+00 : f32
    %835 = vector.broadcast %cst_244 : f32 to vector<2x128xf32>
    %836 = arith.mulf %834, %835 : vector<2x128xf32>
    %cst_245 = arith.constant 0.285714298 : f32
    %837 = vector.broadcast %cst_245 : f32 to vector<2x128xf32>
    %838 = arith.subf %820, %837 : vector<2x128xf32>
    %cst_246 = arith.constant 1.750000e+00 : f32
    %839 = vector.broadcast %cst_246 : f32 to vector<2x128xf32>
    %840 = arith.mulf %838, %839 : vector<2x128xf32>
    %cst_247 = arith.constant 0.857142865 : f32
    %841 = vector.broadcast %cst_247 : f32 to vector<2x128xf32>
    %842 = arith.subf %820, %841 : vector<2x128xf32>
    %cst_248 = arith.constant 1.750000e+00 : f32
    %843 = vector.broadcast %cst_248 : f32 to vector<2x128xf32>
    %844 = arith.mulf %842, %843 : vector<2x128xf32>
    %cst_249 = arith.constant 1.42857146 : f32
    %845 = vector.broadcast %cst_249 : f32 to vector<2x128xf32>
    %846 = arith.subf %820, %845 : vector<2x128xf32>
    %cst_250 = arith.constant 1.750000e+00 : f32
    %847 = vector.broadcast %cst_250 : f32 to vector<2x128xf32>
    %848 = arith.mulf %846, %847 : vector<2x128xf32>
    %cst_251 = arith.constant 2.000000e+00 : f32
    %849 = vector.broadcast %cst_251 : f32 to vector<2x128xf32>
    %850 = arith.subf %820, %849 : vector<2x128xf32>
    %cst_252 = arith.constant 1.750000e+00 : f32
    %851 = vector.broadcast %cst_252 : f32 to vector<2x128xf32>
    %852 = arith.mulf %850, %851 : vector<2x128xf32>
    %853 = tpu.concatenate %824, %828, %832, %836, %840, %844, %848, %852 in 1 : vector<2x128xf32>, vector<2x128xf32>, vector<2x128xf32>, vector<2x128xf32>, vector<2x128xf32>, vector<2x128xf32>, vector<2x128xf32>, vector<2x128xf32> -> vector<2x1024xf32>
    %854 = arith.mulf %853, %853 : vector<2x1024xf32>
    %cst_253 = arith.constant 0.000000e+00 : f32
    %855 = vector.broadcast %cst_253 : f32 to vector<2x1024xf32>
    %856 = arith.subf %855, %854 : vector<2x1024xf32>
    %857 = math.exp %856 : vector<2x1024xf32>
    %cst_254 = arith.constant 0.000000e+00 : f32
    %858 = vector.broadcast %cst_254 : f32 to vector<2x128xf32>
    %859 = arith.subf %858, %784 : vector<2x128xf32>
    %860 = math.exp %859 : vector<2x128xf32>
    %cst_255 = arith.constant 1.000000e+00 : f32
    %861 = vector.broadcast %cst_255 : f32 to vector<2x128xf32>
    %862 = arith.addf %861, %860 : vector<2x128xf32>
    %863 = tpu.reciprocal %862 {approx = true} : vector<2x128xf32> -> vector<2x128xf32>
    %864 = arith.mulf %784, %863 : vector<2x128xf32>
    %865 = arith.truncf %864 : vector<2x128xf32> to vector<2x128xbf16>
    %cst_256 = arith.constant dense<0.000000e+00> : vector<2x128xf32>
    %866 = tpu.matmul %865, %788, %cst_256 {dimension_numbers = #tpu.dot_dimension_numbers<[1], [0], [0], [1], [0, 0, 1, 1], [], []>} : vector<2x128xbf16>, vector<128x128xbf16>, vector<2x128xf32> -> vector<2x128xf32>
    %867 = vector.broadcast %789 : vector<1x128xf32> to vector<2x128xf32>
    %868 = arith.addf %866, %867 : vector<2x128xf32>
    %869 = arith.truncf %857 : vector<2x1024xf32> to vector<2x1024xbf16>
    %cst_257 = arith.constant dense<0.000000e+00> : vector<2x128xf32>
    %870 = tpu.matmul %869, %787, %cst_257 {dimension_numbers = #tpu.dot_dimension_numbers<[1], [0], [0], [1], [0, 0, 1, 1], [], []>} : vector<2x1024xbf16>, vector<1024x128xbf16>, vector<2x128xf32> -> vector<2x128xf32>
    %871 = arith.addf %868, %870 : vector<2x128xf32>
    %c0_258 = arith.constant 0 : index
    %c0_259 = arith.constant 0 : index
    %872 = vector.load %arg34[%c0_258, %c0_259] : memref<2x128xf32, #tpu.memory_space<vmem>>, vector<2x128xf32>
    tpu.vector_store %arg34[%c0_258, %c0_259], %871 {strides = array<i32>} : memref<2x128xf32, #tpu.memory_space<vmem>>, vector<2x128xf32>,
    return
  }
  func.func @transform_0(%arg0: i32) -> (i32, i32, i32) {
    %c0_i32 = arith.constant 0 : i32
    %c0_i32_0 = arith.constant 0 : i32
    %c0_i32_1 = arith.constant 0 : i32
    return %arg0, %c0_i32, %c0_i32_0 : i32, i32, i32
  }
  func.func @transform_1(%arg0: i32) -> (i32, i32) {
    %c0_i32 = arith.constant 0 : i32
    %c0_i32_0 = arith.constant 0 : i32
    %c0_i32_1 = arith.constant 0 : i32
    return %c0_i32, %c0_i32_0 : i32, i32
  }
  func.func @transform_2(%arg0: i32) -> (i32, i32) {
    %c0_i32 = arith.constant 0 : i32
    %c0_i32_0 = arith.constant 0 : i32
    %c0_i32_1 = arith.constant 0 : i32
    return %c0_i32, %c0_i32_0 : i32, i32
  }
  func.func @transform_3(%arg0: i32) -> (i32, i32) {
    %c0_i32 = arith.constant 0 : i32
    %c0_i32_0 = arith.constant 0 : i32
    %c0_i32_1 = arith.constant 0 : i32
    return %c0_i32, %c0_i32_0 : i32, i32
  }
  func.func @transform_4(%arg0: i32) -> (i32, i32) {
    %c0_i32 = arith.constant 0 : i32
    %c0_i32_0 = arith.constant 0 : i32
    %c0_i32_1 = arith.constant 0 : i32
    return %c0_i32, %c0_i32_0 : i32, i32
  }
  func.func @transform_5(%arg0: i32) -> (i32, i32) {
    %c0_i32 = arith.constant 0 : i32
    %c0_i32_0 = arith.constant 0 : i32
    %c0_i32_1 = arith.constant 0 : i32
    return %c0_i32, %c0_i32_0 : i32, i32
  }
  func.func @transform_6(%arg0: i32) -> (i32, i32, i32, i32) {
    %c0_i32 = arith.constant 0 : i32
    %c0_i32_0 = arith.constant 0 : i32
    %c0_i32_1 = arith.constant 0 : i32
    %c0_i32_2 = arith.constant 0 : i32
    %c0_i32_3 = arith.constant 0 : i32
    return %c0_i32, %c0_i32_0, %c0_i32_1, %c0_i32_2 : i32, i32, i32, i32
  }
  func.func @transform_7(%arg0: i32) -> (i32, i32, i32, i32) {
    %c0_i32 = arith.constant 0 : i32
    %c0_i32_0 = arith.constant 0 : i32
    %c0_i32_1 = arith.constant 0 : i32
    %c0_i32_2 = arith.constant 0 : i32
    %c0_i32_3 = arith.constant 0 : i32
    return %c0_i32, %c0_i32_0, %c0_i32_1, %c0_i32_2 : i32, i32, i32, i32
  }
  func.func @transform_8(%arg0: i32) -> (i32, i32, i32) {
    %c0_i32 = arith.constant 0 : i32
    %c0_i32_0 = arith.constant 0 : i32
    %c0_i32_1 = arith.constant 0 : i32
    %c0_i32_2 = arith.constant 0 : i32
    return %c0_i32, %c0_i32_0, %c0_i32_1 : i32, i32, i32
  }
  func.func @transform_9(%arg0: i32) -> (i32, i32, i32) {
    %c0_i32 = arith.constant 0 : i32
    %c0_i32_0 = arith.constant 0 : i32
    %c0_i32_1 = arith.constant 0 : i32
    %c0_i32_2 = arith.constant 0 : i32
    return %c0_i32, %c0_i32_0, %c0_i32_1 : i32, i32, i32
  }
  func.func @transform_10(%arg0: i32) -> (i32, i32, i32, i32) {
    %c0_i32 = arith.constant 0 : i32
    %c0_i32_0 = arith.constant 0 : i32
    %c0_i32_1 = arith.constant 0 : i32
    %c0_i32_2 = arith.constant 0 : i32
    %c0_i32_3 = arith.constant 0 : i32
    return %c0_i32, %c0_i32_0, %c0_i32_1, %c0_i32_2 : i32, i32, i32, i32
  }
  func.func @transform_11(%arg0: i32) -> (i32, i32, i32, i32) {
    %c0_i32 = arith.constant 0 : i32
    %c0_i32_0 = arith.constant 0 : i32
    %c0_i32_1 = arith.constant 0 : i32
    %c0_i32_2 = arith.constant 0 : i32
    %c0_i32_3 = arith.constant 0 : i32
    return %c0_i32, %c0_i32_0, %c0_i32_1, %c0_i32_2 : i32, i32, i32, i32
  }
  func.func @transform_12(%arg0: i32) -> (i32, i32, i32) {
    %c0_i32 = arith.constant 0 : i32
    %c0_i32_0 = arith.constant 0 : i32
    %c0_i32_1 = arith.constant 0 : i32
    %c0_i32_2 = arith.constant 0 : i32
    return %c0_i32, %c0_i32_0, %c0_i32_1 : i32, i32, i32
  }
  func.func @transform_13(%arg0: i32) -> (i32, i32, i32) {
    %c0_i32 = arith.constant 0 : i32
    %c0_i32_0 = arith.constant 0 : i32
    %c0_i32_1 = arith.constant 0 : i32
    %c0_i32_2 = arith.constant 0 : i32
    return %c0_i32, %c0_i32_0, %c0_i32_1 : i32, i32, i32
  }
  func.func @transform_14(%arg0: i32) -> (i32, i32, i32) {
    %c0_i32 = arith.constant 0 : i32
    %c0_i32_0 = arith.constant 0 : i32
    %c0_i32_1 = arith.constant 0 : i32
    %c0_i32_2 = arith.constant 0 : i32
    return %c0_i32, %c0_i32_0, %c0_i32_1 : i32, i32, i32
  }
  func.func @transform_15(%arg0: i32) -> (i32, i32, i32) {
    %c0_i32 = arith.constant 0 : i32
    %c0_i32_0 = arith.constant 0 : i32
    %c0_i32_1 = arith.constant 0 : i32
    %c0_i32_2 = arith.constant 0 : i32
    return %c0_i32, %c0_i32_0, %c0_i32_1 : i32, i32, i32
  }
  func.func @transform_16(%arg0: i32) -> (i32, i32, i32, i32) {
    %c0_i32 = arith.constant 0 : i32
    %c0_i32_0 = arith.constant 0 : i32
    %c0_i32_1 = arith.constant 0 : i32
    %c0_i32_2 = arith.constant 0 : i32
    %c0_i32_3 = arith.constant 0 : i32
    return %c0_i32, %c0_i32_0, %c0_i32_1, %c0_i32_2 : i32, i32, i32, i32
  }
  func.func @transform_17(%arg0: i32) -> (i32, i32, i32, i32) {
    %c0_i32 = arith.constant 0 : i32
    %c0_i32_0 = arith.constant 0 : i32
    %c0_i32_1 = arith.constant 0 : i32
    %c0_i32_2 = arith.constant 0 : i32
    %c0_i32_3 = arith.constant 0 : i32
    return %c0_i32, %c0_i32_0, %c0_i32_1, %c0_i32_2 : i32, i32, i32, i32
  }
  func.func @transform_18(%arg0: i32) -> (i32, i32, i32) {
    %c0_i32 = arith.constant 0 : i32
    %c0_i32_0 = arith.constant 0 : i32
    %c0_i32_1 = arith.constant 0 : i32
    %c0_i32_2 = arith.constant 0 : i32
    return %c0_i32, %c0_i32_0, %c0_i32_1 : i32, i32, i32
  }
  func.func @transform_19(%arg0: i32) -> (i32, i32, i32) {
    %c0_i32 = arith.constant 0 : i32
    %c0_i32_0 = arith.constant 0 : i32
    %c0_i32_1 = arith.constant 0 : i32
    %c0_i32_2 = arith.constant 0 : i32
    return %c0_i32, %c0_i32_0, %c0_i32_1 : i32, i32, i32
  }
  func.func @transform_20(%arg0: i32) -> (i32, i32, i32, i32) {
    %c0_i32 = arith.constant 0 : i32
    %c0_i32_0 = arith.constant 0 : i32
    %c0_i32_1 = arith.constant 0 : i32
    %c0_i32_2 = arith.constant 0 : i32
    %c0_i32_3 = arith.constant 0 : i32
    return %c0_i32, %c0_i32_0, %c0_i32_1, %c0_i32_2 : i32, i32, i32, i32
  }
  func.func @transform_21(%arg0: i32) -> (i32, i32, i32, i32) {
    %c0_i32 = arith.constant 0 : i32
    %c0_i32_0 = arith.constant 0 : i32
    %c0_i32_1 = arith.constant 0 : i32
    %c0_i32_2 = arith.constant 0 : i32
    %c0_i32_3 = arith.constant 0 : i32
    return %c0_i32, %c0_i32_0, %c0_i32_1, %c0_i32_2 : i32, i32, i32, i32
  }
  func.func @transform_22(%arg0: i32) -> (i32, i32, i32) {
    %c0_i32 = arith.constant 0 : i32
    %c0_i32_0 = arith.constant 0 : i32
    %c0_i32_1 = arith.constant 0 : i32
    %c0_i32_2 = arith.constant 0 : i32
    return %c0_i32, %c0_i32_0, %c0_i32_1 : i32, i32, i32
  }
  func.func @transform_23(%arg0: i32) -> (i32, i32, i32) {
    %c0_i32 = arith.constant 0 : i32
    %c0_i32_0 = arith.constant 0 : i32
    %c0_i32_1 = arith.constant 0 : i32
    %c0_i32_2 = arith.constant 0 : i32
    return %c0_i32, %c0_i32_0, %c0_i32_1 : i32, i32, i32
  }
  func.func @transform_24(%arg0: i32) -> (i32, i32, i32) {
    %c0_i32 = arith.constant 0 : i32
    %c0_i32_0 = arith.constant 0 : i32
    %c0_i32_1 = arith.constant 0 : i32
    %c0_i32_2 = arith.constant 0 : i32
    return %c0_i32, %c0_i32_0, %c0_i32_1 : i32, i32, i32
  }
  func.func @transform_25(%arg0: i32) -> (i32, i32, i32) {
    %c0_i32 = arith.constant 0 : i32
    %c0_i32_0 = arith.constant 0 : i32
    %c0_i32_1 = arith.constant 0 : i32
    %c0_i32_2 = arith.constant 0 : i32
    return %c0_i32, %c0_i32_0, %c0_i32_1 : i32, i32, i32
  }
  func.func @transform_26(%arg0: i32) -> (i32, i32) {
    %c0_i32 = arith.constant 0 : i32
    %c0_i32_0 = arith.constant 0 : i32
    %c0_i32_1 = arith.constant 0 : i32
    return %c0_i32, %c0_i32_0 : i32, i32
  }
  func.func @transform_27(%arg0: i32) -> (i32, i32) {
    %c0_i32 = arith.constant 0 : i32
    %c0_i32_0 = arith.constant 0 : i32
    %c0_i32_1 = arith.constant 0 : i32
    return %c0_i32, %c0_i32_0 : i32, i32
  }
  func.func @transform_28(%arg0: i32) -> (i32, i32) {
    %c0_i32 = arith.constant 0 : i32
    %c0_i32_0 = arith.constant 0 : i32
    %c0_i32_1 = arith.constant 0 : i32
    return %c0_i32, %c0_i32_0 : i32, i32
  }
  func.func @transform_29(%arg0: i32) -> (i32, i32) {
    %c0_i32 = arith.constant 0 : i32
    %c0_i32_0 = arith.constant 0 : i32
    %c0_i32_1 = arith.constant 0 : i32
    return %c0_i32, %c0_i32_0 : i32, i32
  }
  func.func @transform_30(%arg0: i32) -> (i32, i32) {
    %c0_i32 = arith.constant 0 : i32
    %c0_i32_0 = arith.constant 0 : i32
    %c0_i32_1 = arith.constant 0 : i32
    return %c0_i32, %c0_i32_0 : i32, i32
  }
  func.func @transform_31(%arg0: i32) -> (i32, i32) {
    %c0_i32 = arith.constant 0 : i32
    %c0_i32_0 = arith.constant 0 : i32
    %c0_i32_1 = arith.constant 0 : i32
    return %c0_i32, %c0_i32_0 : i32, i32
  }
  func.func @transform_32(%arg0: i32) -> (i32, i32) {
    %c0_i32 = arith.constant 0 : i32
    %c0_i32_0 = arith.constant 0 : i32
    %c0_i32_1 = arith.constant 0 : i32
    return %c0_i32, %c0_i32_0 : i32, i32
  }
  func.func @transform_33(%arg0: i32) -> (i32, i32) {
    %c0_i32 = arith.constant 0 : i32
    %c0_i32_0 = arith.constant 0 : i32
    return %arg0, %c0_i32 : i32, i32
  }
}

</mosaic_0001>

<bundles_post_ra>
// kernel: katmixer_forward.1
= control target key start
LH: loop header
LB: loop body
LE: loop exit
PB: predicated region body
PF: predicated region fallthrough
CT: control target
= control target key end

     0   :  { %s6340_s6 = smov 1   ;;  %s6341_s10 = smov 2   ;;  %s8008_s0 = inlined_call_operand.smem [shape: u32[34], index: -1, kind: input, shape index: {}] }
   0x1   :  { %s6409_s5 = sld [smem:[%s8008_s0]]   ;;  %s6342_s14 = smov 3  }
   0x2   :  { %s6414_s9 = sld [smem:[%s8008_s0 + %s6340_s6]]   ;;  %s6343_s18 = smov 4  }
   0x3   :  { %s6419_s13 = sld [smem:[%s8008_s0 + %s6341_s10]]   ;;  %s6344_s22 = smov 5  }
   0x4   :  { %s6424_s17 = sld [smem:[%s8008_s0 + %s6342_s14]]   ;;  %s6345_s26 = smov 6  }
   0x5   :  { %s6429_s21 = sld [smem:[%s8008_s0 + %s6343_s18]]   ;;  %s6346_s30 = smov 7  }
   0x6   :  { %s6434_s25 = sld [smem:[%s8008_s0 + %s6344_s22]]   ;;  %s6347_s4 = smov 8  }
   0x7   :  { %8022 = sst [smem:[#allocation44_spill]] %s6409_s5  ;;  %s6348_s10 = smov 9  }
   0x8   :  { %8023 = sst [smem:[#allocation45_spill]] %s6414_s9  ;;  %s6349_s15 = smov 10  }
   0x9   :  { %8024 = sst [smem:[#allocation46_spill]] %s6419_s13  ;;  %s6350_s20 = smov 11  }
   0xa   :  { %8025 = sst [smem:[#allocation47_spill]] %s6424_s17  ;;  %s6352_s1 = smov 13  }
   0xb   :  { %s6439_s29 = sld [smem:[%s8008_s0 + %s6345_s26]]   ;;  %s6351_s26 = smov 12  }
   0xc   :  { %8026 = sst [smem:[#allocation48_spill]] %s6434_s25  ;;  %s6353_s7 = smov 14  }
   0xd   :  { %s6444_s3 = sld [smem:[%s8008_s0 + %s6346_s30]]   ;;  %s6355_s22 = smov 16  }
   0xe   :  { %s6449_s8 = sld [smem:[%s8008_s0 + %s6347_s4]]   ;;  %s6356_s28 = smov 17  }
   0xf   :  { %s6454_s14 = sld [smem:[%s8008_s0 + %s6348_s10]]  }
  0x10   :  { %s6459_s19 = sld [smem:[%s8008_s0 + %s6349_s15]]   ;;  %s6354_s15 = smov 15  }
  0x11   :  { %8027 = sst [smem:[#allocation49_spill]] %s6439_s29 }
  0x12   :  { %s6464_s24 = sld [smem:[%s8008_s0 + %s6350_s20]]  }
  0x13   :  { %8028 = sst [smem:[#allocation50_spill]] %s6444_s3 }
  0x14   :  { %8029 = sst [smem:[#allocation51_spill]] %s6449_s8 }
  0x15   :  { %s6469_s30 = sld [smem:[%s8008_s0 + %s6351_s26]]  }
  0x16   :  { %8030 = sst [smem:[#allocation52_spill]] %s6459_s19 }
  0x17   :  { %s6474_s6 = sld [smem:[%s8008_s0 + %s6352_s1]]  }
  0x18   :  { %8031 = sst [smem:[#allocation53_spill]] %s6464_s24 }
  0x19   :  { %s6479_s12 = sld [smem:[%s8008_s0 + %s6353_s7]]   ;;  %s6357_s7 = smov 18  }
  0x1a   :  { %s6484_s20 = sld [smem:[%s8008_s0 + %s6354_s15]]   ;;  %s6358_s15 = smov 19  }
  0x1b   :  { %s6489_s27 = sld [smem:[%s8008_s0 + %s6355_s22]]   ;;  %s6359_s22 = smov 20  }
  0x1c   :  { %s6494_s4 = sld [smem:[%s8008_s0 + %s6356_s28]]   ;;  %s6360_s28 = smov 21  }
  0x1d   :  { %s6499_s24 = sld [smem:[%s8008_s0 + %s6357_s7]]   ;;  %s6361_s7 = smov 22  }
  0x1e   :  { %s6504_s19 = sld [smem:[%s8008_s0 + %s6358_s15]]   ;;  %s6362_s15 = smov 23  }
  0x1f   :  { %s6509_s8 = sld [smem:[%s8008_s0 + %s6359_s22]]   ;;  %s6363_s22 = smov 24  }
  0x20   :  { %s6514_s3 = sld [smem:[%s8008_s0 + %s6360_s28]]   ;;  %s6364_s28 = smov 25  }
  0x21   :  { %s6524_s29 = sld [smem:[%s8008_s0 + %s6362_s15]]   ;;  %s6366_s15 = smov 27  }
  0x22   :  { %s6529_s25 = sld [smem:[%s8008_s0 + %s6363_s22]]   ;;  %s6367_s22 = smov 28  }
  0x23   :  { %8032 = sst [smem:[#allocation54_spill]] %s6499_s24 }
  0x24   :  { %s6519_s24 = sld [smem:[%s8008_s0 + %s6361_s7]]   ;;  %s6365_s7 = smov 26  }
  0x25   :  { %s6534_s13 = sld [smem:[%s8008_s0 + %s6364_s28]]   ;;  %s6368_s28 = smov 29  }
  0x26   :  { %s6544_s9 = sld [smem:[%s8008_s0 + %s6366_s15]]   ;;  %s6370_s15 = smov 31  }
  0x27   :  { %s6554_s17 = sld [smem:[%s8008_s0 + %s6368_s28]]   ;;  %s6372_s28 = smov 33  }
  0x28   :  { %8034 = sst [smem:[#allocation56_spill]] %s6529_s25 }
  0x29   :  { %s6549_s25 = sld [smem:[%s8008_s0 + %s6367_s22]]   ;;  %s6371_s22 = smov 32  }
  0x2a   :  { %8033 = sst [smem:[#allocation55_spill]] %s6519_s24 }
  0x2b   :  { %8035 = sst [smem:[#allocation57_spill]] %s6534_s13 }
  0x2c   :  { %s6539_s24 = sld [smem:[%s8008_s0 + %s6365_s7]]   ;;  %s6369_s7 = smov 30  }
  0x2d   :  { %8036 = sst [smem:[#allocation58_spill]] %s6544_s9 }
  0x2e   :  { %8037 = sst [smem:[#allocation59_spill]] %s6554_s17 }
  0x2f   :  { %s6559_s5 = sld [smem:[%s8008_s0 + %s6369_s7]]  }
  0x30   :  { %s6564_s9 = sld [smem:[%s8008_s0 + %s6370_s15]]  }
  0x31   :  { %s6569_s13 = sld [smem:[%s8008_s0 + %s6371_s22]]  }
  0x32   :  { %s6574_s17 = sld [smem:[%s8008_s0 + %s6372_s28]]  }
  0x33   :  { %72 = vsyncpa [#allocation3], 0 }
  0x34   :  { %73 = vsyncpa [#allocation6], 0 }
  0x35   :  { %74 = vsyncpa [#allocation9], 0 }
  0x36   :  { %75 = vsyncpa [#allocation12], 0 }
  0x37   :  { %76 = vsyncpa [#allocation15], 0 }
  0x38   :  { %77 = vsyncpa [#allocation18], 0 }
  0x39   :  { %78 = vsyncpa [#allocation21], 0 }
  0x3a   :  { %79 = vsyncpa [#allocation24], 0 }
  0x3b   :  { %80 = vsyncpa [#allocation27], 0 }
  0x3c   :  { %81 = vsyncpa [#allocation30], 0  ;;  %s116_s7 = sshll.u32 %s6454_s14, 4  ;;  %s117_s7 = int_to_ptr.hbm [resolvable:$true] %s116_s7 }
  0x3d   :  { %82 = vsyncpa [#allocation4], 0  ;;  %s6373_s10 = smov [#allocation5]   ;;  %s146_s11 = sshll.u32 %s6474_s6, 4  ;;  %s147_s11 = int_to_ptr.hbm [resolvable:$true] %s146_s11 }
  0x3e   :  { %s118_s0 = sshll.u32 %s6373_s10, 4  ;;  %s5838_s15 = sshra.s32 %s117_s7, 4  ;;  %s119_s0 = int_to_ptr.vmem [resolvable:$true] %s118_s0  ;;  %s5839_s15 = int_to_ptr.hbm [resolvable:$true] %s5838_s15 }
  0x3f   :  { %s5840_s16 = scalar_lea.hbm %s5839_s15, 32  ;;  %s5842_s18 = scalar_lea.hbm %s6454_s14, 32 }
  0x40   :  { %p5841_p0 = scmp.ne.s32.totalorder %s5839_s15, %s5840_s16  ;;  %p5843_p1 = scmp.lt.s32.totalorder %s5839_s15, %s6454_s14 }
  0x41   :  { %p5844_p2 = scmp.lt.s32.totalorder %s5842_s18, %s5840_s16 }
  0x43   :  { %p5845_p3 = por %p5844_p2, %p5843_p1 }
  0x45   :  { %p5846_p4 = pnand %p5845_p3, %p5841_p0 }
  0x47   :  { %5849 = shalt.err (!%p5846_p4)
}
  0x48   :  { %s6374_s22 = smov 128   ;;  %s6375_s23 = smov 8  }
  0x49   :  { %124 = dma.hbm_to_vmem [thread:$0]  %s117_s7, 512, %s119_s0, [#allocation6], %s6374_s22, %s6374_s22, %s6375_s23  }
  0x4a   :  { %s6376_s26 = smov [#allocation8]   ;;  %s172_s1 = sshll.u32 %s6484_s20, 4  ;;  %s6584_s1 = int_to_ptr.hbm [resolvable:$true] %s172_s1 }
  0x4b   :  { %s148_s28 = sshll.u32 %s6376_s26, 4  ;;  %s5862_s14 = sshra.s32 %s147_s11, 4  ;;  %s149_s28 = int_to_ptr.vmem [resolvable:$true] %s148_s28  ;;  %s5863_s14 = int_to_ptr.hbm [resolvable:$true] %s5862_s14 }
  0x4c   :  { %s5864_s2 = scalar_lea.hbm %s5863_s14, 32  ;;  %s5866_s10 = scalar_lea.hbm %s6474_s6, 32 }
  0x4d   :  { %p5865_p5 = scmp.ne.s32.totalorder %s5863_s14, %s5864_s2  ;;  %p5867_p6 = scmp.lt.s32.totalorder %s5863_s14, %s6474_s6 }
  0x4e   :  { %p5868_p7 = scmp.lt.s32.totalorder %s5866_s10, %s5864_s2 }
  0x50   :  { %p5869_p8 = por %p5868_p7, %p5867_p6 }
  0x52   :  { %p5870_p9 = pnand %p5869_p8, %p5865_p5 }
  0x54   :  { %5873 = shalt.err (!%p5870_p9)
}
  0x55   :  { %154 = dma.hbm_to_vmem [thread:$0]  %s147_s11, 512, %s149_s28, [#allocation9], %s6374_s22, %s6374_s22, %s6375_s23  }
  0x56   :  { %s6377_s7 = smov [#allocation11]   ;;  %s198_s15 = sshll.u32 %s6494_s4, 4  ;;  %s199_s15 = int_to_ptr.hbm [resolvable:$true] %s198_s15 }
  0x57   :  { %s174_s0 = sshll.u32 %s6377_s7, 4  ;;  %s5886_s16 = sshra.s32 %s6584_s1, 4  ;;  %s175_s0 = int_to_ptr.vmem [resolvable:$true] %s174_s0  ;;  %s5887_s16 = int_to_ptr.hbm [resolvable:$true] %s5886_s16 }
  0x58   :  { %s5888_s18 = scalar_lea.hbm %s5887_s16, 32  ;;  %s5890_s6 = scalar_lea.hbm %s6484_s20, 32 }
  0x59   :  { %p5889_p10 = scmp.ne.s32.totalorder %s5887_s16, %s5888_s18  ;;  %p5891_p11 = scmp.lt.s32.totalorder %s5887_s16, %s6484_s20 }
  0x5a   :  { %p5892_p12 = scmp.lt.s32.totalorder %s5890_s6, %s5888_s18 }
  0x5c   :  { %p5893_p13 = por %p5892_p12, %p5891_p11 }
  0x5e   :  { %p5894_p0 = pnand %p5893_p13, %p5889_p10 }
  0x60   :  { %5897 = shalt.err (!%p5894_p0)
}
  0x61   :  { %180 = dma.hbm_to_vmem [thread:$0]  %s6584_s1, 512, %s175_s0, [#allocation12], %s6374_s22, %s6374_s22, %s6375_s23  }
  0x62   :  { %s6378_s11 = smov [#allocation14]   ;;  %s226_s28 = sshll.u32 %s6509_s8, 4  ;;  %s6600_s28 = int_to_ptr.hbm [resolvable:$true] %s226_s28 }
  0x63   :  { %s200_s26 = sshll.u32 %s6378_s11, 4  ;;  %s5910_s20 = sshra.s32 %s199_s15, 4  ;;  %s201_s26 = int_to_ptr.vmem [resolvable:$true] %s200_s26  ;;  %s5911_s20 = int_to_ptr.hbm [resolvable:$true] %s5910_s20 }
  0x64   :  { %s5912_s14 = scalar_lea.hbm %s5911_s20, 8  ;;  %s5914_s2 = scalar_lea.hbm %s6494_s4, 8 }
  0x65   :  { %p5913_p1 = scmp.ne.s32.totalorder %s5911_s20, %s5912_s14  ;;  %p5915_p2 = scmp.lt.s32.totalorder %s5911_s20, %s6494_s4 }
  0x66   :  { %p5916_p3 = scmp.lt.s32.totalorder %s5914_s2, %s5912_s14 }
  0x68   :  { %p5917_p4 = por %p5916_p3, %p5915_p2 }
  0x6a   :  { %p5918_p5 = pnand %p5917_p4, %p5913_p1 }
  0x6c   :  { %5921 = shalt.err (!%p5918_p5)
}
  0x6d   :  { %s6379_s10 = smov 16   ;;  %s6380_s1 = smov 1  }
  0x6e   :  { %206 = dma.hbm_to_vmem [thread:$0]  %s199_s15, 128, %s201_s26, [#allocation15], %s6379_s10, %s6379_s10, %s6380_s1  }
  0x6f   :  { %s254_s7 = sshll.u32 %s6524_s29, 4  ;;  %s6381_s0 = smov [#allocation17]   ;;  %s6608_s7 = int_to_ptr.hbm [resolvable:$true] %s254_s7 }
  0x70   :  { %s228_s16 = sshll.u32 %s6381_s0, 4  ;;  %s5934_s4 = sshra.s32 %s6600_s28, 4  ;;  %s229_s16 = int_to_ptr.vmem [resolvable:$true] %s228_s16  ;;  %s5935_s4 = int_to_ptr.hbm [resolvable:$true] %s5934_s4 }
  0x71   :  { %s5936_s18 = scalar_lea.hbm %s5935_s4, 12  ;;  %s5938_s6 = scalar_lea.hbm %s6509_s8, 12 }
  0x72   :  { %p5937_p6 = scmp.ne.s32.totalorder %s5935_s4, %s5936_s18  ;;  %p5939_p7 = scmp.lt.s32.totalorder %s5935_s4, %s6509_s8 }
  0x73   :  { %p5940_p8 = scmp.lt.s32.totalorder %s5938_s6, %s5936_s18 }
  0x75   :  { %p5941_p9 = por %p5940_p8, %p5939_p7 }
  0x77   :  { %p5942_p10 = pnand %p5941_p9, %p5937_p6 }
  0x79   :  { %5945 = shalt.err (!%p5942_p10)
}
  0x7a   :  { %234 = dma.hbm_to_vmem [thread:$0]  %s6600_s28, 192, %s229_s16, [#allocation18], %s6379_s10, %s6379_s10, %s6380_s1  }
  0x7b   :  { %s6382_s15 = smov [#allocation20]   ;;  %s283_s26 = sshll.u32 %s6539_s24, 4  ;;  %s284_s26 = int_to_ptr.hbm [resolvable:$true] %s283_s26 }
  0x7c   :  { %s256_s11 = sshll.u32 %s6382_s15, 4  ;;  %s5958_s20 = sshra.s32 %s6608_s7, 4  ;;  %s257_s11 = int_to_ptr.vmem [resolvable:$true] %s256_s11  ;;  %s5959_s20 = int_to_ptr.hbm [resolvable:$true] %s5958_s20 }
  0x7d   :  { %s5960_s8 = scalar_lea.hbm %s5959_s20, 2  ;;  %s5962_s14 = scalar_lea.hbm %s6524_s29, 2 }
  0x7e   :  { %p5961_p11 = scmp.ne.s32.totalorder %s5959_s20, %s5960_s8  ;;  %p5963_p12 = scmp.lt.s32.totalorder %s5959_s20, %s6524_s29 }
  0x7f   :  { %p5964_p13 = scmp.lt.s32.totalorder %s5962_s14, %s5960_s8 }
  0x81   :  { %p5965_p0 = por %p5964_p13, %p5963_p12 }
  0x83   :  { %p5966_p1 = pnand %p5965_p0, %p5961_p11 }
  0x85   :  { %5969 = shalt.err (!%p5966_p1)
}
  0x86   :  { %262 = dma.hbm_to_vmem [thread:$0]  %s6608_s7, 32, %s257_s11, [#allocation21], %s6379_s10, %s6379_s10, %s6380_s1  }
  0x87   :  { %s305_s28 = sshll.u32 %s6549_s25, 4  ;;  %s6383_s2 = smov [#allocation23]   ;;  %s306_s28 = int_to_ptr.hbm [resolvable:$true] %s305_s28 }
  0x88   :  { %s285_s0 = sshll.u32 %s6383_s2, 4  ;;  %s5982_s16 = sshra.s32 %s284_s26, 4  ;;  %s286_s0 = int_to_ptr.vmem [resolvable:$true] %s285_s0  ;;  %s5983_s16 = int_to_ptr.hbm [resolvable:$true] %s5982_s16 }
  0x89   :  { %s5984_s29 = scalar_lea.hbm %s5983_s16, 1  ;;  %s5986_s4 = scalar_lea.hbm %s6539_s24, 1 }
  0x8a   :  { %p5985_p2 = scmp.ne.s32.totalorder %s5983_s16, %s5984_s29  ;;  %p5987_p3 = scmp.lt.s32.totalorder %s5983_s16, %s6539_s24 }
  0x8b   :  { %p5988_p4 = scmp.lt.s32.totalorder %s5986_s4, %s5984_s29 }
  0x8d   :  { %p5989_p5 = por %p5988_p4, %p5987_p3 }
  0x8f   :  { %p5990_p6 = pnand %p5989_p5, %p5985_p2 }
  0x91   :  { %5993 = shalt.err (!%p5990_p6)
}
  0x92   :  { %288 = dma.hbm_to_vmem [thread:$0]  %s284_s26, 16, %s286_s0, [#allocation24]  }
  0x93   :  { %s6384_s18 = smov [#allocation26]   ;;  %s6006_s6 = sshra.s32 %s306_s28, 4  ;;  %s6007_s6 = int_to_ptr.hbm [resolvable:$true] %s6006_s6 }
  0x94   :  { %s307_s7 = sshll.u32 %s6384_s18, 4  ;;  %s6008_s15 = scalar_lea.hbm %s6007_s6, 1  ;;  %s308_s7 = int_to_ptr.vmem [resolvable:$true] %s307_s7 }
  0x95   :  { %p6009_p7 = scmp.ne.s32.totalorder %s6007_s6, %s6008_s15  ;;  %s6010_s11 = scalar_lea.hbm %s6549_s25, 1 }
  0x96   :  { %p6011_p8 = scmp.lt.s32.totalorder %s6007_s6, %s6549_s25  ;;  %p6012_p9 = scmp.lt.s32.totalorder %s6010_s11, %s6008_s15 }
  0x98   :  { %p6013_p10 = por %p6012_p9, %p6011_p8 }
  0x9a   :  { %p6014_p11 = pnand %p6013_p10, %p6009_p7 }
  0x9c   :  { %6017 = shalt.err (!%p6014_p11)
}
  0x9d   :  { %310 = dma.hbm_to_vmem [thread:$0]  %s306_s28, 16, %s308_s7, [#allocation27]  }
  0x9e   :  { %s328_s24 = sshll.u32 %s6564_s9, 4  ;;  %s6385_s26 = smov [#allocation29]   ;;  %s329_s24 = int_to_ptr.hbm [resolvable:$true] %s328_s24 }
  0x9f   :  { %s330_s20 = sshll.u32 %s6385_s26, 4  ;;  %s95_s8 = sshll.u32 %s6429_s21, 4  ;;  %s331_s20 = int_to_ptr.vmem [resolvable:$true] %s330_s20  ;;  %s96_s8 = int_to_ptr.hbm [resolvable:$true] %s95_s8 }
  0xa0   :  { %s6030_s14 = sshra.s32 %s329_s24, 4  ;;  %s6034_s25 = scalar_lea.hbm %s6564_s9, 64  ;;  %s6031_s14 = int_to_ptr.hbm [resolvable:$true] %s6030_s14 }
  0xa1   :  { %s6032_s2 = scalar_lea.hbm %s6031_s14, 64  ;;  %p6035_p13 = scmp.lt.s32.totalorder %s6031_s14, %s6564_s9 }
  0xa2   :  { %p6033_p12 = scmp.ne.s32.totalorder %s6031_s14, %s6032_s2  ;;  %p6036_p0 = scmp.lt.s32.totalorder %s6034_s25, %s6032_s2 }
  0xa4   :  { %p6037_p1 = por %p6036_p0, %p6035_p13 }
  0xa6   :  { %p6038_p2 = pnand %p6037_p1, %p6033_p12 }
  0xa8   :  { %6041 = shalt.err (!%p6038_p2)
}
  0xa9   :  { %s6386_s28 = smov 64   ;;  %s6387_s0 = smov 4  }
  0xaa   :  { %336 = dma.hbm_to_vmem [thread:$0]  %s329_s24, 1024, %s331_s20, [#allocation30], %s6386_s28, %s6386_s28, %s6387_s0  }
  0xab   :  { %s6388_s16 = smov [#allocation2]   ;;  %s133_s4 = sshll.u32 %s6469_s30, 4  ;;  %s6638_s4 = int_to_ptr.hbm [resolvable:$true] %s133_s4 }
  0xac   :  { %s97_s29 = sshll.u32 %s6388_s16, 4  ;;  %s6054_s9 = sshra.s32 %s96_s8, 4  ;;  %s98_s29 = int_to_ptr.vmem [resolvable:$true] %s97_s29  ;;  %s6055_s9 = int_to_ptr.hbm [resolvable:$true] %s6054_s9 }
  0xad   :  { %s6056_s18 = scalar_lea.hbm %s6055_s9, 64  ;;  %s6058_s7 = scalar_lea.hbm %s6429_s21, 64 }
  0xae   :  { %p6057_p3 = scmp.ne.s32.totalorder %s6055_s9, %s6056_s18  ;;  %p6059_p4 = scmp.lt.s32.totalorder %s6055_s9, %s6429_s21 }
  0xaf   :  { %p6060_p5 = scmp.lt.s32.totalorder %s6058_s7, %s6056_s18 }
  0xb1   :  { %p6061_p6 = por %p6060_p5, %p6059_p4 }
  0xb3   :  { %p6062_p7 = pnand %p6061_p6, %p6057_p3 }
  0xb5   :  { %6065 = shalt.err (!%p6062_p7)
}
  0xb6   :  { %103 = dma.hbm_to_vmem [thread:$0]  %s96_s8, 1024, %s98_s29, [#allocation3], %s6386_s28, %s6386_s28, %s6387_s0  }
  0xb7   :  { %s159_s6 = sshll.u32 %s6479_s12, 4  ;;  %s6389_s15 = smov [#allocation7]   ;;  %s6646_s6 = int_to_ptr.hbm [resolvable:$true] %s159_s6 }
  0xb8   :  { %s135_s11 = sshll.u32 %s6389_s15, 4  ;;  %s6078_s24 = sshra.s32 %s6638_s4, 4  ;;  %s136_s11 = int_to_ptr.vmem [resolvable:$true] %s135_s11  ;;  %s6079_s24 = int_to_ptr.hbm [resolvable:$true] %s6078_s24 }
  0xb9   :  { %s6080_s21 = scalar_lea.hbm %s6079_s24, 32  ;;  %s6082_s26 = scalar_lea.hbm %s6469_s30, 32 }
  0xba   :  { %p6081_p8 = scmp.ne.s32.totalorder %s6079_s24, %s6080_s21  ;;  %p6083_p9 = scmp.lt.s32.totalorder %s6079_s24, %s6469_s30 }
  0xbb   :  { %p6084_p10 = scmp.lt.s32.totalorder %s6082_s26, %s6080_s21 }
  0xbd   :  { %p6085_p11 = por %p6084_p10, %p6083_p9 }
  0xbf   :  { %p6086_p12 = pnand %p6085_p11, %p6081_p8 }
  0xc1   :  { %6089 = shalt.err (!%p6086_p12)
}
  0xc2   :  { %141 = dma.hbm_to_vmem [thread:$0]  %s6638_s4, 512, %s136_s11, [#allocation6], %s6374_s22, %s6374_s22, %s6375_s23  }
  0xc3   :  { %s6390_s20 = smov [#allocation10]   ;;  %s185_s14 = sshll.u32 %s6489_s27, 4  ;;  %s6656_s14 = int_to_ptr.hbm [resolvable:$true] %s185_s14 }
  0xc4   :  { %s161_s8 = sshll.u32 %s6390_s20, 4  ;;  %s6102_s30 = sshra.s32 %s6646_s6, 4  ;;  %s162_s8 = int_to_ptr.vmem [resolvable:$true] %s161_s8  ;;  %s6103_s30 = int_to_ptr.hbm [resolvable:$true] %s6102_s30 }
  0xc5   :  { %s6104_s2 = scalar_lea.hbm %s6103_s30, 16  ;;  %s6106_s25 = scalar_lea.hbm %s6479_s12, 16 }
  0xc6   :  { %p6105_p13 = scmp.ne.s32.totalorder %s6103_s30, %s6104_s2  ;;  %p6107_p0 = scmp.lt.s32.totalorder %s6103_s30, %s6479_s12 }
  0xc7   :  { %p6108_p1 = scmp.lt.s32.totalorder %s6106_s25, %s6104_s2 }
  0xc9   :  { %p6109_p2 = por %p6108_p1, %p6107_p0 }
  0xcb   :  { %p6110_p3 = pnand %p6109_p2, %p6105_p13 }
  0xcd   :  { %6113 = shalt.err (!%p6110_p3)
}
  0xce   :  { %167 = dma.hbm_to_vmem [thread:$0]  %s6646_s6, 256, %s162_s8, [#allocation9], %s6386_s28, %s6386_s28, %s6387_s0  }
  0xcf   :  { %s213_s22 = sshll.u32 %s6504_s19, 4  ;;  %s6391_s23 = smov [#allocation13]   ;;  %s6666_s22 = int_to_ptr.hbm [resolvable:$true] %s213_s22 }
  0xd0   :  { %s187_s16 = sshll.u32 %s6391_s23, 4  ;;  %s6126_s12 = sshra.s32 %s6656_s14, 4  ;;  %s188_s16 = int_to_ptr.vmem [resolvable:$true] %s187_s16  ;;  %s6127_s12 = int_to_ptr.hbm [resolvable:$true] %s6126_s12 }
  0xd1   :  { %s6128_s29 = scalar_lea.hbm %s6127_s12, 12  ;;  %s6130_s4 = scalar_lea.hbm %s6489_s27, 12 }
  0xd2   :  { %p6129_p4 = scmp.ne.s32.totalorder %s6127_s12, %s6128_s29  ;;  %p6131_p5 = scmp.lt.s32.totalorder %s6127_s12, %s6489_s27 }
  0xd3   :  { %p6132_p6 = scmp.lt.s32.totalorder %s6130_s4, %s6128_s29 }
  0xd5   :  { %p6133_p7 = por %p6132_p6, %p6131_p5 }
  0xd7   :  { %p6134_p8 = pnand %p6133_p7, %p6129_p4 }
  0xd9   :  { %6137 = shalt.err (!%p6134_p8)
}
  0xda   :  { %193 = dma.hbm_to_vmem [thread:$0]  %s6656_s14, 192, %s188_s16, [#allocation12], %s6379_s10, %s6379_s10, %s6380_s1  }
  0xdb   :  { %s6392_s28 = smov [#allocation16]   ;;  %s239_s9 = sshll.u32 %s6514_s3, 4  ;;  %s6676_s9 = int_to_ptr.hbm [resolvable:$true] %s239_s9 }
  0xdc   :  { %s215_s0 = sshll.u32 %s6392_s28, 4  ;;  %s6150_s27 = sshra.s32 %s6666_s22, 4  ;;  %s216_s0 = int_to_ptr.vmem [resolvable:$true] %s215_s0  ;;  %s6151_s27 = int_to_ptr.hbm [resolvable:$true] %s6150_s27 }
  0xdd   :  { %s6152_s18 = scalar_lea.hbm %s6151_s27, 2  ;;  %s6154_s7 = scalar_lea.hbm %s6504_s19, 2 }
  0xde   :  { %p6153_p9 = scmp.ne.s32.totalorder %s6151_s27, %s6152_s18  ;;  %p6155_p10 = scmp.lt.s32.totalorder %s6151_s27, %s6504_s19 }
  0xdf   :  { %p6156_p11 = scmp.lt.s32.totalorder %s6154_s7, %s6152_s18 }
  0xe1   :  { %p6157_p12 = por %p6156_p11, %p6155_p10 }
  0xe3   :  { %p6158_p13 = pnand %p6157_p12, %p6153_p9 }
  0xe5   :  { %6161 = shalt.err (!%p6158_p13)
}
  0xe6   :  { %s8038_s6 = sld [smem:[#allocation57_spill]]  ;;  %s6393_s11 = smov [#allocation19]  }
  0xe7   :  { %221 = dma.hbm_to_vmem [thread:$0]  %s6666_s22, 32, %s216_s0, [#allocation15], %s6379_s10, %s6379_s10, %s6380_s1  }
  0xe8   :  { %s241_s24 = sshll.u32 %s6393_s11, 4  ;;  %s6174_s19 = sshra.s32 %s6676_s9, 4  ;;  %s242_s24 = int_to_ptr.vmem [resolvable:$true] %s241_s24  ;;  %s6175_s19 = int_to_ptr.hbm [resolvable:$true] %s6174_s19 }
  0xe9   :  { %s6176_s21 = scalar_lea.hbm %s6175_s19, 8  ;;  %s6178_s26 = scalar_lea.hbm %s6514_s3, 8 }
  0xea   :  { %p6177_p0 = scmp.ne.s32.totalorder %s6175_s19, %s6176_s21  ;;  %p6179_p1 = scmp.lt.s32.totalorder %s6175_s19, %s6514_s3 }
  0xeb   :  { %p6180_p2 = scmp.lt.s32.totalorder %s6178_s26, %s6176_s21 }
  0xec   :  { %s269_s15 = sshll.u32 %s8038_s6, 4  ;;  %s6686_s15 = int_to_ptr.hbm [resolvable:$true] %s269_s15 }
  0xed   :  { %p6181_p3 = por %p6180_p2, %p6179_p1 }
  0xef   :  { %p6182_p4 = pnand %p6181_p3, %p6177_p0 }
  0xf1   :  { %6185 = shalt.err (!%p6182_p4)
}
  0xf2   :  { %s8039_s20 = sld [smem:[#allocation58_spill]]  ;;  %s6394_s8 = smov [#allocation22]  }
  0xf3   :  { %247 = dma.hbm_to_vmem [thread:$0]  %s6676_s9, 128, %s242_s24, [#allocation18], %s6379_s10, %s6379_s10, %s6380_s1  }
  0xf4   :  { %s271_s14 = sshll.u32 %s6394_s8, 4  ;;  %s6198_s2 = sshra.s32 %s6686_s15, 4  ;;  %s272_s14 = int_to_ptr.vmem [resolvable:$true] %s271_s14  ;;  %s6199_s2 = int_to_ptr.hbm [resolvable:$true] %s6198_s2 }
  0xf5   :  { %s6200_s3 = scalar_lea.hbm %s6199_s2, 2  ;;  %s6202_s25 = scalar_lea.hbm %s8038_s6, 2 }
  0xf6   :  { %p6201_p5 = scmp.ne.s32.totalorder %s6199_s2, %s6200_s3  ;;  %p6203_p6 = scmp.lt.s32.totalorder %s6199_s2, %s8038_s6 }
  0xf7   :  { %p6204_p7 = scmp.lt.s32.totalorder %s6202_s25, %s6200_s3 }
  0xf8   :  { %s294_s30 = sshll.u32 %s8039_s20, 4  ;;  %s295_s30 = int_to_ptr.hbm [resolvable:$true] %s294_s30 }
  0xf9   :  { %p6205_p8 = por %p6204_p7, %p6203_p6 }
  0xfb   :  { %p6206_p9 = pnand %p6205_p8, %p6201_p5 }
  0xfd   :  { %6209 = shalt.err (!%p6206_p9)
}
  0xfe   :  { %s8040_s22 = sld [smem:[#allocation59_spill]]  ;;  %s6395_s16 = smov [#allocation25]  }
  0xff   :  { %277 = dma.hbm_to_vmem [thread:$0]  %s6686_s15, 32, %s272_s14, [#allocation21], %s6379_s10, %s6379_s10, %s6380_s1  }
 0x100   :  { %s296_s12 = sshll.u32 %s6395_s16, 4  ;;  %s6222_s29 = sshra.s32 %s295_s30, 4  ;;  %s297_s12 = int_to_ptr.vmem [resolvable:$true] %s296_s12  ;;  %s6223_s29 = int_to_ptr.hbm [resolvable:$true] %s6222_s29 }
 0x101   :  { %s6224_s4 = scalar_lea.hbm %s6223_s29, 1  ;;  %s6226_s28 = scalar_lea.hbm %s8039_s20, 1 }
 0x102   :  { %p6225_p10 = scmp.ne.s32.totalorder %s6223_s29, %s6224_s4  ;;  %p6227_p11 = scmp.lt.s32.totalorder %s6223_s29, %s8039_s20 }
 0x103   :  { %p6228_p12 = scmp.lt.s32.totalorder %s6226_s28, %s6224_s4 }
 0x104   :  { %s316_s23 = sshll.u32 %s8040_s22, 4  ;;  %s317_s23 = int_to_ptr.hbm [resolvable:$true] %s316_s23 }
 0x105   :  { %p6229_p13 = por %p6228_p12, %p6227_p11 }
 0x107   :  { %p6230_p0 = pnand %p6229_p13, %p6225_p10 }
 0x109   :  { %6233 = shalt.err (!%p6230_p0)
}
 0x10a   :  { %299 = dma.hbm_to_vmem [thread:$0]  %s295_s30, 16, %s297_s12, [#allocation24]  }
 0x10b   :  { %s6396_s10 = smov [#allocation28]   ;;  %s342_s0 = sshll.u32 %s6569_s13, 4  ;;  %s343_s0 = int_to_ptr.hbm [resolvable:$true] %s342_s0 }
 0x10c   :  { %s318_s1 = sshll.u32 %s6396_s10, 4  ;;  %s6246_s9 = sshra.s32 %s317_s23, 4  ;;  %s319_s1 = int_to_ptr.vmem [resolvable:$true] %s318_s1  ;;  %s6247_s9 = int_to_ptr.hbm [resolvable:$true] %s6246_s9 }
 0x10d   :  { %s6248_s27 = scalar_lea.hbm %s6247_s9, 1  ;;  %s6250_s18 = scalar_lea.hbm %s8040_s22, 1 }
 0x10e   :  { %p6249_p1 = scmp.ne.s32.totalorder %s6247_s9, %s6248_s27  ;;  %p6251_p2 = scmp.lt.s32.totalorder %s6247_s9, %s8040_s22 }
 0x10f   :  { %p6252_p3 = scmp.lt.s32.totalorder %s6250_s18, %s6248_s27 }
 0x111   :  { %p6253_p4 = por %p6252_p3, %p6251_p2 }
 0x113   :  { %p6254_p5 = pnand %p6253_p4, %p6249_p1 }
 0x115   :  { %6257 = shalt.err (!%p6254_p5)
}
 0x116   :  { %321 = dma.hbm_to_vmem [thread:$0]  %s317_s23, 16, %s319_s1, [#allocation27]  }
 0x117   :  { %s6397_s7 = smov [#allocation31]   ;;  %s6270_s15 = sshra.s32 %s343_s0, 4  ;;  %s6271_s15 = int_to_ptr.hbm [resolvable:$true] %s6270_s15 }
 0x118   :  { %s344_s6 = sshll.u32 %s6397_s7, 4  ;;  %s6272_s11 = scalar_lea.hbm %s6271_s15, 1  ;;  %s345_s6 = int_to_ptr.vmem [resolvable:$true] %s344_s6 }
 0x119   :  { %p6273_p6 = scmp.ne.s32.totalorder %s6271_s15, %s6272_s11  ;;  %s6274_s24 = scalar_lea.hbm %s6569_s13, 1 }
 0x11a   :  { %p6275_p7 = scmp.lt.s32.totalorder %s6271_s15, %s6569_s13  ;;  %p6276_p8 = scmp.lt.s32.totalorder %s6274_s24, %s6272_s11 }
 0x11c   :  { %p6277_p9 = por %p6276_p8, %p6275_p7 }
 0x11e   :  { %p6278_p10 = pnand %p6277_p9, %p6273_p6 }
 0x120   :  { %6281 = shalt.err (!%p6278_p10)
}
 0x121   :  { %347 = dma.hbm_to_vmem [thread:$0]  %s343_s0, 16, %s345_s6, [#allocation30]  }
 0x122   :  { %6318 = dma.done.wait [#allocation3], 1024  }
 0x123   :  { %6319 = vsyncadd [#allocation3], 4294966272 }
 0x124   :  { %6320 = dma.done.wait [#allocation6], 1024  }
 0x125   :  { %6321 = vsyncadd [#allocation6], 4294966272 }
 0x126   :  { %6322 = dma.done.wait [#allocation9], 768  }
 0x127   :  { %6323 = vsyncadd [#allocation9], 4294966528 }
 0x128   :  { %6324 = dma.done.wait [#allocation12], 704  }
 0x129   :  { %6325 = vsyncadd [#allocation12], 4294966592 }
 0x12a   :  { %6326 = dma.done.wait [#allocation15], 160  }
 0x12b   :  { %6327 = vsyncadd [#allocation15], 4294967136 }
 0x12c   :  { %6328 = dma.done.wait [#allocation18], 320  }
 0x12d   :  { %6329 = vsyncadd [#allocation18], 4294966976 }
 0x12e   :  { %6330 = dma.done.wait [#allocation21], 64  }
 0x12f   :  { %6331 = vsyncadd [#allocation21], 4294967232 }
 0x130   :  { %6332 = dma.done.wait [#allocation24], 32  }
 0x131   :  { %6333 = vsyncadd [#allocation24], 4294967264 }
 0x132   :  { %6334 = dma.done.wait [#allocation27], 32  }
 0x133   :  { %6335 = vsyncadd [#allocation27], 4294967264 }
 0x134   :  { %6336 = dma.done.wait [#allocation30], 1040  }
 0x135   :  { %6337 = vsyncadd [#allocation30], 4294966256  ;;  %s8041_s13 = sld [smem:[#allocation44_spill]]  ;;  %v576_v0 = vlaneseq  ;;  %v6398_v2 = vmov 0.0   ;;  %v5400_v14 = vld [vmem:[#allocation2 + $0x38] sm:$0xff]  ;;  %v5399_v15 = vld [vmem:[#allocation2 + $0x30] sm:$0xff] }
 0x136   :  { %956 = vmatpush.bf16.msra.mxu0 %v5400_v14  ;;  %v5398_v40 = vld [vmem:[#allocation2 + $0x28] sm:$0xff]  ;;  %v5397_v41 = vld [vmem:[#allocation2 + $0x20] sm:$0xff]  ;;  %v5396_v43 = vld [vmem:[#allocation2 + $0x18] sm:$0xff]  ;;  %s8042_s19 = sld [smem:[#allocation47_spill]]  ;;  %vm1649_vm15 = vcmask 130048   ;;  %s4423_s12 = sshll.u32 %s6574_s17, 4  ;;  %s4424_s12 = int_to_ptr.hbm [resolvable:$true] %s4423_s12 }
 0x137   :  { %v577_v1 = vand.u32 127, %v576_v0  ;;  %v5395_v47 = vld [vmem:[#allocation2 + $0x10] sm:$0xff]  ;;  %v5394_v52 = vld [vmem:[#allocation2 + $0x8] sm:$0xff]  ;;  %v5393_v54 = vld [vmem:[#allocation2] sm:$0xff]  ;;  %s8043_s21 = sld [smem:[#allocation45_spill]]  ;;  %s6306_s29 = sshra.s32 %s4424_s12, 4  ;;  %s6307_s29 = int_to_ptr.hbm [resolvable:$true] %s6306_s29 }
 0x138   :  { %s8044_s26 = sld [smem:[#allocation46_spill]]  ;;  %s6308_s4 = scalar_lea.hbm %s6307_s29, 2 }
 0x139   :  { %vm578_vm0 = vcmp.lt.s32.totalorder %v577_v1, 48  ;;  %vm1531_vm1 = vcmp.lt.s32.totalorder %v577_v1, 32  ;;  %vm2255_vm2 = vcmp.lt.s32.totalorder %v577_v1, 64  ;;  %s8049_s20 = sld [smem:[#allocation48_spill]]  ;;  %p6309_p11 = scmp.ne.s32.totalorder %s6307_s29, %s6308_s4 }
 0x13a   :  { %v4475_v3 = vsel %vm578_vm0, 1.0, %v6398_v2  ;;  %v6711_v4 = vsel %vm1531_vm1, 1.0, %v6398_v2  ;;  %v6713_v5 = vsel %vm2255_vm2, 1.0, %v6398_v2  ;;  %957 = vmatpush.bf16.msra.mxu0 %v5399_v15  ;;  %s8050_s8 = sld [smem:[#allocation49_spill]]  ;;  %s6310_s28 = scalar_lea.hbm %s6574_s17, 2 }
 0x13b   :  { %v6716_v6 = vld [vmem:[%s8041_s13 + $0x10] sm:$0xff]  ;;  %v6719_v7 = vld [vmem:[%s8041_s13] sm:$0xff]  ;;  %v6724_v10 = vld [vmem:[%s8041_s13 + $0x18] sm:$0xff]  ;;  %s8051_s14 = sld [smem:[#allocation50_spill]]  ;;  %p6311_p12 = scmp.lt.s32.totalorder %s6307_s29, %s6574_s17 }
 0x13c   :  { %v583_v8 = vmul.f32 %v4475_v3, %v6716_v6  ;;  %v581_v9 = vmul.f32 %v4475_v3, %v6719_v7  ;;  %v6727_v11 = vld [vmem:[%s8041_s13 + $0x8] sm:$0xff]  ;;  %v584_v12 = vmul.f32 %v4475_v3, %v6724_v10  ;;  %v879_v36 = vsub.f32 0.0, %v6719_v7  ;;  %v5336_v60 = vld [vmem:[%s8042_s19 + $0x38] sm:$0xff]  ;;  %v5335_v1 = vld [vmem:[%s8042_s19 + $0x30] sm:$0xff]  ;;  %s8052_s30 = sld [smem:[#allocation51_spill]]  ;;  %p6312_p13 = scmp.lt.s32.totalorder %s6310_s28, %s6308_s4 }
 0x13d   :  { %v582_v13 = vmul.f32 %v4475_v3, %v6727_v11  ;;  %v880_v37 = vsub.f32 0.0, %v6727_v11  ;;  %v881_v45 = vsub.f32 0.0, %v6716_v6  ;;  %v882_v46 = vsub.f32 0.0, %v6724_v10  ;;  %v5344_v61 = vld [vmem:[%s8042_s19 + $0x78] sm:$0xff]  ;;  %1375 = vmatpush.bf16.msra.mxu1 %v5336_v60  ;;  %v5343_v2 = vld [vmem:[%s8042_s19 + $0x70] sm:$0xff]  ;;  %v5334_v15 = vld [vmem:[%s8042_s19 + $0x28] sm:$0xff] }
 0x13e   :  { %589 = vadd.xlane.f32.xlu1 %v583_v8  ;;  %585 = vadd.xlane.f32.xlu0 %v581_v9  ;;  %v883_v38 = vmul.f32 1.442695, %v879_v36  ;;  %v5352_v62 = vld [vmem:[%s8042_s19 + $0xb8] sm:$0xff]  ;;  %v5354_v60 = vld [vmem:[%s8042_s19 + $0xc8] sm:$0xff]  ;;  %s8053_s2 = sld [smem:[#allocation52_spill]]  ;;  %p6313_p0 = por %p6312_p13, %p6311_p12 }
 0x13f   :  { %v885_v39 = vmul.f32 1.442695, %v880_v37  ;;  %958 = vmatpush.bf16.msra.mxu0 %v5398_v40  ;;  %v887_v50 = vmul.f32 1.442695, %v881_v45  ;;  %v889_v51 = vmul.f32 1.442695, %v882_v46  ;;  %1394 = vmatpush.bf16.msra.mxu2 %v5344_v61 }
 0x140   :  { %5626 = vpow2.f32 %v883_v38  ;;  %v5360_v0 = vld [vmem:[%s8042_s19 + $0xf8] sm:$0xff]  ;;  %1413 = vmatpush.bf16.msra.mxu3 %v5352_v62  ;;  %s8054_s3 = sld [smem:[#allocation53_spill]]  ;;  %p6314_p1 = pnand %p6313_p0, %p6309_p11 }
 0x141   :  { %5628 = vpow2.f32 %v885_v39  ;;  %1376 = vmatpush.bf16.msra.mxu1 %v5335_v1  ;;  %v5340_v36 = vld [vmem:[%s8042_s19 + $0x58] sm:$0xff]  ;;  %s8055_s25 = sld [smem:[#allocation54_spill]] }
 0x142   :  { %v5348_v37 = vld [vmem:[%s8042_s19 + $0x98] sm:$0xff]  ;;  %s8056_s22 = sld [smem:[#allocation56_spill]] }
 0x143   :  { %959 = vmatpush.bf16.msra.mxu0 %v5397_v41  ;;  %1395 = vmatpush.bf16.msra.mxu2 %v5343_v2  ;;  %v5356_v41 = vld [vmem:[%s8042_s19 + $0xd8] sm:$0xff]  ;;  %v5337_v2 = vld [vmem:[%s8042_s19 + $0x40] sm:$0xff]  ;;  %s8057_s23 = sld [smem:[#allocation55_spill]] }
 0x145   :  { %1377 = vmatpush.bf16.msra.mxu1 %v5334_v15 }
 0x146   :  { %591 = vadd.xlane.f32.xlu1 %v584_v12  ;;  %587 = vadd.xlane.f32.xlu0 %v582_v13  ;;  %v5627_v42 = vpop.eup %5626 }
 0x147   :  { %v5629_v44 = vpop.eup %5628  ;;  %960 = vmatpush.bf16.msra.mxu0 %v5396_v43  ;;  %v891_v48 = vadd.f32 1.0, %v5627_v42 }
 0x148   :  { %v892_v49 = vadd.f32 1.0, %v5629_v44  ;;  %v5331_v44 = vld [vmem:[%s8042_s19 + $0x10] sm:$0xff] }
 0x149   :  { %5630 = vrcp.f32 %v891_v48  ;;  %v5339_v48 = vld [vmem:[%s8042_s19 + $0x50] sm:$0xff] }
 0x14a   :  { %5632 = vrcp.f32 %v892_v49  ;;  %v5347_v49 = vld [vmem:[%s8042_s19 + $0x90] sm:$0xff] }
 0x14b   :  { %961 = vmatpush.bf16.msra.mxu0 %v5395_v47  ;;  %5634 = vpow2.f32 %v887_v50 }
 0x14c   :  { %5636 = vpow2.f32 %v889_v51 }
 0x14f   :  { %962 = vmatpush.bf16.msra.mxu0 %v5394_v52  ;;  %v5631_v53 = vpop.eup %5630  ;;  %v5355_v52 = vld [vmem:[%s8042_s19 + $0xd0] sm:$0xff] }
 0x150   :  { %v5633_v55 = vpop.eup %5632  ;;  %v899_v56 = vmul.f32 %v5631_v53, %v6719_v7 }
 0x151   :  { %v900_v57 = vmul.f32 %v5633_v55, %v6727_v11  ;;  %v5635_v58 = vpop.eup %5634  ;;  %v5330_v55 = vld [vmem:[%s8042_s19 + $0x8] sm:$0xff] }
 0x152   :  { %v5637_v63 = vpop.eup %5636 }
 0x153   :  { %963 = vmatpush.bf16.msra.mxu0 %v5393_v54  ;;  %v903_v59 = vpack.c.bf16 %v900_v57, %v899_v56  ;;  %v5338_v57 = vld [vmem:[%s8042_s19 + $0x48] sm:$0xff] }
 0x156   :  { %964 = vmatmul.bf16.vlgmr.msra.gmra.mxu0 %v903_v59 }
 0x157   :  { %1432 = vmatpush.bf16.msrb.mxu0 %v5360_v0 }
 0x1b1   :  { %v590_v16 = vpop.xlane.xlu1 %589  ;;  %v586_v17 = vpop.xlane.xlu0 %585 }
 0x1b2   :  { %v6731_v18 = vmul.f32 0.020833334, %v590_v16  ;;  %v6733_v19 = vmul.f32 0.020833334, %v586_v17  ;;  %v5342_v16 = vld [vmem:[%s8042_s19 + $0x68] sm:$0xff] }
 0x1b3   :  { %v5350_v17 = vld [vmem:[%s8042_s19 + $0xa8] sm:$0xff]  ;;  %1396 = vmatpush.bf16.msra.mxu2 %v5342_v16  ;;  %v6814_v16 = vld [vmem:[%s8043_s21] ss:$0 sm:$0xff] }
 0x1b4   :  { %v599_v20 = vsub.f32 %v583_v8, %v6731_v18  ;;  %v597_v21 = vsub.f32 %v581_v9, %v6733_v19  ;;  %v893_v8 = vadd.f32 1.0, %v5635_v58  ;;  %v894_v9 = vadd.f32 1.0, %v5637_v63  ;;  %v5346_v58 = vld [vmem:[%s8042_s19 + $0x88] sm:$0xff]  ;;  %v5329_v63 = vld [vmem:[%s8042_s19] sm:$0xff] }
 0x1b5   :  { %v621_v15 = vsub.f32 %v6719_v7, %v6733_v19 }
 0x1b6   :  { %v603_v22 = vmul.f32 %v599_v20, %v599_v20  ;;  %v601_v23 = vmul.f32 %v597_v21, %v597_v21  ;;  %5638 = vrcp.f32 %v893_v8 }
 0x1b7   :  { %5640 = vrcp.f32 %v894_v9 }
 0x1b8   :  { %v607_v24 = vmul.f32 %v4475_v3, %v603_v22  ;;  %v605_v25 = vmul.f32 %v4475_v3, %v601_v23  ;;  %v5358_v22 = vld [vmem:[%s8042_s19 + $0xe8] sm:$0xff] }
 0x1b9   :  { %v592_v26 = vpop.xlane.xlu1 %591  ;;  %v588_v27 = vpop.xlane.xlu0 %587 }
 0x1ba   :  { %v6737_v28 = vmul.f32 0.020833334, %v592_v26  ;;  %v6739_v29 = vmul.f32 0.020833334, %v588_v27  ;;  %613 = vadd.xlane.f32.xlu0 %v607_v24  ;;  %609 = vadd.xlane.f32.xlu2 %v605_v25  ;;  %v5333_v26 = vld [vmem:[%s8042_s19 + $0x20] sm:$0xff] }
 0x1bb   :  { %v5341_v27 = vld [vmem:[%s8042_s19 + $0x60] sm:$0xff]  ;;  %1378 = vmatpush.bf16.msra.mxu1 %v5333_v26 }
 0x1bc   :  { %v600_v30 = vsub.f32 %v584_v12, %v6737_v28  ;;  %v598_v31 = vsub.f32 %v582_v13, %v6739_v29  ;;  %v5359_v12 = vld [vmem:[%s8042_s19 + $0xf0] sm:$0xff]  ;;  %v5639_v25 = vpop.eup %5638  ;;  %1397 = vmatpush.bf16.msra.mxu2 %v5341_v27 }
 0x1bd   :  { %1433 = vmatpush.bf16.msrb.mxu0 %v5359_v12 }
 0x1be   :  { %v604_v32 = vmul.f32 %v600_v30, %v600_v30  ;;  %v602_v33 = vmul.f32 %v598_v31, %v598_v31  ;;  %v5349_v30 = vld [vmem:[%s8042_s19 + $0xa0] sm:$0xff]  ;;  %v5641_v31 = vpop.eup %5640 }
 0x1c0   :  { %v608_v34 = vmul.f32 %v4475_v3, %v604_v32  ;;  %v606_v35 = vmul.f32 %v4475_v3, %v602_v33  ;;  %v5351_v3 = vld [vmem:[%s8042_s19 + $0xb0] sm:$0xff]  ;;  %v5357_v32 = vld [vmem:[%s8042_s19 + $0xe0] sm:$0xff]  ;;  %v901_v33 = vmul.f32 %v5639_v25, %v6716_v6  ;;  %1398 = vmatpush.bf16.msra.mxu2 %v5340_v36  ;;  %v5376_v36 = vld [vmem:[%s8042_s19 + $0x178] sm:$0xff] }
 0x1c1   :  { %1414 = vmatpush.bf16.msra.mxu3 %v5351_v3  ;;  %1434 = vmatpush.bf16.msrb.mxu0 %v5358_v22  ;;  %v5345_v3 = vld [vmem:[%s8042_s19 + $0x80] sm:$0xff] }
 0x1c2   :  { %615 = vadd.xlane.f32.xlu1 %v608_v34  ;;  %611 = vadd.xlane.f32.xlu2 %v606_v35  ;;  %v902_v34 = vmul.f32 %v5641_v31, %v6724_v10  ;;  %v5332_v35 = vld [vmem:[%s8042_s19 + $0x18] sm:$0xff] }
 0x1c3   :  { %1379 = vmatpush.bf16.msra.mxu1 %v5332_v35  ;;  %v5368_v35 = vld [vmem:[%s8042_s19 + $0x138] sm:$0xff] }
 0x1c4   :  { %v904_v40 = vpack.c.bf16 %v902_v34, %v901_v33  ;;  %1399 = vmatpush.bf16.msra.mxu2 %v5339_v48 }
 0x1c5   :  { %1415 = vmatpush.bf16.msra.mxu3 %v5350_v17  ;;  %1435 = vmatpush.bf16.msrb.mxu0 %v5357_v32 }
 0x1c6   :  { %969 = vmatmul.bf16.gmra.mxu0 %v904_v40 }
 0x1c7   :  { %1380 = vmatpush.bf16.msra.mxu1 %v5331_v44 }
 0x1c8   :  { %1400 = vmatpush.bf16.msra.mxu2 %v5338_v57 }
 0x1c9   :  { %1416 = vmatpush.bf16.msra.mxu3 %v5349_v30  ;;  %1436 = vmatpush.bf16.msrb.mxu0 %v5356_v41  ;;  %v5392_v41 = vld [vmem:[%s8042_s19 + $0x1f8] sm:$0xff] }
 0x1cb   :  { %1381 = vmatpush.bf16.msra.mxu1 %v5330_v55 }
 0x1cc   :  { %1401 = vmatpush.bf16.msra.mxu2 %v5337_v2 }
 0x1cd   :  { %1417 = vmatpush.bf16.msra.mxu3 %v5348_v37  ;;  %1437 = vmatpush.bf16.msrb.mxu0 %v5355_v52  ;;  %v5384_v37 = vld [vmem:[%s8042_s19 + $0x1b8] sm:$0xff] }
 0x1cf   :  { %1382 = vmatpush.bf16.msra.mxu1 %v5329_v63 }
 0x1d0   :  { %1470 = vmatpush.bf16.msrb.mxu2 %v5376_v36 }
 0x1d1   :  { %1418 = vmatpush.bf16.msra.mxu3 %v5347_v49  ;;  %1438 = vmatpush.bf16.msrb.mxu0 %v5354_v60  ;;  %v5383_v49 = vld [vmem:[%s8042_s19 + $0x1b0] sm:$0xff] }
 0x1d3   :  { %1451 = vmatpush.bf16.msrb.mxu1 %v5368_v35 }
 0x1d5   :  { %1419 = vmatpush.bf16.msra.mxu3 %v5346_v58 }
 0x1d9   :  { %1420 = vmatpush.bf16.msra.mxu3 %v5345_v3  ;;  %v5382_v3 = vld [vmem:[%s8042_s19 + $0x1a8] sm:$0xff] }
 0x1dd   :  { %1489 = vmatpush.bf16.msrb.mxu3 %v5384_v37 }
 0x1e1   :  { %1490 = vmatpush.bf16.msrb.mxu3 %v5383_v49 }
 0x1e5   :  { %1491 = vmatpush.bf16.msrb.mxu3 %v5382_v3 }
 0x22d   :  { %v610_v13 = vpop.xlane.xlu2 %609  ;;  %v614_v14 = vpop.xlane.xlu0 %613 }
 0x22e   :  { %v617_v20 = vmul.f32 0.020833334, %v610_v13  ;;  %v619_v21 = vmul.f32 0.020833334, %v614_v14  ;;  %v5353_v14 = vld [vmem:[%s8042_s19 + $0xc0] sm:$0xff] }
 0x22f   :  { %1439 = vmatpush.bf16.msrb.mxu0 %v5353_v14 }
 0x230   :  { %v6761_v23 = vadd.f32 1e-05, %v617_v20  ;;  %v6763_v24 = vadd.f32 1e-05, %v619_v21  ;;  %v623_v21 = vsub.f32 %v6716_v6, %v6731_v18 }
 0x232   :  { %5642 = vrsqrt.f32 %v6761_v23  ;;  %vm655_vm3 = vweird.f32 %v6763_v24  ;;  %vm635_vm6 = vweird.f32 %v6761_v23 }
 0x233   :  { %5644 = vrsqrt.f32 %v6763_v24  ;;  %1508 = vmatpush.bf16.msra.mxu0 %v5392_v41 }
 0x235   :  { %v616_v38 = vpop.xlane.xlu1 %615  ;;  %v612_v39 = vpop.xlane.xlu2 %611 }
 0x236   :  { %v620_v42 = vmul.f32 0.020833334, %v616_v38  ;;  %v618_v43 = vmul.f32 0.020833334, %v612_v39  ;;  %v624_v38 = vsub.f32 %v6724_v10, %v6737_v28  ;;  %v5375_v10 = vld [vmem:[%s8042_s19 + $0x170] sm:$0xff]  ;;  %v622_v28 = vsub.f32 %v6727_v11, %v6739_v29 }
 0x237   :  { %1471 = vmatpush.bf16.msrb.mxu2 %v5375_v10 }
 0x238   :  { %v5643_v45 = vpop.eup %5642  ;;  %v6778_v46 = vadd.f32 1e-05, %v620_v42  ;;  %v6780_v47 = vadd.f32 1e-05, %v618_v43  ;;  %v5367_v42 = vld [vmem:[%s8042_s19 + $0x130] sm:$0xff] }
 0x239   :  { %v5645_v50 = vpop.eup %5644  ;;  %v630_v51 = vmul.f32 %v5643_v45, %v6761_v23  ;;  %vm636_vm5 = vweird.f32 %v5643_v45  ;;  %1452 = vmatpush.bf16.msrb.mxu1 %v5367_v42 }
 0x23a   :  { %v650_v53 = vmul.f32 %v5645_v50, %v6763_v24  ;;  %5646 = vrsqrt.f32 %v6778_v46  ;;  %vm656_vm4 = vweird.f32 %v5645_v50  ;;  %vm637_vm8 = vmor %vm635_vm6, %vm636_vm5  ;;  %vm665_vm9 = vweird.f32 %v6778_v46  ;;  %v6824_v24 = vld [vmem:[%s8044_s26] ss:$0 sm:$0xff] }
 0x23b   :  { %v631_v54 = vmul.f32 %v5643_v45, %v630_v51  ;;  %5648 = vrsqrt.f32 %v6780_v47  ;;  %vm6804_vm7 = vmor %vm655_vm3, %vm656_vm4  ;;  %vm645_vm13 = vweird.f32 %v6780_v47 }
 0x23c   :  { %v651_v56 = vmul.f32 %v5645_v50, %v650_v53 }
 0x23d   :  { %v632_v59 = vmul.f32 0.5, %v631_v54 }
 0x23e   :  { %v652_v61 = vmul.f32 0.5, %v651_v56 }
 0x23f   :  { %v633_v62 = vsub.f32 1.5, %v632_v59 }
 0x240   :  { %v6795_v0 = vpop.eup %5646  ;;  %v653_v1 = vsub.f32 1.5, %v652_v61  ;;  %v5366_v61 = vld [vmem:[%s8042_s19 + $0x128] sm:$0xff] }
 0x241   :  { %v6799_v8 = vpop.eup %5648  ;;  %v634_v9 = vmul.f32 %v5643_v45, %v633_v62  ;;  %v660_v13 = vmul.f32 %v6795_v0, %v6778_v46  ;;  %vm666_vm10 = vweird.f32 %v6795_v0  ;;  %v5374_v62 = vld [vmem:[%s8042_s19 + $0x168] sm:$0xff]  ;;  %1453 = vmatpush.bf16.msrb.mxu1 %v5366_v61 }
 0x242   :  { %v654_v17 = vmul.f32 %v5645_v50, %v653_v1  ;;  %v640_v20 = vmul.f32 %v6799_v8, %v6780_v47  ;;  %vm6834_vm11 = vmor %vm665_vm9, %vm666_vm10  ;;  %vm646_vm12 = vweird.f32 %v6799_v8  ;;  %1472 = vmatpush.bf16.msrb.mxu2 %v5374_v62 }
 0x243   :  { %v638_v22 = vsel %vm637_vm8, %v5643_v45, %v634_v9  ;;  %v661_v23 = vmul.f32 %v6795_v0, %v660_v13  ;;  %vm647_vm14 = vmor %vm645_vm13, %vm646_vm12 }
 0x244   :  { %v669_v7 = vmul.f32 %v638_v22, %v621_v15  ;;  %v658_v19 = vsel %vm6804_vm7, %v5645_v50, %v654_v17  ;;  %v641_v25 = vmul.f32 %v6799_v8, %v640_v20  ;;  %v5391_v50 = vld [vmem:[%s8042_s19 + $0x1f0] sm:$0xff]  ;;  %v5381_v22 = vld [vmem:[%s8042_s19 + $0x1a0] sm:$0xff] }
 0x245   :  { %v671_v6 = vmul.f32 %v658_v19, %v623_v21  ;;  %v662_v18 = vmul.f32 0.5, %v661_v23  ;;  %1509 = vmatpush.bf16.msra.mxu0 %v5391_v50  ;;  %v5373_v21 = vld [vmem:[%s8042_s19 + $0x160] sm:$0xff]  ;;  %1492 = vmatpush.bf16.msrb.mxu3 %v5381_v22 }
 0x246   :  { %v676_v26 = vmul.f32 %v6814_v16, %v669_v7  ;;  %v642_v27 = vmul.f32 0.5, %v641_v25  ;;  %1473 = vmatpush.bf16.msrb.mxu2 %v5373_v21  ;;  %v5379_v21 = vld [vmem:[%s8042_s19 + $0x190] sm:$0xff] }
 0x247   :  { %v678_v30 = vmul.f32 %v6814_v16, %v671_v6  ;;  %v663_v31 = vsub.f32 1.5, %v662_v18 }
 0x248   :  { %v6839_v33 = vadd.f32 %v6824_v24, %v676_v26  ;;  %v643_v34 = vsub.f32 1.5, %v642_v27  ;;  %v5389_v27 = vld [vmem:[%s8042_s19 + $0x1e0] sm:$0xff] }
 0x249   :  { %v6848_v39 = vadd.f32 %v6824_v24, %v678_v30  ;;  %v664_v40 = vmul.f32 %v6795_v0, %v663_v31 }
 0x24a   :  { %v644_v43 = vmul.f32 %v6799_v8, %v643_v34  ;;  %v4476_v44 = vadd.f32 2.0, %v6839_v33  ;;  %v4480_v45 = vadd.f32 1.4285715, %v6839_v33  ;;  %v4484_v46 = vadd.f32 0.85714287, %v6839_v33 }
 0x24b   :  { %v668_v47 = vsel %vm6834_vm11, %v6795_v0, %v664_v40  ;;  %v4488_v48 = vadd.f32 0.2857143, %v6839_v33  ;;  %v4478_v51 = vadd.f32 2.0, %v6848_v39  ;;  %v4482_v63 = vadd.f32 1.4285715, %v6848_v39 }
 0x24c   :  { %v672_v52 = vmul.f32 %v668_v47, %v624_v38  ;;  %v648_v11 = vsel %vm647_vm14, %v6799_v8, %v644_v43  ;;  %v691_v29 = vmul.f32 1.75, %v4476_v44  ;;  %v699_v53 = vmul.f32 1.75, %v4480_v45  ;;  %v5390_v8 = vld [vmem:[%s8042_s19 + $0x1e8] sm:$0xff] }
 0x24d   :  { %v670_v54 = vmul.f32 %v648_v11, %v622_v28  ;;  %v707_v55 = vmul.f32 1.75, %v4484_v46  ;;  %v715_v56 = vmul.f32 1.75, %v4488_v48  ;;  %v693_v57 = vmul.f32 1.75, %v4478_v51  ;;  %1510 = vmatpush.bf16.msra.mxu0 %v5390_v8  ;;  %v5364_v51 = vld [vmem:[%s8042_s19 + $0x118] sm:$0xff] }
 0x24e   :  { %v679_v58 = vmul.f32 %v6814_v16, %v672_v52  ;;  %v751_v59 = vmul.f32 %v691_v29, %v691_v29  ;;  %v752_v60 = vmul.f32 %v699_v53, %v699_v53  ;;  %v701_v23 = vmul.f32 1.75, %v4482_v63  ;;  %v5372_v52 = vld [vmem:[%s8042_s19 + $0x158] sm:$0xff] }
 0x24f   :  { %v677_v0 = vmul.f32 %v6814_v16, %v670_v54  ;;  %v753_v1 = vmul.f32 %v707_v55, %v707_v55  ;;  %v754_v2 = vmul.f32 %v715_v56, %v715_v56  ;;  %v767_v14 = vmul.f32 %v693_v57, %v693_v57  ;;  %v5365_v16 = vld [vmem:[%s8042_s19 + $0x120] sm:$0xff]  ;;  %v5380_v56 = vld [vmem:[%s8042_s19 + $0x198] sm:$0xff]  ;;  %1474 = vmatpush.bf16.msrb.mxu2 %v5372_v52 }
 0x250   :  { %v6879_v9 = vadd.f32 %v6824_v24, %v679_v58  ;;  %v783_v12 = vsub.f32 0.0, %v751_v59  ;;  %v784_v13 = vsub.f32 0.0, %v752_v60  ;;  %v768_v30 = vmul.f32 %v701_v23, %v701_v23  ;;  %1454 = vmatpush.bf16.msrb.mxu1 %v5365_v16  ;;  %1493 = vmatpush.bf16.msrb.mxu3 %v5380_v56  ;;  %v5371_v16 = vld [vmem:[%s8042_s19 + $0x150] sm:$0xff] }
 0x251   :  { %v6882_v15 = vadd.f32 %v6824_v24, %v677_v0  ;;  %v785_v17 = vsub.f32 0.0, %v753_v1  ;;  %v786_v20 = vsub.f32 0.0, %v754_v2  ;;  %v799_v6 = vsub.f32 0.0, %v767_v14  ;;  %1511 = vmatpush.bf16.msra.mxu0 %v5389_v27 }
 0x252   :  { %v815_v7 = vmul.f32 1.442695, %v783_v12  ;;  %v817_v19 = vmul.f32 1.442695, %v784_v13  ;;  %v4479_v25 = vadd.f32 2.0, %v6879_v9  ;;  %v800_v50 = vsub.f32 0.0, %v768_v30 }
 0x253   :  { %v4477_v18 = vadd.f32 2.0, %v6882_v15  ;;  %v4481_v26 = vadd.f32 1.4285715, %v6882_v15  ;;  %v4485_v24 = vadd.f32 0.85714287, %v6882_v15  ;;  %v5388_v12 = vld [vmem:[%s8042_s19 + $0x1d8] sm:$0xff]  ;;  %1475 = vmatpush.bf16.msrb.mxu2 %v5371_v16 }
 0x254   :  { %5650 = vpow2.f32 %v815_v7  ;;  %v819_v31 = vmul.f32 1.442695, %v785_v17  ;;  %v4489_v32 = vadd.f32 0.2857143, %v6882_v15  ;;  %v821_v34 = vmul.f32 1.442695, %v786_v20  ;;  %1455 = vmatpush.bf16.msrb.mxu1 %v5364_v51  ;;  %1494 = vmatpush.bf16.msrb.mxu3 %v5379_v21 }
 0x255   :  { %v692_v35 = vmul.f32 1.75, %v4477_v18  ;;  %v700_v36 = vmul.f32 1.75, %v4481_v26  ;;  %5652 = vpow2.f32 %v817_v19  ;;  %v708_v37 = vmul.f32 1.75, %v4485_v24  ;;  %v5363_v13 = vld [vmem:[%s8042_s19 + $0x110] sm:$0xff]  ;;  %1512 = vmatpush.bf16.msra.mxu0 %v5388_v12  ;;  %v5370_v26 = vld [vmem:[%s8042_s19 + $0x148] sm:$0xff] }
 0x256   :  { %5654 = vpow2.f32 %v819_v31  ;;  %v716_v38 = vmul.f32 1.75, %v4489_v32  ;;  %v694_v40 = vmul.f32 1.75, %v4479_v25  ;;  %v4486_v41 = vadd.f32 0.85714287, %v6848_v39  ;;  %v5387_v19 = vld [vmem:[%s8042_s19 + $0x1d0] sm:$0xff]  ;;  %v5362_v25 = vld [vmem:[%s8042_s19 + $0x108] sm:$0xff] }
 0x257   :  { %v759_v42 = vmul.f32 %v692_v35, %v692_v35  ;;  %v760_v43 = vmul.f32 %v700_v36, %v700_v36  ;;  %v761_v44 = vmul.f32 %v708_v37, %v708_v37  ;;  %v847_v45 = vmul.f32 1.442695, %v799_v6  ;;  %v5378_v24 = vld [vmem:[%s8042_s19 + $0x188] sm:$0xff]  ;;  %1476 = vmatpush.bf16.msrb.mxu2 %v5370_v26 }
 0x258   :  { %v762_v46 = vmul.f32 %v716_v38, %v716_v38  ;;  %5656 = vpow2.f32 %v821_v34  ;;  %v775_v10 = vmul.f32 %v694_v40, %v694_v40  ;;  %v4483_v28 = vadd.f32 1.4285715, %v6879_v9  ;;  %1456 = vmatpush.bf16.msrb.mxu1 %v5363_v13  ;;  %1495 = vmatpush.bf16.msrb.mxu3 %v5378_v24 }
 0x259   :  { %v791_v47 = vsub.f32 0.0, %v759_v42  ;;  %v792_v48 = vsub.f32 0.0, %v760_v43  ;;  %v793_v49 = vsub.f32 0.0, %v761_v44  ;;  %v4487_v55 = vadd.f32 0.85714287, %v6879_v9  ;;  %1513 = vmatpush.bf16.msra.mxu0 %v5387_v19  ;;  %v5386_v42 = vld [vmem:[%s8042_s19 + $0x1c8] sm:$0xff] }
 0x25a   :  { %v6897_v11 = vpop.eup %5650  ;;  %v794_v29 = vsub.f32 0.0, %v762_v46  ;;  %v807_v53 = vsub.f32 0.0, %v775_v10  ;;  %v702_v54 = vmul.f32 1.75, %v4483_v28  ;;  %5658 = vpow2.f32 %v847_v45  ;;  %v5361_v46 = vld [vmem:[%s8042_s19 + $0x100] sm:$0xff] }
 0x25b   :  { %v6901_v57 = vpop.eup %5652  ;;  %v831_v58 = vmul.f32 1.442695, %v791_v47  ;;  %v833_v59 = vmul.f32 1.442695, %v792_v48  ;;  %v835_v60 = vmul.f32 1.442695, %v793_v49 }
 0x25c   :  { %v6903_v61 = vpop.eup %5654  ;;  %v837_v62 = vmul.f32 1.442695, %v794_v29  ;;  %v863_v63 = vmul.f32 1.442695, %v807_v53  ;;  %v776_v0 = vmul.f32 %v702_v54, %v702_v54  ;;  %v849_v1 = vmul.f32 1.442695, %v800_v50  ;;  %1457 = vmatpush.bf16.msrb.mxu1 %v5362_v25 }
 0x25d   :  { %5660 = vpow2.f32 %v831_v58  ;;  %v709_v2 = vmul.f32 1.75, %v4486_v41  ;;  %v710_v3 = vmul.f32 1.75, %v4487_v55  ;;  %v4490_v8 = vadd.f32 0.2857143, %v6848_v39  ;;  %v5369_v50 = vld [vmem:[%s8042_s19 + $0x140] sm:$0xff]  ;;  %1514 = vmatpush.bf16.msra.mxu0 %v5386_v42 }
 0x25e   :  { %v6908_v14 = vpop.eup %5656  ;;  %5662 = vpow2.f32 %v833_v59  ;;  %v808_v17 = vsub.f32 0.0, %v776_v0  ;;  %v4491_v20 = vadd.f32 0.2857143, %v6879_v9  ;;  %v4492_v35 = vadd.f32 -0.2857143, %v6839_v33  ;;  %v5377_v53 = vld [vmem:[%s8042_s19 + $0x180] sm:$0xff]  ;;  %1477 = vmatpush.bf16.msrb.mxu2 %v5369_v50 }
 0x25f   :  { %5664 = vpow2.f32 %v835_v60  ;;  %v769_v22 = vmul.f32 %v709_v2, %v709_v2  ;;  %v777_v23 = vmul.f32 %v710_v3, %v710_v3  ;;  %v717_v7 = vmul.f32 1.75, %v4490_v8  ;;  %1496 = vmatpush.bf16.msrb.mxu3 %v5377_v53 }
 0x260   :  { %5666 = vpow2.f32 %v837_v62  ;;  %v865_v6 = vmul.f32 1.442695, %v808_v17  ;;  %v718_v18 = vmul.f32 1.75, %v4491_v20  ;;  %v6917_v27 = vpop.eup %5658  ;;  %v4493_v36 = vadd.f32 -0.2857143, %v6882_v15  ;;  %1458 = vmatpush.bf16.msrb.mxu1 %v5361_v46 }
 0x261   :  { %5668 = vpow2.f32 %v863_v63  ;;  %v801_v30 = vsub.f32 0.0, %v769_v22  ;;  %v809_v31 = vsub.f32 0.0, %v777_v23  ;;  %v770_v32 = vmul.f32 %v717_v7, %v717_v7 }
 0x262   :  { %5670 = vpow2.f32 %v849_v1  ;;  %v778_v34 = vmul.f32 %v718_v18, %v718_v18  ;;  %v723_v10 = vmul.f32 1.75, %v4492_v35  ;;  %v724_v28 = vmul.f32 1.75, %v4493_v36 }
 0x263   :  { %v5661_v37 = vpop.eup %5660  ;;  %5672 = vpow2.f32 %v865_v6  ;;  %v851_v38 = vmul.f32 1.442695, %v801_v30  ;;  %v867_v40 = vmul.f32 1.442695, %v809_v31  ;;  %v802_v41 = vsub.f32 0.0, %v770_v32 }
 0x264   :  { %v5663_v43 = vpop.eup %5662  ;;  %v975_v44 = vpack.c.bf16 %v5661_v37, %v6897_v11  ;;  %v810_v45 = vsub.f32 0.0, %v778_v34  ;;  %v4496_v51 = vadd.f32 -0.85714287, %v6839_v33  ;;  %v755_v54 = vmul.f32 %v723_v10, %v723_v10 }
 0x265   :  { %v5665_v47 = vpop.eup %5664  ;;  %v976_v48 = vpack.c.bf16 %v5663_v43, %v6901_v57  ;;  %5674 = vpow2.f32 %v851_v38  ;;  %v853_v49 = vmul.f32 1.442695, %v802_v41  ;;  %v5385_v57 = vld [vmem:[%s8042_s19 + $0x1c0] sm:$0xff]  ;;  %v763_v58 = vmul.f32 %v724_v28, %v724_v28 }
 0x266   :  { %v5667_v52 = vpop.eup %5666  ;;  %1383 = vmatmul.bf16.vlgmr.msra.gmra.mxu1 %v975_v44  ;;  %v977_v11 = vpack.c.bf16 %v5665_v47, %v6903_v61  ;;  %5676 = vpow2.f32 %v867_v40  ;;  %v869_v29 = vmul.f32 1.442695, %v810_v45  ;;  %v4497_v59 = vadd.f32 -0.85714287, %v6882_v15  ;;  %1515 = vmatpush.bf16.msra.mxu0 %v5385_v57 }
 0x267   :  { %v6929_v55 = vpop.eup %5668  ;;  %1402 = vmatmul.bf16.vlgmr.msra.gmra.mxu2 %v976_v48  ;;  %v978_v56 = vpack.c.bf16 %v5667_v52, %v6908_v14  ;;  %5678 = vpow2.f32 %v853_v49  ;;  %v787_v62 = vsub.f32 0.0, %v755_v54  ;;  %v731_v63 = vmul.f32 1.75, %v4496_v51 }
 0x268   :  { %v6934_v60 = vpop.eup %5670  ;;  %1421 = vmatmul.bf16.vlgmr.msra.gmra.mxu3 %v977_v11  ;;  %v983_v61 = vpack.c.bf16 %v6929_v55, %v6917_v27  ;;  %5680 = vpow2.f32 %v869_v29  ;;  %v795_v1 = vsub.f32 0.0, %v763_v58  ;;  %v732_v2 = vmul.f32 1.75, %v4497_v59 }
 0x269   :  { %v6938_v0 = vpop.eup %5672  ;;  %1440 = vmatmul.bf16.vlgmr.msrb.gmra.mxu0 %v978_v56  ;;  %v4500_v3 = vadd.f32 -1.4285715, %v6839_v33  ;;  %v4501_v8 = vadd.f32 -1.4285715, %v6882_v15  ;;  %v823_v13 = vmul.f32 1.442695, %v787_v62  ;;  %v756_v14 = vmul.f32 %v731_v63, %v731_v63 }
 0x26a   :  { %v984_v12 = vpack.c.bf16 %v6938_v0, %v6934_v60  ;;  %v4504_v17 = vadd.f32 -2.0, %v6839_v33  ;;  %v839_v16 = vmul.f32 1.442695, %v795_v1  ;;  %v764_v21 = vmul.f32 %v732_v2, %v732_v2 }
 0x26b   :  { %v6945_v20 = vpop.eup %5674  ;;  %v739_v22 = vmul.f32 1.75, %v4500_v3  ;;  %v740_v23 = vmul.f32 1.75, %v4501_v8  ;;  %5682 = vpow2.f32 %v823_v13  ;;  %v788_v19 = vsub.f32 0.0, %v756_v14 }
 0x26c   :  { %v5677_v7 = vpop.eup %5676  ;;  %v4505_v25 = vadd.f32 -2.0, %v6882_v15  ;;  %v747_v6 = vmul.f32 1.75, %v4504_v17  ;;  %5684 = vpow2.f32 %v839_v16  ;;  %v796_v24 = vsub.f32 0.0, %v764_v21 }
 0x26d   :  { %v5679_v18 = vpop.eup %5678  ;;  %v985_v26 = vpack.c.bf16 %v5677_v7, %v6945_v20  ;;  %v757_v30 = vmul.f32 %v739_v22, %v739_v22  ;;  %v825_v31 = vmul.f32 1.442695, %v788_v19  ;;  %v765_v32 = vmul.f32 %v740_v23, %v740_v23 }
 0x26e   :  { %v5681_v33 = vpop.eup %5680  ;;  %v748_v34 = vmul.f32 1.75, %v4505_v25  ;;  %v758_v35 = vmul.f32 %v747_v6, %v747_v6  ;;  %v841_v37 = vmul.f32 1.442695, %v796_v24  ;;  %v4494_v40 = vadd.f32 -0.2857143, %v6848_v39 }
 0x26f   :  { %v986_v36 = vpack.c.bf16 %v5681_v33, %v5679_v18  ;;  %v789_v38 = vsub.f32 0.0, %v757_v30  ;;  %5686 = vpow2.f32 %v825_v31  ;;  %v797_v41 = vsub.f32 0.0, %v765_v32 }
 0x270   :  { %v766_v15 = vmul.f32 %v748_v34, %v748_v34  ;;  %v790_v42 = vsub.f32 0.0, %v758_v35  ;;  %5688 = vpow2.f32 %v841_v37  ;;  %v4495_v44 = vadd.f32 -0.2857143, %v6879_v9 }
 0x271   :  { %v827_v43 = vmul.f32 1.442695, %v789_v38  ;;  %v725_v45 = vmul.f32 1.75, %v4494_v40  ;;  %v6951_v46 = vpop.eup %5682  ;;  %v843_v10 = vmul.f32 1.442695, %v797_v41  ;;  %v4506_v48 = vadd.f32 -2.0, %v6848_v39 }
 0x272   :  { %v798_v28 = vsub.f32 0.0, %v766_v15  ;;  %v829_v47 = vmul.f32 1.442695, %v790_v42  ;;  %v6954_v49 = vpop.eup %5684  ;;  %v726_v50 = vmul.f32 1.75, %v4495_v44  ;;  %v4498_v52 = vadd.f32 -0.85714287, %v6848_v39 }
 0x273   :  { %5690 = vpow2.f32 %v827_v43  ;;  %v771_v51 = vmul.f32 %v725_v45, %v725_v45  ;;  %v979_v11 = vpack.c.bf16 %v6954_v49, %v6951_v46  ;;  %v4499_v53 = vadd.f32 -0.85714287, %v6879_v9 }
 0x274   :  { %5692 = vpow2.f32 %v843_v10  ;;  %v845_v29 = vmul.f32 1.442695, %v798_v28  ;;  %v779_v54 = vmul.f32 %v726_v50, %v726_v50  ;;  %v733_v57 = vmul.f32 1.75, %v4498_v52 }
 0x275   :  { %5694 = vpow2.f32 %v829_v47  ;;  %v803_v56 = vsub.f32 0.0, %v771_v51  ;;  %v5687_v58 = vpop.eup %5686  ;;  %v734_v59 = vmul.f32 1.75, %v4499_v53  ;;  %v4502_v60 = vadd.f32 -1.4285715, %v6848_v39 }
 0x276   :  { %1388 = vmatmul.bf16.gmra.mxu1 %v983_v61  ;;  %5696 = vpow2.f32 %v845_v29  ;;  %v4503_v62 = vadd.f32 -1.4285715, %v6879_v9  ;;  %v5689_v63 = vpop.eup %5688  ;;  %v811_v0 = vsub.f32 0.0, %v779_v54  ;;  %v772_v2 = vmul.f32 %v733_v57, %v733_v57 }
 0x277   :  { %1407 = vmatmul.bf16.gmra.mxu2 %v984_v12  ;;  %v855_v1 = vmul.f32 1.442695, %v803_v56  ;;  %v4507_v3 = vadd.f32 -2.0, %v6879_v9  ;;  %v980_v8 = vpack.c.bf16 %v5689_v63, %v5687_v58  ;;  %v780_v13 = vmul.f32 %v734_v59, %v734_v59 }
 0x278   :  { %1426 = vmatmul.bf16.gmra.mxu3 %v985_v26  ;;  %v741_v14 = vmul.f32 1.75, %v4502_v60  ;;  %v742_v17 = vmul.f32 1.75, %v4503_v62  ;;  %v871_v55 = vmul.f32 1.442695, %v811_v0  ;;  %v804_v61 = vsub.f32 0.0, %v772_v2 }
 0x279   :  { %v5691_v27 = vpop.eup %5690  ;;  %1445 = vmatmul.bf16.gmra.mxu0 %v986_v36  ;;  %5698 = vpow2.f32 %v855_v1  ;;  %v749_v39 = vmul.f32 1.75, %v4506_v48  ;;  %v812_v16 = vsub.f32 0.0, %v780_v13  ;;  %v750_v22 = vmul.f32 1.75, %v4507_v3  ;;  %v965_v48 = vpop.f32.mrf.mxu0 }
 0x27a   :  { %v5693_v20 = vpop.eup %5692  ;;  %v773_v21 = vmul.f32 %v741_v14, %v741_v14  ;;  %v781_v12 = vmul.f32 %v742_v17, %v742_v17  ;;  %5700 = vpow2.f32 %v871_v55  ;;  %v857_v9 = vmul.f32 1.442695, %v804_v61 }
 0x27b   :  { %v5695_v23 = vpop.eup %5694  ;;  %v981_v7 = vpack.c.bf16 %v5693_v20, %v5691_v27  ;;  %v774_v19 = vmul.f32 %v749_v39, %v749_v39  ;;  %v873_v6 = vmul.f32 1.442695, %v812_v16  ;;  %v782_v24 = vmul.f32 %v750_v22, %v750_v22  ;;  %v6976_v39 = vld [vmem:[%s8049_s20] ss:$0 sm:$0xff] }
 0x27c   :  { %v5697_v25 = vpop.eup %5696  ;;  %v805_v18 = vsub.f32 0.0, %v773_v21  ;;  %v813_v26 = vsub.f32 0.0, %v781_v12  ;;  %5702 = vpow2.f32 %v857_v9 }
 0x27d   :  { %v982_v30 = vpack.c.bf16 %v5697_v25, %v5695_v23  ;;  %v806_v33 = vsub.f32 0.0, %v774_v19  ;;  %5704 = vpow2.f32 %v873_v6  ;;  %v814_v34 = vsub.f32 0.0, %v782_v24  ;;  %v6980_v25 = vld [vmem:[%s8050_s8 + $0x50] sm:$0xff] }
 0x27e   :  { %v859_v31 = vmul.f32 1.442695, %v805_v18  ;;  %v875_v32 = vmul.f32 1.442695, %v813_v26  ;;  %v6983_v6 = vld [vmem:[%s8051_s14 + $0x30] sm:$0xff] }
 0x27f   :  { %v5699_v35 = vpop.eup %5698  ;;  %v861_v36 = vmul.f32 1.442695, %v806_v33  ;;  %v877_v37 = vmul.f32 1.442695, %v814_v34 }
 0x280   :  { %5706 = vpow2.f32 %v859_v31  ;;  %v5701_v38 = vpop.eup %5700  ;;  %v6988_v31 = vld [vmem:[%s8050_s8 + $0x40] sm:$0xff] }
 0x281   :  { %5708 = vpow2.f32 %v875_v32  ;;  %v987_v40 = vpack.c.bf16 %v5701_v38, %v5699_v35  ;;  %v967_v50 = vpop.f32.mrf.mxu0  ;;  %v6991_v32 = vld [vmem:[%s8051_s14 + $0x20] sm:$0xff] }
 0x282   :  { %5710 = vpow2.f32 %v861_v36  ;;  %v5703_v41 = vpop.eup %5702 }
 0x283   :  { %5712 = vpow2.f32 %v877_v37  ;;  %v5705_v15 = vpop.eup %5704 }
 0x284   :  { %v988_v42 = vpack.c.bf16 %v5705_v15, %v5703_v41 }
 0x286   :  { %v5707_v43 = vpop.eup %5706  ;;  %1459 = vmatmul.bf16.vlgmr.msrb.gmra.mxu1 %v979_v11 }
 0x287   :  { %v5709_v44 = vpop.eup %5708  ;;  %1478 = vmatmul.bf16.vlgmr.msrb.gmra.mxu2 %v980_v8 }
 0x288   :  { %v5711_v45 = vpop.eup %5710  ;;  %1497 = vmatmul.bf16.vlgmr.msrb.gmra.mxu3 %v981_v7  ;;  %v989_v10 = vpack.c.bf16 %v5709_v44, %v5707_v43  ;;  %v966_v7 = vadd.f32 %v6976_v39, %v965_v48  ;;  %v7001_v44 = vld [vmem:[%s8051_s14 + $0x10] sm:$0xff] }
 0x289   :  { %v5713_v28 = vpop.eup %5712  ;;  %1516 = vmatmul.bf16.vlgmr.msra.gmra.mxu0 %v982_v30  ;;  %v6969_v51 = vpop.f32.mrf.mxu0 }
 0x28a   :  { %v990_v47 = vpack.c.bf16 %v5713_v28, %v5711_v45  ;;  %v7004_v28 = vld [vmem:[%s8050_s8 + $0x30] sm:$0xff] }
 0x291   :  { %v6971_v52 = vpop.f32.mrf.mxu0 }
 0x296   :  { %1464 = vmatmul.bf16.gmra.mxu1 %v987_v40 }
 0x297   :  { %1483 = vmatmul.bf16.gmra.mxu2 %v988_v42  ;;  %v968_v42 = vadd.f32 %v6976_v39, %v967_v50 }
 0x298   :  { %1502 = vmatmul.bf16.gmra.mxu3 %v989_v10 }
 0x299   :  { %1521 = vmatmul.bf16.gmra.mxu0 %v990_v47 }
 0x2e3   :  { %v1384_v46 = vpop.f32.mrf.mxu1 }
 0x2e6   :  { %v1441_v49 = vpop.f32.mrf.mxu0 }
 0x2ea   :  { %v1403_v11 = vpop.f32.mrf.mxu2 }
 0x2eb   :  { %v1422_v29 = vpop.f32.mrf.mxu3  ;;  %v1386_v53 = vpop.f32.mrf.mxu1  ;;  %v1404_v1 = vadd.f32 %v1403_v11, %v1384_v46  ;;  %v7009_v46 = vld [vmem:[%s8050_s8 + $0x58] sm:$0xff] }
 0x2ed   :  { %v1423_v3 = vadd.f32 %v1422_v29, %v1404_v1 }
 0x2ee   :  { %v1443_v54 = vpop.f32.mrf.mxu0 }
 0x2ef   :  { %v1442_v17 = vadd.f32 %v1441_v49, %v1423_v3  ;;  %v7012_v49 = vld [vmem:[%s8051_s14 + $0x38] sm:$0xff] }
 0x2f2   :  { %v1405_v56 = vpop.f32.mrf.mxu2 }
 0x2f3   :  { %v1424_v57 = vpop.f32.mrf.mxu3  ;;  %v1389_v58 = vpop.f32.mrf.mxu1  ;;  %v1406_v14 = vadd.f32 %v1405_v56, %v1386_v53  ;;  %v7021_v56 = vld [vmem:[%s8051_s14 + $0x28] sm:$0xff] }
 0x2f5   :  { %v1425_v20 = vadd.f32 %v1424_v57, %v1406_v14 }
 0x2f6   :  { %v1446_v59 = vpop.f32.mrf.mxu0 }
 0x2f7   :  { %v1444_v19 = vadd.f32 %v1443_v54, %v1425_v20  ;;  %v7018_v54 = vld [vmem:[%s8050_s8 + $0x48] sm:$0xff] }
 0x2fa   :  { %v1408_v60 = vpop.f32.mrf.mxu2 }
 0x2fb   :  { %v1427_v62 = vpop.f32.mrf.mxu3  ;;  %v1391_v63 = vpop.f32.mrf.mxu1  ;;  %v1409_v23 = vadd.f32 %v1408_v60, %v1389_v58 }
 0x2fd   :  { %v1428_v24 = vadd.f32 %v1427_v62, %v1409_v23  ;;  %v7025_v62 = vld [vmem:[%s8051_s14] sm:$0xff] }
 0x2fe   :  { %v6973_v0 = vpop.f32.mrf.mxu0 }
 0x2ff   :  { %v1447_v43 = vadd.f32 %v1446_v59, %v1428_v24 }
 0x302   :  { %v1410_v2 = vpop.f32.mrf.mxu2 }
 0x303   :  { %v1429_v8 = vpop.f32.mrf.mxu3  ;;  %v1460_v13 = vpop.f32.mrf.mxu1  ;;  %v1411_v45 = vadd.f32 %v1410_v2, %v1391_v63 }
 0x304   :  { %v1461_v55 = vadd.f32 %v1460_v13, %v1442_v17 }
 0x305   :  { %v1430_v58 = vadd.f32 %v1429_v8, %v1411_v45  ;;  %v971_v8 = vadd.f32 %v6976_v39, %v6969_v51 }
 0x306   :  { %v1517_v27 = vpop.f32.mrf.mxu0 }
 0x30a   :  { %v1479_v61 = vpop.f32.mrf.mxu2 }
 0x30b   :  { %v1480_v16 = vadd.f32 %v1479_v61, %v1461_v55  ;;  %v1498_v21 = vpop.f32.mrf.mxu3  ;;  %v1462_v12 = vpop.f32.mrf.mxu1  ;;  %v7037_v55 = vld [vmem:[%s8050_s8 + $0x38] sm:$0xff] }
 0x30c   :  { %v1463_v26 = vadd.f32 %v1462_v12, %v1444_v19  ;;  %v7040_v61 = vld [vmem:[%s8051_s14 + $0x18] sm:$0xff]  ;;  %v1449_v12 = vadd.f32 %v6973_v0, %v1430_v58  ;;  %v1536_v58 = vld [vmem:[%s8050_s8 + $0x10] sm:$0xff] }
 0x30d   :  { %v1499_v22 = vadd.f32 %v1498_v21, %v1480_v16 }
 0x30e   :  { %v1519_v30 = vpop.f32.mrf.mxu0 }
 0x30f   :  { %v1518_v9 = vadd.f32 %v1517_v27, %v1499_v22  ;;  %v7046_v22 = vld [vmem:[%s8050_s8 + $0x20] sm:$0xff] }
 0x311   :  { %v6985_v18 = vadd.f32 %v1518_v9, %v966_v7 }
 0x312   :  { %v1481_v33 = vpop.f32.mrf.mxu2 }
 0x313   :  { %v1482_v34 = vadd.f32 %v1481_v33, %v1463_v26  ;;  %v1500_v35 = vpop.f32.mrf.mxu3  ;;  %v1554_v36 = vmul.f32 %v6980_v25, %v6985_v18  ;;  %v1594_v37 = vmul.f32 %v6983_v6, %v6985_v18  ;;  %v1465_v38 = vpop.f32.mrf.mxu1  ;;  %v1539_v33 = vld [vmem:[%s8050_s8 + $0x28] sm:$0xff] }
 0x314   :  { %v1466_v29 = vadd.f32 %v1465_v38, %v1447_v43 }
 0x315   :  { %v1501_v40 = vadd.f32 %v1500_v35, %v1482_v34  ;;  %v1558_v41 = vadd.f32 %v1554_v36, %v6988_v31  ;;  %v1598_v15 = vadd.f32 %v1594_v37, %v6991_v32  ;;  %v1547_v34 = vld [vmem:[%s8051_s14 + $0x8] sm:$0xff] }
 0x316   :  { %v1522_v2 = vpop.f32.mrf.mxu0 }
 0x317   :  { %v1520_v10 = vadd.f32 %v1519_v30, %v1501_v40  ;;  %v1562_v47 = vmul.f32 %v1558_v41, %v6985_v18  ;;  %v1602_v48 = vmul.f32 %v1598_v15, %v6985_v18 }
 0x319   :  { %v7014_v11 = vadd.f32 %v1520_v10, %v968_v42  ;;  %v1606_v50 = vadd.f32 %v1602_v48, %v7001_v44  ;;  %v1566_v57 = vadd.f32 %v1562_v47, %v7004_v28 }
 0x31a   :  { %v1484_v53 = vpop.f32.mrf.mxu2 }
 0x31b   :  { %v1485_v59 = vadd.f32 %v1484_v53, %v1466_v29  ;;  %v1503_v60 = vpop.f32.mrf.mxu3  ;;  %v1556_v63 = vmul.f32 %v7009_v46, %v7014_v11  ;;  %v1596_v1 = vmul.f32 %v7012_v49, %v7014_v11  ;;  %v1610_v3 = vmul.f32 %v1606_v50, %v6985_v18  ;;  %v1467_v27 = vpop.f32.mrf.mxu1 }
 0x31c   :  { %v1570_v20 = vmul.f32 %v1566_v57, %v6985_v18  ;;  %v1468_v19 = vadd.f32 %v1467_v27, %v1449_v12  ;;  %v973_v53 = vadd.f32 %v6976_v39, %v6971_v52 }
 0x31d   :  { %v1504_v13 = vadd.f32 %v1503_v60, %v1485_v59  ;;  %v1560_v14 = vadd.f32 %v1556_v63, %v7018_v54  ;;  %v1600_v17 = vadd.f32 %v1596_v1, %v7021_v56  ;;  %v1614_v16 = vadd.f32 %v1610_v3, %v7025_v62 }
 0x31e   :  { %v1574_v0 = vadd.f32 %v1570_v20, %v7046_v22  ;;  %v1524_v10 = vpop.f32.mrf.mxu0 }
 0x31f   :  { %v1523_v21 = vadd.f32 %v1522_v2, %v1504_v13  ;;  %v1564_v23 = vmul.f32 %v1560_v14, %v7014_v11  ;;  %v1604_v51 = vmul.f32 %v1600_v17, %v7014_v11  ;;  %v1618_v7 = vmul.f32 %v1614_v16, %v6985_v18 }
 0x320   :  { %v1578_v47 = vmul.f32 %v1574_v0, %v6985_v18 }
 0x321   :  { %v7051_v9 = vadd.f32 %v1523_v21, %v971_v8  ;;  %v1568_v26 = vadd.f32 %v1564_v23, %v7037_v55  ;;  %v1608_v24 = vadd.f32 %v1604_v51, %v7040_v61  ;;  %v1622_v35 = vand.u32 2147483647, %v1618_v7  ;;  %v1534_v21 = vld [vmem:[%s8050_s8] sm:$0xff] }
 0x322   :  { %v1486_v30 = vpop.f32.mrf.mxu2 }
 0x323   :  { %v1487_v36 = vadd.f32 %v1486_v30, %v1468_v19  ;;  %v1572_v37 = vmul.f32 %v1568_v26, %v7014_v11  ;;  %v1612_v38 = vmul.f32 %v1608_v24, %v7014_v11  ;;  %v1505_v40 = vpop.f32.mrf.mxu3  ;;  %v1555_v41 = vmul.f32 %v6980_v25, %v7051_v9  ;;  %v1537_v25 = vld [vmem:[%s8050_s8 + $0x18] sm:$0xff] }
 0x324   :  { %v1595_v15 = vmul.f32 %v6983_v6, %v7051_v9  ;;  %v1626_v48 = vadd.f32 1.0, %v1622_v35 }
 0x325   :  { %v1506_v42 = vadd.f32 %v1505_v40, %v1487_v36  ;;  %v1576_v43 = vadd.f32 %v1572_v37, %v1539_v33  ;;  %v1616_v45 = vadd.f32 %v1612_v38, %v1547_v34  ;;  %v1559_v29 = vadd.f32 %v1555_v41, %v6988_v31  ;;  %v5401_v41 = vld [vmem:[%s8052_s30] sm:$0xff] }
 0x326   :  { %v1599_v50 = vadd.f32 %v1595_v15, %v6991_v32  ;;  %v1582_v31 = vadd.f32 %v1578_v47, %v1536_v58  ;;  %5714 = vrcp.f32 %v1626_v48 }
 0x327   :  { %v1525_v57 = vadd.f32 %v1524_v10, %v1506_v42  ;;  %v1580_v59 = vmul.f32 %v1576_v43, %v7014_v11  ;;  %v1620_v6 = vmul.f32 %v1616_v45, %v7014_v11  ;;  %v1563_v60 = vmul.f32 %v1559_v29, %v7051_v9 }
 0x328   :  { %v1603_v63 = vmul.f32 %v1599_v50, %v7051_v9  ;;  %v1586_v27 = vmul.f32 %v1582_v31, %v6985_v18  ;;  %v7118_v31 = vld [vmem:[#allocation5 + $0x8] sm:$0xff] }
 0x329   :  { %v7075_v1 = vadd.f32 %v1525_v57, %v973_v53  ;;  %v1624_v2 = vand.u32 2147483647, %v1620_v6  ;;  %v1584_v32 = vadd.f32 %v1580_v59, %v1537_v25  ;;  %v1567_v13 = vadd.f32 %v1563_v60, %v7004_v28  ;;  %v7112_v60 = vld [vmem:[%s8053_s2 + $0x40] sm:$0xff] }
 0x32a   :  { %v1607_v52 = vadd.f32 %v1603_v63, %v7001_v44  ;;  %v1590_v7 = vadd.f32 %v1586_v27, %v1534_v21  ;;  %v7115_v63 = vld [vmem:[%s8053_s2 + $0x50] sm:$0xff] }
 0x32b   :  { %v1628_v39 = vadd.f32 1.0, %v1624_v2  ;;  %v1557_v3 = vmul.f32 %v7009_v46, %v7075_v1  ;;  %v1597_v14 = vmul.f32 %v7012_v49, %v7075_v1  ;;  %v1588_v20 = vmul.f32 %v1584_v32, %v7014_v11  ;;  %v1535_v46 = vld [vmem:[%s8050_s8 + $0x8] sm:$0xff]  ;;  %v7121_v32 = vld [vmem:[%s8054_s3 + $0x20] sm:$0xff] }
 0x32c   :  { %v1611_v17 = vmul.f32 %v1607_v52, %v7051_v9  ;;  %v1571_v12 = vmul.f32 %v1567_v13, %v7051_v9  ;;  %v5715_v49 = vpop.eup %5714  ;;  %v7124_v52 = vld [vmem:[%s8054_s3 + $0x30] sm:$0xff] }
 0x32d   :  { %5716 = vrcp.f32 %v1628_v39  ;;  %v1561_v8 = vadd.f32 %v1557_v3, %v7018_v54  ;;  %v1601_v44 = vadd.f32 %v1597_v14, %v7021_v56  ;;  %v1592_v19 = vadd.f32 %v1588_v20, %v1535_v46  ;;  %v7128_v3 = vld [vmem:[%s8053_s2 + $0x30] sm:$0xff] }
 0x32e   :  { %v1615_v16 = vadd.f32 %v1611_v17, %v7025_v62  ;;  %v1575_v24 = vadd.f32 %v1571_v12, %v7046_v22  ;;  %v1634_v30 = vmul.f32 %v5715_v49, %v1590_v7  ;;  %v7132_v17 = vld [vmem:[%s8053_s2 + $0x58] sm:$0xff] }
 0x32f   :  { %v1565_v28 = vmul.f32 %v1561_v8, %v7075_v1  ;;  %v1605_v23 = vmul.f32 %v1601_v44, %v7075_v1  ;;  %v7135_v8 = vld [vmem:[%s8054_s3 + $0x38] sm:$0xff] }
 0x330   :  { %v1619_v54 = vmul.f32 %v1615_v16, %v7051_v9  ;;  %v7140_v16 = vld [vmem:[%s8053_s2 + $0x48] sm:$0xff] }
 0x331   :  { %v1569_v51 = vadd.f32 %v1565_v28, %v7037_v55  ;;  %v1609_v56 = vadd.f32 %v1605_v23, %v7040_v61  ;;  %v1579_v55 = vmul.f32 %v1575_v24, %v7051_v9  ;;  %v7164_v24 = vld [vmem:[%s8053_s2 + $0x20] sm:$0xff] }
 0x332   :  { %v1623_v36 = vand.u32 2147483647, %v1619_v54 }
 0x333   :  { %v5717_v26 = vpop.eup %5716  ;;  %v1573_v62 = vmul.f32 %v1569_v51, %v7075_v1  ;;  %v1613_v35 = vmul.f32 %v1609_v56, %v7075_v1  ;;  %v1583_v22 = vadd.f32 %v1579_v55, %v1536_v58  ;;  %v7158_v56 = vld [vmem:[%s8054_s3] sm:$0xff] }
 0x334   :  { %v1636_v0 = vmul.f32 %v5717_v26, %v1592_v19  ;;  %v1627_v42 = vadd.f32 1.0, %v1623_v36  ;;  %v7155_v19 = vld [vmem:[%s8053_s2 + $0x38] sm:$0xff] }
 0x335   :  { %v1577_v37 = vadd.f32 %v1573_v62, %v1539_v33  ;;  %v1617_v40 = vadd.f32 %v1613_v35, %v1547_v34  ;;  %v1587_v33 = vmul.f32 %v1583_v22, %v7051_v9  ;;  %v7161_v26 = vld [vmem:[%s8054_s3 + $0x18] sm:$0xff] }
 0x336   :  { %v1640_v38 = vpack.c.bf16 %v1636_v0, %v1634_v30  ;;  %5718 = vrcp.f32 %v1627_v42 }
 0x337   :  { %v1581_v15 = vmul.f32 %v1577_v37, %v7075_v1  ;;  %v1621_v61 = vmul.f32 %v1617_v40, %v7075_v1  ;;  %v1591_v48 = vadd.f32 %v1587_v33, %v1534_v21  ;;  %v7143_v21 = vld [vmem:[%s8054_s3 + $0x10] sm:$0xff]  ;;  %v7170_v40 = vld [vmem:[%s8053_s2 + $0x28] sm:$0xff] }
 0x338   :  { %1660 = vmatpush.bf16.msra.mxu1 %v1640_v38  ;;  %v7179_v33 = vld [vmem:[%s8053_s2 + $0x10] sm:$0xff] }
 0x339   :  { %v1625_v43 = vand.u32 2147483647, %v1621_v61  ;;  %v1585_v45 = vadd.f32 %v1581_v15, %v1537_v25  ;;  %v7108_v25 = vld [vmem:[#allocation5] sm:$0xff] }
 0x33b   :  { %4801 = vmatmul.msk.bf16.vlgmr.msra.gmra.mxu1 %vm1649_vm15, %v5401_v41  ;;  %v1629_v10 = vadd.f32 1.0, %v1625_v43  ;;  %v1589_v34 = vmul.f32 %v1585_v45, %v7075_v1 }
 0x33c   :  { %v5719_v47 = vpop.eup %5718 }
 0x33d   :  { %5720 = vrcp.f32 %v1629_v10  ;;  %v1593_v29 = vadd.f32 %v1589_v34, %v1535_v46  ;;  %v1635_v53 = vmul.f32 %v5719_v47, %v1591_v48  ;;  %v7146_v46 = vld [vmem:[%s8054_s3 + $0x28] sm:$0xff]  ;;  %v7182_v34 = vld [vmem:[%s8053_s2 + $0x18] sm:$0xff] }
 0x343   :  { %v5721_v50 = vpop.eup %5720 }
 0x344   :  { %v1637_v57 = vmul.f32 %v5721_v50, %v1593_v29  ;;  %v6399_v50 = vmov 16.0  }
 0x345   :  { %5722 = vrcp.f32 %v6399_v50 }
 0x346   :  { %v1641_v58 = vpack.c.bf16 %v1637_v57, %v1635_v53 }
 0x348   :  { %1674 = vmatpush.bf16.msra.mxu2 %v1641_v58 }
 0x34b   :  { %4802 = vmatmul.msk.bf16.vlgmr.msra.gmra.mxu2 %vm1649_vm15, %v5401_v41  ;;  %v7173_v41 = vld [vmem:[%s8054_s3 + $0x8] sm:$0xff] }
 0x3b8   :  { %v1662_v59 = vpop.f32.mrf.mxu1 }
 0x3b9   :  { %v1663_v6 = vadd.f32 %v1662_v59, %v7108_v25 }
 0x3bb   :  { %v1701_v2 = vmul.f32 %v7115_v63, %v1663_v6  ;;  %v1741_v13 = vmul.f32 %v7124_v52, %v1663_v6 }
 0x3bd   :  { %v1705_v39 = vadd.f32 %v1701_v2, %v7112_v60  ;;  %v1745_v44 = vadd.f32 %v1741_v13, %v7121_v32 }
 0x3bf   :  { %v1709_v27 = vmul.f32 %v1705_v39, %v1663_v6  ;;  %v1749_v23 = vmul.f32 %v1745_v44, %v1663_v6  ;;  %v5723_v39 = vpop.eup %5722  ;;  %v7190_v44 = vld [vmem:[%s8053_s2 + $0x8] sm:$0xff] }
 0x3c0   :  { %v1664_v14 = vpop.f32.mrf.mxu1  ;;  %vm1808_vm0 = vweird.f32 %v5723_v39 }
 0x3c1   :  { %v1665_v20 = vadd.f32 %v1664_v14, %v7118_v31  ;;  %v1713_v28 = vadd.f32 %v1709_v27, %v7128_v3  ;;  %v1753_v7 = vadd.f32 %v1749_v23, %v7143_v21  ;;  %v7187_v27 = vld [vmem:[%s8053_s2] sm:$0xff] }
 0x3c3   :  { %v1703_v12 = vmul.f32 %v7132_v17, %v1665_v20  ;;  %v1743_v49 = vmul.f32 %v7135_v8, %v1665_v20  ;;  %v1717_v62 = vmul.f32 %v1713_v28, %v1663_v6  ;;  %v1757_v35 = vmul.f32 %v1753_v7, %v1663_v6 }
 0x3c5   :  { %v1707_v54 = vadd.f32 %v1703_v12, %v7140_v16  ;;  %v1747_v51 = vadd.f32 %v1743_v49, %v7146_v46  ;;  %v1761_v38 = vadd.f32 %v1757_v35, %v7158_v56  ;;  %v1721_v55 = vadd.f32 %v1717_v62, %v7164_v24 }
 0x3c6   :  { %v1804_v49 = vmul.f32 16.0, %v5723_v39 }
 0x3c7   :  { %v1711_v30 = vmul.f32 %v1707_v54, %v1665_v20  ;;  %v1751_v0 = vmul.f32 %v1747_v51, %v1665_v20  ;;  %v1765_v42 = vmul.f32 %v1761_v38, %v1663_v6  ;;  %v1725_v10 = vmul.f32 %v1721_v55, %v1663_v6 }
 0x3c9   :  { %v1715_v36 = vadd.f32 %v1711_v30, %v7155_v19  ;;  %v1755_v37 = vadd.f32 %v1751_v0, %v7161_v26  ;;  %v1769_v45 = vand.u32 2147483647, %v1765_v42  ;;  %v1729_v57 = vadd.f32 %v1725_v10, %v7179_v33 }
 0x3ca   :  { %v1805_v30 = vsub.f32 1.0, %v1804_v49 }
 0x3cb   :  { %v1719_v15 = vmul.f32 %v1715_v36, %v1665_v20  ;;  %v1759_v61 = vmul.f32 %v1755_v37, %v1665_v20  ;;  %v1773_v29 = vadd.f32 1.0, %v1769_v45  ;;  %v1733_v13 = vmul.f32 %v1729_v57, %v1663_v6 }
 0x3cc   :  { %v1806_v55 = vmul.f32 %v5723_v39, %v1805_v30 }
 0x3cd   :  { %v1723_v43 = vadd.f32 %v1719_v15, %v7170_v40  ;;  %v1763_v22 = vadd.f32 %v1759_v61, %v7173_v41  ;;  %5724 = vrcp.f32 %v1773_v29  ;;  %v1737_v23 = vadd.f32 %v1733_v13, %v7187_v27 }
 0x3ce   :  { %v1676_v2 = vpop.f32.mrf.mxu2 }
 0x3cf   :  { %v1727_v47 = vmul.f32 %v1723_v43, %v1665_v20  ;;  %v1767_v48 = vmul.f32 %v1763_v22, %v1665_v20  ;;  %v7193_v12 = vadd.f32 %v1676_v2, %v7108_v25  ;;  %v1807_v22 = vadd.f32 %v5723_v39, %v1806_v55 }
 0x3d1   :  { %v1771_v53 = vand.u32 2147483647, %v1767_v48  ;;  %v1731_v58 = vadd.f32 %v1727_v47, %v7182_v34  ;;  %v1702_v6 = vmul.f32 %v7115_v63, %v7193_v12  ;;  %v7215_v50 = vsel %vm1808_vm0, %v5723_v39, %v1807_v22 }
 0x3d3   :  { %v1775_v59 = vadd.f32 1.0, %v1771_v53  ;;  %v1735_v14 = vmul.f32 %v1731_v58, %v1665_v20  ;;  %v5725_v28 = vpop.eup %5724  ;;  %v1742_v20 = vmul.f32 %v7124_v52, %v7193_v12  ;;  %v1706_v25 = vadd.f32 %v1702_v6, %v7112_v60 }
 0x3d4   :  { %v1781_v7 = vmul.f32 %v5725_v28, %v1737_v23 }
 0x3d5   :  { %5726 = vrcp.f32 %v1775_v59  ;;  %v1739_v54 = vadd.f32 %v1735_v14, %v7190_v44  ;;  %v1746_v36 = vadd.f32 %v1742_v20, %v7121_v32  ;;  %v1710_v15 = vmul.f32 %v1706_v25, %v7193_v12 }
 0x3d6   :  { %v1678_v0 = vpop.f32.mrf.mxu2 }
 0x3d7   :  { %v1679_v38 = vadd.f32 %v1678_v0, %v7118_v31  ;;  %v1750_v61 = vmul.f32 %v1746_v36, %v7193_v12  ;;  %v1714_v52 = vadd.f32 %v1710_v15, %v7128_v3 }
 0x3d9   :  { %v1754_v63 = vadd.f32 %v1750_v61, %v7143_v21  ;;  %v1704_v45 = vmul.f32 %v7132_v17, %v1679_v38  ;;  %v1744_v60 = vmul.f32 %v7135_v8, %v1679_v38  ;;  %v1718_v21 = vmul.f32 %v1714_v52, %v7193_v12 }
 0x3db   :  { %v5727_v51 = vpop.eup %5726  ;;  %v1758_v32 = vmul.f32 %v1754_v63, %v7193_v12  ;;  %v1708_v31 = vadd.f32 %v1704_v45, %v7140_v16  ;;  %v1748_v47 = vadd.f32 %v1744_v60, %v7146_v46  ;;  %v1722_v46 = vadd.f32 %v1718_v21, %v7164_v24 }
 0x3dc   :  { %v1783_v62 = vmul.f32 %v5727_v51, %v1739_v54 }
 0x3dd   :  { %v1762_v48 = vadd.f32 %v1758_v32, %v7158_v56  ;;  %v1712_v3 = vmul.f32 %v1708_v31, %v1679_v38  ;;  %v1752_v53 = vmul.f32 %v1748_v47, %v1679_v38  ;;  %v1726_v54 = vmul.f32 %v1722_v46, %v7193_v12 }
 0x3de   :  { %v1789_v35 = vadd.f32 %v1783_v62, %v1781_v7 }
 0x3df   :  { %v1766_v17 = vmul.f32 %v1762_v48, %v7193_v12  ;;  %v1716_v57 = vadd.f32 %v1712_v3, %v7155_v19  ;;  %v1756_v58 = vadd.f32 %v1752_v53, %v7161_v26  ;;  %v1730_v24 = vadd.f32 %v1726_v54, %v7179_v33 }
 0x3e0   :  { %v1790_v37 = vrot.slane %v1789_v35, 4 }
 0x3e1   :  { %v1720_v59 = vmul.f32 %v1716_v57, %v1679_v38  ;;  %v1760_v56 = vmul.f32 %v1756_v58, %v1679_v38  ;;  %v1770_v2 = vand.u32 2147483647, %v1766_v17  ;;  %v1785_v57 = vld [vmem:[#allocation7] sm:$0xff]  ;;  %v1786_v58 = vld [vmem:[#allocation7 + $0x8] sm:$0xff] }
 0x3e2   :  { %v1791_v42 = vadd.f32 %v1790_v37, %v1789_v35 }
 0x3e3   :  { %v1724_v39 = vadd.f32 %v1720_v59, %v7170_v40  ;;  %v1764_v28 = vadd.f32 %v1760_v56, %v7173_v41  ;;  %v1774_v26 = vadd.f32 1.0, %v1770_v2  ;;  %v1734_v41 = vmul.f32 %v1730_v24, %v7193_v12  ;;  %v1787_v2 = vld [vmem:[#allocation8] sm:$0xff] }
 0x3e4   :  { %v1792_v43 = vrot.slane %v1791_v42, 2 }
 0x3e5   :  { %v1728_v19 = vmul.f32 %v1724_v39, %v1679_v38  ;;  %v1768_v51 = vmul.f32 %v1764_v28, %v1679_v38  ;;  %5728 = vrcp.f32 %v1774_v26  ;;  %v1738_v55 = vadd.f32 %v1734_v41, %v7187_v27  ;;  %v1788_v39 = vld [vmem:[#allocation8 + $0x8] sm:$0xff] }
 0x3e6   :  { %v1793_v10 = vadd.f32 %v1792_v43, %v1791_v42 }
 0x3e7   :  { %v1772_v6 = vand.u32 2147483647, %v1768_v51  ;;  %v1732_v0 = vadd.f32 %v1728_v19, %v7182_v34 }
 0x3e8   :  { %v1794_v29 = vrot.slane %v1793_v10, 1 }
 0x3e9   :  { %v1736_v35 = vmul.f32 %v1732_v0, %v1679_v38 }
 0x3ea   :  { %v1795_v8 = vadd.f32 %v1794_v29, %v1793_v10 }
 0x3eb   :  { %v5729_v36 = vpop.eup %5728  ;;  %v1740_v15 = vadd.f32 %v1736_v35, %v7190_v44 }
 0x3ec   :  { %v1810_v16 = vmul.f32 %v7215_v50, %v1795_v8  ;;  %v1782_v33 = vmul.f32 %v5729_v36, %v1738_v55 }
 0x3ee   :  { %v1812_v13 = vsub.f32 %v1781_v7, %v1810_v16  ;;  %v1814_v14 = vsub.f32 %v1783_v62, %v1810_v16  ;;  %v1776_v7 = vadd.f32 1.0, %v1772_v6  ;;  %v5402_v6 = vld [vmem:[#allocation10] sm:$0xff] }
 0x3f0   :  { %v1816_v49 = vmul.f32 %v1812_v13, %v1812_v13  ;;  %v1818_v23 = vmul.f32 %v1814_v14, %v1814_v14  ;;  %5730 = vrcp.f32 %v1776_v7 }
 0x3f2   :  { %v1820_v30 = vadd.f32 %v1818_v23, %v1816_v49 }
 0x3f4   :  { %v1821_v20 = vrot.slane %v1820_v30, 4 }
 0x3f6   :  { %v1822_v62 = vadd.f32 %v1821_v20, %v1820_v30  ;;  %v5731_v61 = vpop.eup %5730 }
 0x3f7   :  { %v1784_v63 = vmul.f32 %v5731_v61, %v1740_v15 }
 0x3f8   :  { %v1823_v40 = vrot.slane %v1822_v62, 2 }
 0x3f9   :  { %v1796_v43 = vadd.f32 %v1784_v63, %v1782_v33 }
 0x3fa   :  { %v1824_v25 = vadd.f32 %v1823_v40, %v1822_v62 }
 0x3fb   :  { %v1797_v22 = vrot.slane %v1796_v43, 4 }
 0x3fc   :  { %v1825_v37 = vrot.slane %v1824_v25, 1 }
 0x3fd   :  { %v1798_v45 = vadd.f32 %v1797_v22, %v1796_v43  ;;  %v7237_v43 = vld [vmem:[#allocation11] sm:$0xff] }
 0x3fe   :  { %v1826_v42 = vadd.f32 %v1825_v37, %v1824_v25 }
 0x3ff   :  { %v1799_v12 = vrot.slane %v1798_v45, 2 }
 0x400   :  { %v1834_v34 = vmul.f32 %v1826_v42, %v7215_v50 }
 0x401   :  { %v1800_v38 = vadd.f32 %v1799_v12, %v1798_v45  ;;  %v5407_v45 = vld [vmem:[%s8055_s25 + $0x20] sm:$0xff] }
 0x402   :  { %v1836_v52 = vadd.f32 1e-05, %v1834_v34  ;;  %v5409_v34 = vld [vmem:[%s8055_s25 + $0x30] sm:$0xff] }
 0x403   :  { %v1801_v32 = vrot.slane %v1800_v38, 1 }
 0x404   :  { %5732 = vrsqrt.f32 %v1836_v52  ;;  %vm1844_vm2 = vweird.f32 %v1836_v52 }
 0x405   :  { %v1802_v31 = vadd.f32 %v1801_v32, %v1800_v38  ;;  %v5406_v32 = vld [vmem:[%s8055_s25 + $0x18] sm:$0xff] }
 0x407   :  { %v1811_v44 = vmul.f32 %v7215_v50, %v1802_v31  ;;  %v7248_v31 = vld [vmem:[#allocation13 + $0x5] ss:$0 sm:$0xff] }
 0x409   :  { %v1813_v48 = vsub.f32 %v1782_v33, %v1811_v44  ;;  %v1815_v29 = vsub.f32 %v1784_v63, %v1811_v44  ;;  %v5410_v63 = vld [vmem:[%s8055_s25 + $0x38] sm:$0xff] }
 0x40a   :  { %v5733_v60 = vpop.eup %5732  ;;  %2110 = vmatpush.bf16.msrb.mxu0 %v5410_v63 }
 0x40b   :  { %v1839_v10 = vmul.f32 %v5733_v60, %v1836_v52  ;;  %vm1845_vm1 = vweird.f32 %v5733_v60  ;;  %v1817_v3 = vmul.f32 %v1813_v48, %v1813_v48  ;;  %v1819_v53 = vmul.f32 %v1815_v29, %v1815_v29  ;;  %v5408_v52 = vld [vmem:[%s8055_s25 + $0x28] sm:$0xff] }
 0x40c   :  { %vm1846_vm3 = vmor %vm1844_vm2, %vm1845_vm1 }
 0x40d   :  { %v1840_v27 = vmul.f32 %v5733_v60, %v1839_v10  ;;  %v1827_v8 = vadd.f32 %v1819_v53, %v1817_v3  ;;  %v7264_v53 = vld [vmem:[#allocation13 + $0x3] ss:$0 sm:$0xff] }
 0x40e   :  { %2111 = vmatpush.bf16.msrb.mxu0 %v5409_v34 }
 0x40f   :  { %v1841_v47 = vmul.f32 0.5, %v1840_v27  ;;  %v1828_v56 = vrot.slane %v1827_v8, 4  ;;  %v7250_v27 = vld [vmem:[#allocation13 + $0x4] ss:$0 sm:$0xff] }
 0x411   :  { %v1842_v21 = vsub.f32 1.5, %v1841_v47  ;;  %v1829_v23 = vadd.f32 %v1828_v56, %v1827_v8  ;;  %v5405_v47 = vld [vmem:[%s8055_s25 + $0x10] sm:$0xff]  ;;  %v5404_v8 = vld [vmem:[%s8055_s25 + $0x8] sm:$0xff] }
 0x412   :  { %2112 = vmatpush.bf16.msrb.mxu0 %v5408_v52 }
 0x413   :  { %v1843_v17 = vmul.f32 %v5733_v60, %v1842_v21  ;;  %v1830_v51 = vrot.slane %v1829_v23, 2 }
 0x415   :  { %v1847_v16 = vsel %vm1846_vm3, %v5733_v60, %v1843_v17  ;;  %v1831_v30 = vadd.f32 %v1830_v51, %v1829_v23  ;;  %v7245_v60 = vld [vmem:[#allocation11 + $0x8] sm:$0xff] }
 0x416   :  { %v1858_v46 = vmul.f32 %v1847_v16, %v1812_v13  ;;  %v1860_v59 = vmul.f32 %v1847_v16, %v1814_v14  ;;  %2113 = vmatpush.bf16.msrb.mxu0 %v5407_v45 }
 0x417   :  { %v1832_v20 = vrot.slane %v1831_v30, 1 }
 0x418   :  { %v1862_v28 = vmul.f32 %v1858_v46, %v1785_v57  ;;  %v1864_v49 = vmul.f32 %v1860_v59, %v1786_v58  ;;  %v7275_v46 = vld [vmem:[#allocation14 + $0x1] ss:$0 sm:$0xff] }
 0x419   :  { %v1833_v24 = vadd.f32 %v1832_v20, %v1831_v30 }
 0x41a   :  { %v1866_v54 = vadd.f32 %v1862_v28, %v1787_v2  ;;  %v1868_v19 = vadd.f32 %v1864_v49, %v1788_v39  ;;  %2114 = vmatpush.bf16.msrb.mxu0 %v5406_v32  ;;  %v5403_v49 = vld [vmem:[%s8055_s25] sm:$0xff] }
 0x41b   :  { %v1835_v13 = vmul.f32 %v1833_v24, %v7215_v50 }
 0x41c   :  { %v1872_v26 = vpack.c.bf16 %v1868_v19, %v1866_v54 }
 0x41d   :  { %v1837_v14 = vadd.f32 1e-05, %v1835_v13 }
 0x41e   :  { %1891 = vmatpush.bf16.msra.mxu3 %v1872_v26  ;;  %2115 = vmatpush.bf16.msrb.mxu0 %v5405_v47  ;;  %v7288_v26 = vld [vmem:[#allocation14] ss:$0 sm:$0xff] }
 0x41f   :  { %5734 = vrsqrt.f32 %v1837_v14  ;;  %vm1854_vm5 = vweird.f32 %v1837_v14 }
 0x421   :  { %4807 = vmatmul.msk.bf16.vlgmr.msra.gmra.mxu3 %vm1649_vm15, %v5402_v6 }
 0x422   :  { %2116 = vmatpush.bf16.msrb.mxu0 %v5404_v8 }
 0x425   :  { %v5735_v0 = vpop.eup %5734 }
 0x426   :  { %v1849_v7 = vmul.f32 %v5735_v0, %v1837_v14  ;;  %vm1855_vm4 = vweird.f32 %v5735_v0  ;;  %2117 = vmatpush.bf16.msrb.mxu0 %v5403_v49 }
 0x427   :  { %vm1856_vm6 = vmor %vm1854_vm5, %vm1855_vm4 }
 0x428   :  { %v1850_v62 = vmul.f32 %v5735_v0, %v1849_v7 }
 0x42a   :  { %v1851_v40 = vmul.f32 0.5, %v1850_v62 }
 0x42c   :  { %v1852_v41 = vsub.f32 1.5, %v1851_v40 }
 0x42e   :  { %v1853_v35 = vmul.f32 %v5735_v0, %v1852_v41  ;;  %v5577_v41 = vld [vmem:[#allocation13 + $0x1] ss:$0 sm:$0xff] }
 0x430   :  { %v1857_v25 = vsel %vm1856_vm6, %v5735_v0, %v1853_v35 }
 0x431   :  { %v1859_v36 = vmul.f32 %v1857_v25, %v1813_v48  ;;  %v1861_v37 = vmul.f32 %v1857_v25, %v1815_v29  ;;  %v7256_v29 = vld [vmem:[#allocation14 + $0x3] ss:$0 sm:$0xff] }
 0x433   :  { %v1863_v55 = vmul.f32 %v1859_v36, %v1785_v57  ;;  %v1865_v15 = vmul.f32 %v1861_v37, %v1786_v58 }
 0x435   :  { %v1867_v61 = vadd.f32 %v1863_v55, %v1787_v2  ;;  %v1869_v42 = vadd.f32 %v1865_v15, %v1788_v39  ;;  %v7280_v39 = vld [vmem:[#allocation13 + $0x2] ss:$0 sm:$0xff] }
 0x437   :  { %v1873_v33 = vpack.c.bf16 %v1869_v42, %v1867_v61 }
 0x439   :  { %1905 = vmatpush.bf16.msrb.mxu1 %v1873_v33 }
 0x43c   :  { %4808 = vmatmul.msk.bf16.vlgmr.msrb.gmra.mxu1 %vm1649_vm15, %v5402_v6 }
 0x4a4   :  { %v1893_v22 = vpop.f32.mrf.mxu3 }
 0x4a5   :  { %v1894_v12 = vadd.f32 %v1893_v22, %v7237_v43 }
 0x4a7   :  { %v7243_v38 = vadd.f32 %v1894_v12, %v6985_v18  ;;  %v7258_v18 = vld [vmem:[#allocation14 + $0x2] ss:$0 sm:$0xff]  ;;  %v5578_v12 = vld [vmem:[#allocation13] ss:$0 sm:$0xff] }
 0x4a9   :  { %v1929_v48 = vmul.f32 %v7248_v31, %v7243_v38  ;;  %v1987_v17 = vmul.f32 %v7256_v29, %v7243_v38 }
 0x4ab   :  { %v1936_v3 = vadd.f32 %v7250_v27, %v1929_v48 }
 0x4ac   :  { %v1895_v10 = vpop.f32.mrf.mxu3 }
 0x4ad   :  { %v1896_v44 = vadd.f32 %v1895_v10, %v7245_v60  ;;  %v1940_v16 = vmul.f32 %v1936_v3, %v7243_v38 }
 0x4af   :  { %v7261_v21 = vadd.f32 %v1896_v44, %v7014_v11  ;;  %v1994_v11 = vadd.f32 %v7258_v18, %v1987_v17  ;;  %v1947_v2 = vadd.f32 %v7264_v53, %v1940_v16 }
 0x4b1   :  { %v1930_v57 = vmul.f32 %v7248_v31, %v7261_v21  ;;  %v1988_v58 = vmul.f32 %v7256_v29, %v7261_v21  ;;  %v1998_v28 = vmul.f32 %v1994_v11, %v7243_v38  ;;  %v1951_v19 = vmul.f32 %v1947_v2, %v7243_v38 }
 0x4b3   :  { %v1937_v59 = vadd.f32 %v7250_v27, %v1930_v57  ;;  %v1995_v56 = vadd.f32 %v7258_v18, %v1988_v58  ;;  %v2005_v51 = vadd.f32 %v7275_v46, %v1998_v28  ;;  %v1958_v20 = vadd.f32 %v7280_v39, %v1951_v19 }
 0x4b5   :  { %v1941_v23 = vmul.f32 %v1937_v59, %v7261_v21  ;;  %v1999_v54 = vmul.f32 %v1995_v56, %v7261_v21  ;;  %v2009_v24 = vmul.f32 %v2005_v51, %v7243_v38  ;;  %v1962_v40 = vmul.f32 %v1958_v20, %v7243_v38 }
 0x4b7   :  { %v1948_v30 = vadd.f32 %v7264_v53, %v1941_v23  ;;  %v2006_v6 = vadd.f32 %v7275_v46, %v1999_v54  ;;  %v2016_v0 = vadd.f32 %v7288_v26, %v2009_v24  ;;  %v1969_v61 = vadd.f32 %v5577_v41, %v1962_v40 }
 0x4b9   :  { %v1952_v13 = vmul.f32 %v1948_v30, %v7261_v21  ;;  %v2010_v14 = vmul.f32 %v2006_v6, %v7261_v21  ;;  %v2020_v35 = vmul.f32 %v2016_v0, %v7243_v38  ;;  %v1907_v15 = vpop.f32.mrf.mxu1  ;;  %v1973_v22 = vmul.f32 %v1969_v61, %v7243_v38 }
 0x4ba   :  { %v1908_v63 = vadd.f32 %v1907_v15, %v7237_v43 }
 0x4bb   :  { %v1959_v7 = vadd.f32 %v7280_v39, %v1952_v13  ;;  %v2017_v62 = vadd.f32 %v7288_v26, %v2010_v14  ;;  %v2024_v37 = vand.u32 2147483647, %v2020_v35 }
 0x4bc   :  { %v7305_v52 = vadd.f32 %v1908_v63, %v7051_v9  ;;  %v1980_v9 = vadd.f32 %v5578_v12, %v1973_v22 }
 0x4bd   :  { %v1963_v25 = vmul.f32 %v1959_v7, %v7261_v21  ;;  %v2021_v36 = vmul.f32 %v2017_v62, %v7261_v21  ;;  %v2028_v33 = vadd.f32 1.0, %v2024_v37 }
 0x4be   :  { %v1931_v32 = vmul.f32 %v7248_v31, %v7305_v52  ;;  %v1989_v10 = vmul.f32 %v7256_v29, %v7305_v52 }
 0x4bf   :  { %v2025_v55 = vand.u32 2147483647, %v2021_v36  ;;  %v1970_v42 = vadd.f32 %v5577_v41, %v1963_v25  ;;  %5736 = vrcp.f32 %v2028_v33 }
 0x4c0   :  { %v1938_v44 = vadd.f32 %v7250_v27, %v1931_v32  ;;  %v1996_v43 = vadd.f32 %v7258_v18, %v1989_v10  ;;  %v7352_v32 = vld [vmem:[#allocation17 + $0x4] ss:$0 sm:$0xff] }
 0x4c1   :  { %v2029_v34 = vadd.f32 1.0, %v2025_v55  ;;  %v1974_v45 = vmul.f32 %v1970_v42, %v7261_v21  ;;  %v1909_v48 = vpop.f32.mrf.mxu1 }
 0x4c2   :  { %v1910_v8 = vadd.f32 %v1909_v48, %v7245_v60  ;;  %v1942_v57 = vmul.f32 %v1938_v44, %v7305_v52  ;;  %v2000_v58 = vmul.f32 %v1996_v43, %v7305_v52  ;;  %v7355_v44 = vld [vmem:[#allocation19 + $0x3] ss:$0 sm:$0xff]  ;;  %v7357_v43 = vld [vmem:[#allocation19 + $0x2] ss:$0 sm:$0xff] }
 0x4c3   :  { %5738 = vrcp.f32 %v2029_v34  ;;  %v1981_v3 = vadd.f32 %v5578_v12, %v1974_v45  ;;  %v7347_v34 = vld [vmem:[#allocation16] ss:$0 sm:$0xff]  ;;  %v7350_v45 = vld [vmem:[#allocation17 + $0x5] ss:$0 sm:$0xff] }
 0x4c4   :  { %v7319_v59 = vadd.f32 %v1910_v8, %v7075_v1  ;;  %v2007_v56 = vadd.f32 %v7275_v46, %v2000_v58  ;;  %v1949_v28 = vadd.f32 %v7264_v53, %v1942_v57  ;;  %v7365_v57 = vld [vmem:[#allocation19 + $0x1] ss:$0 sm:$0xff] }
 0x4c5   :  { %v5737_v47 = vpop.eup %5736 }
 0x4c6   :  { %v2036_v16 = vmul.f32 %v5737_v47, %v1980_v9  ;;  %v1932_v49 = vmul.f32 %v7248_v31, %v7319_v59  ;;  %v1990_v60 = vmul.f32 %v7256_v29, %v7319_v59  ;;  %v2011_v23 = vmul.f32 %v2007_v56, %v7305_v52  ;;  %v7361_v9 = vld [vmem:[#allocation17 + $0x3] ss:$0 sm:$0xff]  ;;  %v7370_v56 = vld [vmem:[#allocation17 + $0x2] ss:$0 sm:$0xff] }
 0x4c7   :  { %v1953_v51 = vmul.f32 %v1949_v28, %v7305_v52 }
 0x4c8   :  { %v1939_v54 = vadd.f32 %v7250_v27, %v1932_v49  ;;  %v1997_v19 = vadd.f32 %v7258_v18, %v1990_v60  ;;  %v2018_v1 = vadd.f32 %v7288_v26, %v2011_v23 }
 0x4c9   :  { %v5739_v17 = vpop.eup %5738  ;;  %v1960_v24 = vadd.f32 %v7280_v39, %v1953_v51 }
 0x4ca   :  { %v2037_v11 = vmul.f32 %v5739_v17, %v1981_v3  ;;  %v1943_v30 = vmul.f32 %v1939_v54, %v7319_v59  ;;  %v2001_v6 = vmul.f32 %v1997_v19, %v7319_v59  ;;  %v2022_v31 = vmul.f32 %v2018_v1, %v7305_v52  ;;  %v7375_v54 = vld [vmem:[#allocation19] ss:$0 sm:$0xff] }
 0x4cb   :  { %v1964_v7 = vmul.f32 %v1960_v24, %v7305_v52 }
 0x4cc   :  { %v2040_v2 = vpack.c.bf16 %v2037_v11, %v2036_v16  ;;  %v1950_v20 = vadd.f32 %v7264_v53, %v1943_v30  ;;  %v2008_v29 = vadd.f32 %v7275_v46, %v2001_v6  ;;  %v2026_v13 = vand.u32 2147483647, %v2022_v31 }
 0x4cd   :  { %v1971_v46 = vadd.f32 %v5577_v41, %v1964_v7 }
 0x4ce   :  { %2118 = vmatmul.bf16.vlgmr.msrb.gmra.mxu0 %v2040_v2  ;;  %v1954_v27 = vmul.f32 %v1950_v20, %v7319_v59  ;;  %v2012_v18 = vmul.f32 %v2008_v29, %v7319_v59  ;;  %v2030_v53 = vadd.f32 1.0, %v2026_v13 }
 0x4cf   :  { %v1975_v37 = vmul.f32 %v1971_v46, %v7305_v52 }
 0x4d0   :  { %v1961_v14 = vadd.f32 %v7280_v39, %v1954_v27  ;;  %v2019_v0 = vadd.f32 %v7288_v26, %v2012_v18  ;;  %5740 = vrcp.f32 %v2030_v53  ;;  %v7381_v18 = vld [vmem:[#allocation17 + $0x1] ss:$0 sm:$0xff] }
 0x4d1   :  { %v1982_v15 = vadd.f32 %v5578_v12, %v1975_v37 }
 0x4d2   :  { %v1965_v62 = vmul.f32 %v1961_v14, %v7319_v59  ;;  %v2023_v40 = vmul.f32 %v2019_v0, %v7319_v59 }
 0x4d4   :  { %v2027_v35 = vand.u32 2147483647, %v2023_v40  ;;  %v1972_v25 = vadd.f32 %v5577_v41, %v1965_v62 }
 0x4d6   :  { %v2031_v36 = vadd.f32 1.0, %v2027_v35  ;;  %v1976_v55 = vmul.f32 %v1972_v25, %v7319_v59  ;;  %v5741_v39 = vpop.eup %5740 }
 0x4d7   :  { %v2038_v42 = vmul.f32 %v5741_v39, %v1982_v15  ;;  %v5589_v39 = vld [vmem:[#allocation17] ss:$0 sm:$0xff] }
 0x4d8   :  { %5742 = vrcp.f32 %v2031_v36  ;;  %v1983_v26 = vadd.f32 %v5578_v12, %v1976_v55 }
 0x4de   :  { %v5743_v61 = vpop.eup %5742 }
 0x4df   :  { %v2039_v33 = vmul.f32 %v5743_v61, %v1983_v26 }
 0x4e1   :  { %v2041_v63 = vpack.c.bf16 %v2039_v33, %v2038_v42 }
 0x4e3   :  { %2123 = vmatmul.bf16.gmra.mxu0 %v2041_v63 }
 0x54b   :  { %v2119_v22 = vpop.f32.mrf.mxu0 }
 0x54c   :  { %v2120_v41 = vadd.f32 %v7347_v34, %v2119_v22 }
 0x54e   :  { %v2142_v10 = vmul.f32 %v7350_v45, %v2120_v41  ;;  %v2200_v3 = vmul.f32 %v7355_v44, %v2120_v41 }
 0x550   :  { %v2149_v48 = vadd.f32 %v7352_v32, %v2142_v10  ;;  %v2207_v8 = vadd.f32 %v7357_v43, %v2200_v3 }
 0x552   :  { %v2153_v17 = vmul.f32 %v2149_v48, %v2120_v41  ;;  %v2211_v2 = vmul.f32 %v2207_v8, %v2120_v41 }
 0x553   :  { %v2121_v12 = vpop.f32.mrf.mxu0 }
 0x554   :  { %v2122_v47 = vadd.f32 %v7347_v34, %v2121_v12  ;;  %v2160_v11 = vadd.f32 %v7361_v9, %v2153_v17  ;;  %v2218_v23 = vadd.f32 %v7365_v57, %v2211_v2 }
 0x556   :  { %v2143_v58 = vmul.f32 %v7350_v45, %v2122_v47  ;;  %v2201_v16 = vmul.f32 %v7355_v44, %v2122_v47  ;;  %v2164_v60 = vmul.f32 %v2160_v11, %v2120_v41  ;;  %v2222_v30 = vmul.f32 %v2218_v23, %v2120_v41 }
 0x558   :  { %v2150_v28 = vadd.f32 %v7352_v32, %v2143_v58  ;;  %v2208_v49 = vadd.f32 %v7357_v43, %v2201_v16  ;;  %v2171_v51 = vadd.f32 %v7370_v56, %v2164_v60  ;;  %v2229_v20 = vadd.f32 %v7375_v54, %v2222_v30 }
 0x55a   :  { %v2154_v19 = vmul.f32 %v2150_v28, %v2122_v47  ;;  %v2212_v1 = vmul.f32 %v2208_v49, %v2122_v47  ;;  %v2175_v27 = vmul.f32 %v2171_v51, %v2120_v41  ;;  %v2233_v13 = vmul.f32 %v2229_v20, %v2120_v41 }
 0x55c   :  { %v2161_v6 = vadd.f32 %v7361_v9, %v2154_v19  ;;  %v2219_v31 = vadd.f32 %v7365_v57, %v2212_v1  ;;  %v2237_v7 = vand.u32 2147483647, %v2233_v13  ;;  %v2182_v53 = vadd.f32 %v7381_v18, %v2175_v27 }
 0x55e   :  { %v2165_v29 = vmul.f32 %v2161_v6, %v2122_v47  ;;  %v2223_v24 = vmul.f32 %v2219_v31, %v2122_v47  ;;  %v2241_v35 = vadd.f32 1.0, %v2237_v7  ;;  %v2186_v55 = vmul.f32 %v2182_v53, %v2120_v41 }
 0x560   :  { %v2172_v14 = vadd.f32 %v7370_v56, %v2165_v29  ;;  %v2230_v0 = vadd.f32 %v7375_v54, %v2223_v24  ;;  %5744 = vrcp.f32 %v2241_v35  ;;  %v2124_v37 = vpop.f32.mrf.mxu0  ;;  %v2193_v33 = vadd.f32 %v5589_v39, %v2186_v55 }
 0x561   :  { %v2125_v15 = vadd.f32 %v7347_v34, %v2124_v37 }
 0x562   :  { %v2176_v62 = vmul.f32 %v2172_v14, %v2122_v47  ;;  %v2234_v40 = vmul.f32 %v2230_v0, %v2122_v47 }
 0x563   :  { %v2144_v61 = vmul.f32 %v7350_v45, %v2125_v15  ;;  %v2202_v42 = vmul.f32 %v7355_v44, %v2125_v15 }
 0x564   :  { %v2238_v46 = vand.u32 2147483647, %v2234_v40  ;;  %v2183_v25 = vadd.f32 %v7381_v18, %v2176_v62 }
 0x565   :  { %v2151_v22 = vadd.f32 %v7352_v32, %v2144_v61  ;;  %v2209_v10 = vadd.f32 %v7357_v43, %v2202_v42 }
 0x566   :  { %v2242_v36 = vadd.f32 1.0, %v2238_v46  ;;  %v2187_v26 = vmul.f32 %v2183_v25, %v2122_v47  ;;  %v5745_v63 = vpop.eup %5744 }
 0x567   :  { %v7392_v12 = vmul.f32 %v5745_v63, %v2193_v33  ;;  %v2155_v41 = vmul.f32 %v2151_v22, %v2125_v15  ;;  %v2213_v17 = vmul.f32 %v2209_v10, %v2125_v15 }
 0x568   :  { %5746 = vrcp.f32 %v2242_v36  ;;  %v2194_v48 = vadd.f32 %v5589_v39, %v2187_v26  ;;  %v2126_v8 = vpop.f32.mrf.mxu0 }
 0x569   :  { %v2258_v47 = vmul.f32 %v6713_v5, %v7392_v12  ;;  %v2127_v16 = vadd.f32 %v7347_v34, %v2126_v8  ;;  %v2162_v11 = vadd.f32 %v7361_v9, %v2155_v41  ;;  %v2220_v2 = vadd.f32 %v7365_v57, %v2213_v17 }
 0x56b   :  { %2262 = vadd.xlane.f32.xlu2 %v2258_v47  ;;  %v2166_v49 = vmul.f32 %v2162_v11, %v2125_v15  ;;  %v2224_v60 = vmul.f32 %v2220_v2, %v2125_v15  ;;  %v2145_v23 = vmul.f32 %v7350_v45, %v2127_v16  ;;  %v2203_v19 = vmul.f32 %v7355_v44, %v2127_v16 }
 0x56d   :  { %v2173_v1 = vadd.f32 %v7370_v56, %v2166_v49  ;;  %v2231_v51 = vadd.f32 %v7375_v54, %v2224_v60  ;;  %v2152_v34 = vadd.f32 %v7352_v32, %v2145_v23  ;;  %v2210_v30 = vadd.f32 %v7357_v43, %v2203_v19  ;;  %v5418_v60 = vld [vmem:[%s8056_s22 + $0x38] sm:$0xff]  ;;  %v5417_v23 = vld [vmem:[%s8056_s22 + $0x30] sm:$0xff]  ;;  %v5416_v19 = vld [vmem:[%s8056_s22 + $0x28] sm:$0xff] }
 0x56e   :  { %v5747_v3 = vpop.eup %5746  ;;  %2434 = vmatpush.bf16.msrb.mxu2 %v5418_v60 }
 0x56f   :  { %v7396_v58 = vmul.f32 %v5747_v3, %v2194_v48  ;;  %v2177_v6 = vmul.f32 %v2173_v1, %v2125_v15  ;;  %v2235_v31 = vmul.f32 %v2231_v51, %v2125_v15  ;;  %v2156_v20 = vmul.f32 %v2152_v34, %v2127_v16 }
 0x570   :  { %v2214_v29 = vmul.f32 %v2210_v30, %v2127_v16 }
 0x571   :  { %v2259_v28 = vmul.f32 %v6713_v5, %v7396_v58  ;;  %v2239_v24 = vand.u32 2147483647, %v2235_v31  ;;  %v2163_v27 = vadd.f32 %v7361_v9, %v2156_v20  ;;  %v2184_v44 = vadd.f32 %v7381_v18, %v2177_v6  ;;  %v5415_v20 = vld [vmem:[%s8056_s22 + $0x20] sm:$0xff] }
 0x572   :  { %v2221_v45 = vadd.f32 %v7365_v57, %v2214_v29  ;;  %2435 = vmatpush.bf16.msrb.mxu2 %v5417_v23 }
 0x573   :  { %2264 = vadd.xlane.f32.xlu0 %v2259_v28  ;;  %v2243_v13 = vadd.f32 1.0, %v2239_v24  ;;  %v2167_v14 = vmul.f32 %v2163_v27, %v2127_v16  ;;  %v2188_v43 = vmul.f32 %v2184_v44, %v2125_v15  ;;  %v5414_v27 = vld [vmem:[%s8056_s22 + $0x18] sm:$0xff] }
 0x574   :  { %v2225_v0 = vmul.f32 %v2221_v45, %v2127_v16 }
 0x575   :  { %5748 = vrcp.f32 %v2243_v13  ;;  %v2174_v7 = vadd.f32 %v7370_v56, %v2167_v14  ;;  %v2195_v35 = vadd.f32 %v5589_v39, %v2188_v43  ;;  %v5413_v43 = vld [vmem:[%s8056_s22 + $0x10] sm:$0xff] }
 0x576   :  { %v2232_v32 = vadd.f32 %v7375_v54, %v2225_v0  ;;  %2436 = vmatpush.bf16.msrb.mxu2 %v5416_v19 }
 0x577   :  { %v2178_v62 = vmul.f32 %v2174_v7, %v2127_v16 }
 0x578   :  { %v2236_v40 = vmul.f32 %v2232_v32, %v2127_v16 }
 0x579   :  { %v2185_v46 = vadd.f32 %v7381_v18, %v2178_v62 }
 0x57a   :  { %v2240_v53 = vand.u32 2147483647, %v2236_v40  ;;  %2437 = vmatpush.bf16.msrb.mxu2 %v5415_v20 }
 0x57b   :  { %v5749_v9 = vpop.eup %5748  ;;  %v2189_v37 = vmul.f32 %v2185_v46, %v2127_v16  ;;  %v5594_v46 = vld [vmem:[%s8057_s23] ss:$0 sm:$0xff] }
 0x57c   :  { %v2244_v25 = vadd.f32 1.0, %v2240_v53  ;;  %v7415_v57 = vmul.f32 %v5749_v9, %v2195_v35  ;;  %v5412_v53 = vld [vmem:[%s8056_s22 + $0x8] sm:$0xff] }
 0x57d   :  { %v2196_v56 = vadd.f32 %v5589_v39, %v2189_v37 }
 0x57e   :  { %5750 = vrcp.f32 %v2244_v25  ;;  %v2260_v36 = vmul.f32 %v6713_v5, %v7415_v57  ;;  %2438 = vmatpush.bf16.msrb.mxu2 %v5414_v27 }
 0x580   :  { %2266 = vadd.xlane.f32.xlu1 %v2260_v36 }
 0x582   :  { %2439 = vmatpush.bf16.msrb.mxu2 %v5413_v43  ;;  %v4884_v43 = vld [vmem:[%s8050_s8 + $0xb0] sm:$0xff] }
 0x584   :  { %v5751_v55 = vpop.eup %5750 }
 0x585   :  { %v7419_v54 = vmul.f32 %v5751_v55, %v2196_v56 }
 0x586   :  { %2440 = vmatpush.bf16.msrb.mxu2 %v5412_v53  ;;  %v7477_v53 = vld [vmem:[%s8050_s8 + $0xa8] sm:$0xff] }
 0x587   :  { %v2261_v15 = vmul.f32 %v6713_v5, %v7419_v54 }
 0x589   :  { %2268 = vadd.xlane.f32.xlu2 %v2261_v15 }
 0x5de   :  { %v2263_v26 = vpop.xlane.xlu2 %2262 }
 0x5df   :  { %v7423_v18 = vmul.f32 0.015625, %v2263_v26  ;;  %v5411_v26 = vld [vmem:[%s8056_s22] sm:$0xff] }
 0x5e0   :  { %2441 = vmatpush.bf16.msrb.mxu2 %v5411_v26 }
 0x5e1   :  { %v2274_v42 = vsub.f32 %v2258_v47, %v7423_v18  ;;  %v2298_v35 = vsub.f32 %v7392_v12, %v7423_v18 }
 0x5e3   :  { %v2278_v63 = vmul.f32 %v2274_v42, %v2274_v42 }
 0x5e5   :  { %v2282_v39 = vmul.f32 %v6713_v5, %v2278_v63 }
 0x5e6   :  { %v2265_v61 = vpop.xlane.xlu0 %2264 }
 0x5e7   :  { %v7426_v33 = vmul.f32 0.015625, %v2265_v61  ;;  %2286 = vadd.xlane.f32.xlu0 %v2282_v39 }
 0x5e9   :  { %v2275_v22 = vsub.f32 %v2259_v28, %v7426_v33  ;;  %v2299_v37 = vsub.f32 %v7396_v58, %v7426_v33 }
 0x5eb   :  { %v2279_v10 = vmul.f32 %v2275_v22, %v2275_v22  ;;  %v5595_v22 = vld [vmem:[#allocation20] ss:$0 sm:$0xff] }
 0x5ed   :  { %v2283_v48 = vmul.f32 %v6713_v5, %v2279_v10 }
 0x5ef   :  { %2288 = vadd.xlane.f32.xlu1 %v2283_v48 }
 0x5f3   :  { %v2267_v3 = vpop.xlane.xlu1 %2266 }
 0x5f4   :  { %v7431_v41 = vmul.f32 0.015625, %v2267_v3 }
 0x5f6   :  { %v2276_v17 = vsub.f32 %v2260_v36, %v7431_v41 }
 0x5f8   :  { %v2280_v8 = vmul.f32 %v2276_v17, %v2276_v17 }
 0x5fa   :  { %v2284_v47 = vmul.f32 %v6713_v5, %v2280_v8 }
 0x5fc   :  { %v2269_v16 = vpop.xlane.xlu2 %2268  ;;  %2290 = vadd.xlane.f32.xlu2 %v2284_v47 }
 0x5fd   :  { %v7435_v11 = vmul.f32 0.015625, %v2269_v16 }
 0x5ff   :  { %v2277_v2 = vsub.f32 %v2261_v15, %v7435_v11 }
 0x601   :  { %v2281_v28 = vmul.f32 %v2277_v2, %v2277_v2 }
 0x603   :  { %v2285_v49 = vmul.f32 %v6713_v5, %v2281_v28 }
 0x605   :  { %2292 = vadd.xlane.f32.xlu0 %v2285_v49 }
 0x65a   :  { %v2287_v1 = vpop.xlane.xlu0 %2286 }
 0x65b   :  { %v2294_v51 = vmul.f32 0.015625, %v2287_v1  ;;  %v2300_v1 = vsub.f32 %v7415_v57, %v7431_v41  ;;  %v7456_v41 = vld [vmem:[#allocation22] ss:$0 sm:$0xff] }
 0x65d   :  { %v2302_v30 = vadd.f32 1e-05, %v2294_v51 }
 0x65f   :  { %5752 = vrsqrt.f32 %v2302_v30  ;;  %vm2312_vm8 = vweird.f32 %v2302_v30 }
 0x662   :  { %v2289_v34 = vpop.xlane.xlu1 %2288 }
 0x663   :  { %v2295_v6 = vmul.f32 0.015625, %v2289_v34 }
 0x665   :  { %v2303_v31 = vadd.f32 1e-05, %v2295_v6  ;;  %v5753_v29 = vpop.eup %5752  ;;  %v2301_v6 = vsub.f32 %v7419_v54, %v7435_v11 }
 0x666   :  { %v2307_v24 = vmul.f32 %v5753_v29, %v2302_v30  ;;  %vm2313_vm7 = vweird.f32 %v5753_v29 }
 0x667   :  { %5754 = vrsqrt.f32 %v2303_v31  ;;  %vm2314_vm10 = vmor %vm2312_vm8, %vm2313_vm7  ;;  %vm2322_vm11 = vweird.f32 %v2303_v31 }
 0x668   :  { %v2308_v44 = vmul.f32 %v5753_v29, %v2307_v24 }
 0x66a   :  { %v2309_v14 = vmul.f32 0.5, %v2308_v44 }
 0x66c   :  { %v2310_v7 = vsub.f32 1.5, %v2309_v14 }
 0x66d   :  { %v5755_v45 = vpop.eup %5754 }
 0x66e   :  { %v2317_v13 = vmul.f32 %v5755_v45, %v2303_v31  ;;  %v2311_v62 = vmul.f32 %v5753_v29, %v2310_v7  ;;  %vm2323_vm9 = vweird.f32 %v5755_v45 }
 0x66f   :  { %v2291_v36 = vpop.xlane.xlu2 %2290  ;;  %vm2324_vm12 = vmor %vm2322_vm11, %vm2323_vm9 }
 0x670   :  { %v2318_v0 = vmul.f32 %v5755_v45, %v2317_v13  ;;  %v2315_v9 = vsel %vm2314_vm10, %v5753_v29, %v2311_v62  ;;  %v2296_v55 = vmul.f32 0.015625, %v2291_v36  ;;  %v7470_v62 = vld [vmem:[%s8050_s8 + $0xb8] sm:$0xff] }
 0x671   :  { %v2346_v56 = vmul.f32 %v2315_v9, %v2298_v35  ;;  %v4890_v35 = vld [vmem:[%s8051_s14 + $0x60] sm:$0xff]  ;;  %v4892_v9 = vld [vmem:[%s8051_s14 + $0x70] sm:$0xff] }
 0x672   :  { %v2319_v32 = vmul.f32 0.5, %v2318_v0  ;;  %v2304_v42 = vadd.f32 1e-05, %v2296_v55 }
 0x673   :  { %v2353_v63 = vmul.f32 %v5594_v46, %v2346_v56 }
 0x674   :  { %v2320_v40 = vsub.f32 1.5, %v2319_v32  ;;  %5756 = vrsqrt.f32 %v2304_v42  ;;  %vm2332_vm14 = vweird.f32 %v2304_v42  ;;  %v7466_v32 = vld [vmem:[%s8050_s8 + $0xa0] sm:$0xff] }
 0x675   :  { %v2360_v18 = vadd.f32 %v5595_v22, %v2353_v63 }
 0x676   :  { %v2321_v25 = vmul.f32 %v5755_v45, %v2320_v40 }
 0x678   :  { %v2325_v15 = vsel %vm2324_vm12, %v5755_v45, %v2321_v25  ;;  %v2293_v39 = vpop.xlane.xlu0 %2292 }
 0x679   :  { %v2347_v61 = vmul.f32 %v2325_v15, %v2299_v37  ;;  %v2297_v48 = vmul.f32 0.015625, %v2293_v39  ;;  %v7491_v37 = vld [vmem:[%s8050_s8 + $0x90] sm:$0xff] }
 0x67a   :  { %v5757_v17 = vpop.eup %5756 }
 0x67b   :  { %v2354_v12 = vmul.f32 %v5594_v46, %v2347_v61  ;;  %v2305_v58 = vadd.f32 1e-05, %v2297_v48  ;;  %v2327_v33 = vmul.f32 %v5757_v17, %v2304_v42  ;;  %vm2333_vm13 = vweird.f32 %v5757_v17  ;;  %v7499_v61 = vld [vmem:[%s8050_s8 + $0x98] sm:$0xff] }
 0x67c   :  { %vm2334_vm0 = vmor %vm2332_vm14, %vm2333_vm13 }
 0x67d   :  { %v2361_v10 = vadd.f32 %v5595_v22, %v2354_v12  ;;  %5758 = vrsqrt.f32 %v2305_v58  ;;  %v2328_v8 = vmul.f32 %v5757_v17, %v2327_v33  ;;  %vm2342_vm2 = vweird.f32 %v2305_v58  ;;  %v7504_v12 = vld [vmem:[%s8051_s14 + $0x58] sm:$0xff]  ;;  %v7516_v33 = vld [vmem:[%s8050_s8 + $0x88] sm:$0xff] }
 0x67f   :  { %v2364_v3 = vpack.c.bf16 %v2361_v10, %v2360_v18  ;;  %v2329_v47 = vmul.f32 0.5, %v2328_v8 }
 0x681   :  { %2442 = vmatmul.bf16.vlgmr.msrb.gmra.mxu2 %v2364_v3  ;;  %v2330_v16 = vsub.f32 1.5, %v2329_v47  ;;  %v7511_v3 = vld [vmem:[%s8050_s8 + $0x80] sm:$0xff] }
 0x683   :  { %v5759_v2 = vpop.eup %5758  ;;  %v2331_v28 = vmul.f32 %v5757_v17, %v2330_v16  ;;  %v4886_v16 = vld [vmem:[%s8051_s14 + $0x40] sm:$0xff] }
 0x684   :  { %v2337_v49 = vmul.f32 %v5759_v2, %v2305_v58  ;;  %vm2343_vm1 = vweird.f32 %v5759_v2 }
 0x685   :  { %v2335_v19 = vsel %vm2334_vm0, %v5757_v17, %v2331_v28  ;;  %vm2344_vm3 = vmor %vm2342_vm2, %vm2343_vm1 }
 0x686   :  { %v2338_v60 = vmul.f32 %v5759_v2, %v2337_v49  ;;  %v2348_v34 = vmul.f32 %v2335_v19, %v2300_v1 }
 0x688   :  { %v2339_v23 = vmul.f32 0.5, %v2338_v60  ;;  %v2355_v29 = vmul.f32 %v5594_v46, %v2348_v34 }
 0x68a   :  { %v2340_v51 = vsub.f32 1.5, %v2339_v23  ;;  %v2362_v27 = vadd.f32 %v5595_v22, %v2355_v29 }
 0x68c   :  { %v2341_v30 = vmul.f32 %v5759_v2, %v2340_v51 }
 0x68e   :  { %v2345_v31 = vsel %vm2344_vm3, %v5759_v2, %v2341_v30  ;;  %v7521_v2 = vld [vmem:[%s8051_s14 + $0x48] sm:$0xff] }
 0x68f   :  { %v2349_v20 = vmul.f32 %v2345_v31, %v2301_v6 }
 0x691   :  { %v2356_v24 = vmul.f32 %v5594_v46, %v2349_v20  ;;  %v7481_v46 = vld [vmem:[%s8051_s14 + $0x68] sm:$0xff] }
 0x693   :  { %v2363_v45 = vadd.f32 %v5595_v22, %v2356_v24  ;;  %v4888_v22 = vld [vmem:[%s8051_s14 + $0x50] sm:$0xff] }
 0x694   :  { %v4876_v24 = vld [vmem:[%s8050_s8 + $0x70] sm:$0xff] }
 0x695   :  { %v2365_v57 = vpack.c.bf16 %v2363_v45, %v2362_v27  ;;  %v4877_v27 = vld [vmem:[%s8050_s8 + $0x78] sm:$0xff] }
 0x697   :  { %2447 = vmatmul.bf16.gmra.mxu2 %v2365_v57 }
 0x704   :  { %v2443_v44 = vpop.f32.mrf.mxu2 }
 0x705   :  { %v2444_v54 = vadd.f32 %v7456_v41, %v2443_v44 }
 0x707   :  { %v2453_v11 = vadd.f32 %v2444_v54, %v7243_v38 }
 0x709   :  { %v7461_v14 = vmul.f32 %v6711_v4, %v2453_v11 }
 0x70b   :  { %v2483_v38 = vmul.f32 %v4884_v43, %v7461_v14  ;;  %v2523_v56 = vmul.f32 %v4892_v9, %v7461_v14 }
 0x70c   :  { %v2445_v13 = vpop.f32.mrf.mxu2 }
 0x70d   :  { %v2446_v0 = vadd.f32 %v7456_v41, %v2445_v13  ;;  %v2487_v36 = vadd.f32 %v7466_v32, %v2483_v38  ;;  %v2527_v42 = vadd.f32 %v4890_v35, %v2523_v56 }
 0x70f   :  { %v2454_v7 = vadd.f32 %v2446_v0, %v7261_v21  ;;  %v7485_v21 = vld [vmem:[%s8051_s14 + $0x78] sm:$0xff]  ;;  %v2491_v26 = vmul.f32 %v2487_v36, %v7461_v14  ;;  %v2531_v39 = vmul.f32 %v2527_v42, %v7461_v14 }
 0x711   :  { %v7473_v40 = vmul.f32 %v6711_v4, %v2454_v7  ;;  %v2495_v10 = vadd.f32 %v7491_v37, %v2491_v26  ;;  %v2535_v8 = vadd.f32 %v4888_v22, %v2531_v39  ;;  %v4875_v26 = vld [vmem:[%s8050_s8 + $0x68] sm:$0xff] }
 0x713   :  { %v2485_v25 = vmul.f32 %v7470_v62, %v7473_v40  ;;  %v2525_v55 = vmul.f32 %v7485_v21, %v7473_v40  ;;  %v2499_v58 = vmul.f32 %v2495_v10, %v7461_v14  ;;  %v2539_v60 = vmul.f32 %v2535_v8, %v7461_v14 }
 0x715   :  { %v2489_v15 = vadd.f32 %v7477_v53, %v2485_v25  ;;  %v2529_v63 = vadd.f32 %v7481_v46, %v2525_v55  ;;  %v2503_v49 = vadd.f32 %v7511_v3, %v2499_v58  ;;  %v2543_v1 = vadd.f32 %v4886_v16, %v2539_v60  ;;  %v5419_v60 = vld [vmem:[%s8052_s30 + $0x8] sm:$0xff] }
 0x717   :  { %v2493_v18 = vmul.f32 %v2489_v15, %v7473_v40  ;;  %v2533_v48 = vmul.f32 %v2529_v63, %v7473_v40  ;;  %v2507_v30 = vmul.f32 %v2503_v49, %v7461_v14  ;;  %v2547_v31 = vmul.f32 %v2543_v1, %v7461_v14  ;;  %v4874_v15 = vld [vmem:[%s8050_s8 + $0x60] sm:$0xff] }
 0x719   :  { %v2497_v17 = vadd.f32 %v7499_v61, %v2493_v18  ;;  %v2537_v47 = vadd.f32 %v7504_v12, %v2533_v48  ;;  %v2551_v45 = vand.u32 2147483647, %v2547_v31  ;;  %v2511_v54 = vadd.f32 %v4876_v24, %v2507_v30 }
 0x71a   :  { %v2448_v34 = vpop.f32.mrf.mxu2 }
 0x71b   :  { %v2501_v28 = vmul.f32 %v2497_v17, %v7473_v40  ;;  %v2541_v23 = vmul.f32 %v2537_v47, %v7473_v40  ;;  %v2449_v29 = vadd.f32 %v7456_v41, %v2448_v34  ;;  %v2555_v13 = vadd.f32 1.0, %v2551_v45 }
 0x71c   :  { %v2515_v56 = vmul.f32 %v2511_v54, %v7461_v14 }
 0x71d   :  { %v2505_v19 = vadd.f32 %v7516_v33, %v2501_v28  ;;  %v2545_v51 = vadd.f32 %v7521_v2, %v2541_v23  ;;  %v2455_v44 = vadd.f32 %v2449_v29, %v7305_v52  ;;  %5760 = vrcp.f32 %v2555_v13 }
 0x71e   :  { %v2519_v39 = vadd.f32 %v4874_v15, %v2515_v56  ;;  %v4912_v56 = vld [vmem:[%s8053_s2 + $0xb0] sm:$0xff] }
 0x71f   :  { %v2509_v6 = vmul.f32 %v2505_v19, %v7473_v40  ;;  %v2549_v20 = vmul.f32 %v2545_v51, %v7473_v40  ;;  %v7538_v7 = vmul.f32 %v6711_v4, %v2455_v44 }
 0x721   :  { %v2553_v57 = vand.u32 2147483647, %v2549_v20  ;;  %v2513_v11 = vadd.f32 %v4877_v27, %v2509_v6  ;;  %v2484_v38 = vmul.f32 %v4884_v43, %v7538_v7  ;;  %v2524_v25 = vmul.f32 %v4892_v9, %v7538_v7 }
 0x722   :  { %v2450_v36 = vpop.f32.mrf.mxu2 }
 0x723   :  { %v2557_v0 = vadd.f32 1.0, %v2553_v57  ;;  %v2517_v55 = vmul.f32 %v2513_v11, %v7473_v40  ;;  %v2451_v52 = vadd.f32 %v7456_v41, %v2450_v36  ;;  %v2488_v42 = vadd.f32 %v7466_v32, %v2484_v38  ;;  %v5761_v9 = vpop.eup %5760 }
 0x724   :  { %v2528_v63 = vadd.f32 %v4890_v35, %v2524_v25  ;;  %v2563_v8 = vmul.f32 %v5761_v9, %v2519_v39  ;;  %v4908_v9 = vld [vmem:[%s8053_s2 + $0x90] sm:$0xff] }
 0x725   :  { %5762 = vrcp.f32 %v2557_v0  ;;  %v2456_v18 = vadd.f32 %v2451_v52, %v7319_v59  ;;  %v2492_v10 = vmul.f32 %v2488_v42, %v7538_v7  ;;  %v2521_v48 = vadd.f32 %v4875_v26, %v2517_v55  ;;  %v4910_v52 = vld [vmem:[%s8053_s2 + $0xa0] sm:$0xff]  ;;  %v4916_v39 = vld [vmem:[%s8054_s3 + $0x50] sm:$0xff] }
 0x726   :  { %v2532_v43 = vmul.f32 %v2528_v63, %v7538_v7 }
 0x727   :  { %v7552_v58 = vmul.f32 %v6711_v4, %v2456_v18  ;;  %v2496_v32 = vadd.f32 %v7491_v37, %v2492_v10  ;;  %v2574_v10 = vld [vmem:[#allocation5 + $0x18] sm:$0xff] }
 0x728   :  { %v2536_v41 = vadd.f32 %v4888_v22, %v2532_v43 }
 0x729   :  { %v2486_v59 = vmul.f32 %v7470_v62, %v7552_v58  ;;  %v2526_v35 = vmul.f32 %v7485_v21, %v7552_v58  ;;  %v2500_v22 = vmul.f32 %v2496_v32, %v7538_v7 }
 0x72a   :  { %v2540_v28 = vmul.f32 %v2536_v41, %v7538_v7  ;;  %v4913_v41 = vld [vmem:[%s8053_s2 + $0xb8] sm:$0xff] }
 0x72b   :  { %v5763_v17 = vpop.eup %5762  ;;  %v2490_v23 = vadd.f32 %v7477_v53, %v2486_v59  ;;  %v2530_v19 = vadd.f32 %v7481_v46, %v2526_v35  ;;  %v2504_v53 = vadd.f32 %v7511_v3, %v2500_v22  ;;  %v4911_v59 = vld [vmem:[%s8053_s2 + $0xa8] sm:$0xff] }
 0x72c   :  { %v2565_v47 = vmul.f32 %v5763_v17, %v2521_v48  ;;  %v2544_v1 = vadd.f32 %v4886_v16, %v2540_v28  ;;  %v4919_v35 = vld [vmem:[%s8054_s3 + $0x68] sm:$0xff] }
 0x72d   :  { %v2494_v37 = vmul.f32 %v2490_v23, %v7552_v58  ;;  %v2534_v51 = vmul.f32 %v2530_v19, %v7552_v58  ;;  %v2508_v20 = vmul.f32 %v2504_v53, %v7538_v7  ;;  %v4906_v53 = vld [vmem:[%s8053_s2 + $0x80] sm:$0xff] }
 0x72e   :  { %v2570_v49 = vpack.c.bf16 %v2565_v47, %v2563_v8  ;;  %v2548_v62 = vmul.f32 %v2544_v1, %v7538_v7  ;;  %v4921_v8 = vld [vmem:[%s8054_s3 + $0x78] sm:$0xff] }
 0x72f   :  { %v2498_v21 = vadd.f32 %v7499_v61, %v2494_v37  ;;  %v2538_v34 = vadd.f32 %v7504_v12, %v2534_v51  ;;  %v2512_v12 = vadd.f32 %v4876_v24, %v2508_v20  ;;  %v4909_v51 = vld [vmem:[%s8053_s2 + $0x98] sm:$0xff]  ;;  %v4907_v20 = vld [vmem:[%s8053_s2 + $0x88] sm:$0xff] }
 0x730   :  { %2590 = vmatpush.bf16.msrb.mxu3 %v2570_v49  ;;  %v2552_v30 = vand.u32 2147483647, %v2548_v62  ;;  %v4917_v62 = vld [vmem:[%s8054_s3 + $0x58] sm:$0xff] }
 0x731   :  { %v2502_v46 = vmul.f32 %v2498_v21, %v7552_v58  ;;  %v2542_v16 = vmul.f32 %v2538_v34, %v7552_v58  ;;  %v2516_v54 = vmul.f32 %v2512_v12, %v7538_v7 }
 0x732   :  { %v2556_v61 = vadd.f32 1.0, %v2552_v30 }
 0x733   :  { %4900 = vmatmul.msk.bf16.vlgmr.msrb.gmra.mxu3 %vm1649_vm15, %v5419_v60  ;;  %v2506_v6 = vadd.f32 %v7516_v33, %v2502_v46  ;;  %v2546_v31 = vadd.f32 %v7521_v2, %v2542_v16  ;;  %v2520_v11 = vadd.f32 %v4874_v15, %v2516_v54  ;;  %v4918_v15 = vld [vmem:[%s8054_s3 + $0x60] sm:$0xff] }
 0x734   :  { %5764 = vrcp.f32 %v2556_v61 }
 0x735   :  { %v2510_v29 = vmul.f32 %v2506_v6, %v7552_v58  ;;  %v2550_v45 = vmul.f32 %v2546_v31, %v7552_v58 }
 0x737   :  { %v2554_v57 = vand.u32 2147483647, %v2550_v45  ;;  %v2514_v44 = vadd.f32 %v4877_v27, %v2510_v29  ;;  %v2573_v27 = vld [vmem:[#allocation5 + $0x10] sm:$0xff]  ;;  %v4915_v29 = vld [vmem:[%s8054_s3 + $0x48] sm:$0xff] }
 0x739   :  { %v2558_v3 = vadd.f32 1.0, %v2554_v57  ;;  %v2518_v33 = vmul.f32 %v2514_v44, %v7552_v58 }
 0x73a   :  { %v5765_v2 = vpop.eup %5764 }
 0x73b   :  { %5766 = vrcp.f32 %v2558_v3  ;;  %v2522_v13 = vadd.f32 %v4875_v26, %v2518_v33  ;;  %v2564_v38 = vmul.f32 %v5765_v2, %v2520_v11  ;;  %v4920_v26 = vld [vmem:[%s8054_s3 + $0x70] sm:$0xff] }
 0x741   :  { %v5767_v0 = vpop.eup %5766 }
 0x742   :  { %v2566_v25 = vmul.f32 %v5767_v0, %v2522_v13  ;;  %v4904_v13 = vld [vmem:[%s8053_s2 + $0x70] sm:$0xff]  ;;  %v4905_v0 = vld [vmem:[%s8053_s2 + $0x78] sm:$0xff] }
 0x744   :  { %v2571_v24 = vpack.c.bf16 %v2566_v25, %v2564_v38 }
 0x746   :  { %2604 = vmatpush.bf16.msra.mxu1 %v2571_v24 }
 0x749   :  { %4901 = vmatmul.msk.bf16.vlgmr.msra.gmra.mxu1 %vm1649_vm15, %v5419_v60  ;;  %v4914_v60 = vld [vmem:[%s8054_s3 + $0x40] sm:$0xff] }
 0x7b6   :  { %v2592_v36 = vpop.f32.mrf.mxu3 }
 0x7b7   :  { %v7582_v55 = vadd.f32 %v2592_v36, %v2573_v27 }
 0x7b9   :  { %v2633_v42 = vmul.f32 %v4912_v56, %v7582_v55  ;;  %v2673_v63 = vmul.f32 %v4920_v26, %v7582_v55 }
 0x7bb   :  { %v2637_v18 = vadd.f32 %v4910_v52, %v2633_v42  ;;  %v2677_v43 = vadd.f32 %v4918_v15, %v2673_v63 }
 0x7bd   :  { %v2641_v48 = vmul.f32 %v2637_v18, %v7582_v55  ;;  %v2681_v47 = vmul.f32 %v2677_v43, %v7582_v55 }
 0x7be   :  { %v2594_v17 = vpop.f32.mrf.mxu3 }
 0x7bf   :  { %v2595_v32 = vadd.f32 %v2594_v17, %v2574_v10  ;;  %v2645_v28 = vadd.f32 %v4908_v9, %v2641_v48  ;;  %v2685_v49 = vadd.f32 %v4916_v39, %v2681_v47 }
 0x7c1   :  { %v2635_v23 = vmul.f32 %v4913_v41, %v2595_v32  ;;  %v2675_v19 = vmul.f32 %v4921_v8, %v2595_v32  ;;  %v2689_v1 = vmul.f32 %v2685_v49, %v7582_v55  ;;  %v2649_v21 = vmul.f32 %v2645_v28, %v7582_v55 }
 0x7c3   :  { %v2639_v22 = vadd.f32 %v4911_v59, %v2635_v23  ;;  %v2679_v37 = vadd.f32 %v4919_v35, %v2675_v19  ;;  %v2693_v34 = vadd.f32 %v4914_v60, %v2689_v1  ;;  %v2653_v45 = vadd.f32 %v4906_v53, %v2649_v21  ;;  %v4902_v1 = vld [vmem:[%s8053_s2 + $0x60] sm:$0xff] }
 0x7c5   :  { %v2643_v46 = vmul.f32 %v2639_v22, %v2595_v32  ;;  %v2683_v16 = vmul.f32 %v2679_v37, %v2595_v32  ;;  %v2697_v30 = vmul.f32 %v2693_v34, %v7582_v55  ;;  %v2657_v2 = vmul.f32 %v2653_v45, %v7582_v55 }
 0x7c6   :  { %v2606_v44 = vpop.f32.mrf.mxu1 }
 0x7c7   :  { %v2647_v6 = vadd.f32 %v4909_v51, %v2643_v46  ;;  %v2687_v31 = vadd.f32 %v4917_v62, %v2683_v16  ;;  %v2701_v61 = vand.u32 2147483647, %v2697_v30  ;;  %v7606_v3 = vadd.f32 %v2606_v44, %v2573_v27 }
 0x7c8   :  { %v2661_v27 = vadd.f32 %v4904_v13, %v2657_v2 }
 0x7c9   :  { %v2651_v57 = vmul.f32 %v2647_v6, %v2595_v32  ;;  %v2691_v12 = vmul.f32 %v2687_v31, %v2595_v32  ;;  %v2705_v11 = vadd.f32 1.0, %v2701_v61  ;;  %v2634_v24 = vmul.f32 %v4912_v56, %v7606_v3 }
 0x7ca   :  { %v2674_v36 = vmul.f32 %v4920_v26, %v7606_v3  ;;  %v2665_v56 = vmul.f32 %v2661_v27, %v7582_v55 }
 0x7cb   :  { %v2655_v54 = vadd.f32 %v4907_v20, %v2651_v57  ;;  %v2695_v33 = vadd.f32 %v4915_v29, %v2691_v12  ;;  %v2638_v63 = vadd.f32 %v4910_v52, %v2634_v24  ;;  %5768 = vrcp.f32 %v2705_v11  ;;  %v4903_v52 = vld [vmem:[%s8053_s2 + $0x68] sm:$0xff] }
 0x7cc   :  { %v2678_v18 = vadd.f32 %v4918_v15, %v2674_v36  ;;  %v2669_v16 = vadd.f32 %v4902_v1, %v2665_v56 }
 0x7cd   :  { %v2659_v38 = vmul.f32 %v2655_v54, %v2595_v32  ;;  %v2699_v25 = vmul.f32 %v2695_v33, %v2595_v32  ;;  %v2642_v17 = vmul.f32 %v2638_v63, %v7606_v3 }
 0x7ce   :  { %v2682_v47 = vmul.f32 %v2678_v18, %v7606_v3  ;;  %v2608_v28 = vpop.f32.mrf.mxu1 }
 0x7cf   :  { %v2703_v42 = vand.u32 2147483647, %v2699_v25  ;;  %v2663_v43 = vadd.f32 %v4905_v0, %v2659_v38  ;;  %v2609_v49 = vadd.f32 %v2608_v28, %v2574_v10  ;;  %v2646_v26 = vadd.f32 %v4908_v9, %v2642_v17 }
 0x7d0   :  { %v2686_v19 = vadd.f32 %v4916_v39, %v2682_v47 }
 0x7d1   :  { %v2707_v48 = vadd.f32 1.0, %v2703_v42  ;;  %v2667_v23 = vmul.f32 %v2663_v43, %v2595_v32  ;;  %v2636_v22 = vmul.f32 %v4913_v41, %v2609_v49  ;;  %v2676_v15 = vmul.f32 %v4921_v8, %v2609_v49  ;;  %v5769_v21 = vpop.eup %5768 }
 0x7d2   :  { %v2690_v37 = vmul.f32 %v2686_v19, %v7606_v3  ;;  %v2650_v6 = vmul.f32 %v2646_v26, %v7606_v3  ;;  %v2713_v32 = vmul.f32 %v5769_v21, %v2669_v16 }
 0x7d3   :  { %5770 = vrcp.f32 %v2707_v48  ;;  %v2640_v34 = vadd.f32 %v4911_v59, %v2636_v22  ;;  %v2680_v46 = vadd.f32 %v4919_v35, %v2676_v15  ;;  %v2671_v30 = vadd.f32 %v4903_v52, %v2667_v23 }
 0x7d4   :  { %v2694_v10 = vadd.f32 %v4914_v60, %v2690_v37  ;;  %v2654_v57 = vadd.f32 %v4906_v53, %v2650_v6 }
 0x7d5   :  { %v2644_v45 = vmul.f32 %v2640_v34, %v2609_v49  ;;  %v2684_v55 = vmul.f32 %v2680_v46, %v2609_v49 }
 0x7d6   :  { %v2698_v39 = vmul.f32 %v2694_v10, %v7606_v3  ;;  %v2658_v60 = vmul.f32 %v2654_v57, %v7606_v3 }
 0x7d7   :  { %v2648_v61 = vadd.f32 %v4909_v51, %v2644_v45  ;;  %v2688_v41 = vadd.f32 %v4917_v62, %v2684_v55 }
 0x7d8   :  { %v2702_v59 = vand.u32 2147483647, %v2698_v39  ;;  %v2662_v63 = vadd.f32 %v4904_v13, %v2658_v60 }
 0x7d9   :  { %v5771_v31 = vpop.eup %5770  ;;  %v2652_v12 = vmul.f32 %v2648_v61, %v2609_v49  ;;  %v2692_v44 = vmul.f32 %v2688_v41, %v2609_v49 }
 0x7da   :  { %v2715_v9 = vmul.f32 %v5771_v31, %v2671_v30  ;;  %v2706_v25 = vadd.f32 1.0, %v2702_v59  ;;  %v2666_v27 = vmul.f32 %v2662_v63, %v7606_v3 }
 0x7db   :  { %v2656_v54 = vadd.f32 %v4907_v20, %v2652_v12  ;;  %v2696_v33 = vadd.f32 %v4915_v29, %v2692_v44 }
 0x7dc   :  { %v2723_v8 = vadd.f32 %v2715_v9, %v2713_v32  ;;  %5772 = vrcp.f32 %v2706_v25  ;;  %v2670_v47 = vadd.f32 %v4902_v1, %v2666_v27  ;;  %v2718_v25 = vld [vmem:[#allocation7 + $0x10] sm:$0xff] }
 0x7dd   :  { %v2660_v11 = vmul.f32 %v2656_v54, %v2609_v49  ;;  %v2700_v38 = vmul.f32 %v2696_v33, %v2609_v49 }
 0x7de   :  { %v2724_v35 = vrot.slane %v2723_v8, 4 }
 0x7df   :  { %v2704_v36 = vand.u32 2147483647, %v2700_v38  ;;  %v2664_v51 = vadd.f32 %v4905_v0, %v2660_v11 }
 0x7e0   :  { %v2725_v2 = vadd.f32 %v2724_v35, %v2723_v8 }
 0x7e1   :  { %v2708_v62 = vadd.f32 1.0, %v2704_v36  ;;  %v2668_v20 = vmul.f32 %v2664_v51, %v2609_v49 }
 0x7e2   :  { %v2726_v24 = vrot.slane %v2725_v2, 2  ;;  %v5773_v43 = vpop.eup %5772 }
 0x7e3   :  { %5774 = vrcp.f32 %v2708_v62  ;;  %v2672_v28 = vadd.f32 %v4903_v52, %v2668_v20  ;;  %v2714_v13 = vmul.f32 %v5773_v43, %v2670_v47  ;;  %v2721_v62 = vld [vmem:[#allocation8 + $0x10] sm:$0xff]  ;;  %v5420_v47 = vld [vmem:[#allocation10 + $0x8] sm:$0xff] }
 0x7e4   :  { %v2727_v42 = vadd.f32 %v2726_v24, %v2725_v2  ;;  %v2719_v24 = vld [vmem:[#allocation7 + $0x18] sm:$0xff] }
 0x7e6   :  { %v2728_v53 = vrot.slane %v2727_v42, 1 }
 0x7e8   :  { %v2729_v18 = vadd.f32 %v2728_v53, %v2727_v42  ;;  %v2722_v53 = vld [vmem:[#allocation8 + $0x18] sm:$0xff] }
 0x7e9   :  { %v5775_v56 = vpop.eup %5774 }
 0x7ea   :  { %v2737_v29 = vmul.f32 %v2729_v18, %v7215_v50  ;;  %v2716_v0 = vmul.f32 %v5775_v56, %v2672_v28 }
 0x7ec   :  { %v2739_v48 = vsub.f32 %v2713_v32, %v2737_v29  ;;  %v2741_v17 = vsub.f32 %v2715_v9, %v2737_v29  ;;  %v2730_v22 = vadd.f32 %v2716_v0, %v2714_v13 }
 0x7ee   :  { %v2743_v23 = vmul.f32 %v2739_v48, %v2739_v48  ;;  %v2745_v26 = vmul.f32 %v2741_v17, %v2741_v17  ;;  %v2731_v37 = vrot.slane %v2730_v22, 4 }
 0x7f0   :  { %v2747_v19 = vadd.f32 %v2745_v26, %v2743_v23  ;;  %v2732_v34 = vadd.f32 %v2731_v37, %v2730_v22 }
 0x7f2   :  { %v2748_v15 = vrot.slane %v2747_v19, 4  ;;  %v2733_v49 = vrot.slane %v2732_v34, 2 }
 0x7f4   :  { %v2749_v21 = vadd.f32 %v2748_v15, %v2747_v19  ;;  %v2734_v16 = vadd.f32 %v2733_v49, %v2732_v34  ;;  %v5427_v49 = vld [vmem:[%s8055_s25 + $0x70] sm:$0xff] }
 0x7f6   :  { %v2750_v3 = vrot.slane %v2749_v21, 2  ;;  %v2735_v6 = vrot.slane %v2734_v16, 1 }
 0x7f8   :  { %v2751_v46 = vadd.f32 %v2750_v3, %v2749_v21  ;;  %v2736_v1 = vadd.f32 %v2735_v6, %v2734_v16  ;;  %v5428_v3 = vld [vmem:[%s8055_s25 + $0x78] sm:$0xff]  ;;  %v2803_v16 = vld [vmem:[#allocation11 + $0x10] sm:$0xff] }
 0x7f9   :  { %3043 = vmatpush.bf16.msra.mxu0 %v5428_v3  ;;  %v5601_v3 = vld [vmem:[#allocation13 + $0x7] ss:$0 sm:$0xff] }
 0x7fa   :  { %v2752_v30 = vrot.slane %v2751_v46, 1  ;;  %v2738_v31 = vmul.f32 %v2736_v1, %v7215_v50  ;;  %v7633_v1 = vld [vmem:[#allocation13 + $0xb] ss:$0 sm:$0xff] }
 0x7fc   :  { %v2753_v10 = vadd.f32 %v2752_v30, %v2751_v46  ;;  %v2740_v55 = vsub.f32 %v2714_v13, %v2738_v31  ;;  %v2742_v32 = vsub.f32 %v2716_v0, %v2738_v31  ;;  %v5426_v46 = vld [vmem:[%s8055_s25 + $0x68] sm:$0xff]  ;;  %v5425_v30 = vld [vmem:[%s8055_s25 + $0x60] sm:$0xff] }
 0x7fd   :  { %3044 = vmatpush.bf16.msra.mxu0 %v5427_v49 }
 0x7fe   :  { %v2761_v52 = vmul.f32 %v2753_v10, %v7215_v50  ;;  %v2744_v9 = vmul.f32 %v2740_v55, %v2740_v55  ;;  %v2746_v39 = vmul.f32 %v2742_v32, %v2742_v32 }
 0x800   :  { %v2763_v45 = vadd.f32 1e-05, %v2761_v52  ;;  %v2754_v61 = vadd.f32 %v2746_v39, %v2744_v9  ;;  %v7635_v52 = vld [vmem:[#allocation14 + $0x7] ss:$0 sm:$0xff] }
 0x801   :  { %3045 = vmatpush.bf16.msra.mxu0 %v5426_v46 }
 0x802   :  { %5776 = vrsqrt.f32 %v2763_v45  ;;  %v2755_v41 = vrot.slane %v2754_v61, 4  ;;  %vm2771_vm5 = vweird.f32 %v2763_v45 }
 0x804   :  { %v2756_v57 = vadd.f32 %v2755_v41, %v2754_v61  ;;  %v2804_v61 = vld [vmem:[#allocation11 + $0x18] sm:$0xff]  ;;  %v5423_v41 = vld [vmem:[%s8055_s25 + $0x50] sm:$0xff] }
 0x805   :  { %3046 = vmatpush.bf16.msra.mxu0 %v5425_v30 }
 0x806   :  { %v2757_v44 = vrot.slane %v2756_v57, 2 }
 0x808   :  { %v5777_v8 = vpop.eup %5776  ;;  %v2758_v35 = vadd.f32 %v2757_v44, %v2756_v57  ;;  %v7652_v57 = vld [vmem:[#allocation14 + $0x5] ss:$0 sm:$0xff]  ;;  %v7654_v44 = vld [vmem:[#allocation13 + $0x9] ss:$0 sm:$0xff] }
 0x809   :  { %v2766_v12 = vmul.f32 %v5777_v8, %v2763_v45  ;;  %vm2772_vm4 = vweird.f32 %v5777_v8  ;;  %v5424_v45 = vld [vmem:[%s8055_s25 + $0x58] sm:$0xff] }
 0x80a   :  { %v2759_v33 = vrot.slane %v2758_v35, 1  ;;  %vm2773_vm6 = vmor %vm2771_vm5, %vm2772_vm4  ;;  %3047 = vmatpush.bf16.msra.mxu0 %v5424_v45 }
 0x80b   :  { %v2767_v59 = vmul.f32 %v5777_v8, %v2766_v12 }
 0x80c   :  { %v2760_v60 = vadd.f32 %v2759_v33, %v2758_v35 }
 0x80d   :  { %v2768_v54 = vmul.f32 0.5, %v2767_v59 }
 0x80e   :  { %v2762_v38 = vmul.f32 %v2760_v60, %v7215_v50  ;;  %3048 = vmatpush.bf16.msra.mxu0 %v5423_v41 }
 0x80f   :  { %v2769_v2 = vsub.f32 1.5, %v2768_v54 }
 0x810   :  { %v2764_v51 = vadd.f32 1e-05, %v2762_v38  ;;  %v7664_v38 = vld [vmem:[#allocation14 + $0x4] ss:$0 sm:$0xff] }
 0x811   :  { %v2770_v11 = vmul.f32 %v5777_v8, %v2769_v2  ;;  %v5422_v2 = vld [vmem:[%s8055_s25 + $0x48] sm:$0xff] }
 0x812   :  { %5778 = vrsqrt.f32 %v2764_v51  ;;  %vm2781_vm8 = vweird.f32 %v2764_v51  ;;  %3049 = vmatpush.bf16.msra.mxu0 %v5422_v2 }
 0x813   :  { %v2774_v36 = vsel %vm2773_vm6, %v5777_v8, %v2770_v11 }
 0x814   :  { %v2785_v42 = vmul.f32 %v2774_v36, %v2739_v48  ;;  %v2787_v63 = vmul.f32 %v2774_v36, %v2741_v17 }
 0x816   :  { %v2789_v18 = vmul.f32 %v2785_v42, %v2718_v25  ;;  %v2791_v27 = vmul.f32 %v2787_v63, %v2719_v24 }
 0x818   :  { %v2793_v20 = vadd.f32 %v2789_v18, %v2721_v62  ;;  %v2795_v29 = vadd.f32 %v2791_v27, %v2722_v53  ;;  %v5779_v28 = vpop.eup %5778  ;;  %v5600_v18 = vld [vmem:[#allocation13 + $0x8] ss:$0 sm:$0xff] }
 0x819   :  { %v2776_v56 = vmul.f32 %v5779_v28, %v2764_v51  ;;  %vm2782_vm7 = vweird.f32 %v5779_v28 }
 0x81a   :  { %v2800_v43 = vpack.c.bf16 %v2795_v29, %v2793_v20  ;;  %vm2783_vm9 = vmor %vm2781_vm8, %vm2782_vm7 }
 0x81b   :  { %v2777_v23 = vmul.f32 %v5779_v28, %v2776_v56 }
 0x81c   :  { %2820 = vmatpush.bf16.msra.mxu3 %v2800_v43 }
 0x81d   :  { %v2778_v26 = vmul.f32 0.5, %v2777_v23 }
 0x81f   :  { %4926 = vmatmul.msk.bf16.vlgmr.msra.gmra.mxu3 %vm1649_vm15, %v5420_v47  ;;  %v2779_v48 = vsub.f32 1.5, %v2778_v26 }
 0x821   :  { %v2780_v17 = vmul.f32 %v5779_v28, %v2779_v48 }
 0x823   :  { %v2784_v13 = vsel %vm2783_vm9, %v5779_v28, %v2780_v17 }
 0x824   :  { %v2786_v0 = vmul.f32 %v2784_v13, %v2740_v55  ;;  %v2788_v19 = vmul.f32 %v2784_v13, %v2742_v32  ;;  %v7641_v55 = vld [vmem:[#allocation13 + $0xa] ss:$0 sm:$0xff]  ;;  %v7643_v32 = vld [vmem:[#allocation14 + $0x6] ss:$0 sm:$0xff] }
 0x826   :  { %v2790_v22 = vmul.f32 %v2786_v0, %v2718_v25  ;;  %v2792_v15 = vmul.f32 %v2788_v19, %v2719_v24 }
 0x828   :  { %v2794_v37 = vadd.f32 %v2790_v22, %v2721_v62  ;;  %v2796_v21 = vadd.f32 %v2792_v15, %v2722_v53 }
 0x82a   :  { %v2801_v34 = vpack.c.bf16 %v2796_v21, %v2794_v37 }
 0x82c   :  { %2834 = vmatpush.bf16.msrb.mxu1 %v2801_v34 }
 0x82f   :  { %4927 = vmatmul.msk.bf16.vlgmr.msrb.gmra.mxu1 %vm1649_vm15, %v5420_v47 }
 0x8a2   :  { %v2822_v6 = vpop.f32.mrf.mxu3 }
 0x8a3   :  { %v2823_v10 = vadd.f32 %v2822_v6, %v2803_v16 }
 0x8a5   :  { %v7638_v31 = vadd.f32 %v2823_v10, %v7461_v14 }
 0x8a7   :  { %v2860_v9 = vmul.f32 %v7633_v1, %v7638_v31  ;;  %v2918_v39 = vmul.f32 %v7635_v52, %v7638_v31 }
 0x8a9   :  { %v2867_v8 = vadd.f32 %v7641_v55, %v2860_v9  ;;  %v2925_v14 = vadd.f32 %v7643_v32, %v2918_v39 }
 0x8aa   :  { %v2824_v12 = vpop.f32.mrf.mxu3 }
 0x8ab   :  { %v2825_v59 = vadd.f32 %v2824_v12, %v2804_v61  ;;  %v2871_v35 = vmul.f32 %v2867_v8, %v7638_v31  ;;  %v2929_v54 = vmul.f32 %v2925_v14, %v7638_v31 }
 0x8ac   :  { %v2836_v42 = vpop.f32.mrf.mxu1 }
 0x8ad   :  { %v7659_v33 = vadd.f32 %v2825_v59, %v7473_v40  ;;  %v2936_v60 = vadd.f32 %v7652_v57, %v2929_v54  ;;  %v2878_v11 = vadd.f32 %v7654_v44, %v2871_v35  ;;  %v2837_v63 = vadd.f32 %v2836_v42, %v2803_v16  ;;  %v5421_v40 = vld [vmem:[%s8055_s25 + $0x40] sm:$0xff] }
 0x8ae   :  { %3050 = vmatpush.bf16.msra.mxu0 %v5421_v40 }
 0x8af   :  { %v2861_v25 = vmul.f32 %v7633_v1, %v7659_v33  ;;  %v2919_v24 = vmul.f32 %v7635_v52, %v7659_v33  ;;  %v2940_v36 = vmul.f32 %v2936_v60, %v7638_v31  ;;  %v2882_v53 = vmul.f32 %v2878_v11, %v7638_v31  ;;  %v5602_v60 = vld [vmem:[#allocation13 + $0x6] ss:$0 sm:$0xff] }
 0x8b0   :  { %v7677_v20 = vadd.f32 %v2837_v63, %v7538_v7 }
 0x8b1   :  { %v2868_v51 = vadd.f32 %v7641_v55, %v2861_v25  ;;  %v2926_v62 = vadd.f32 %v7643_v32, %v2919_v24  ;;  %v2947_v27 = vadd.f32 %v7664_v38, %v2940_v36  ;;  %v2889_v26 = vadd.f32 %v5600_v18, %v2882_v53 }
 0x8b2   :  { %v2862_v23 = vmul.f32 %v7633_v1, %v7677_v20  ;;  %v2920_v48 = vmul.f32 %v7635_v52, %v7677_v20 }
 0x8b3   :  { %v2872_v29 = vmul.f32 %v2868_v51, %v7659_v33  ;;  %v2930_v43 = vmul.f32 %v2926_v62, %v7659_v33  ;;  %v2951_v47 = vmul.f32 %v2947_v27, %v7638_v31  ;;  %v2893_v34 = vmul.f32 %v2889_v26, %v7638_v31 }
 0x8b4   :  { %v2869_v0 = vadd.f32 %v7641_v55, %v2862_v23  ;;  %v2838_v19 = vpop.f32.mrf.mxu1  ;;  %v2927_v22 = vadd.f32 %v7643_v32, %v2920_v48 }
 0x8b5   :  { %v2879_v28 = vadd.f32 %v7654_v44, %v2872_v29  ;;  %v2937_v56 = vadd.f32 %v7652_v57, %v2930_v43  ;;  %v2955_v13 = vand.u32 2147483647, %v2951_v47  ;;  %v2839_v15 = vadd.f32 %v2838_v19, %v2804_v61 }
 0x8b6   :  { %v2873_v49 = vmul.f32 %v2869_v0, %v7677_v20  ;;  %v2931_v46 = vmul.f32 %v2927_v22, %v7677_v20  ;;  %v2900_v41 = vadd.f32 %v5601_v3, %v2893_v34 }
 0x8b7   :  { %v2883_v7 = vmul.f32 %v2879_v28, %v7659_v33  ;;  %v2941_v17 = vmul.f32 %v2937_v56, %v7659_v33  ;;  %v7697_v16 = vadd.f32 %v2839_v15, %v7552_v58  ;;  %v2959_v10 = vadd.f32 1.0, %v2955_v13 }
 0x8b8   :  { %v2938_v45 = vadd.f32 %v7652_v57, %v2931_v46  ;;  %v2880_v14 = vadd.f32 %v7654_v44, %v2873_v49  ;;  %v2904_v2 = vmul.f32 %v2900_v41, %v7638_v31  ;;  %v5607_v49 = vld [vmem:[#allocation16 + $0x1] ss:$0 sm:$0xff]  ;;  %v7727_v46 = vld [vmem:[#allocation17 + $0xb] ss:$0 sm:$0xff]  ;;  %v7738_v41 = vld [vmem:[#allocation17 + $0x9] ss:$0 sm:$0xff] }
 0x8b9   :  { %v2890_v37 = vadd.f32 %v5600_v18, %v2883_v7  ;;  %v2948_v21 = vadd.f32 %v7664_v38, %v2941_v17  ;;  %v2863_v39 = vmul.f32 %v7633_v1, %v7697_v16  ;;  %v2921_v61 = vmul.f32 %v7635_v52, %v7697_v16 }
 0x8ba   :  { %v2942_v58 = vmul.f32 %v2938_v45, %v7677_v20  ;;  %5780 = vrcp.f32 %v2959_v10  ;;  %v2884_v11 = vmul.f32 %v2880_v14, %v7677_v20  ;;  %v2911_v63 = vadd.f32 %v5602_v60, %v2904_v2  ;;  %v7731_v10 = vld [vmem:[#allocation17 + $0xa] ss:$0 sm:$0xff]  ;;  %v7733_v45 = vld [vmem:[#allocation19 + $0x6] ss:$0 sm:$0xff]  ;;  %v7741_v14 = vld [vmem:[#allocation19 + $0x5] ss:$0 sm:$0xff] }
 0x8bb   :  { %v2894_v30 = vmul.f32 %v2890_v37, %v7659_v33  ;;  %v2952_v6 = vmul.f32 %v2948_v21, %v7659_v33  ;;  %v2870_v59 = vadd.f32 %v7641_v55, %v2863_v39  ;;  %v2928_v35 = vadd.f32 %v7643_v32, %v2921_v61 }
 0x8bc   :  { %v2949_v54 = vadd.f32 %v7664_v38, %v2942_v58  ;;  %v2891_v51 = vadd.f32 %v5600_v18, %v2884_v11 }
 0x8bd   :  { %v2956_v9 = vand.u32 2147483647, %v2952_v6  ;;  %v2901_v8 = vadd.f32 %v5601_v3, %v2894_v30  ;;  %v2874_v1 = vmul.f32 %v2870_v59, %v7697_v16  ;;  %v2932_v25 = vmul.f32 %v2928_v35, %v7697_v16  ;;  %v7729_v30 = vld [vmem:[#allocation19 + $0x7] ss:$0 sm:$0xff] }
 0x8be   :  { %v2953_v55 = vmul.f32 %v2949_v54, %v7677_v20 }
 0x8bf   :  { %v2960_v12 = vadd.f32 1.0, %v2956_v9  ;;  %v2905_v52 = vmul.f32 %v2901_v8, %v7659_v33  ;;  %v2881_v24 = vadd.f32 %v7654_v44, %v2874_v1  ;;  %v2939_v32 = vadd.f32 %v7652_v57, %v2932_v25  ;;  %v7744_v1 = vld [vmem:[#allocation17 + $0x8] ss:$0 sm:$0xff] }
 0x8c0   :  { %v5781_v36 = vpop.eup %5780  ;;  %v2957_v29 = vand.u32 2147483647, %v2953_v55  ;;  %v2895_v57 = vmul.f32 %v2891_v51, %v7677_v20 }
 0x8c1   :  { %5782 = vrcp.f32 %v2960_v12  ;;  %v2885_v42 = vmul.f32 %v2881_v24, %v7697_v16  ;;  %v2912_v40 = vadd.f32 %v5602_v60, %v2905_v52  ;;  %v2943_v62 = vmul.f32 %v2939_v32, %v7697_v16  ;;  %v7747_v52 = vld [vmem:[#allocation19 + $0x4] ss:$0 sm:$0xff] }
 0x8c2   :  { %v2967_v43 = vmul.f32 %v5781_v36, %v2911_v63  ;;  %v2961_v26 = vadd.f32 1.0, %v2957_v29  ;;  %v2902_v17 = vadd.f32 %v5601_v3, %v2895_v57  ;;  %v7755_v63 = vld [vmem:[#allocation17 + $0x7] ss:$0 sm:$0xff] }
 0x8c3   :  { %v2892_v27 = vadd.f32 %v5600_v18, %v2885_v42  ;;  %v2950_v28 = vadd.f32 %v7664_v38, %v2943_v62 }
 0x8c4   :  { %5784 = vrcp.f32 %v2961_v26  ;;  %v2906_v0 = vmul.f32 %v2902_v17, %v7677_v20 }
 0x8c5   :  { %v2896_v44 = vmul.f32 %v2892_v27, %v7697_v16  ;;  %v2954_v23 = vmul.f32 %v2950_v28, %v7697_v16 }
 0x8c6   :  { %v2913_v15 = vadd.f32 %v5602_v60, %v2906_v0 }
 0x8c7   :  { %v5783_v53 = vpop.eup %5782  ;;  %v2958_v48 = vand.u32 2147483647, %v2954_v23  ;;  %v2903_v7 = vadd.f32 %v5601_v3, %v2896_v44 }
 0x8c8   :  { %v2968_v47 = vmul.f32 %v5783_v53, %v2912_v40 }
 0x8c9   :  { %v2962_v13 = vadd.f32 1.0, %v2958_v48  ;;  %v2907_v18 = vmul.f32 %v2903_v7, %v7697_v16 }
 0x8ca   :  { %v2971_v56 = vpack.c.bf16 %v2968_v47, %v2967_v43  ;;  %v5785_v38 = vpop.eup %5784 }
 0x8cb   :  { %5786 = vrcp.f32 %v2962_v13  ;;  %v2914_v19 = vadd.f32 %v5602_v60, %v2907_v18  ;;  %v2969_v21 = vmul.f32 %v5785_v38, %v2913_v15  ;;  %v5613_v18 = vld [vmem:[#allocation17 + $0x6] ss:$0 sm:$0xff] }
 0x8cc   :  { %3051 = vmatmul.bf16.vlgmr.msra.gmra.mxu0 %v2971_v56 }
 0x8d1   :  { %v5787_v22 = vpop.eup %5786 }
 0x8d2   :  { %v2970_v37 = vmul.f32 %v5787_v22, %v2914_v19 }
 0x8d4   :  { %v2972_v34 = vpack.c.bf16 %v2970_v37, %v2969_v21 }
 0x8dc   :  { %3056 = vmatmul.bf16.gmra.mxu0 %v2972_v34 }
 0x949   :  { %v3052_v3 = vpop.f32.mrf.mxu0 }
 0x94a   :  { %v3053_v6 = vadd.f32 %v5607_v49, %v3052_v3 }
 0x94c   :  { %v3077_v9 = vmul.f32 %v7727_v46, %v3053_v6  ;;  %v3135_v39 = vmul.f32 %v7729_v30, %v3053_v6 }
 0x94e   :  { %v3084_v61 = vadd.f32 %v7731_v10, %v3077_v9  ;;  %v3142_v8 = vadd.f32 %v7733_v45, %v3135_v39 }
 0x950   :  { %v3088_v58 = vmul.f32 %v3084_v61, %v3053_v6  ;;  %v3146_v12 = vmul.f32 %v3142_v8, %v3053_v6 }
 0x951   :  { %v3054_v59 = vpop.f32.mrf.mxu0 }
 0x952   :  { %v3055_v35 = vadd.f32 %v5607_v49, %v3054_v59  ;;  %v3095_v54 = vadd.f32 %v7738_v41, %v3088_v58  ;;  %v3153_v2 = vadd.f32 %v7741_v14, %v3146_v12 }
 0x954   :  { %v3099_v60 = vmul.f32 %v3095_v54, %v3053_v6  ;;  %v3157_v11 = vmul.f32 %v3153_v2, %v3053_v6  ;;  %v3078_v25 = vmul.f32 %v7727_v46, %v3055_v35  ;;  %v3136_v24 = vmul.f32 %v7729_v30, %v3055_v35 }
 0x956   :  { %v3106_v55 = vadd.f32 %v7744_v1, %v3099_v60  ;;  %v3164_v32 = vadd.f32 %v7747_v52, %v3157_v11  ;;  %v3085_v36 = vadd.f32 %v7731_v10, %v3078_v25  ;;  %v3143_v42 = vadd.f32 %v7733_v45, %v3136_v24 }
 0x958   :  { %v3110_v40 = vmul.f32 %v3106_v55, %v3053_v6  ;;  %v3168_v51 = vmul.f32 %v3164_v32, %v3053_v6  ;;  %v3089_v62 = vmul.f32 %v3085_v36, %v3055_v35  ;;  %v3147_v53 = vmul.f32 %v3143_v42, %v3055_v35 }
 0x959   :  { %v3057_v27 = vpop.f32.mrf.mxu0 }
 0x95a   :  { %v3058_v29 = vadd.f32 %v5607_v49, %v3057_v27  ;;  %v3172_v43 = vand.u32 2147483647, %v3168_v51  ;;  %v3096_v47 = vadd.f32 %v7738_v41, %v3089_v62  ;;  %v3117_v28 = vadd.f32 %v7755_v63, %v3110_v40 }
 0x95b   :  { %v3154_v44 = vadd.f32 %v7741_v14, %v3147_v53 }
 0x95c   :  { %v3176_v56 = vadd.f32 1.0, %v3172_v43  ;;  %v3100_v57 = vmul.f32 %v3096_v47, %v3055_v35  ;;  %v3079_v23 = vmul.f32 %v7727_v46, %v3058_v29  ;;  %v3137_v48 = vmul.f32 %v7729_v30, %v3058_v29 }
 0x95d   :  { %v3158_v26 = vmul.f32 %v3154_v44, %v3055_v35  ;;  %v3121_v13 = vmul.f32 %v3117_v28, %v3053_v6 }
 0x95e   :  { %5788 = vrcp.f32 %v3176_v56  ;;  %v3107_v7 = vadd.f32 %v7744_v1, %v3100_v57  ;;  %v3086_v17 = vadd.f32 %v7731_v10, %v3079_v23  ;;  %v3144_v38 = vadd.f32 %v7733_v45, %v3137_v48 }
 0x95f   :  { %v3165_v0 = vadd.f32 %v7747_v52, %v3158_v26  ;;  %v3128_v9 = vadd.f32 %v5613_v18, %v3121_v13 }
 0x960   :  { %v3111_v19 = vmul.f32 %v3107_v7, %v3055_v35  ;;  %v3090_v22 = vmul.f32 %v3086_v17, %v3058_v29  ;;  %v3148_v21 = vmul.f32 %v3144_v38, %v3058_v29 }
 0x961   :  { %v3059_v15 = vpop.f32.mrf.mxu0  ;;  %v3169_v37 = vmul.f32 %v3165_v0, %v3055_v35 }
 0x962   :  { %v3060_v34 = vadd.f32 %v5607_v49, %v3059_v15  ;;  %v3097_v3 = vadd.f32 %v7738_v41, %v3090_v22  ;;  %v3155_v61 = vadd.f32 %v7741_v14, %v3148_v21  ;;  %v3118_v6 = vadd.f32 %v7755_v63, %v3111_v19 }
 0x963   :  { %v3173_v39 = vand.u32 2147483647, %v3169_v37 }
 0x964   :  { %v5789_v8 = vpop.eup %5788  ;;  %v3101_v58 = vmul.f32 %v3097_v3, %v3058_v29  ;;  %v3080_v12 = vmul.f32 %v7727_v46, %v3060_v34  ;;  %v3138_v59 = vmul.f32 %v7729_v30, %v3060_v34  ;;  %v3159_v60 = vmul.f32 %v3155_v61, %v3058_v29 }
 0x965   :  { %v7771_v54 = vmul.f32 %v5789_v8, %v3128_v9  ;;  %v3177_v2 = vadd.f32 1.0, %v3173_v39  ;;  %v3122_v32 = vmul.f32 %v3118_v6, %v3055_v35 }
 0x966   :  { %v3108_v49 = vadd.f32 %v7744_v1, %v3101_v58  ;;  %v3087_v11 = vadd.f32 %v7731_v10, %v3080_v12  ;;  %v3145_v25 = vadd.f32 %v7733_v45, %v3138_v59  ;;  %v3166_v55 = vadd.f32 %v7747_v52, %v3159_v60 }
 0x967   :  { %v3192_v24 = vmul.f32 %v6713_v5, %v7771_v54  ;;  %5790 = vrcp.f32 %v3177_v2  ;;  %v3129_v10 = vadd.f32 %v5613_v18, %v3122_v32 }
 0x968   :  { %v3112_v46 = vmul.f32 %v3108_v49, %v3058_v29  ;;  %v3091_v36 = vmul.f32 %v3087_v11, %v3060_v34  ;;  %v3149_v30 = vmul.f32 %v3145_v25, %v3060_v34  ;;  %v3170_v42 = vmul.f32 %v3166_v55, %v3058_v29  ;;  %v5436_v25 = vld [vmem:[%s8056_s22 + $0x78] sm:$0xff]  ;;  %v5435_v55 = vld [vmem:[%s8056_s22 + $0x70] sm:$0xff] }
 0x969   :  { %3196 = vadd.xlane.f32.xlu1 %v3192_v24  ;;  %3370 = vmatpush.bf16.msra.mxu2 %v5436_v25 }
 0x96a   :  { %v3098_v40 = vadd.f32 %v7738_v41, %v3091_v36  ;;  %v3156_v51 = vadd.f32 %v7741_v14, %v3149_v30  ;;  %v3174_v62 = vand.u32 2147483647, %v3170_v42  ;;  %v3119_v45 = vadd.f32 %v7755_v63, %v3112_v46  ;;  %v5434_v46 = vld [vmem:[%s8056_s22 + $0x68] sm:$0xff]  ;;  %v5433_v30 = vld [vmem:[%s8056_s22 + $0x60] sm:$0xff] }
 0x96c   :  { %v3102_v53 = vmul.f32 %v3098_v40, %v3060_v34  ;;  %v3160_v27 = vmul.f32 %v3156_v51, %v3060_v34  ;;  %v3178_v47 = vadd.f32 1.0, %v3174_v62  ;;  %v3123_v56 = vmul.f32 %v3119_v45, %v3058_v29  ;;  %v5432_v51 = vld [vmem:[%s8056_s22 + $0x58] sm:$0xff] }
 0x96d   :  { %v5791_v43 = vpop.eup %5790  ;;  %3371 = vmatpush.bf16.msra.mxu2 %v5435_v55 }
 0x96e   :  { %v7782_v28 = vmul.f32 %v5791_v43, %v3129_v10  ;;  %v3109_v35 = vadd.f32 %v7744_v1, %v3102_v53  ;;  %v3167_v44 = vadd.f32 %v7747_v52, %v3160_v27  ;;  %5792 = vrcp.f32 %v3178_v47  ;;  %v5431_v53 = vld [vmem:[%s8056_s22 + $0x50] sm:$0xff] }
 0x96f   :  { %v3130_v48 = vadd.f32 %v5613_v18, %v3123_v56 }
 0x970   :  { %v3193_v41 = vmul.f32 %v6713_v5, %v7782_v28  ;;  %v3113_v14 = vmul.f32 %v3109_v35, %v3060_v34  ;;  %v3171_v57 = vmul.f32 %v3167_v44, %v3060_v34  ;;  %v5430_v44 = vld [vmem:[%s8056_s22 + $0x48] sm:$0xff] }
 0x971   :  { %3372 = vmatpush.bf16.msra.mxu2 %v5434_v46 }
 0x972   :  { %3198 = vadd.xlane.f32.xlu2 %v3193_v41  ;;  %v3175_v23 = vand.u32 2147483647, %v3171_v57  ;;  %v3120_v26 = vadd.f32 %v7755_v63, %v3113_v14 }
 0x974   :  { %v3179_v7 = vadd.f32 1.0, %v3175_v23  ;;  %v5793_v17 = vpop.eup %5792  ;;  %v3124_v1 = vmul.f32 %v3120_v26, %v3060_v34  ;;  %v5429_v23 = vld [vmem:[%s8056_s22 + $0x40] sm:$0xff] }
 0x975   :  { %v7789_v13 = vmul.f32 %v5793_v17, %v3130_v48  ;;  %3373 = vmatpush.bf16.msra.mxu2 %v5433_v30 }
 0x976   :  { %5794 = vrcp.f32 %v3179_v7  ;;  %v3131_v0 = vadd.f32 %v5613_v18, %v3124_v1 }
 0x977   :  { %v3194_v52 = vmul.f32 %v6713_v5, %v7789_v13 }
 0x979   :  { %3200 = vadd.xlane.f32.xlu0 %v3194_v52  ;;  %3374 = vmatpush.bf16.msra.mxu2 %v5432_v51 }
 0x97c   :  { %v5795_v38 = vpop.eup %5794 }
 0x97d   :  { %v7793_v29 = vmul.f32 %v5795_v38, %v3131_v0  ;;  %3375 = vmatpush.bf16.msra.mxu2 %v5431_v53  ;;  %v5620_v53 = vld [vmem:[#allocation22 + $0x1] ss:$0 sm:$0xff] }
 0x97f   :  { %v3195_v19 = vmul.f32 %v6713_v5, %v7793_v29 }
 0x981   :  { %3202 = vadd.xlane.f32.xlu1 %v3195_v19  ;;  %3376 = vmatpush.bf16.msra.mxu2 %v5430_v44 }
 0x985   :  { %3377 = vmatpush.bf16.msra.mxu2 %v5429_v23 }
 0x9dc   :  { %v3197_v63 = vpop.xlane.xlu1 %3196 }
 0x9dd   :  { %v7797_v22 = vmul.f32 0.015625, %v3197_v63 }
 0x9df   :  { %v3208_v15 = vsub.f32 %v3192_v24, %v7797_v22 }
 0x9e1   :  { %v3212_v37 = vmul.f32 %v3208_v15, %v3208_v15  ;;  %v5618_v15 = vld [vmem:[%s8057_s23 + $0x1] ss:$0 sm:$0xff] }
 0x9e3   :  { %v3216_v21 = vmul.f32 %v6713_v5, %v3212_v37 }
 0x9e5   :  { %v3199_v34 = vpop.xlane.xlu2 %3198  ;;  %3220 = vadd.xlane.f32.xlu2 %v3216_v21 }
 0x9e6   :  { %v7801_v3 = vmul.f32 0.015625, %v3199_v34 }
 0x9e8   :  { %v3209_v18 = vsub.f32 %v3193_v41, %v7801_v3  ;;  %v3233_v34 = vsub.f32 %v7782_v28, %v7801_v3 }
 0x9ea   :  { %v3213_v9 = vmul.f32 %v3209_v18, %v3209_v18 }
 0x9ec   :  { %v3217_v39 = vmul.f32 %v6713_v5, %v3213_v9  ;;  %v3201_v61 = vpop.xlane.xlu0 %3200 }
 0x9ed   :  { %v7805_v8 = vmul.f32 0.015625, %v3201_v61 }
 0x9ee   :  { %3222 = vadd.xlane.f32.xlu0 %v3217_v39 }
 0x9ef   :  { %v3210_v6 = vsub.f32 %v3194_v52, %v7805_v8  ;;  %v3232_v52 = vsub.f32 %v7771_v54, %v7797_v22  ;;  %v5619_v54 = vld [vmem:[#allocation20 + $0x1] ss:$0 sm:$0xff]  ;;  %v3234_v55 = vsub.f32 %v7789_v13, %v7805_v8 }
 0x9f1   :  { %v3214_v58 = vmul.f32 %v3210_v6, %v3210_v6 }
 0x9f3   :  { %v3218_v59 = vmul.f32 %v6713_v5, %v3214_v58 }
 0x9f4   :  { %v3203_v12 = vpop.xlane.xlu1 %3202 }
 0x9f5   :  { %v7809_v2 = vmul.f32 0.015625, %v3203_v12  ;;  %3224 = vadd.xlane.f32.xlu1 %v3218_v59 }
 0x9f7   :  { %v3211_v60 = vsub.f32 %v3195_v19, %v7809_v2  ;;  %v3235_v30 = vsub.f32 %v7793_v29, %v7809_v2 }
 0x9f9   :  { %v3215_v49 = vmul.f32 %v3211_v60, %v3211_v60 }
 0x9fb   :  { %v3219_v11 = vmul.f32 %v6713_v5, %v3215_v49 }
 0x9fd   :  { %3226 = vadd.xlane.f32.xlu2 %v3219_v11 }
 0xa58   :  { %v3221_v24 = vpop.xlane.xlu2 %3220 }
 0xa59   :  { %v3228_v32 = vmul.f32 0.015625, %v3221_v24 }
 0xa5b   :  { %v3236_v36 = vadd.f32 1e-05, %v3228_v32 }
 0xa5d   :  { %5796 = vrsqrt.f32 %v3236_v36  ;;  %vm3246_vm10 = vweird.f32 %v3236_v36 }
 0xa61   :  { %v3223_v42 = vpop.xlane.xlu0 %3222 }
 0xa62   :  { %v3229_v40 = vmul.f32 0.015625, %v3223_v42 }
 0xa63   :  { %v5797_v5 = vpop.eup %5796 }
 0xa64   :  { %v3241_v62 = vmul.f32 %v5797_v5, %v3236_v36  ;;  %v3237_v10 = vadd.f32 1e-05, %v3229_v40  ;;  %vm3247_vm15 = vweird.f32 %v5797_v5 }
 0xa65   :  { %vm3248_vm11 = vmor %vm3246_vm10, %vm3247_vm15 }
 0xa66   :  { %v3242_v45 = vmul.f32 %v5797_v5, %v3241_v62  ;;  %5798 = vrsqrt.f32 %v3237_v10  ;;  %vm3256_vm13 = vweird.f32 %v3237_v10 }
 0xa68   :  { %v3243_v27 = vmul.f32 0.5, %v3242_v45  ;;  %v3225_v43 = vpop.xlane.xlu1 %3224 }
 0xa69   :  { %v3230_v35 = vmul.f32 0.015625, %v3225_v43 }
 0xa6a   :  { %v3244_v47 = vsub.f32 1.5, %v3243_v27 }
 0xa6b   :  { %v3238_v56 = vadd.f32 1e-05, %v3230_v35 }
 0xa6c   :  { %v5799_v41 = vpop.eup %5798  ;;  %v3245_v14 = vmul.f32 %v5797_v5, %v3244_v47 }
 0xa6d   :  { %v3251_v57 = vmul.f32 %v5799_v41, %v3237_v10  ;;  %5800 = vrsqrt.f32 %v3238_v56  ;;  %vm3257_vm12 = vweird.f32 %v5799_v41  ;;  %vm3266_vm1 = vweird.f32 %v3238_v56 }
 0xa6e   :  { %v3249_v7 = vsel %vm3248_vm11, %v5797_v5, %v3245_v14  ;;  %vm3258_vm14 = vmor %vm3256_vm13, %vm3257_vm12 }
 0xa6f   :  { %v3252_v26 = vmul.f32 %v5799_v41, %v3251_v57  ;;  %v3280_v63 = vmul.f32 %v3249_v7, %v3232_v52 }
 0xa70   :  { %v3227_v48 = vpop.xlane.xlu2 %3226 }
 0xa71   :  { %v3253_v17 = vmul.f32 0.5, %v3252_v26  ;;  %v3231_v1 = vmul.f32 0.015625, %v3227_v48  ;;  %v3287_v61 = vmul.f32 %v5618_v15, %v3280_v63 }
 0xa73   :  { %v3254_v0 = vsub.f32 1.5, %v3253_v17  ;;  %v3239_v38 = vadd.f32 1e-05, %v3231_v1  ;;  %v5801_v19 = vpop.eup %5800  ;;  %v3294_v60 = vadd.f32 %v5619_v54, %v3287_v61 }
 0xa74   :  { %v3261_v21 = vmul.f32 %v5801_v19, %v3238_v56  ;;  %vm3267_vm0 = vweird.f32 %v5801_v19 }
 0xa75   :  { %v3255_v37 = vmul.f32 %v5799_v41, %v3254_v0  ;;  %5802 = vrsqrt.f32 %v3239_v38  ;;  %vm3268_vm2 = vmor %vm3266_vm1, %vm3267_vm0  ;;  %vm3276_vm4 = vweird.f32 %v3239_v38 }
 0xa76   :  { %v3262_v9 = vmul.f32 %v5801_v19, %v3261_v21 }
 0xa77   :  { %v3259_v18 = vsel %vm3258_vm14, %v5799_v41, %v3255_v37 }
 0xa78   :  { %v3281_v39 = vmul.f32 %v3259_v18, %v3233_v34  ;;  %v3263_v22 = vmul.f32 0.5, %v3262_v9 }
 0xa7a   :  { %v3288_v6 = vmul.f32 %v5618_v15, %v3281_v39  ;;  %v3264_v12 = vsub.f32 1.5, %v3263_v22 }
 0xa7b   :  { %v5803_v58 = vpop.eup %5802 }
 0xa7c   :  { %v3271_v59 = vmul.f32 %v5803_v58, %v3239_v38  ;;  %v3295_v49 = vadd.f32 %v5619_v54, %v3288_v6  ;;  %v3265_v11 = vmul.f32 %v5801_v19, %v3264_v12  ;;  %vm3277_vm3 = vweird.f32 %v5803_v58 }
 0xa7d   :  { %vm3278_vm5 = vmor %vm3276_vm4, %vm3277_vm3  ;;  %vm3676_vm3 = vcmask 1041408  }
 0xa7e   :  { %v3272_v25 = vmul.f32 %v5803_v58, %v3271_v59  ;;  %v3298_v24 = vpack.c.bf16 %v3295_v49, %v3294_v60  ;;  %v3269_v3 = vsel %vm3268_vm2, %v5801_v19, %v3265_v11  ;;  %vm3673_vm2 = vcmask 1041409  }
 0xa7f   :  { %v3282_v46 = vmul.f32 %v3269_v3, %v3234_v55 }
 0xa80   :  { %v3273_v28 = vmul.f32 0.5, %v3272_v25  ;;  %3378 = vmatmul.bf16.vlgmr.msra.gmra.mxu2 %v3298_v24 }
 0xa81   :  { %v3289_v51 = vmul.f32 %v5618_v15, %v3282_v46 }
 0xa82   :  { %v3274_v32 = vsub.f32 1.5, %v3273_v28 }
 0xa83   :  { %v3296_v62 = vadd.f32 %v5619_v54, %v3289_v51 }
 0xa84   :  { %v3275_v36 = vmul.f32 %v5803_v58, %v3274_v32 }
 0xa86   :  { %v3279_v42 = vsel %vm3278_vm5, %v5803_v58, %v3275_v36 }
 0xa87   :  { %v3283_v40 = vmul.f32 %v3279_v42, %v3235_v30 }
 0xa89   :  { %v3290_v5 = vmul.f32 %v5618_v15, %v3283_v40 }
 0xa8b   :  { %v3297_v10 = vadd.f32 %v5619_v54, %v3290_v5 }
 0xa8d   :  { %v3299_v45 = vpack.c.bf16 %v3297_v10, %v3296_v62  ;;  %v5508_v10 = vld [vmem:[#allocation29 + $0x38] sm:$0xff] }
 0xa8e   :  { %3905 = vmatpush.bf16.msrb.mxu3 %v5508_v10 }
 0xa90   :  { %3383 = vmatmul.bf16.gmra.mxu2 %v3299_v45 }
 0xb03   :  { %v3379_v27 = vpop.f32.mrf.mxu2 }
 0xb04   :  { %v3380_v13 = vadd.f32 %v5620_v53, %v3379_v27  ;;  %v5507_v27 = vld [vmem:[#allocation29 + $0x30] sm:$0xff] }
 0xb05   :  { %3906 = vmatpush.bf16.msrb.mxu3 %v5507_v27 }
 0xb06   :  { %v3389_v8 = vadd.f32 %v3380_v13, %v7638_v31 }
 0xb08   :  { %v7832_v43 = vmul.f32 %v6711_v4, %v3389_v8 }
 0xb0a   :  { %v3399_v29 = vmul.f32 %v6711_v4, %v7832_v43 }
 0xb0b   :  { %v3381_v2 = vpop.f32.mrf.mxu2 }
 0xb0c   :  { %3403 = vadd.xlane.f32.xlu2 %v3399_v29  ;;  %v3382_v44 = vadd.f32 %v5620_v53, %v3381_v2 }
 0xb0e   :  { %v3390_v14 = vadd.f32 %v3382_v44, %v7659_v33 }
 0xb10   :  { %v7845_v48 = vmul.f32 %v6711_v4, %v3390_v14 }
 0xb12   :  { %v3400_v33 = vmul.f32 %v6711_v4, %v7845_v48 }
 0xb13   :  { %v3384_v47 = vpop.f32.mrf.mxu2 }
 0xb14   :  { %v3385_v35 = vadd.f32 %v5620_v53, %v3384_v47 }
 0xb16   :  { %v3391_v41 = vadd.f32 %v3385_v35, %v7677_v20  ;;  %v5506_v35 = vld [vmem:[#allocation29 + $0x28] sm:$0xff] }
 0xb17   :  { %3907 = vmatpush.bf16.msrb.mxu3 %v5506_v35 }
 0xb18   :  { %v7838_v56 = vmul.f32 %v6711_v4, %v3391_v41 }
 0xb1a   :  { %v3401_v31 = vmul.f32 %v6711_v4, %v7838_v56 }
 0xb1b   :  { %v3386_v57 = vpop.f32.mrf.mxu2 }
 0xb1c   :  { %v3387_v23 = vadd.f32 %v5620_v53, %v3386_v57  ;;  %3407 = vadd.xlane.f32.xlu0 %v3401_v31 }
 0xb1e   :  { %v3392_v26 = vadd.f32 %v3387_v23, %v7697_v16 }
 0xb20   :  { %v7848_v7 = vmul.f32 %v6711_v4, %v3392_v26 }
 0xb22   :  { %v3402_v20 = vmul.f32 %v6711_v4, %v7848_v7 }
 0xb24   :  { %3409 = vadd.xlane.f32.xlu1 %v3402_v20  ;;  %3405 = vadd.xlane.f32.xlu0 %v3400_v33 }
 0xb7f   :  { %v3404_v17 = vpop.xlane.xlu2 %3403 }
 0xb80   :  { %v7854_v1 = vmul.f32 0.03125, %v3404_v17 }
 0xb82   :  { %v3415_v52 = vsub.f32 %v3399_v29, %v7854_v1 }
 0xb84   :  { %v3419_v16 = vmul.f32 %v3415_v52, %v3415_v52 }
 0xb86   :  { %v3423_v0 = vmul.f32 %v6711_v4, %v3419_v16  ;;  %v5621_v16 = vld [vmem:[#allocation23] ss:$0 sm:$0xff] }
 0xb88   :  { %3427 = vadd.xlane.f32.xlu0 %v3423_v0 }
 0xb8f   :  { %v3408_v38 = vpop.xlane.xlu0 %3407 }
 0xb90   :  { %v7858_v19 = vmul.f32 0.03125, %v3408_v38 }
 0xb92   :  { %v3417_v63 = vsub.f32 %v3401_v31, %v7858_v19  ;;  %v3441_v31 = vsub.f32 %v7838_v56, %v7858_v19  ;;  %v3439_v56 = vsub.f32 %v7832_v43, %v7854_v1 }
 0xb94   :  { %v3421_v15 = vmul.f32 %v3417_v63, %v3417_v63  ;;  %v5505_v63 = vld [vmem:[#allocation29 + $0x20] sm:$0xff] }
 0xb95   :  { %3908 = vmatpush.bf16.msrb.mxu3 %v5505_v63 }
 0xb96   :  { %v3425_v37 = vmul.f32 %v6711_v4, %v3421_v15 }
 0xb97   :  { %v3410_v21 = vpop.xlane.xlu1 %3409  ;;  %v3406_v34 = vpop.xlane.xlu0 %3405 }
 0xb98   :  { %v7862_v18 = vmul.f32 0.03125, %v3410_v21  ;;  %v7864_v9 = vmul.f32 0.03125, %v3406_v34  ;;  %3431 = vadd.xlane.f32.xlu1 %v3425_v37 }
 0xb9a   :  { %v3418_v39 = vsub.f32 %v3402_v20, %v7862_v18  ;;  %v3416_v61 = vsub.f32 %v3400_v33, %v7864_v9  ;;  %v3442_v52 = vsub.f32 %v7848_v7, %v7862_v18  ;;  %v3440_v7 = vsub.f32 %v7845_v48, %v7864_v9  ;;  %v5501_v48 = vld [vmem:[#allocation29] sm:$0xff] }
 0xb9c   :  { %v3422_v54 = vmul.f32 %v3418_v39, %v3418_v39  ;;  %v3420_v22 = vmul.f32 %v3416_v61, %v3416_v61  ;;  %v5504_v39 = vld [vmem:[#allocation29 + $0x18] sm:$0xff] }
 0xb9d   :  { %v5622_v61 = vld [vmem:[#allocation25] ss:$0 sm:$0xff]  ;;  %3909 = vmatpush.bf16.msrb.mxu3 %v5504_v39 }
 0xb9e   :  { %v3426_v6 = vmul.f32 %v6711_v4, %v3422_v54  ;;  %v3424_v58 = vmul.f32 %v6711_v4, %v3420_v22 }
 0xba0   :  { %3433 = vadd.xlane.f32.xlu2 %v3426_v6  ;;  %3429 = vadd.xlane.f32.xlu1 %v3424_v58 }
 0xbfb   :  { %v3428_v12 = vpop.xlane.xlu0 %3427 }
 0xbfc   :  { %v3435_v59 = vmul.f32 0.03125, %v3428_v12  ;;  %v5503_v12 = vld [vmem:[#allocation29 + $0x10] sm:$0xff] }
 0xbfd   :  { %3910 = vmatpush.bf16.msrb.mxu3 %v5503_v12  ;;  %v5451_v12 = vld [vmem:[%s6559_s5 + $0x70] sm:$0xff] }
 0xbfe   :  { %v3443_v60 = vadd.f32 1e-05, %v3435_v59 }
 0xc00   :  { %5804 = vrsqrt.f32 %v3443_v60  ;;  %vm3453_vm10 = vweird.f32 %v3443_v60 }
 0xc06   :  { %v5805_v24 = vpop.eup %5804 }
 0xc07   :  { %v3448_v3 = vmul.f32 %v5805_v24, %v3443_v60  ;;  %vm3454_vm9 = vweird.f32 %v5805_v24 }
 0xc08   :  { %vm3455_vm11 = vmor %vm3453_vm10, %vm3454_vm9 }
 0xc09   :  { %v3449_v30 = vmul.f32 %v5805_v24, %v3448_v3 }
 0xc0b   :  { %v3432_v49 = vpop.xlane.xlu1 %3431  ;;  %v3450_v45 = vmul.f32 0.5, %v3449_v30 }
 0xc0c   :  { %v3437_v11 = vmul.f32 0.03125, %v3432_v49 }
 0xc0d   :  { %v3451_v2 = vsub.f32 1.5, %v3450_v45 }
 0xc0e   :  { %v3445_v25 = vadd.f32 1e-05, %v3437_v11 }
 0xc0f   :  { %v3452_v57 = vmul.f32 %v5805_v24, %v3451_v2 }
 0xc10   :  { %5806 = vrsqrt.f32 %v3445_v25  ;;  %vm3473_vm7 = vweird.f32 %v3445_v25 }
 0xc11   :  { %v3456_v0 = vsel %vm3455_vm11, %v5805_v24, %v3452_v57  ;;  %v5502_v24 = vld [vmem:[#allocation29 + $0x8] sm:$0xff] }
 0xc12   :  { %v3487_v34 = vmul.f32 %v3456_v0, %v3439_v56  ;;  %3911 = vmatpush.bf16.msrb.mxu3 %v5502_v24  ;;  %v5442_v24 = vld [vmem:[%s6559_s5 + $0x28] sm:$0xff] }
 0xc13   :  { %v3434_v28 = vpop.xlane.xlu2 %3433  ;;  %v3430_v42 = vpop.xlane.xlu1 %3429 }
 0xc14   :  { %v3438_v55 = vmul.f32 0.03125, %v3434_v28  ;;  %v3436_v51 = vmul.f32 0.03125, %v3430_v42  ;;  %v3494_v1 = vmul.f32 %v5621_v16, %v3487_v34 }
 0xc16   :  { %v5807_v32 = vpop.eup %5806  ;;  %v3446_v46 = vadd.f32 1e-05, %v3438_v55  ;;  %v3444_v62 = vadd.f32 1e-05, %v3436_v51  ;;  %v3501_v11 = vadd.f32 %v5622_v61, %v3494_v1  ;;  %3912 = vmatpush.bf16.msrb.mxu3 %v5501_v48  ;;  %v5460_v1 = vld [vmem:[%s6559_s5 + $0xb8] sm:$0xff]  ;;  %v5449_v48 = vld [vmem:[%s6559_s5 + $0x60] sm:$0xff] }
 0xc17   :  { %v3468_v36 = vmul.f32 %v5807_v32, %v3445_v25  ;;  %vm3474_vm6 = vweird.f32 %v5807_v32  ;;  %4336 = vmatpush.bf16.msrb.mxu2 %v5460_v1 }
 0xc18   :  { %5808 = vrsqrt.f32 %v3446_v46  ;;  %vm3475_vm8 = vmor %vm3473_vm7, %vm3474_vm6  ;;  %vm3483_vm12 = vweird.f32 %v3446_v46  ;;  %vm3463_vm0 = vweird.f32 %v3444_v62 }
 0xc19   :  { %v3469_v40 = vmul.f32 %v5807_v32, %v3468_v36  ;;  %5810 = vrsqrt.f32 %v3444_v62 }
 0xc1b   :  { %v3470_v5 = vmul.f32 0.5, %v3469_v40 }
 0xc1d   :  { %v3471_v53 = vsub.f32 1.5, %v3470_v5 }
 0xc1e   :  { %v5809_v13 = vpop.eup %5808 }
 0xc1f   :  { %v3472_v8 = vmul.f32 %v5807_v32, %v3471_v53  ;;  %v3478_v29 = vmul.f32 %v5809_v13, %v3446_v46  ;;  %v5811_v44 = vpop.eup %5810  ;;  %vm3484_vm15 = vweird.f32 %v5809_v13 }
 0xc20   :  { %v3458_v23 = vmul.f32 %v5811_v44, %v3444_v62  ;;  %vm3485_vm13 = vmor %vm3483_vm12, %vm3484_vm15  ;;  %vm3464_vm14 = vweird.f32 %v5811_v44 }
 0xc21   :  { %v3479_v47 = vmul.f32 %v5809_v13, %v3478_v29  ;;  %v3476_v41 = vsel %vm3475_vm8, %v5807_v32, %v3472_v8  ;;  %vm3465_vm1 = vmor %vm3463_vm0, %vm3464_vm14 }
 0xc22   :  { %v3489_v20 = vmul.f32 %v3476_v41, %v3441_v31  ;;  %v3459_v33 = vmul.f32 %v5811_v44, %v3458_v23 }
 0xc23   :  { %v3480_v14 = vmul.f32 0.5, %v3479_v47 }
 0xc24   :  { %v3460_v38 = vmul.f32 0.5, %v3459_v33  ;;  %v3496_v15 = vmul.f32 %v5621_v16, %v3489_v20 }
 0xc25   :  { %v3481_v26 = vsub.f32 1.5, %v3480_v14 }
 0xc26   :  { %v3461_v21 = vsub.f32 1.5, %v3460_v38  ;;  %v3503_v18 = vadd.f32 %v5622_v61, %v3496_v15 }
 0xc27   :  { %v3482_v17 = vmul.f32 %v5809_v13, %v3481_v26 }
 0xc28   :  { %v3462_v22 = vmul.f32 %v5811_v44, %v3461_v21 }
 0xc29   :  { %v3486_v19 = vsel %vm3485_vm13, %v5809_v13, %v3482_v17 }
 0xc2a   :  { %v3490_v37 = vmul.f32 %v3486_v19, %v3442_v52  ;;  %v3466_v43 = vsel %vm3465_vm1, %v5811_v44, %v3462_v22 }
 0xc2b   :  { %v3488_v58 = vmul.f32 %v3466_v43, %v3440_v7  ;;  %v5452_v43 = vld [vmem:[%s6559_s5 + $0x78] sm:$0xff] }
 0xc2c   :  { %v3497_v54 = vmul.f32 %v5621_v16, %v3490_v37  ;;  %4323 = vmatpush.bf16.msrb.mxu0 %v5452_v43  ;;  %v5474_v43 = vld [vmem:[%s6559_s5 + $0x128] sm:$0xff] }
 0xc2d   :  { %v3495_v60 = vmul.f32 %v5621_v16, %v3488_v58  ;;  %v5468_v58 = vld [vmem:[%s6559_s5 + $0xf8] sm:$0xff] }
 0xc2e   :  { %v3504_v6 = vadd.f32 %v5622_v61, %v3497_v54  ;;  %4349 = vmatpush.bf16.msra.mxu3 %v5468_v58 }
 0xc2f   :  { %v3502_v25 = vadd.f32 %v5622_v61, %v3495_v60  ;;  %v5459_v60 = vld [vmem:[%s6559_s5 + $0xb0] sm:$0xff] }
 0xc30   :  { %v3512_v59 = vadd.f32 %v3504_v6, %v3503_v18  ;;  %v5444_v6 = vld [vmem:[%s6559_s5 + $0x38] sm:$0xff]  ;;  %4324 = vmatpush.bf16.msrb.mxu0 %v5451_v12  ;;  %4337 = vmatpush.bf16.msrb.mxu2 %v5459_v60 }
 0xc31   :  { %v3505_v3 = vadd.f32 %v3502_v25, %v3501_v11  ;;  %4310 = vmatpush.bf16.msra.mxu1 %v5444_v6 }
 0xc32   :  { %v3513_v49 = vrot.slane %v3512_v59, 4 }
 0xc33   :  { %v3506_v32 = vrot.slane %v3505_v3, 4 }
 0xc34   :  { %v3514_v28 = vadd.f32 %v3513_v49, %v3512_v59  ;;  %v5467_v49 = vld [vmem:[%s6559_s5 + $0xf0] sm:$0xff] }
 0xc35   :  { %v3507_v46 = vadd.f32 %v3506_v32, %v3505_v3  ;;  %4350 = vmatpush.bf16.msra.mxu3 %v5467_v49  ;;  %v5458_v3 = vld [vmem:[%s6559_s5 + $0xa8] sm:$0xff]  ;;  %v5441_v32 = vld [vmem:[%s6559_s5 + $0x20] sm:$0xff] }
 0xc36   :  { %v3515_v55 = vrot.slane %v3514_v28, 2  ;;  %4338 = vmatpush.bf16.msrb.mxu2 %v5458_v3  ;;  %v5482_v49 = vld [vmem:[%s6559_s5 + $0x168] sm:$0xff] }
 0xc37   :  { %v3508_v30 = vrot.slane %v3507_v46, 2  ;;  %v5490_v3 = vld [vmem:[%s6559_s5 + $0x1a8] sm:$0xff] }
 0xc38   :  { %v3516_v9 = vadd.f32 %v3515_v55, %v3514_v28  ;;  %v5450_v28 = vld [vmem:[%s6559_s5 + $0x68] sm:$0xff] }
 0xc39   :  { %v3509_v40 = vadd.f32 %v3508_v30, %v3507_v46  ;;  %v5466_v55 = vld [vmem:[%s6559_s5 + $0xe8] sm:$0xff]  ;;  %4325 = vmatpush.bf16.msrb.mxu0 %v5450_v28  ;;  %v5465_v46 = vld [vmem:[%s6559_s5 + $0xe0] sm:$0xff]  ;;  %v5440_v30 = vld [vmem:[%s6559_s5 + $0x18] sm:$0xff] }
 0xc3a   :  { %v3517_v36 = vrot.slane %v3516_v9, 1  ;;  %4351 = vmatpush.bf16.msra.mxu3 %v5466_v55  ;;  %v5498_v55 = vld [vmem:[%s6559_s5 + $0x1e8] sm:$0xff] }
 0xc3b   :  { %v3510_v5 = vrot.slane %v3509_v40, 1 }
 0xc3c   :  { %v3518_v42 = vadd.f32 %v3517_v36, %v3516_v9  ;;  %v5457_v9 = vld [vmem:[%s6559_s5 + $0xa0] sm:$0xff] }
 0xc3d   :  { %v3511_v45 = vadd.f32 %v3510_v5, %v3509_v40  ;;  %4326 = vmatpush.bf16.msrb.mxu0 %v5449_v48  ;;  %4339 = vmatpush.bf16.msrb.mxu2 %v5457_v9  ;;  %v5456_v5 = vld [vmem:[%s6559_s5 + $0x98] sm:$0xff] }
 0xc3e   :  { %v7879_v51 = vmul.f32 %v3518_v42, %v7215_v50  ;;  %v5448_v42 = vld [vmem:[%s6559_s5 + $0x58] sm:$0xff]  ;;  %4352 = vmatpush.bf16.msra.mxu3 %v5465_v46 }
 0xc3f   :  { %v7885_v27 = vmul.f32 %v3511_v45, %v7215_v50  ;;  %v5439_v45 = vld [vmem:[%s6559_s5 + $0x10] sm:$0xff] }
 0xc40   :  { %v3669_v62 = vmul.f32 %v6711_v4, %v7879_v51  ;;  %v3834_v10 = vsub.f32 0.0, %v7879_v51 }
 0xc41   :  { %v3668_v8 = vmul.f32 %v6711_v4, %v7885_v27  ;;  %v3833_v29 = vsub.f32 0.0, %v7885_v27  ;;  %4327 = vmatpush.bf16.msrb.mxu0 %v5448_v42  ;;  %4340 = vmatpush.bf16.msrb.mxu2 %v5456_v5 }
 0xc42   :  { %v3837_v53 = vmul.f32 1.442695, %v3834_v10  ;;  %v3672_v13 = vrot.slane %v3669_v62, 7 }
 0xc43   :  { %v3835_v47 = vmul.f32 1.442695, %v3833_v29  ;;  %v5463_v29 = vld [vmem:[%s6559_s5 + $0xd0] sm:$0xff] }
 0xc44   :  { %5812 = vpow2.f32 %v3837_v53  ;;  %v3674_v2 = vsel %vm3673_vm2, %v3672_v13, %v3668_v8  ;;  %v5447_v53 = vld [vmem:[%s6559_s5 + $0x50] sm:$0xff] }
 0xc45   :  { %v3677_v35 = vsel %vm3676_vm3, %v3674_v2, 0.0  ;;  %5814 = vpow2.f32 %v3835_v47  ;;  %4328 = vmatpush.bf16.msrb.mxu0 %v5447_v53  ;;  %v5438_v47 = vld [vmem:[%s6559_s5 + $0x8] sm:$0xff]  ;;  %v5473_v53 = vld [vmem:[%s6559_s5 + $0x120] sm:$0xff] }
 0xc46   :  { %3678 = vadd.xlane.f32.xlu2 %v3677_v35  ;;  %v5446_v35 = vld [vmem:[%s6559_s5 + $0x48] sm:$0xff] }
 0xc49   :  { %4329 = vmatpush.bf16.msrb.mxu0 %v5446_v35  ;;  %v5489_v35 = vld [vmem:[%s6559_s5 + $0x1a0] sm:$0xff] }
 0xc4a   :  { %v5813_v44 = vpop.eup %5812 }
 0xc4b   :  { %v3840_v41 = vadd.f32 1.0, %v5813_v44  ;;  %v5815_v50 = vpop.eup %5814 }
 0xc4c   :  { %v3839_v14 = vadd.f32 1.0, %v5815_v50  ;;  %v5462_v50 = vld [vmem:[%s6559_s5 + $0xc8] sm:$0xff] }
 0xc4d   :  { %5816 = vrcp.f32 %v3840_v41  ;;  %v5454_v41 = vld [vmem:[%s6559_s5 + $0x88] sm:$0xff] }
 0xc4e   :  { %5818 = vrcp.f32 %v3839_v14 }
 0xc53   :  { %v5817_v31 = vpop.eup %5816 }
 0xc54   :  { %v3844_v57 = vmul.f32 %v5817_v31, %v7879_v51  ;;  %v5819_v26 = vpop.eup %5818  ;;  %v5624_v31 = vld [vmem:[#allocation26] ss:$0 sm:$0xff] }
 0xc55   :  { %v3843_v20 = vmul.f32 %v5819_v26, %v7885_v27  ;;  %v5625_v26 = vld [vmem:[#allocation28] ss:$0 sm:$0xff] }
 0xc56   :  { %v3846_v23 = vpack.c.bf16 %v3844_v57, %v3844_v57 }
 0xc57   :  { %v3845_v33 = vpack.c.bf16 %v3843_v20, %v3843_v20 }
 0xc58   :  { %v3853_v17 = vunpack.c.l.b16 %v3846_v23 }
 0xc59   :  { %v3852_v52 = vunpack.c.l.b16 %v3845_v33 }
 0xc5b   :  { %v3854_v16 = vsel %vm3673_vm2, %v3853_v17, %v3852_v52  ;;  %v5437_v17 = vld [vmem:[%s6559_s5] sm:$0xff] }
 0xc5c   :  { %v3855_v0 = vpack.c.b16 %v3854_v16, %v3854_v16  ;;  %v5445_v52 = vld [vmem:[%s6559_s5 + $0x40] sm:$0xff] }
 0xc5d   :  { %v5461_v16 = vld [vmem:[%s6559_s5 + $0xc0] sm:$0xff]  ;;  %4330 = vmatpush.bf16.msrb.mxu0 %v5445_v52 }
 0xc5e   :  { %3913 = vmatmul.bf16.vlgmr.msrb.gmra.mxu3 %v3855_v0 }
 0xcb9   :  { %v3679_v38 = vpop.xlane.xlu2 %3678 }
 0xcba   :  { %v7895_v56 = vmul.f32 0.03125, %v3679_v38 }
 0xcbc   :  { %v3682_v19 = vrot.slane %v7895_v56, 1  ;;  %v3685_v63 = vsub.f32 %v3668_v8, %v7895_v56  ;;  %v5455_v8 = vld [vmem:[%s6559_s5 + $0x90] sm:$0xff]  ;;  %v3700_v14 = vsub.f32 %v7885_v27, %v7895_v56  ;;  %v5453_v27 = vld [vmem:[%s6559_s5 + $0x80] sm:$0xff]  ;;  %v5476_v56 = vld [vmem:[%s6559_s5 + $0x138] sm:$0xff] }
 0xcbd   :  { %4341 = vmatpush.bf16.msrb.mxu2 %v5455_v8 }
 0xcbe   :  { %v3686_v15 = vsub.f32 %v3669_v62, %v3682_v19  ;;  %v3687_v37 = vmul.f32 %v3685_v63, %v3685_v63  ;;  %v5464_v62 = vld [vmem:[%s6559_s5 + $0xd8] sm:$0xff]  ;;  %v3701_v23 = vsub.f32 %v7879_v51, %v3682_v19 }
 0xcbf   :  { %4353 = vmatpush.bf16.msra.mxu3 %v5464_v62  ;;  %v5484_v63 = vld [vmem:[%s6559_s5 + $0x178] sm:$0xff] }
 0xcc0   :  { %v3688_v21 = vmul.f32 %v3686_v15, %v3686_v15  ;;  %v3689_v39 = vmul.f32 %v6711_v4, %v3687_v37  ;;  %v5492_v51 = vld [vmem:[%s6559_s5 + $0x1b8] sm:$0xff]  ;;  %4375 = vmatpush.bf16.msra.mxu0 %v5484_v63 }
 0xcc1   :  { %4342 = vmatpush.bf16.msrb.mxu2 %v5454_v41  ;;  %v5500_v19 = vld [vmem:[%s6559_s5 + $0x1f8] sm:$0xff] }
 0xcc2   :  { %v3690_v34 = vmul.f32 %v6711_v4, %v3688_v21  ;;  %v5443_v4 = vld [vmem:[%s6559_s5 + $0x30] sm:$0xff] }
 0xcc3   :  { %4311 = vmatpush.bf16.msra.mxu1 %v5443_v4  ;;  %4354 = vmatpush.bf16.msra.mxu3 %v5463_v29 }
 0xcc4   :  { %v3693_v61 = vrot.slane %v3690_v34, 7  ;;  %v5475_v34 = vld [vmem:[%s6559_s5 + $0x130] sm:$0xff] }
 0xcc5   :  { %4343 = vmatpush.bf16.msrb.mxu2 %v5453_v27  ;;  %v5480_v27 = vld [vmem:[%s6559_s5 + $0x158] sm:$0xff] }
 0xcc6   :  { %v3694_v54 = vsel %vm3673_vm2, %v3693_v61, %v3689_v39  ;;  %v5483_v39 = vld [vmem:[%s6559_s5 + $0x170] sm:$0xff] }
 0xcc7   :  { %v3696_v22 = vsel %vm3676_vm3, %v3694_v54, 0.0  ;;  %4312 = vmatpush.bf16.msra.mxu1 %v5442_v24  ;;  %4355 = vmatpush.bf16.msra.mxu3 %v5462_v50  ;;  %v5491_v54 = vld [vmem:[%s6559_s5 + $0x1b0] sm:$0xff] }
 0xcc8   :  { %3697 = vadd.xlane.f32.xlu0 %v3696_v22  ;;  %v5499_v22 = vld [vmem:[%s6559_s5 + $0x1f0] sm:$0xff]  ;;  %4376 = vmatpush.bf16.msra.mxu0 %v5483_v39 }
 0xcc9   :  { %4388 = vmatpush.bf16.msra.mxu2 %v5492_v51 }
 0xccb   :  { %4313 = vmatpush.bf16.msra.mxu1 %v5441_v32  ;;  %4356 = vmatpush.bf16.msra.mxu3 %v5461_v16  ;;  %v5488_v16 = vld [vmem:[%s6559_s5 + $0x198] sm:$0xff] }
 0xccc   :  { %4377 = vmatpush.bf16.msra.mxu0 %v5482_v49 }
 0xccd   :  { %4389 = vmatpush.bf16.msra.mxu2 %v5491_v54 }
 0xccf   :  { %4314 = vmatpush.bf16.msra.mxu1 %v5440_v30  ;;  %4401 = vmatpush.bf16.msrb.mxu3 %v5500_v19 }
 0xcd1   :  { %4390 = vmatpush.bf16.msra.mxu2 %v5490_v3  ;;  %v5478_v3 = vld [vmem:[%s6559_s5 + $0x148] sm:$0xff] }
 0xcd3   :  { %4315 = vmatpush.bf16.msra.mxu1 %v5439_v45  ;;  %4402 = vmatpush.bf16.msrb.mxu3 %v5499_v22 }
 0xcd5   :  { %4391 = vmatpush.bf16.msra.mxu2 %v5489_v35 }
 0xcd7   :  { %4316 = vmatpush.bf16.msra.mxu1 %v5438_v47  ;;  %4403 = vmatpush.bf16.msrb.mxu3 %v5498_v55 }
 0xcd9   :  { %4392 = vmatpush.bf16.msra.mxu2 %v5488_v16 }
 0xcdb   :  { %4317 = vmatpush.bf16.msra.mxu1 %v5437_v17 }
 0xcdf   :  { %4362 = vmatpush.bf16.msrb.mxu1 %v5476_v56  ;;  %v5496_v56 = vld [vmem:[%s6559_s5 + $0x1d8] sm:$0xff] }
 0xce1   :  { %v7905_v7 = vpop.f32.mrf.mxu3 }
 0xce3   :  { %4363 = vmatpush.bf16.msrb.mxu1 %v5475_v34 }
 0xce7   :  { %4364 = vmatpush.bf16.msrb.mxu1 %v5474_v43 }
 0xce9   :  { %v3916_v18 = vpop.f32.mrf.mxu3 }
 0xceb   :  { %4365 = vmatpush.bf16.msrb.mxu1 %v5473_v53 }
 0xd3b   :  { %v3698_v59 = vpop.xlane.xlu0 %3697 }
 0xd3c   :  { %v3699_v11 = vmul.f32 0.03125, %v3698_v59 }
 0xd3e   :  { %v3702_v25 = vadd.f32 1e-05, %v3699_v11 }
 0xd40   :  { %5820 = vrsqrt.f32 %v3702_v25  ;;  %vm3709_vm5 = vweird.f32 %v3702_v25 }
 0xd46   :  { %v5821_v36 = vpop.eup %5820 }
 0xd47   :  { %v3704_v40 = vmul.f32 %v5821_v36, %v3702_v25  ;;  %vm3710_vm4 = vweird.f32 %v5821_v36 }
 0xd48   :  { %vm3711_vm6 = vmor %vm3709_vm5, %vm3710_vm4 }
 0xd49   :  { %v3705_v10 = vmul.f32 %v5821_v36, %v3704_v40 }
 0xd4b   :  { %v3706_v13 = vmul.f32 0.5, %v3705_v10 }
 0xd4d   :  { %v3707_v2 = vsub.f32 1.5, %v3706_v13  ;;  %v5481_v13 = vld [vmem:[%s6559_s5 + $0x160] sm:$0xff] }
 0xd4e   :  { %4378 = vmatpush.bf16.msra.mxu0 %v5481_v13 }
 0xd4f   :  { %v3708_v44 = vmul.f32 %v5821_v36, %v3707_v2 }
 0xd51   :  { %v3712_v57 = vsel %vm3711_vm6, %v5821_v36, %v3708_v44  ;;  %v5497_v44 = vld [vmem:[%s6559_s5 + $0x1e0] sm:$0xff] }
 0xd52   :  { %v3714_v20 = vrot.slane %v3712_v57, 1  ;;  %v3717_v33 = vmul.f32 %v3712_v57, %v3700_v14  ;;  %4404 = vmatpush.bf16.msrb.mxu3 %v5497_v44  ;;  %4379 = vmatpush.bf16.msra.mxu0 %v5480_v27  ;;  %v5493_v44 = vld [vmem:[%s6559_s5 + $0x1c0] sm:$0xff] }
 0xd54   :  { %v3718_v0 = vmul.f32 %v3714_v20, %v3701_v23  ;;  %v3722_v38 = vmul.f32 %v5624_v31, %v3717_v33  ;;  %v5472_v23 = vld [vmem:[%s6559_s5 + $0x118] sm:$0xff] }
 0xd55   :  { %4366 = vmatpush.bf16.msrb.mxu1 %v5472_v23 }
 0xd56   :  { %v3723_v15 = vmul.f32 %v5624_v31, %v3718_v0  ;;  %v7948_v37 = vadd.f32 %v5625_v26, %v3722_v38  ;;  %4405 = vmatpush.bf16.msrb.mxu3 %v5496_v56 }
 0xd58   :  { %v7950_v21 = vadd.f32 %v5625_v26, %v3723_v15  ;;  %v5025_v61 = vadd.f32 2.0, %v7948_v37  ;;  %v5027_v18 = vadd.f32 1.4285715, %v7948_v37  ;;  %v5029_v6 = vadd.f32 0.85714287, %v7948_v37 }
 0xd59   :  { %v5031_v4 = vadd.f32 0.2857143, %v7948_v37  ;;  %v5033_v60 = vadd.f32 -0.2857143, %v7948_v37  ;;  %v5035_v45 = vadd.f32 -0.85714287, %v7948_v37 }
 0xd5a   :  { %v5026_v1 = vadd.f32 2.0, %v7950_v21  ;;  %v5028_v58 = vadd.f32 1.4285715, %v7950_v21  ;;  %v5030_v12 = vadd.f32 0.85714287, %v7950_v21  ;;  %v3731_v11 = vmul.f32 1.75, %v5025_v61 }
 0xd5b   :  { %v5032_v59 = vadd.f32 0.2857143, %v7950_v21  ;;  %v5034_v28 = vadd.f32 -0.2857143, %v7950_v21  ;;  %v3735_v32 = vmul.f32 1.75, %v5027_v18  ;;  %v3739_v48 = vmul.f32 1.75, %v5029_v6 }
 0xd5c   :  { %v3732_v25 = vmul.f32 1.75, %v5026_v1  ;;  %v3736_v24 = vmul.f32 1.75, %v5028_v58  ;;  %v3740_v9 = vmul.f32 1.75, %v5030_v12  ;;  %v3743_v42 = vmul.f32 1.75, %v5031_v4  ;;  %v5471_v1 = vld [vmem:[%s6559_s5 + $0x110] sm:$0xff] }
 0xd5d   :  { %v3744_v46 = vmul.f32 1.75, %v5032_v59  ;;  %v3748_v40 = vmul.f32 1.75, %v5034_v28  ;;  %v3747_v10 = vmul.f32 1.75, %v5033_v60  ;;  %v5036_v47 = vadd.f32 -0.85714287, %v7950_v21  ;;  %v5479_v58 = vld [vmem:[%s6559_s5 + $0x150] sm:$0xff]  ;;  %4367 = vmatpush.bf16.msrb.mxu1 %v5471_v1 }
 0xd5e   :  { %v3763_v36 = vrot.slane %v3732_v25, 7  ;;  %v3768_v30 = vrot.slane %v3736_v24, 7  ;;  %v3773_v5 = vrot.slane %v3740_v9, 7  ;;  %v5037_v0 = vadd.f32 -1.4285715, %v7948_v37  ;;  %v5495_v60 = vld [vmem:[%s6559_s5 + $0x1d0] sm:$0xff]  ;;  %4380 = vmatpush.bf16.msra.mxu0 %v5479_v58 }
 0xd5f   :  { %v3778_v62 = vrot.slane %v3744_v46, 7  ;;  %v3783_v2 = vrot.slane %v3748_v40, 7  ;;  %v3752_v20 = vmul.f32 1.75, %v5036_v47  ;;  %v3751_v63 = vmul.f32 1.75, %v5035_v45  ;;  %4406 = vmatpush.bf16.msrb.mxu3 %v5495_v60  ;;  %v5469_v47 = vld [vmem:[%s6559_s5 + $0x100] sm:$0xff] }
 0xd60   :  { %v3764_v8 = vsel %vm3673_vm2, %v3763_v36, %v3731_v11  ;;  %v3769_v29 = vsel %vm3673_vm2, %v3768_v30, %v3735_v32  ;;  %v3774_v14 = vsel %vm3673_vm2, %v3773_v5, %v3739_v48  ;;  %v5038_v19 = vadd.f32 -1.4285715, %v7950_v21  ;;  %v5470_v48 = vld [vmem:[%s6559_s5 + $0x108] sm:$0xff] }
 0xd61   :  { %v3801_v41 = vmul.f32 %v3764_v8, %v3764_v8  ;;  %v3802_v50 = vmul.f32 %v3769_v29, %v3769_v29  ;;  %v3803_v31 = vmul.f32 %v3774_v14, %v3774_v14  ;;  %v3779_v57 = vsel %vm3673_vm2, %v3778_v62, %v3743_v42  ;;  %v5494_v42 = vld [vmem:[%s6559_s5 + $0x1c8] sm:$0xff]  ;;  %v5477_v8 = vld [vmem:[%s6559_s5 + $0x140] sm:$0xff]  ;;  %4368 = vmatpush.bf16.msrb.mxu1 %v5470_v48 }
 0xd62   :  { %v3784_v26 = vsel %vm3673_vm2, %v3783_v2, %v3747_v10  ;;  %v3804_v52 = vmul.f32 %v3779_v57, %v3779_v57  ;;  %v3788_v51 = vrot.slane %v3752_v20, 7  ;;  %v5039_v61 = vadd.f32 -2.0, %v7948_v37  ;;  %v5487_v37 = vld [vmem:[%s6559_s5 + $0x190] sm:$0xff]  ;;  %v5486_v10 = vld [vmem:[%s6559_s5 + $0x188] sm:$0xff]  ;;  %4381 = vmatpush.bf16.msra.mxu0 %v5478_v3 }
 0xd63   :  { %v3809_v33 = vsub.f32 0.0, %v3801_v41  ;;  %v3810_v17 = vsub.f32 0.0, %v3802_v50  ;;  %v3811_v38 = vsub.f32 0.0, %v3803_v31  ;;  %v3756_v18 = vmul.f32 1.75, %v5038_v19  ;;  %4393 = vmatpush.bf16.msra.mxu2 %v5487_v37  ;;  %4407 = vmatpush.bf16.msrb.mxu3 %v5494_v42  ;;  %v5485_v50 = vld [vmem:[%s6559_s5 + $0x180] sm:$0xff]  ;;  %s6400_s5 = smov [#allocation32]  }
 0xd64   :  { %v3812_v39 = vsub.f32 0.0, %v3804_v52  ;;  %v3789_v22 = vsel %vm3673_vm2, %v3788_v51, %v3751_v63  ;;  %v5040_v6 = vadd.f32 -2.0, %v7950_v21  ;;  %v3755_v4 = vmul.f32 1.75, %v5037_v0  ;;  %s4421_s16 = sshll.u32 %s6400_s5, 4  ;;  %s4422_s16 = int_to_ptr.vmem [resolvable:$true] %s4421_s16 }
 0xd65   :  { %v3817_v15 = vmul.f32 1.442695, %v3809_v33  ;;  %v3819_v34 = vmul.f32 1.442695, %v3810_v17  ;;  %v3821_v54 = vmul.f32 1.442695, %v3811_v38  ;;  %v3805_v49 = vmul.f32 %v3784_v26, %v3784_v26  ;;  %4369 = vmatpush.bf16.msrb.mxu1 %v5469_v47 }
 0xd66   :  { %v3823_v43 = vmul.f32 1.442695, %v3812_v39  ;;  %v3793_v12 = vrot.slane %v3756_v18, 7  ;;  %v3760_v59 = vmul.f32 1.75, %v5040_v6  ;;  %v3806_v11 = vmul.f32 %v3789_v22, %v3789_v22  ;;  %4382 = vmatpush.bf16.msra.mxu0 %v5477_v8  ;;  %v5623_v6 = vld [vmem:[#allocation31] ss:$0 sm:$0xff] }
 0xd67   :  { %5822 = vpow2.f32 %v3817_v15  ;;  %v3759_v25 = vmul.f32 1.75, %v5039_v61  ;;  %v3813_v9 = vsub.f32 0.0, %v3805_v49  ;;  %4394 = vmatpush.bf16.msra.mxu2 %v5486_v10  ;;  %4408 = vmatpush.bf16.msrb.mxu3 %v5493_v44  ;;  %v3915_v37 = vadd.f32 %v5623_v6, %v7905_v7 }
 0xd68   :  { %5824 = vpow2.f32 %v3819_v34  ;;  %v3794_v21 = vsel %vm3673_vm2, %v3793_v12, %v3755_v4  ;;  %v3798_v24 = vrot.slane %v3760_v59, 7  ;;  %v3814_v40 = vsub.f32 0.0, %v3806_v11 }
 0xd69   :  { %5826 = vpow2.f32 %v3821_v54  ;;  %v3807_v28 = vmul.f32 %v3794_v21, %v3794_v21  ;;  %v3825_v35 = vmul.f32 1.442695, %v3813_v9 }
 0xd6a   :  { %5828 = vpow2.f32 %v3823_v43  ;;  %v3799_v55 = vsel %vm3673_vm2, %v3798_v24, %v3759_v25  ;;  %v3827_v41 = vmul.f32 1.442695, %v3814_v40 }
 0xd6b   :  { %v3808_v46 = vmul.f32 %v3799_v55, %v3799_v55  ;;  %v3815_v45 = vsub.f32 0.0, %v3807_v28  ;;  %5830 = vpow2.f32 %v3825_v35  ;;  %4395 = vmatpush.bf16.msra.mxu2 %v5485_v50 }
 0xd6c   :  { %5832 = vpow2.f32 %v3827_v41 }
 0xd6d   :  { %v5823_v32 = vpop.eup %5822  ;;  %v3816_v29 = vsub.f32 0.0, %v3808_v46  ;;  %v3829_v14 = vmul.f32 1.442695, %v3815_v45 }
 0xd6e   :  { %v5825_v36 = vpop.eup %5824  ;;  %v3918_v30 = vpack.c.bf16 %v5823_v32, %v5823_v32 }
 0xd6f   :  { %v5827_v5 = vpop.eup %5826  ;;  %v3919_v62 = vpack.c.bf16 %v5825_v36, %v5825_v36  ;;  %v3831_v31 = vmul.f32 1.442695, %v3816_v29  ;;  %5834 = vpow2.f32 %v3829_v14 }
 0xd70   :  { %v5829_v53 = vpop.eup %5828  ;;  %4318 = vmatmul.bf16.vlgmr.msra.gmra.mxu1 %v3918_v30  ;;  %v3920_v13 = vpack.c.bf16 %v5827_v5, %v5827_v5 }
 0xd71   :  { %4331 = vmatmul.bf16.vlgmr.msrb.gmra.mxu0 %v3919_v62  ;;  %v3921_v2 = vpack.c.bf16 %v5829_v53, %v5829_v53  ;;  %5836 = vpow2.f32 %v3831_v31  ;;  %v5831_v57 = vpop.eup %5830 }
 0xd72   :  { %4344 = vmatmul.bf16.vlgmr.msrb.gmra.mxu2 %v3920_v13  ;;  %v5833_v23 = vpop.eup %5832  ;;  %v3922_v33 = vpack.c.bf16 %v5831_v57, %v5831_v57 }
 0xd73   :  { %4357 = vmatmul.bf16.vlgmr.msra.gmra.mxu3 %v3921_v2  ;;  %v3923_v17 = vpack.c.bf16 %v5833_v23, %v5833_v23 }
 0xd75   :  { %v5835_v26 = vpop.eup %5834 }
 0xd76   :  { %v3924_v52 = vpack.c.bf16 %v5835_v26, %v5835_v26 }
 0xd77   :  { %v5837_v20 = vpop.eup %5836 }
 0xd78   :  { %v3925_v27 = vpack.c.bf16 %v5837_v20, %v5837_v20 }
 0xd80   :  { %4370 = vmatmul.bf16.vlgmr.msrb.gmra.mxu1 %v3922_v33 }
 0xd81   :  { %4383 = vmatmul.bf16.vlgmr.msra.gmra.mxu0 %v3923_v17 }
 0xd82   :  { %4396 = vmatmul.bf16.vlgmr.msra.gmra.mxu2 %v3924_v52 }
 0xd83   :  { %4409 = vmatmul.bf16.vlgmr.msrb.gmra.mxu3 %v3925_v27 }
 0xded   :  { %v4319_v16 = vpop.f32.mrf.mxu1 }
 0xdee   :  { %v4332_v0 = vpop.f32.mrf.mxu0 }
 0xdef   :  { %v4333_v19 = vadd.f32 %v4332_v0, %v4319_v16 }
 0xdf5   :  { %v4345_v38 = vpop.f32.mrf.mxu2  ;;  %v4321_v56 = vpop.f32.mrf.mxu1 }
 0xdf6   :  { %v4358_v63 = vpop.f32.mrf.mxu3  ;;  %v4334_v51 = vpop.f32.mrf.mxu0  ;;  %v4346_v15 = vadd.f32 %v4345_v38, %v4333_v19 }
 0xdf8   :  { %v4359_v61 = vadd.f32 %v4358_v63, %v4346_v15 }
 0xdfd   :  { %v4347_v34 = vpop.f32.mrf.mxu2  ;;  %v4371_v39 = vpop.f32.mrf.mxu1 }
 0xdfe   :  { %v4360_v54 = vpop.f32.mrf.mxu3  ;;  %v4384_v22 = vpop.f32.mrf.mxu0  ;;  %v4372_v18 = vadd.f32 %v4371_v39, %v4359_v61 }
 0xe00   :  { %v4385_v43 = vadd.f32 %v4384_v22, %v4372_v18 }
 0xe05   :  { %v4397_v1 = vpop.f32.mrf.mxu2  ;;  %v4373_v58 = vpop.f32.mrf.mxu1 }
 0xe06   :  { %v4398_v4 = vadd.f32 %v4397_v1, %v4385_v43  ;;  %v4410_v12 = vpop.f32.mrf.mxu3  ;;  %v4386_v59 = vpop.f32.mrf.mxu0 }
 0xe08   :  { %v4411_v60 = vadd.f32 %v4410_v12, %v4398_v4 }
 0xe0a   :  { %v4414_v49 = vadd.f32 %v4411_v60, %v3915_v37 }
 0xe0c   :  { %4415 = vst [vmem:[#allocation32] sm:$0x3] %v4414_v49 }
 0xe0d   :  { %v4399_v11 = vpop.f32.mrf.mxu2 }
 0xe0e   :  { %6317 = shalt.err (!%p6314_p1)
}
 0xe0f   :  { %4426 = dma.vmem_to_hbm [thread:$0]  %s4422_s16, 32, %s4424_s12, [#allocation4]   ;;  %v4412_v21 = vpop.f32.mrf.mxu3 }
 0xe10   :  { %6338 = dma.done.wait [#allocation4], 32  }
 0xe11   :  { %6339 = vsyncadd [#allocation4], 4294967264 }
 0xe12   :  { %4431 = vsyncpa [#allocation3], 1 }
 0xe13   :  { %4432 = vsyncpa [#allocation6], 1 }
 0xe14   :  { %4433 = vsyncpa [#allocation9], 1 }
 0xe15   :  { %4434 = vsyncpa [#allocation12], 1 }
 0xe16   :  { %4435 = vsyncpa [#allocation15], 1 }
 0xe17   :  { %4436 = vsyncpa [#allocation18], 1 }
 0xe18   :  { %4437 = vsyncpa [#allocation21], 1 }
 0xe19   :  { %4438 = vsyncpa [#allocation24], 1 }
 0xe1a   :  { %4439 = vsyncpa [#allocation27], 1 }
 0xe1b   :  { %4440 = vsyncpa [#allocation30], 1 }
 0xe1c   :  { %4441 = vsyncpa [#allocation4], 1 }

</bundles_post_ra>
